<compile_context>
chip_gen: v7x
topology: tpu7x:2x2x1
jax: 0.10.0
libtpu: 0.0.40
codegen_flags: <defaults>
</compile_context>

<pallas_src>
import jax
import jax.numpy as jnp
from jax.experimental import pallas as pl
from jax.experimental.pallas import tpu as pltpu


# ----------------------------------------------------------------------------
# Kernels
# ----------------------------------------------------------------------------
def stnkd_trunk_kernel(x_ref,
                       w1_ref, b1_ref, w2_ref, b2_ref, w3_ref, b3_ref,
                       feat_ref, acc_ref):
    """Per-(batch, point-tile) step: pointwise MLP trunk + running max pool.

    x_ref   : (1, k, TN) bf16      -- native Conv1d layout, points on lanes
    w*_ref  : (C_out, C_in) bf16   -- BN folded, transposed-trunk orientation
    b*_ref  : (C_out, 1)   f32
    feat_ref: (1, 1, 1024) f32     -- pooled features, written on last tile
    acc_ref : (1024, 128)  f32     -- running max scratch (post-ReLU => >= 0)
    """
    n = pl.program_id(1)

    @pl.when(n == 0)
    def _init():
        # Zero is a valid running-max identity only because the trunk ends in
        # ReLU (all activations are non-negative).
        acc_ref[...] = jnp.zeros_like(acc_ref)

    x = x_ref[0]                                                     # (k, TN) bf16

    # Pointwise MLP trunk (Conv1d k=1 == per-point matmul), BN folded,
    # bf16 MXU operands with f32 accumulation, channels on sublanes.
    h = jnp.dot(w1_ref[...], x, preferred_element_type=jnp.float32) + b1_ref[...]
    h = jnp.maximum(h, 0.0)                                          # (64, TN)
    h = jnp.dot(w2_ref[...], h.astype(jnp.bfloat16),
                preferred_element_type=jnp.float32) + b2_ref[...]
    h = jnp.maximum(h, 0.0)                                          # (128, TN)
    h = jnp.dot(w3_ref[...], h.astype(jnp.bfloat16),
                preferred_element_type=jnp.float32) + b3_ref[...]
    h = jnp.maximum(h, 0.0)                                          # (1024, TN)

    # Chunked VPU max over the point (lane) axis -- static 128-wide lane slices
    # are free; no XLU reduce until the final per-batch fold below.
    tn = h.shape[1]
    m = h[:, 0:128]
    for c in range(1, tn // 128):
        m = jnp.maximum(m, h[:, c * 128:(c + 1) * 128])
    acc_ref[...] = jnp.maximum(acc_ref[...], m)                      # (1024, 128)

    @pl.when(n == pl.num_programs(1) - 1)
    def _finalize():
        # One cross-lane max per batch, then emit a lane-dense (1, 1, 1024) row.
        feat_ref[...] = jnp.max(acc_ref[...], axis=1).reshape(1, 1, 1024)


def stnkd_head_kernel(feat_ref,
                      fw1_ref, fb1_ref, fw2_ref, fb2_ref, fw3_ref, fb3_ref,
                      out_ref):
    """Runs once: fc1/fc2/fc3 head on pooled features (identity folded in fb3)."""
    f = jnp.dot(feat_ref[...].astype(jnp.bfloat16), fw1_ref[...],
                preferred_element_type=jnp.float32) + fb1_ref[...]
    f = jnp.maximum(f, 0.0)                                          # (B, 512)
    f = jnp.dot(f, fw2_ref[...], preferred_element_type=jnp.float32) + fb2_ref[...]
    f = jnp.maximum(f, 0.0)                                          # (B, 256)
    f = jnp.dot(f, fw3_ref[...], preferred_element_type=jnp.float32) + fb3_ref[...]
    out_ref[...] = f.astype(out_ref.dtype)                           # (B, k*k)


# ----------------------------------------------------------------------------
# Wrapper
# ----------------------------------------------------------------------------
def _fold_bn_conv(w, b, gamma, beta, mean, var, eps=1e-5):
    """Fold eval-mode BN into a conv (w: (out, in)); keep (out, in) for W @ x."""
    scale = gamma / jnp.sqrt(var + eps)
    w_f = (w * scale[:, None]).astype(jnp.bfloat16)                  # (out, in)
    b_f = ((b - mean) * scale + beta).reshape(-1, 1).astype(jnp.float32)  # (out, 1)
    return w_f, b_f


def _fold_bn_fc(w, b, gamma, beta, mean, var, eps=1e-5):
    """Fold eval-mode BN into a linear (w: (out, in)); transpose for x @ W."""
    scale = gamma / jnp.sqrt(var + eps)
    w_f = (w * scale[:, None]).T.astype(jnp.float32)                 # (in, out)
    b_f = ((b - mean) * scale + beta).reshape(1, -1).astype(jnp.float32)
    return w_f, b_f


def _choose_tn(n_pad, tn_max):
    """Largest multiple of 128 that divides n_pad and is <= tn_max."""
    m = n_pad // 128
    d_cap = max(1, tn_max // 128)
    for d in range(min(d_cap, m), 0, -1):
        if m % d == 0:
            return 128 * d
    return 128


def stnkd_forward(x_ncl, p, k, *, tn_max=1024):
    """x_ncl: (B, k, N) float32, PyTorch Conv1d layout. Returns (B, k, k)."""
    B, C, N = x_ncl.shape
    assert C == k

    # ---- fold eval-mode BatchNorm into the preceding conv/fc weights ----
    w1, b1 = _fold_bn_conv(p["conv1_w"], p["conv1_b"], p["bn1_g"], p["bn1_b"], p["bn1_m"], p["bn1_v"])
    w2, b2 = _fold_bn_conv(p["conv2_w"], p["conv2_b"], p["bn2_g"], p["bn2_b"], p["bn2_m"], p["bn2_v"])
    w3, b3 = _fold_bn_conv(p["conv3_w"], p["conv3_b"], p["bn3_g"], p["bn3_b"], p["bn3_m"], p["bn3_v"])
    fw1, fb1 = _fold_bn_fc(p["fc1_w"], p["fc1_b"], p["bn4_g"], p["bn4_b"], p["bn4_m"], p["bn4_v"])
    fw2, fb2 = _fold_bn_fc(p["fc2_w"], p["fc2_b"], p["bn5_g"], p["bn5_b"], p["bn5_m"], p["bn5_v"])
    fw1 = fw1.astype(jnp.bfloat16)                                   # FLOP-dominant head matmul
    fw3 = p["fc3_w"].T.astype(jnp.float32)
    # Fold the identity-matrix add into the fc3 bias.
    fb3 = (p["fc3_b"][None, :] + jnp.eye(k, dtype=jnp.float32).reshape(1, k * k)).astype(jnp.float32)

    # ---- prepare x: bf16, native (B, k, N) layout, N edge-padded to 128*TN ----
    x = x_ncl.astype(jnp.bfloat16)
    n_pad = ((N + 127) // 128) * 128
    if n_pad != N:
        # Replicating a real point cannot change the per-batch max.
        x = jnp.pad(x, ((0, 0), (0, 0), (0, n_pad - N)), mode="edge")
    TN = _choose_tn(n_pad, tn_max)
    grid = (B, n_pad // TN)

    # ---- trunk: pointwise MLP + max pool, grid = (batch, point tiles) ----
    trunk_weights = (w1, b1, w2, b2, w3, b3)
    feat = pl.pallas_call(
        stnkd_trunk_kernel,
        out_shape=jax.ShapeDtypeStruct((B, 1, 1024), jnp.float32),
        grid=grid,
        in_specs=([pl.BlockSpec((1, k, TN), lambda b, n: (b, 0, n))]
                  + [pl.BlockSpec(a.shape, lambda b, n: (0, 0)) for a in trunk_weights]),
        out_specs=pl.BlockSpec((1, 1, 1024), lambda b, n: (b, 0, 0)),
        scratch_shapes=[pltpu.VMEM((1024, 128), jnp.float32)],
        compiler_params=pltpu.CompilerParams(
            dimension_semantics=("parallel", "arbitrary")),
    )(x, *trunk_weights)
    feat = feat.reshape(B, 1024)

    # ---- head: runs exactly once (O(1) weight loads) ----
    head_inputs = (feat, fw1, fb1, fw2, fb2, fw3, fb3)
    out = pl.pallas_call(
        stnkd_head_kernel,
        out_shape=jax.ShapeDtypeStruct((B, k * k), jnp.float32),
        grid=(1,),
        in_specs=[pl.BlockSpec(a.shape, lambda i: (0, 0)) for a in head_inputs],
        out_specs=pl.BlockSpec((B, k * k), lambda i: (0, 0)),
        compiler_params=pltpu.CompilerParams(
            dimension_semantics=("arbitrary",)),
    )(*head_inputs)
    return out.reshape(B, k, k)


# ----------------------------------------------------------------------------
# Pure-JAX reference (matches the PyTorch forward, BN in eval mode)
# ----------------------------------------------------------------------------
def stnkd_ref(x, p, k, eps=1e-5):
    def conv_bn_relu(h, w, b, g, bb, m, v):
        y = jnp.einsum("oc,bcn->bon", w, h) + b[None, :, None]
        y = (y - m[None, :, None]) / jnp.sqrt(v[None, :, None] + eps) * g[None, :, None] + bb[None, :, None]
        return jnp.maximum(y, 0.0)

    def fc_bn_relu(f, w, b, g, bb, m, v):
        y = f @ w.T + b
        y = (y - m) / jnp.sqrt(v + eps) * g + bb
        return jnp.maximum(y, 0.0)

    h = conv_bn_relu(x, p["conv1_w"], p["conv1_b"], p["bn1_g"], p["bn1_b"], p["bn1_m"], p["bn1_v"])
    h = conv_bn_relu(h, p["conv2_w"], p["conv2_b"], p["bn2_g"], p["bn2_b"], p["bn2_m"], p["bn2_v"])
    h = conv_bn_relu(h, p["conv3_w"], p["conv3_b"], p["bn3_g"], p["bn3_b"], p["bn3_m"], p["bn3_v"])
    feat = jnp.max(h, axis=2)                                        # (B, 1024)
    f = fc_bn_relu(feat, p["fc1_w"], p["fc1_b"], p["bn4_g"], p["bn4_b"], p["bn4_m"], p["bn4_v"])
    f = fc_bn_relu(f, p["fc2_w"], p["fc2_b"], p["bn5_g"], p["bn5_b"], p["bn5_m"], p["bn5_v"])
    f = f @ p["fc3_w"].T + p["fc3_b"]
    f = f + jnp.eye(k, dtype=jnp.float32).reshape(1, -1)
    return f.reshape(-1, k, k)


def make_params(key, k):
    ks = iter(jax.random.split(key, 40))

    def w(shape, s=0.05):
        return jax.random.normal(next(ks), shape, jnp.float32) * s

    def bn(c):
        return dict(
            g=1.0 + 0.1 * jax.random.normal(next(ks), (c,), jnp.float32),
            b=0.1 * jax.random.normal(next(ks), (c,), jnp.float32),
            m=0.1 * jax.random.normal(next(ks), (c,), jnp.float32),
            v=jax.random.uniform(next(ks), (c,), jnp.float32, 0.5, 1.5),
        )

    p = {}
    p["conv1_w"], p["conv1_b"] = w((64, k)), w((64,))
    p["conv2_w"], p["conv2_b"] = w((128, 64)), w((128,))
    p["conv3_w"], p["conv3_b"] = w((1024, 128)), w((1024,))
    p["fc1_w"], p["fc1_b"] = w((512, 1024)), w((512,))
    p["fc2_w"], p["fc2_b"] = w((256, 512)), w((256,))
    p["fc3_w"], p["fc3_b"] = w((k * k, 256)), w((k * k,))
    for name, c in (("bn1", 64), ("bn2", 128), ("bn3", 1024), ("bn4", 512), ("bn5", 256)):
        d = bn(c)
        p[f"{name}_g"], p[f"{name}_b"], p[f"{name}_m"], p[f"{name}_v"] = d["g"], d["b"], d["m"], d["v"]
    return p


if __name__ == "__main__":
    # TODO(synk): BatchNorm is implemented in eval mode (running stats); PyTorch
    # training-mode batch statistics are not reproduced.
    key = jax.random.PRNGKey(0)
    k, B, N = 16, 2, 128
    pkey, xkey = jax.random.split(key)
    params = make_params(pkey, k)
    x = jax.random.normal(xkey, (B, k, N), jnp.float32)              # PyTorch NCL input

    out = stnkd_forward(x, params, k)
    jax.block_until_ready(out)

    ref = stnkd_ref(x, params, k)
    assert out.shape == (B, k, k)
    # bf16 MXU operands (with f32 accumulation) deviate from the pure-f32
    # reference by a few 1e-3; tolerance set accordingly.
    assert jnp.allclose(out, ref, atol=2e-2, rtol=2e-2), "mismatch vs reference"
    print("KERNEL_OK")
</pallas_src>

<mosaic_0001>
module attributes {stable_mosaic.version = 11 : i64} {
  func.func @stnkd_trunk_kernel(%arg0: i32, %arg1: i32, %arg2: memref<1x16x128xbf16, #tpu.memory_space<vmem>>, %arg3: memref<64x16xbf16, #tpu.memory_space<vmem>>, %arg4: memref<64x1xf32, #tpu.memory_space<vmem>>, %arg5: memref<128x64xbf16, #tpu.memory_space<vmem>>, %arg6: memref<128x1xf32, #tpu.memory_space<vmem>>, %arg7: memref<1024x128xbf16, #tpu.memory_space<vmem>>, %arg8: memref<1024x1xf32, #tpu.memory_space<vmem>>, %arg9: memref<1x1x1024xf32, #tpu.memory_space<vmem>>, %arg10: memref<1024x128xf32, #tpu.memory_space<vmem>>) attributes {dimension_semantics = [#tpu.dimension_semantics<parallel>, #tpu.dimension_semantics<arbitrary>], iteration_bounds = array<i64: 2, 1>, scalar_prefetch = 0 : i64, scratch_operands = 1 : i64, tpu.core_type = #tpu.core_type<tc>, window_params = [{transform_indices = @transform_0, window_bounds = array<i64: 1, 16, 128>}, {pipeline_mode = #tpu.pipeline_mode<synchronous>, transform_indices = @transform_1, window_bounds = array<i64: 64, 16>}, {pipeline_mode = #tpu.pipeline_mode<synchronous>, transform_indices = @transform_2, window_bounds = array<i64: 64, 1>}, {pipeline_mode = #tpu.pipeline_mode<synchronous>, transform_indices = @transform_3, window_bounds = array<i64: 128, 64>}, {pipeline_mode = #tpu.pipeline_mode<synchronous>, transform_indices = @transform_4, window_bounds = array<i64: 128, 1>}, {pipeline_mode = #tpu.pipeline_mode<synchronous>, transform_indices = @transform_5, window_bounds = array<i64: 1024, 128>}, {pipeline_mode = #tpu.pipeline_mode<synchronous>, transform_indices = @transform_6, window_bounds = array<i64: 1024, 1>}, {transform_indices = @transform_7, window_bounds = array<i64: 1, 1, 1024>}]} {
    %c0_i32 = arith.constant 0 : i32
    %0 = arith.cmpi eq, %arg1, %c0_i32 : i32
    %1 = arith.extui %0 : i1 to i32
    %c0_i32_0 = arith.constant 0 : i32
    %2 = arith.cmpi ne, %1, %c0_i32_0 : i32
    scf.if %2 {
      %cst_26 = arith.constant 0.000000e+00 : f32
      %34 = vector.broadcast %cst_26 : f32 to vector<1024x128xf32>
      %c0_27 = arith.constant 0 : index
      %c0_28 = arith.constant 0 : index
      %35 = vector.load %arg10[%c0_27, %c0_28] : memref<1024x128xf32, #tpu.memory_space<vmem>>, vector<1024x128xf32>
      tpu.vector_store %arg10[%c0_27, %c0_28], %34 {strides = array<i32>} : memref<1024x128xf32, #tpu.memory_space<vmem>>, vector<1024x128xf32>,
    } else {
    }
    %c0 = arith.constant 0 : index
    %c0_1 = arith.constant 0 : index
    %c0_2 = arith.constant 0 : index
    %3 = vector.load %arg2[%c0, %c0_1, %c0_2] : memref<1x16x128xbf16, #tpu.memory_space<vmem>>, vector<1x16x128xbf16>
    %4 = vector.shape_cast %3 : vector<1x16x128xbf16> to vector<16x128xbf16>
    %c0_3 = arith.constant 0 : index
    %c0_4 = arith.constant 0 : index
    %5 = vector.load %arg3[%c0_3, %c0_4] : memref<64x16xbf16, #tpu.memory_space<vmem>>, vector<64x16xbf16>
    %cst = arith.constant dense<0.000000e+00> : vector<64x128xf32>
    %6 = tpu.matmul %5, %4, %cst {dimension_numbers = #tpu.dot_dimension_numbers<[1], [0], [0], [1], [0, 0, 1, 1], [], []>} : vector<64x16xbf16>, vector<16x128xbf16>, vector<64x128xf32> -> vector<64x128xf32>
    %c0_5 = arith.constant 0 : index
    %c0_6 = arith.constant 0 : index
    %7 = vector.load %arg4[%c0_5, %c0_6] : memref<64x1xf32, #tpu.memory_space<vmem>>, vector<64x1xf32>
    %8 = vector.broadcast %7 : vector<64x1xf32> to vector<64x128xf32>
    %9 = arith.addf %6, %8 : vector<64x128xf32>
    %cst_7 = arith.constant 0.000000e+00 : f32
    %10 = vector.broadcast %cst_7 : f32 to vector<64x128xf32>
    %11 = arith.maximumf %9, %10 : vector<64x128xf32>
    %c0_8 = arith.constant 0 : index
    %c0_9 = arith.constant 0 : index
    %12 = vector.load %arg5[%c0_8, %c0_9] : memref<128x64xbf16, #tpu.memory_space<vmem>>, vector<128x64xbf16>
    %13 = arith.truncf %11 : vector<64x128xf32> to vector<64x128xbf16>
    %cst_10 = arith.constant dense<0.000000e+00> : vector<128x128xf32>
    %14 = tpu.matmul %12, %13, %cst_10 {dimension_numbers = #tpu.dot_dimension_numbers<[1], [0], [0], [1], [0, 0, 1, 1], [], []>} : vector<128x64xbf16>, vector<64x128xbf16>, vector<128x128xf32> -> vector<128x128xf32>
    %c0_11 = arith.constant 0 : index
    %c0_12 = arith.constant 0 : index
    %15 = vector.load %arg6[%c0_11, %c0_12] : memref<128x1xf32, #tpu.memory_space<vmem>>, vector<128x1xf32>
    %16 = vector.broadcast %15 : vector<128x1xf32> to vector<128x128xf32>
    %17 = arith.addf %14, %16 : vector<128x128xf32>
    %cst_13 = arith.constant 0.000000e+00 : f32
    %18 = vector.broadcast %cst_13 : f32 to vector<128x128xf32>
    %19 = arith.maximumf %17, %18 : vector<128x128xf32>
    %c0_14 = arith.constant 0 : index
    %c0_15 = arith.constant 0 : index
    %20 = vector.load %arg7[%c0_14, %c0_15] : memref<1024x128xbf16, #tpu.memory_space<vmem>>, vector<1024x128xbf16>
    %21 = arith.truncf %19 : vector<128x128xf32> to vector<128x128xbf16>
    %cst_16 = arith.constant dense<0.000000e+00> : vector<1024x128xf32>
    %22 = tpu.matmul %20, %21, %cst_16 {dimension_numbers = #tpu.dot_dimension_numbers<[1], [0], [0], [1], [0, 0, 1, 1], [], []>} : vector<1024x128xbf16>, vector<128x128xbf16>, vector<1024x128xf32> -> vector<1024x128xf32>
    %c0_17 = arith.constant 0 : index
    %c0_18 = arith.constant 0 : index
    %23 = vector.load %arg8[%c0_17, %c0_18] : memref<1024x1xf32, #tpu.memory_space<vmem>>, vector<1024x1xf32>
    %24 = vector.broadcast %23 : vector<1024x1xf32> to vector<1024x128xf32>
    %25 = arith.addf %22, %24 : vector<1024x128xf32>
    %cst_19 = arith.constant 0.000000e+00 : f32
    %26 = vector.broadcast %cst_19 : f32 to vector<1024x128xf32>
    %27 = arith.maximumf %25, %26 : vector<1024x128xf32>
    %c0_20 = arith.constant 0 : index
    %c0_21 = arith.constant 0 : index
    %28 = vector.load %arg10[%c0_20, %c0_21] : memref<1024x128xf32, #tpu.memory_space<vmem>>, vector<1024x128xf32>
    %29 = arith.maximumf %28, %27 : vector<1024x128xf32>
    %c0_22 = arith.constant 0 : index
    %c0_23 = arith.constant 0 : index
    %30 = vector.load %arg10[%c0_22, %c0_23] : memref<1024x128xf32, #tpu.memory_space<vmem>>, vector<1024x128xf32>
    tpu.vector_store %arg10[%c0_22, %c0_23], %29 {strides = array<i32>} : memref<1024x128xf32, #tpu.memory_space<vmem>>, vector<1024x128xf32>,
    %c0_i32_24 = arith.constant 0 : i32
    %31 = arith.cmpi eq, %arg1, %c0_i32_24 : i32
    %32 = arith.extui %31 : i1 to i32
    %c0_i32_25 = arith.constant 0 : i32
    %33 = arith.cmpi ne, %32, %c0_i32_25 : i32
    scf.if %33 {
      %c0_26 = arith.constant 0 : index
      %c0_27 = arith.constant 0 : index
      %34 = vector.load %arg10[%c0_26, %c0_27] : memref<1024x128xf32, #tpu.memory_space<vmem>>, vector<1024x128xf32>
      %cst_28 = arith.constant dense<0xFF800000> : vector<1024xf32>
      %35 = vector.multi_reduction <maximumf>, %34, %cst_28 [1] : vector<1024x128xf32> to vector<1024xf32>
      %36 = vector.shape_cast %35 : vector<1024xf32> to vector<1x1x1024xf32>
      %c0_29 = arith.constant 0 : index
      %c0_30 = arith.constant 0 : index
      %c0_31 = arith.constant 0 : index
      %37 = vector.load %arg9[%c0_29, %c0_30, %c0_31] : memref<1x1x1024xf32, #tpu.memory_space<vmem>>, vector<1x1x1024xf32>
      tpu.vector_store %arg9[%c0_29, %c0_30, %c0_31], %36 {strides = array<i32>} : memref<1x1x1024xf32, #tpu.memory_space<vmem>>, vector<1x1x1024xf32>,
    } else {
    }
    return
  }
  func.func @transform_0(%arg0: i32, %arg1: i32) -> (i32, i32, i32) {
    %c0_i32 = arith.constant 0 : i32
    %c0_i32_0 = arith.constant 0 : i32
    return %arg0, %c0_i32, %arg1 : i32, i32, i32
  }
  func.func @transform_1(%arg0: i32, %arg1: i32) -> (i32, i32) {
    %c0_i32 = arith.constant 0 : i32
    %c0_i32_0 = arith.constant 0 : i32
    %c0_i32_1 = arith.constant 0 : i32
    return %c0_i32, %c0_i32_0 : i32, i32
  }
  func.func @transform_2(%arg0: i32, %arg1: i32) -> (i32, i32) {
    %c0_i32 = arith.constant 0 : i32
    %c0_i32_0 = arith.constant 0 : i32
    %c0_i32_1 = arith.constant 0 : i32
    return %c0_i32, %c0_i32_0 : i32, i32
  }
  func.func @transform_3(%arg0: i32, %arg1: i32) -> (i32, i32) {
    %c0_i32 = arith.constant 0 : i32
    %c0_i32_0 = arith.constant 0 : i32
    %c0_i32_1 = arith.constant 0 : i32
    return %c0_i32, %c0_i32_0 : i32, i32
  }
  func.func @transform_4(%arg0: i32, %arg1: i32) -> (i32, i32) {
    %c0_i32 = arith.constant 0 : i32
    %c0_i32_0 = arith.constant 0 : i32
    %c0_i32_1 = arith.constant 0 : i32
    return %c0_i32, %c0_i32_0 : i32, i32
  }
  func.func @transform_5(%arg0: i32, %arg1: i32) -> (i32, i32) {
    %c0_i32 = arith.constant 0 : i32
    %c0_i32_0 = arith.constant 0 : i32
    %c0_i32_1 = arith.constant 0 : i32
    return %c0_i32, %c0_i32_0 : i32, i32
  }
  func.func @transform_6(%arg0: i32, %arg1: i32) -> (i32, i32) {
    %c0_i32 = arith.constant 0 : i32
    %c0_i32_0 = arith.constant 0 : i32
    %c0_i32_1 = arith.constant 0 : i32
    return %c0_i32, %c0_i32_0 : i32, i32
  }
  func.func @transform_7(%arg0: i32, %arg1: i32) -> (i32, i32, i32) {
    %c0_i32 = arith.constant 0 : i32
    %c0_i32_0 = arith.constant 0 : i32
    %c0_i32_1 = arith.constant 0 : i32
    return %arg0, %c0_i32, %c0_i32_0 : i32, i32, i32
  }
}

</mosaic_0001>

<bundles_post_ra>
// kernel: tpu_custom_call.1
= control target key start
LH: loop header
LB: loop body
LE: loop exit
PB: predicated region body
PF: predicated region fallthrough
CT: control target
= control target key end

     0   :  { %12 = vsyncpa [#allocation4], 0  ;;  %s21618_s0 = inlined_call_operand.vmem [shape: bf16[2,16,128], index: 0, kind: input, shape index: {}]   ;;  %s21619_s1 = inlined_call_operand.vmem [shape: bf16[64,16], index: 1, kind: input, shape index: {}]   ;;  %s21620_s2 = inlined_call_operand.vmem [shape: f32[64,1], index: 2, kind: input, shape index: {}]   ;;  %s21621_s3 = inlined_call_operand.vmem [shape: bf16[128,64], index: 3, kind: input, shape index: {}]   ;;  %s21622_s4 = inlined_call_operand.vmem [shape: f32[128,1], index: 4, kind: input, shape index: {}]   ;;  %s21623_s5 = inlined_call_operand.vmem [shape: bf16[1024,128], index: 5, kind: input, shape index: {}]   ;;  %s21624_s6 = inlined_call_operand.vmem [shape: f32[1024,1], index: 6, kind: input, shape index: {}]   ;;  %s21625_s7 = inlined_call_operand.hbm [shape: f32[2,1,1024], index: 7, kind: output, shape index: {}]  }
   0x1   :  { %14 = vsyncpa [#allocation4 + $0x1], 0  ;;  %s15958_s24 = smov 0   ;;  %s15960_s25 = smov 0  }
   0x2   :  { %s15962_s26 = smov 0   ;;  %s15964_s27 = smov 0  }
   0x3   :  { %s15966_s28 = smov 0   ;;  %s15968_s29 = smov 0  }
   0x4 LB: > { %s15312_s30 = sadd.s32 4294967295, %s15913_s29   ;;  %s15313_s8 = sadd.s32 4294967294, %s15913_s29   ;;  %s15913_s29 = sphi %s15968_s29, %s20_s29   ;;  %s15909_s28 = sphi %s15966_s28, %s22127_s28   ;;  %s15905_s27 = sphi %s15964_s27, %s22126_s27   ;;  %s15901_s26 = sphi %s15962_s26, %s22125_s26   ;;  %s15897_s25 = sphi %s15960_s25, %s22124_s25   ;;  %s15893_s24 = sphi %s15958_s24, %s22123_s24  }
   0x5   : > { %s32_s9 = sadd.s32 1, %s15909_s28  ;;  %s193_s10 = sadd.s32 1, %s15901_s26 }
   0x6   : > { %p34_p0 = scmp.ge.s32.totalorder %s32_s9, 2  ;;  %p203_p1 = scmp.ne.s32.totalorder %s15901_s26, %s15897_s25 }
   0x7   : > { %p204_p2 = scmp.eq.s32.totalorder %s15312_s30, 1  ;;  %p209_p3 = scmp.ne.s32.totalorder %s15897_s25, %s15893_s24 }
   0x8   : > { %s22129_s9 = smov (%p34_p0, %s32_s9), 0  ;;  %p210_p5 = scmp.eq.s32.totalorder %s15313_s8, 1 }
   0x9   : > { %p15998_p4 = por %p204_p2, %p203_p1  ;;  %s190_s12 = ssub.s32 %s15909_s28, %s22129_s9 }
   0xa   : > { %p15316_p6 = scmp.ge.s32.totalorder %s15913_s29, 1  ;;  %p191_p7 = scmp.eq.s32.totalorder %s190_s12, 0 }
   0xb   : > { %p16005_p8 = por %p210_p5, %p209_p3  ;;  %p257_p9 = scmp.lt.s32.totalorder %s15913_s29, 3 }
   0xc   : > { %s16011_s14 = scalar_select %p191_p7, %s15901_s26, %s193_s10  }
   0xd   : > { %p258_p10 = pnand %p15316_p6, %p257_p9 }
   0xf   : > { %261 = sbr.rel (%p258_p10) target bundleno = 1727 (0x6bf), region = 48 }
  0x16   : > { %v445_v0 = vld [vmem:[%s21620_s2 + $0x10] sm:$0xff]  ;;  %v443_v1 = vld [vmem:[%s21620_s2] sm:$0xff]  ;;  %p292_p11 = scmp.lt.s32.totalorder %s15905_s27, 1  ;;  %v15915_v2 = vmov 0   ;;  %v446_v3 = vld [vmem:[%s21620_s2 + $0x18] sm:$0xff]  ;;  %vm517_vm0 = vcmask 130048  }
  0x17   : > { %15757 = vset.pattern.permute.xlu1 %v15915_v2  ;;  %15756 = vset.pattern.permute.xlu0 %v15915_v2  ;;  %v15759_v4 = vld [vmem:[%s21619_s1] sm:$0xff]   ;;  %v444_v5 = vld [vmem:[%s21620_s2 + $0x8] sm:$0xff]  ;;  %v15761_v10 = vld [vmem:[%s21619_s1 + $0x10] sm:$0xff]   ;;  %vm759_vm1 = vcmask 523264   ;;  %vm14520_vm2 = vcmask 130112   ;;  %vm14527_vm3 = vcmask 195712  }
  0x18   : > { %463 = vperm.xlu1 %15757, %v445_v0   ;;  %453 = vperm.xlu0 %15756, %v443_v1   ;;  %s293_s21 = scalar_select %p292_p11, %s15905_s27, 1  ;;  %v448_v6 = vld [vmem:[%s21620_s2 + $0x28] sm:$0xff]  ;;  %v447_v8 = vld [vmem:[%s21620_s2 + $0x20] sm:$0xff]  ;;  %v450_v11 = vld [vmem:[%s21620_s2 + $0x38] sm:$0xff]  ;;  %vm14534_vm4 = vcmask 261312   ;;  %vm14541_vm5 = vcmask 326912  }
  0x19   : > { %15507 = vmatprep.mubr.msk.bf16.mxu0 %vm517_vm0, %v15759_v4  ;;  %v15760_v9 = vld [vmem:[%s21619_s1 + $0x8] sm:$0xff]   ;;  %v449_v12 = vld [vmem:[%s21620_s2 + $0x30] sm:$0xff]  ;;  %v623_v14 = vld [vmem:[%s21622_s4] sm:$0xff]  ;;  %vm14548_vm6 = vcmask 392512   ;;  %vm14555_vm7 = vcmask 458112   ;;  %vm14562_vm8 = vcmask 523712  }
  0x1a   : > { %s15414_s10 = sshll.u32 %s293_s21, 3  ;;  %v624_v13 = vld [vmem:[%s21622_s4 + $0x8] sm:$0xff]  ;;  %v15762_v15 = vld [vmem:[%s21619_s1 + $0x18] sm:$0xff]   ;;  %v625_v17 = vld [vmem:[%s21622_s4 + $0x10] sm:$0xff]  ;;  %vm14569_vm9 = vcmask 589312   ;;  %vm14576_vm10 = vcmask 654912  }
  0x1b   : > { %s299_s16 = scalar_lea.vmem %s21618_s0, %s15414_s10  ;;  %v626_v16 = vld [vmem:[%s21622_s4 + $0x18] sm:$0xff]  ;;  %v628_v18 = vld [vmem:[%s21622_s4 + $0x28] sm:$0xff]  ;;  %v627_v19 = vld [vmem:[%s21622_s4 + $0x20] sm:$0xff]  ;;  %vm14583_vm11 = vcmask 720512   ;;  %vm14590_vm12 = vcmask 786112   ;;  %vm14597_vm13 = vcmask 851712  }
  0x1c   : > { %468 = vperm.xlu1 %15757, %v446_v3   ;;  %458 = vperm.xlu0 %15756, %v444_v5   ;;  %v15758_v7 = vld [vmem:[%s299_s16] sm:$0xff]   ;;  %v630_v20 = vld [vmem:[%s21622_s4 + $0x38] sm:$0xff]  ;;  %v629_v21 = vld [vmem:[%s21622_s4 + $0x30] sm:$0xff]  ;;  %vm14604_vm14 = vcmask 917312   ;;  %vm14611_vm15 = vcmask 982912   ;;  %s289_s22 = sand.u32 1, %s15897_s25  }
  0x1d   : > { %15505 = vmatprep.subr.bf16.mxu0 %v15758_v7  ;;  %v632_v22 = vld [vmem:[%s21622_s4 + $0x48] sm:$0xff]  ;;  %v631_v23 = vld [vmem:[%s21622_s4 + $0x40] sm:$0xff]  ;;  %v634_v24 = vld [vmem:[%s21622_s4 + $0x58] sm:$0xff]  ;;  %s15317_s21 = sshll.u32 %s289_s22, 3  ;;  %s15415_s23 = sshll.u32 %s15905_s27, 7 }
  0x1e   : > { %15506 = vmatpush3.bf16.msra.mxu0 %v15758_v7  ;;  %v633_v25 = vld [vmem:[%s21622_s4 + $0x50] sm:$0xff]  ;;  %v636_v26 = vld [vmem:[%s21622_s4 + $0x68] sm:$0xff]  ;;  %v635_v27 = vld [vmem:[%s21622_s4 + $0x60] sm:$0xff]  ;;  %s291_s30 = scalar_lea.vmem [#allocation3], %s15317_s21  ;;  %s21571_s15 = scalar_lea.hbm %s21625_s7, %s15415_s23 }
  0x1f   : > { %v638_v28 = vld [vmem:[%s21622_s4 + $0x78] sm:$0xff]  ;;  %v637_v29 = vld [vmem:[%s21622_s4 + $0x70] sm:$0xff]  ;;  %v1034_v30 = vld [vmem:[%s21624_s6 + $0x8] sm:$0xff]  ;;  %s15239_s8 = sshll.u32 %s291_s30, 4  ;;  %s15225_s16 = scalar_lea.sflag [#allocation4], %s289_s22  ;;  %s21573_s8 = int_to_ptr.vmem [resolvable:$true] %s15239_s8 }
  0x20   : > { %478 = vperm.xlu1 %15757, %v448_v6   ;;  %473 = vperm.xlu0 %15756, %v447_v8   ;;  %v1033_v31 = vld [vmem:[%s21624_s6] sm:$0xff]  ;;  %v1036_v32 = vld [vmem:[%s21624_s6 + $0x18] sm:$0xff]  ;;  %v1035_v33 = vld [vmem:[%s21624_s6 + $0x10] sm:$0xff]  ;;  %s15835_s27 = scalar_lea.vmem %s21573_s8, 128  ;;  %s15917_s17 = smov [#allocation3]  }
  0x21   : > { %15508 = vmatmul.mubr.msk.bf16.vlgmr.msra.gmra.mrb[0].mxu0 %vm517_vm0, %v15760_v9  ;;  %v1038_v34 = vld [vmem:[%s21624_s6 + $0x28] sm:$0xff]  ;;  %v1037_v35 = vld [vmem:[%s21624_s6 + $0x20] sm:$0xff]  ;;  %v1040_v36 = vld [vmem:[%s21624_s6 + $0x38] sm:$0xff]  ;;  %p15836_p12 = scmp.ne.s32.totalorder %s21573_s8, %s15835_s27  ;;  %s15839_s18 = sshll.u32 %s15917_s17, 4  ;;  %s15840_s18 = int_to_ptr.vmem [resolvable:$false] %s15839_s18 }
  0x22   : > { %15511 = vmatprep.mubr.msk.bf16.mxu0 %vm517_vm0, %v15761_v10  ;;  %v1039_v37 = vld [vmem:[%s21624_s6 + $0x30] sm:$0xff]  ;;  %v1042_v38 = vld [vmem:[%s21624_s6 + $0x48] sm:$0xff]  ;;  %v1041_v39 = vld [vmem:[%s21624_s6 + $0x40] sm:$0xff]  ;;  %s15841_s19 = scalar_lea.vmem %s15840_s18, 256  ;;  %p15842_p1 = scmp.lt.s32.totalorder %s21573_s8, %s15840_s18 }
  0x23   : > { %v1044_v40 = vld [vmem:[%s21624_s6 + $0x58] sm:$0xff]  ;;  %v1043_v41 = vld [vmem:[%s21624_s6 + $0x50] sm:$0xff]  ;;  %v1046_v42 = vld [vmem:[%s21624_s6 + $0x68] sm:$0xff]  ;;  %p15837_p13 = pnand %p15836_p12, %p15998_p4  ;;  %p15843_p2 = scmp.lt.s32.totalorder %s15841_s19, %s15835_s27 }
  0x24   : > { %488 = vperm.xlu1 %15757, %v450_v11   ;;  %483 = vperm.xlu0 %15756, %v449_v12   ;;  %v1045_v43 = vld [vmem:[%s21624_s6 + $0x60] sm:$0xff]  ;;  %v1048_v44 = vld [vmem:[%s21624_s6 + $0x78] sm:$0xff]  ;;  %v1047_v45 = vld [vmem:[%s21624_s6 + $0x70] sm:$0xff] }
  0x25   : > { %v1050_v46 = vld [vmem:[%s21624_s6 + $0x88] sm:$0xff]  ;;  %v1049_v47 = vld [vmem:[%s21624_s6 + $0x80] sm:$0xff]  ;;  %v1052_v48 = vld [vmem:[%s21624_s6 + $0x98] sm:$0xff]  ;;  %p15838_p0 = pneg %p15837_p13  ;;  %p15844_p3 = por %p15843_p2, %p15842_p1 }
  0x26   : > { %v1051_v49 = vld [vmem:[%s21624_s6 + $0x90] sm:$0xff]  ;;  %v1054_v50 = vld [vmem:[%s21624_s6 + $0xa8] sm:$0xff]  ;;  %v1053_v51 = vld [vmem:[%s21624_s6 + $0xa0] sm:$0xff] }
  0x27   : > { %v1056_v52 = vld [vmem:[%s21624_s6 + $0xb8] sm:$0xff]  ;;  %v1055_v53 = vld [vmem:[%s21624_s6 + $0xb0] sm:$0xff]  ;;  %v1058_v54 = vld [vmem:[%s21624_s6 + $0xc8] sm:$0xff]  ;;  %p15845_p5 = pnand %p15844_p3, %p15838_p0 }
  0x28   : > { %646 = vperm.xlu1 %15757, %v624_v13   ;;  %641 = vperm.xlu0 %15756, %v623_v14   ;;  %v1057_v55 = vld [vmem:[%s21624_s6 + $0xc0] sm:$0xff]  ;;  %v1060_v56 = vld [vmem:[%s21624_s6 + $0xd8] sm:$0xff]  ;;  %v1059_v57 = vld [vmem:[%s21624_s6 + $0xd0] sm:$0xff] }
  0x29   : > { %15512 = vmatmul.mubr.msk.bf16.gmra.mrb[4].mxu0 %vm517_vm0, %v15762_v15  ;;  %v1062_v58 = vld [vmem:[%s21624_s6 + $0xe8] sm:$0xff]  ;;  %v1061_v59 = vld [vmem:[%s21624_s6 + $0xe0] sm:$0xff]  ;;  %v1064_v60 = vld [vmem:[%s21624_s6 + $0xf8] sm:$0xff]  ;;  %vm14618_vm0 = vcmask 1048512  }
  0x2a   : > { %v1063_v61 = vld [vmem:[%s21624_s6 + $0xf0] sm:$0xff]  ;;  %v1066_v62 = vld [vmem:[%s21624_s6 + $0x108] sm:$0xff]  ;;  %v1065_v63 = vld [vmem:[%s21624_s6 + $0x100] sm:$0xff] }
  0x2b   : > { %v1068_v0 = vld [vmem:[%s21624_s6 + $0x118] sm:$0xff]  ;;  %v1067_v1 = vld [vmem:[%s21624_s6 + $0x110] sm:$0xff]  ;;  %v1070_v2 = vld [vmem:[%s21624_s6 + $0x128] sm:$0xff] }
  0x2c   : > { %656 = vperm.xlu1 %15757, %v626_v16   ;;  %651 = vperm.xlu0 %15756, %v625_v17   ;;  %v1069_v3 = vld [vmem:[%s21624_s6 + $0x120] sm:$0xff]  ;;  %v1072_v5 = vld [vmem:[%s21624_s6 + $0x138] sm:$0xff]  ;;  %v1071_v6 = vld [vmem:[%s21624_s6 + $0x130] sm:$0xff] }
  0x2d   : > { %v15763_v4 = vld [vmem:[%s21621_s3] sm:$0xff]   ;;  %v1074_v7 = vld [vmem:[%s21624_s6 + $0x148] sm:$0xff]  ;;  %v1076_v9 = vld [vmem:[%s21624_s6 + $0x158] sm:$0xff] }
  0x2e   : > { %15523 = vmatprep.mubr.msk.bf16.mxu1 %vm759_vm1, %v15763_v4  ;;  %v1073_v8 = vld [vmem:[%s21624_s6 + $0x140] sm:$0xff]  ;;  %v1075_v10 = vld [vmem:[%s21624_s6 + $0x150] sm:$0xff]  ;;  %v1078_v11 = vld [vmem:[%s21624_s6 + $0x168] sm:$0xff] }
  0x2f   : > { %v1077_v12 = vld [vmem:[%s21624_s6 + $0x160] sm:$0xff]  ;;  %v1080_v13 = vld [vmem:[%s21624_s6 + $0x178] sm:$0xff]  ;;  %v1079_v14 = vld [vmem:[%s21624_s6 + $0x170] sm:$0xff] }
  0x30   : > { %666 = vperm.xlu1 %15757, %v628_v18   ;;  %661 = vperm.xlu0 %15756, %v627_v19   ;;  %v1082_v15 = vld [vmem:[%s21624_s6 + $0x188] sm:$0xff]  ;;  %v1081_v16 = vld [vmem:[%s21624_s6 + $0x180] sm:$0xff]  ;;  %v1084_v19 = vld [vmem:[%s21624_s6 + $0x198] sm:$0xff] }
  0x34   : > { %676 = vperm.xlu1 %15757, %v630_v20   ;;  %671 = vperm.xlu0 %15756, %v629_v21   ;;  %v1083_v20 = vld [vmem:[%s21624_s6 + $0x190] sm:$0xff] }
  0x38   : > { %686 = vperm.xlu1 %15757, %v632_v22   ;;  %681 = vperm.xlu0 %15756, %v631_v23   ;;  %v1086_v22 = vld [vmem:[%s21624_s6 + $0x1a8] sm:$0xff]  ;;  %v1085_v23 = vld [vmem:[%s21624_s6 + $0x1a0] sm:$0xff] }
  0x3c   : > { %696 = vperm.xlu1 %15757, %v634_v24   ;;  %691 = vperm.xlu0 %15756, %v633_v25   ;;  %v1088_v25 = vld [vmem:[%s21624_s6 + $0x1b8] sm:$0xff] }
  0x40   : > { %706 = vperm.xlu1 %15757, %v636_v26   ;;  %701 = vperm.xlu0 %15756, %v635_v27   ;;  %v1087_v26 = vld [vmem:[%s21624_s6 + $0x1b0] sm:$0xff] }
  0x44   : > { %716 = vperm.xlu1 %15757, %v638_v28   ;;  %711 = vperm.xlu0 %15756, %v637_v29   ;;  %v1090_v29 = vld [vmem:[%s21624_s6 + $0x1c8] sm:$0xff] }
  0x48   : > { %1168 = vperm.xlu1 %15757, %v1034_v30   ;;  %1163 = vperm.xlu0 %15756, %v1033_v31   ;;  %v1089_v30 = vld [vmem:[%s21624_s6 + $0x1c0] sm:$0xff] }
  0x4c   : > { %1178 = vperm.xlu1 %15757, %v1036_v32   ;;  %1173 = vperm.xlu0 %15756, %v1035_v33   ;;  %v1092_v32 = vld [vmem:[%s21624_s6 + $0x1d8] sm:$0xff]  ;;  %v1091_v33 = vld [vmem:[%s21624_s6 + $0x1d0] sm:$0xff] }
  0x50   : > { %1188 = vperm.xlu1 %15757, %v1038_v34   ;;  %1183 = vperm.xlu0 %15756, %v1037_v35   ;;  %v1094_v35 = vld [vmem:[%s21624_s6 + $0x1e8] sm:$0xff] }
  0x54   : > { %1198 = vperm.xlu1 %15757, %v1040_v36   ;;  %1193 = vperm.xlu0 %15756, %v1039_v37   ;;  %v1093_v36 = vld [vmem:[%s21624_s6 + $0x1e0] sm:$0xff] }
  0x58   : > { %1208 = vperm.xlu1 %15757, %v1042_v38   ;;  %1203 = vperm.xlu0 %15756, %v1041_v39   ;;  %v1096_v39 = vld [vmem:[%s21624_s6 + $0x1f8] sm:$0xff] }
  0x5c   : > { %1218 = vperm.xlu1 %15757, %v1044_v40   ;;  %1213 = vperm.xlu0 %15756, %v1043_v41   ;;  %v1095_v40 = vld [vmem:[%s21624_s6 + $0x1f0] sm:$0xff] }
  0x60   : > { %1228 = vperm.xlu1 %15757, %v1046_v42   ;;  %1223 = vperm.xlu0 %15756, %v1045_v43   ;;  %v1098_v42 = vld [vmem:[%s21624_s6 + $0x208] sm:$0xff]  ;;  %v1097_v43 = vld [vmem:[%s21624_s6 + $0x200] sm:$0xff] }
  0x64   : > { %1238 = vperm.xlu1 %15757, %v1048_v44   ;;  %1233 = vperm.xlu0 %15756, %v1047_v45   ;;  %v1100_v45 = vld [vmem:[%s21624_s6 + $0x218] sm:$0xff] }
  0x68   : > { %1248 = vperm.xlu1 %15757, %v1050_v46   ;;  %1243 = vperm.xlu0 %15756, %v1049_v47   ;;  %v1099_v46 = vld [vmem:[%s21624_s6 + $0x210] sm:$0xff] }
  0x6c   : > { %1258 = vperm.xlu1 %15757, %v1052_v48   ;;  %1253 = vperm.xlu0 %15756, %v1051_v49   ;;  %v1102_v49 = vld [vmem:[%s21624_s6 + $0x228] sm:$0xff] }
  0x70   : > { %1268 = vperm.xlu1 %15757, %v1054_v50   ;;  %1263 = vperm.xlu0 %15756, %v1053_v51   ;;  %v1101_v50 = vld [vmem:[%s21624_s6 + $0x220] sm:$0xff] }
  0x74   : > { %1278 = vperm.xlu1 %15757, %v1056_v52   ;;  %1273 = vperm.xlu0 %15756, %v1055_v53   ;;  %v1104_v52 = vld [vmem:[%s21624_s6 + $0x238] sm:$0xff]  ;;  %v1103_v53 = vld [vmem:[%s21624_s6 + $0x230] sm:$0xff] }
  0x78   : > { %1288 = vperm.xlu1 %15757, %v1058_v54   ;;  %1283 = vperm.xlu0 %15756, %v1057_v55   ;;  %v1106_v55 = vld [vmem:[%s21624_s6 + $0x248] sm:$0xff] }
  0x7c   : > { %1298 = vperm.xlu1 %15757, %v1060_v56   ;;  %1293 = vperm.xlu0 %15756, %v1059_v57   ;;  %v1105_v56 = vld [vmem:[%s21624_s6 + $0x240] sm:$0xff] }
  0x80   : > { %1308 = vperm.xlu1 %15757, %v1062_v58   ;;  %1303 = vperm.xlu0 %15756, %v1061_v59   ;;  %v1108_v59 = vld [vmem:[%s21624_s6 + $0x258] sm:$0xff] }
  0x84   : > { %1318 = vperm.xlu1 %15757, %v1064_v60   ;;  %1313 = vperm.xlu0 %15756, %v1063_v61   ;;  %v1107_v60 = vld [vmem:[%s21624_s6 + $0x250] sm:$0xff] }
  0x88   : > { %1328 = vperm.xlu1 %15757, %v1066_v62   ;;  %1323 = vperm.xlu0 %15756, %v1065_v63   ;;  %v1110_v62 = vld [vmem:[%s21624_s6 + $0x268] sm:$0xff]  ;;  %v1109_v63 = vld [vmem:[%s21624_s6 + $0x260] sm:$0xff] }
  0x8c   : > { %1338 = vperm.xlu1 %15757, %v1068_v0   ;;  %1333 = vperm.xlu0 %15756, %v1067_v1   ;;  %v1112_v1 = vld [vmem:[%s21624_s6 + $0x278] sm:$0xff] }
  0x90   : > { %1348 = vperm.xlu1 %15757, %v1070_v2   ;;  %1343 = vperm.xlu0 %15756, %v1069_v3   ;;  %v1111_v2 = vld [vmem:[%s21624_s6 + $0x270] sm:$0xff] }
  0x94   : > { %1358 = vperm.xlu1 %15757, %v1072_v5   ;;  %1353 = vperm.xlu0 %15756, %v1071_v6   ;;  %v1114_v5 = vld [vmem:[%s21624_s6 + $0x288] sm:$0xff]  ;;  %v1113_v6 = vld [vmem:[%s21624_s6 + $0x280] sm:$0xff] }
  0x97   : > { %v16260_v17 = vpop.permute.xlu1 %463  ;;  %v16262_v18 = vpop.permute.xlu0 %453 }
  0x98   : > { %1368 = vperm.xlu1 %15757, %v1074_v7   ;;  %1363 = vperm.xlu0 %15756, %v1073_v8   ;;  %v1116_v8 = vld [vmem:[%s21624_s6 + $0x298] sm:$0xff] }
  0x9b   : > { %v16270_v21 = vpop.permute.xlu1 %468  ;;  %v16278_v24 = vpop.permute.xlu0 %458 }
  0x9c   : > { %1378 = vperm.xlu1 %15757, %v1076_v9   ;;  %1373 = vperm.xlu0 %15756, %v1075_v10   ;;  %v1115_v9 = vld [vmem:[%s21624_s6 + $0x290] sm:$0xff] }
  0x9f   : > { %v16286_v27 = vpop.permute.xlu1 %478  ;;  %v16288_v28 = vpop.permute.xlu0 %473 }
  0xa0   : > { %1388 = vperm.xlu1 %15757, %v1078_v11   ;;  %1383 = vperm.xlu0 %15756, %v1077_v12   ;;  %v1118_v11 = vld [vmem:[%s21624_s6 + $0x2a8] sm:$0xff]  ;;  %v1117_v12 = vld [vmem:[%s21624_s6 + $0x2a0] sm:$0xff] }
  0xa3   : > { %v16296_v31 = vpop.permute.xlu1 %488  ;;  %v16304_v34 = vpop.permute.xlu0 %483 }
  0xa4   : > { %1398 = vperm.xlu1 %15757, %v1080_v13   ;;  %1393 = vperm.xlu0 %15756, %v1079_v14  }
  0xa7   : > { %v16312_v37 = vpop.permute.xlu1 %646  ;;  %v16314_v38 = vpop.permute.xlu0 %641 }
  0xa8   : > { %1408 = vperm.xlu1 %15757, %v1082_v15   ;;  %1403 = vperm.xlu0 %15756, %v1081_v16   ;;  %v1120_v15 = vld [vmem:[%s21624_s6 + $0x2b8] sm:$0xff]  ;;  %v1119_v16 = vld [vmem:[%s21624_s6 + $0x2b0] sm:$0xff] }
  0xab   : > { %v16322_v41 = vpop.permute.xlu1 %656  ;;  %v16330_v44 = vpop.permute.xlu0 %651 }
  0xac   : > { %1418 = vperm.xlu1 %15757, %v1084_v19   ;;  %1413 = vperm.xlu0 %15756, %v1083_v20  }
  0xaf   : > { %v16338_v47 = vpop.permute.xlu1 %666  ;;  %v16340_v48 = vpop.permute.xlu0 %661 }
  0xb0   : > { %1428 = vperm.xlu1 %15757, %v1086_v22   ;;  %1423 = vperm.xlu0 %15756, %v1085_v23   ;;  %v1122_v22 = vld [vmem:[%s21624_s6 + $0x2c8] sm:$0xff]  ;;  %v1121_v23 = vld [vmem:[%s21624_s6 + $0x2c0] sm:$0xff] }
  0xb3   : > { %v16348_v51 = vpop.permute.xlu1 %676  ;;  %v16356_v54 = vpop.permute.xlu0 %671 }
  0xb4   : > { %1438 = vperm.xlu1 %15757, %v1088_v25   ;;  %1433 = vperm.xlu0 %15756, %v1087_v26  }
  0xb7   : > { %v16364_v57 = vpop.permute.xlu1 %686  ;;  %v16366_v58 = vpop.permute.xlu0 %681 }
  0xb8   : > { %1448 = vperm.xlu1 %15757, %v1090_v29   ;;  %1443 = vperm.xlu0 %15756, %v1089_v30  }
  0xbb   : > { %v16374_v61 = vpop.permute.xlu1 %696  ;;  %v16382_v0 = vpop.permute.xlu0 %691 }
  0xbc   : > { %1458 = vperm.xlu1 %15757, %v1092_v32   ;;  %1453 = vperm.xlu0 %15756, %v1091_v33  }
  0xbf   : > { %v16390_v3 = vpop.permute.xlu1 %706  ;;  %v16392_v4 = vpop.permute.xlu0 %701 }
  0xc0   : > { %1468 = vperm.xlu1 %15757, %v1094_v35   ;;  %1463 = vperm.xlu0 %15756, %v1093_v36   ;;  %v1124_v36 = vld [vmem:[%s21624_s6 + $0x2d8] sm:$0xff] }
  0xc3   : > { %v16400_v7 = vpop.permute.xlu1 %716  ;;  %v16408_v10 = vpop.permute.xlu0 %711 }
  0xc4   : > { %1478 = vperm.xlu1 %15757, %v1096_v39   ;;  %1473 = vperm.xlu0 %15756, %v1095_v40   ;;  %v1123_v39 = vld [vmem:[%s21624_s6 + $0x2d0] sm:$0xff] }
  0xc7   : > { %v16416_v13 = vpop.permute.xlu1 %1168  ;;  %v16418_v14 = vpop.permute.xlu0 %1163 }
  0xc8   : > { %1488 = vperm.xlu1 %15757, %v1098_v42   ;;  %1483 = vperm.xlu0 %15756, %v1097_v43  }
  0xcb   : > { %v16426_v19 = vpop.permute.xlu1 %1178  ;;  %v16434_v25 = vpop.permute.xlu0 %1173 }
  0xcc   : > { %1498 = vperm.xlu1 %15757, %v1100_v45   ;;  %1493 = vperm.xlu0 %15756, %v1099_v46  }
  0xcf   : > { %v16446_v43 = vpop.permute.xlu1 %1188 }
  0xd0   : > { %1508 = vperm.xlu1 %15757, %v1102_v49   ;;  %1503 = vperm.xlu0 %15756, %v1101_v50   ;;  %v1126_v50 = vld [vmem:[%s21624_s6 + $0x2e8] sm:$0xff] }
  0xd4   : > { %1518 = vperm.xlu1 %15757, %v1104_v52   ;;  %1513 = vperm.xlu0 %15756, %v1103_v53  }
  0xd8   : > { %1528 = vperm.xlu1 %15757, %v1106_v55   ;;  %1523 = vperm.xlu0 %15756, %v1105_v56  }
  0xdc   : > { %1538 = vperm.xlu1 %15757, %v1108_v59   ;;  %1533 = vperm.xlu0 %15756, %v1107_v60  }
  0xe0   : > { %1548 = vperm.xlu1 %15757, %v1110_v62   ;;  %1543 = vperm.xlu0 %15756, %v1109_v63   ;;  %v1128_v63 = vld [vmem:[%s21624_s6 + $0x2f8] sm:$0xff] }
  0xe4   : > { %1558 = vperm.xlu1 %15757, %v1112_v1   ;;  %1553 = vperm.xlu0 %15756, %v1111_v2   ;;  %v1127_v1 = vld [vmem:[%s21624_s6 + $0x2f0] sm:$0xff]  ;;  %v16465_v2 = vpop.permute.xlu1 %1198 }
  0xe8   : > { %1568 = vperm.xlu1 %15757, %v1114_v5   ;;  %1563 = vperm.xlu0 %15756, %v1113_v6  }
  0xec   : > { %1578 = vperm.xlu1 %15757, %v1116_v8   ;;  %1573 = vperm.xlu0 %15756, %v1115_v9  }
  0xf0   : > { %1588 = vperm.xlu1 %15757, %v1118_v11   ;;  %1583 = vperm.xlu0 %15756, %v1117_v12   ;;  %v1130_v11 = vld [vmem:[%s21624_s6 + $0x308] sm:$0xff]  ;;  %v1129_v12 = vld [vmem:[%s21624_s6 + $0x300] sm:$0xff] }
  0xf4   : > { %1598 = vperm.xlu1 %15757, %v1120_v15   ;;  %1593 = vperm.xlu0 %15756, %v1119_v16   ;;  %v15509_v20 = vpop.f32.mrb[0].mxu0 }
  0xf5   : > { %v564_v26 = vpop.f32.mrb[1].mxu0  ;;  %v573_v29 = vadd.f32 %v15509_v20, %v16260_v17  ;;  %v1132_v20 = vld [vmem:[%s21624_s6 + $0x318] sm:$0xff] }
  0xf6   : > { %v565_v30 = vadd.f32 %v564_v26, %v16262_v18  ;;  %v15510_v32 = vpop.f32.mrb[2].mxu0  ;;  %v16448_v18 = vpop.permute.xlu0 %1183  ;;  %v1133_v26 = vld [vmem:[%s21624_s6 + $0x320] sm:$0xff] }
  0xf7   : > { %v576_v33 = vadd.f32 %v15510_v32, %v16270_v21  ;;  %v567_v35 = vpop.f32.mrb[3].mxu0  ;;  %v597_v42 = vmax.f32 %v573_v29, 0.0  ;;  %v15764_v29 = vld [vmem:[%s21621_s3 + $0x8] sm:$0xff]  }
  0xf8   : > { %1608 = vperm.xlu1 %15757, %v1122_v22   ;;  %1603 = vperm.xlu0 %15756, %v1121_v23   ;;  %v568_v40 = vadd.f32 %v567_v35, %v16278_v24  ;;  %v595_v45 = vmax.f32 %v565_v30, 0.0  ;;  %v1125_v24 = vld [vmem:[%s21624_s6 + $0x2e0] sm:$0xff]  ;;  %v1131_v22 = vld [vmem:[%s21624_s6 + $0x310] sm:$0xff]  ;;  %v1134_v23 = vld [vmem:[%s21624_s6 + $0x328] sm:$0xff] }
  0xf9   : > { %v598_v17 = vmax.f32 %v576_v33, 0.0  ;;  %v15765_v33 = vld [vmem:[%s21621_s3 + $0x10] sm:$0xff]   ;;  %v1136_v35 = vld [vmem:[%s21624_s6 + $0x338] sm:$0xff] }
  0xfa   : > { %v596_v46 = vmax.f32 %v568_v40, 0.0 }
  0xfb   : > { %v620_v21 = vpack.c.bf16 %v598_v17, %v597_v42  ;;  %v1138_v42 = vld [vmem:[%s21624_s6 + $0x348] sm:$0xff]  ;;  %v1137_v17 = vld [vmem:[%s21624_s6 + $0x340] sm:$0xff] }
  0xfc   : > { %1618 = vperm.xlu1 %15757, %v1124_v36   ;;  %1613 = vperm.xlu0 %15756, %v1123_v39   ;;  %v15513_v49 = vpop.f32.mrb[4].mxu0  ;;  %v619_v53 = vpack.c.bf16 %v596_v46, %v595_v45  ;;  %v1135_v36 = vld [vmem:[%s21624_s6 + $0x330] sm:$0xff]  ;;  %v15766_v45 = vld [vmem:[%s21621_s3 + $0x18] sm:$0xff]   ;;  %v15767_v46 = vld [vmem:[%s21621_s3 + $0x20] sm:$0xff]  }
  0xfd   : > { %v580_v52 = vpop.f32.mrb[5].mxu0  ;;  %v589_v55 = vadd.f32 %v15513_v49, %v16304_v34  ;;  %v16467_v34 = vpop.permute.xlu0 %1193  ;;  %v1139_v49 = vld [vmem:[%s21624_s6 + $0x350] sm:$0xff] }
  0xfe   : > { %v581_v56 = vadd.f32 %v580_v52, %v16288_v28  ;;  %v15514_v59 = vpop.f32.mrb[6].mxu0  ;;  %15515 = vmatprep.subr.bf16.mxu1 %v619_v53  ;;  %v1142_v52 = vld [vmem:[%s21624_s6 + $0x368] sm:$0xff] }
  0xff   : > { %v592_v60 = vadd.f32 %v15514_v59, %v16296_v31  ;;  %v583_v62 = vpop.f32.mrb[7].mxu0  ;;  %15516 = vmatpush3.bf16.msra.mxu1 %v619_v53  ;;  %v601_v5 = vmax.f32 %v589_v55, 0.0  ;;  %v1141_v53 = vld [vmem:[%s21624_s6 + $0x360] sm:$0xff]  ;;  %v15768_v55 = vld [vmem:[%s21621_s3 + $0x28] sm:$0xff]  }
 0x100   : > { %1628 = vperm.xlu1 %15757, %v1126_v50   ;;  %1623 = vperm.xlu0 %15756, %v1125_v24   ;;  %v584_v28 = vadd.f32 %v583_v62, %v16286_v27  ;;  %v599_v31 = vmax.f32 %v581_v56, 0.0  ;;  %v16476_v27 = vpop.permute.xlu1 %1208  ;;  %v15769_v56 = vld [vmem:[%s21621_s3 + $0x30] sm:$0xff]   ;;  %v1144_v62 = vld [vmem:[%s21624_s6 + $0x378] sm:$0xff] }
 0x101   : > { %v602_v6 = vmax.f32 %v592_v60, 0.0  ;;  %15517 = vmatprep.subr.bf16.mxu1 %v620_v21  ;;  %v16478_v16 = vpop.permute.xlu0 %1203 }
 0x102   : > { %v600_v8 = vmax.f32 %v584_v28, 0.0  ;;  %v1145_v28 = vld [vmem:[%s21624_s6 + $0x380] sm:$0xff] }
 0x103   : > { %v622_v9 = vpack.c.bf16 %v602_v6, %v601_v5  ;;  %15518 = vmatpush3.bf16.msra.mxu1 %v620_v21  ;;  %v1140_v21 = vld [vmem:[%s21624_s6 + $0x358] sm:$0xff] }
 0x104   : > { %1638 = vperm.xlu1 %15757, %v1128_v63   ;;  %1633 = vperm.xlu0 %15756, %v1127_v1   ;;  %v621_v15 = vpack.c.bf16 %v600_v8, %v599_v31  ;;  %v16495_v30 = vpop.permute.xlu1 %1218  ;;  %v1143_v63 = vld [vmem:[%s21624_s6 + $0x370] sm:$0xff]  ;;  %v1146_v1 = vld [vmem:[%s21624_s6 + $0x388] sm:$0xff]  ;;  %v15770_v5 = vld [vmem:[%s21621_s3 + $0x38] sm:$0xff]  }
 0x105   : > { %v16497_v32 = vpop.permute.xlu0 %1213  ;;  %v1148_v8 = vld [vmem:[%s21624_s6 + $0x398] sm:$0xff] }
 0x106   : > { %15519 = vmatprep.subr.bf16.mxu1 %v621_v15 }
 0x107   : > { %15520 = vmatpush3.bf16.msra.mxu1 %v621_v15  ;;  %v1150_v15 = vld [vmem:[%s21624_s6 + $0x3a8] sm:$0xff] }
 0x108   : > { %1648 = vperm.xlu1 %15757, %v1130_v11   ;;  %1643 = vperm.xlu0 %15756, %v1129_v12   ;;  %v16510_v39 = vpop.permute.xlu1 %1228 }
 0x109   : > { %15521 = vmatprep.subr.bf16.mxu1 %v622_v9  ;;  %v16512_v40 = vpop.permute.xlu0 %1223 }
 0x10b   : > { %15522 = vmatpush3.bf16.msra.mxu1 %v622_v9  ;;  %v1147_v9 = vld [vmem:[%s21624_s6 + $0x390] sm:$0xff] }
 0x10c   : > { %1658 = vperm.xlu1 %15757, %v1132_v20   ;;  %1653 = vperm.xlu0 %15756, %v1131_v22   ;;  %v16533_v50 = vpop.permute.xlu1 %1238  ;;  %v1149_v20 = vld [vmem:[%s21624_s6 + $0x3a0] sm:$0xff]  ;;  %v1152_v22 = vld [vmem:[%s21624_s6 + $0x3b8] sm:$0xff] }
 0x10d   : > { %v16535_v24 = vpop.permute.xlu0 %1233 }
 0x10e   : > { %15524 = vmatmul.mubr.msk.bf16.vlgmr.msra.gmra.mrb[0].mxu1 %vm759_vm1, %v15764_v29 }
 0x10f   : > { %15527 = vmatprep.mubr.msk.bf16.mxu1 %vm759_vm1, %v15765_v33  ;;  %v1154_v33 = vld [vmem:[%s21624_s6 + $0x3c8] sm:$0xff] }
 0x110   : > { %1668 = vperm.xlu1 %15757, %v1134_v23   ;;  %1663 = vperm.xlu0 %15756, %v1133_v26   ;;  %v16550_v59 = vpop.permute.xlu1 %1248  ;;  %v1151_v23 = vld [vmem:[%s21624_s6 + $0x3b0] sm:$0xff] }
 0x111   : > { %v16552_v60 = vpop.permute.xlu0 %1243 }
 0x114   : > { %1678 = vperm.xlu1 %15757, %v1136_v35   ;;  %1673 = vperm.xlu0 %15756, %v1135_v36   ;;  %v16571_v6 = vpop.permute.xlu1 %1258  ;;  %v1153_v35 = vld [vmem:[%s21624_s6 + $0x3c0] sm:$0xff] }
 0x115   : > { %v16573_v31 = vpop.permute.xlu0 %1253 }
 0x116   : > { %15528 = vmatmul.mubr.msk.bf16.gmra.mrb[4].mxu1 %vm759_vm1, %v15766_v45  ;;  %v1155_v45 = vld [vmem:[%s21624_s6 + $0x3d0] sm:$0xff] }
 0x117   : > { %15531 = vmatprep.mubr.msk.bf16.mxu1 %vm759_vm1, %v15767_v46  ;;  %v1158_v46 = vld [vmem:[%s21624_s6 + $0x3e8] sm:$0xff] }
 0x118   : > { %1688 = vperm.xlu1 %15757, %v1138_v42   ;;  %1683 = vperm.xlu0 %15756, %v1137_v17   ;;  %v16582_v11 = vpop.permute.xlu1 %1268  ;;  %v1156_v17 = vld [vmem:[%s21624_s6 + $0x3d8] sm:$0xff] }
 0x119   : > { %21673 = vst [vmem:[#allocation6_spill] sm:$0xff] %v16582_v11  ;;  %v16584_v12 = vpop.permute.xlu0 %1263 }
 0x11c   : > { %1698 = vperm.xlu1 %15757, %v1140_v21   ;;  %1693 = vperm.xlu0 %15756, %v1139_v49   ;;  %v16598_v26 = vpop.permute.xlu1 %1278  ;;  %v1157_v21 = vld [vmem:[%s21624_s6 + $0x3e0] sm:$0xff] }
 0x11d   : > { %v16600_v29 = vpop.permute.xlu0 %1273 }
 0x11e   : > { %15532 = vmatmul.mubr.msk.bf16.gmra.mrb[8].mxu1 %vm759_vm1, %v15768_v55  ;;  %v1159_v55 = vld [vmem:[%s21624_s6 + $0x3f0] sm:$0xff] }
 0x11f   : > { %15535 = vmatprep.mubr.msk.bf16.mxu1 %vm759_vm1, %v15769_v56 }
 0x120   : > { %1708 = vperm.xlu1 %15757, %v1142_v52   ;;  %1703 = vperm.xlu0 %15756, %v1141_v53   ;;  %v16608_v36 = vpop.permute.xlu1 %1288  ;;  %v1160_v53 = vld [vmem:[%s21624_s6 + $0x3f8] sm:$0xff] }
 0x121   : > { %21674 = vst [vmem:[#allocation7_spill] sm:$0xff] %v16608_v36  ;;  %v16610_v42 = vpop.permute.xlu0 %1283 }
 0x122   : > { %21675 = vst [vmem:[#allocation8_spill] sm:$0xff] %v16610_v42 }
 0x124   : > { %1718 = vperm.xlu1 %15757, %v1144_v62   ;;  %1713 = vperm.xlu0 %15756, %v1143_v63   ;;  %v16624_v49 = vpop.permute.xlu1 %1298  ;;  %v15771_v63 = vld [vmem:[%s21623_s5] sm:$0xff]  }
 0x125   : > { %21676 = vst [vmem:[#allocation9_spill] sm:$0xff] %v16624_v49  ;;  %v16626_v52 = vpop.permute.xlu0 %1293  ;;  %15555 = vmatprep.mubr.bf16.mxu0 %v15771_v63 }
 0x126   : > { %15536 = vmatmul.mubr.msk.bf16.gmra.mrb[12].mxu1 %vm759_vm1, %v15770_v5  ;;  %21677 = vst [vmem:[#allocation10_spill] sm:$0xff] %v16626_v52 }
 0x128   : > { %1728 = vperm.xlu1 %15757, %v1146_v1   ;;  %1723 = vperm.xlu0 %15756, %v1145_v28   ;;  %v16634_v56 = vpop.permute.xlu1 %1308  ;;  %v15772_v1 = vld [vmem:[%s21623_s5 + $0x110] sm:$0xff]  }
 0x129   : > { %21678 = vst [vmem:[#allocation11_spill] sm:$0xff] %v16634_v56  ;;  %v16636_v62 = vpop.permute.xlu0 %1303  ;;  %15623 = vmatprep.mubr.bf16.mxu1 %v15772_v1 }
 0x12a   : > { %21679 = vst [vmem:[#allocation12_spill] sm:$0xff] %v16636_v62 }
 0x12c   : > { %1738 = vperm.xlu1 %15757, %v1148_v8   ;;  %1733 = vperm.xlu0 %15756, %v1147_v9  }
 0x130   : > { %1748 = vperm.xlu1 %15757, %v1150_v15   ;;  %1743 = vperm.xlu0 %15756, %v1149_v20  }
 0x134   : > { %1758 = vperm.xlu1 %15757, %v1152_v22   ;;  %1753 = vperm.xlu0 %15756, %v1151_v23  }
 0x138   : > { %1768 = vperm.xlu1 %15757, %v1154_v33   ;;  %1763 = vperm.xlu0 %15756, %v1153_v35  }
 0x13c   : > { %1778 = vperm.xlu1 %15757, %v1156_v17   ;;  %1773 = vperm.xlu0 %15756, %v1155_v45  }
 0x140   : > { %1788 = vperm.xlu1 %15757, %v1158_v46   ;;  %1783 = vperm.xlu0 %15756, %v1157_v21  }
 0x144   : > { %1798 = vperm.xlu1 %15757, %v1160_v53   ;;  %1793 = vperm.xlu0 %15756, %v1159_v55  }
 0x1e1   : > { %v15525_v28 = vpop.f32.mrb[0].mxu1 }
 0x1e2   : > { %v827_v5 = vadd.f32 %v15525_v28, %v16330_v44  ;;  %v818_v8 = vpop.f32.mrb[1].mxu1 }
 0x1e3   : > { %v819_v9 = vadd.f32 %v818_v8, %v16314_v38  ;;  %v15526_v15 = vpop.f32.mrb[2].mxu1 }
 0x1e4   : > { %v830_v20 = vadd.f32 %v15526_v15, %v16322_v41  ;;  %v821_v22 = vpop.f32.mrb[3].mxu1  ;;  %v883_v33 = vmax.f32 %v827_v5, 0.0 }
 0x1e5   : > { %v822_v23 = vadd.f32 %v821_v22, %v16312_v37  ;;  %v881_v17 = vmax.f32 %v819_v9, 0.0 }
 0x1e6   : > { %v884_v35 = vmax.f32 %v830_v20, 0.0 }
 0x1e7   : > { %v882_v45 = vmax.f32 %v822_v23, 0.0 }
 0x1e8   : > { %v1026_v46 = vpack.c.bf16 %v884_v35, %v883_v33 }
 0x1e9   : > { %v1025_v21 = vpack.c.bf16 %v882_v45, %v881_v17  ;;  %v15529_v53 = vpop.f32.mrb[4].mxu1 }
 0x1ea   : > { %v843_v55 = vadd.f32 %v15529_v53, %v16356_v54  ;;  %v834_v63 = vpop.f32.mrb[5].mxu1 }
 0x1eb   : > { %v835_v44 = vadd.f32 %v834_v63, %v16340_v48  ;;  %v15530_v1 = vpop.f32.mrb[6].mxu1  ;;  %15539 = vmatprep.subr.bf16.mxu0 %v1025_v21  ;;  %15683 = vmatprep.subr.bf16.mxu1 %v1025_v21 }
 0x1ec   : > { %v846_v38 = vadd.f32 %v15530_v1, %v16348_v51  ;;  %v837_v41 = vpop.f32.mrb[7].mxu1  ;;  %15540 = vmatpush3.bf16.msra.mxu0 %v1025_v21  ;;  %15691 = vmatpush3.bf16.msra.mxu1 %v1025_v21  ;;  %v887_v28 = vmax.f32 %v843_v55, 0.0 }
 0x1ed   : > { %v838_v37 = vadd.f32 %v837_v41, %v16338_v47  ;;  %15541 = vmatprep.subr.bf16.mxu0 %v1026_v46  ;;  %15684 = vmatprep.subr.bf16.mxu1 %v1026_v46  ;;  %v885_v8 = vmax.f32 %v835_v44, 0.0 }
 0x1ee   : > { %v888_v5 = vmax.f32 %v846_v38, 0.0 }
 0x1ef   : > { %v886_v9 = vmax.f32 %v838_v37, 0.0 }
 0x1f0   : > { %v1028_v54 = vpack.c.bf16 %v888_v5, %v887_v28  ;;  %15542 = vmatpush3.bf16.msra.mxu0 %v1026_v46  ;;  %15692 = vmatpush3.bf16.msra.mxu1 %v1026_v46 }
 0x1f1   : > { %v1027_v48 = vpack.c.bf16 %v886_v9, %v885_v8  ;;  %v15533_v15 = vpop.f32.mrb[8].mxu1  ;;  %v15775_v8 = vld [vmem:[%s21623_s5 + $0x10] sm:$0xff]   ;;  %v15776_v9 = vld [vmem:[%s21623_s5 + $0x120] sm:$0xff]  }
 0x1f2   : > { %v859_v20 = vadd.f32 %v15533_v15, %v16382_v0  ;;  %v850_v22 = vpop.f32.mrb[9].mxu1  ;;  %v15779_v15 = vld [vmem:[%s21623_s5 + $0x20] sm:$0xff]  }
 0x1f3   : > { %v851_v51 = vadd.f32 %v850_v22, %v16366_v58  ;;  %v15534_v23 = vpop.f32.mrb[10].mxu1  ;;  %15543 = vmatprep.subr.bf16.mxu0 %v1027_v48  ;;  %15685 = vmatprep.subr.bf16.mxu1 %v1027_v48  ;;  %v15781_v22 = vld [vmem:[%s21623_s5 + $0x28] sm:$0xff]  }
 0x1f4   : > { %v862_v47 = vadd.f32 %v15534_v23, %v16374_v61  ;;  %v853_v33 = vpop.f32.mrb[11].mxu1  ;;  %15544 = vmatpush3.bf16.msra.mxu0 %v1027_v48  ;;  %15693 = vmatpush3.bf16.msra.mxu1 %v1027_v48  ;;  %v891_v17 = vmax.f32 %v859_v20, 0.0  ;;  %v15778_v48 = vld [vmem:[%s21623_s5 + $0x128] sm:$0xff]   ;;  %v15780_v20 = vld [vmem:[%s21623_s5 + $0x130] sm:$0xff]  }
 0x1f5   : > { %v854_v35 = vadd.f32 %v853_v33, %v16364_v57  ;;  %15545 = vmatprep.subr.bf16.mxu0 %v1028_v54  ;;  %15686 = vmatprep.subr.bf16.mxu1 %v1028_v54  ;;  %v889_v46 = vmax.f32 %v851_v51, 0.0  ;;  %v15782_v51 = vld [vmem:[%s21623_s5 + $0x138] sm:$0xff]   ;;  %v15783_v23 = vld [vmem:[%s21623_s5 + $0x30] sm:$0xff]  }
 0x1f6   : > { %v892_v45 = vmax.f32 %v862_v47, 0.0  ;;  %v15784_v47 = vld [vmem:[%s21623_s5 + $0x140] sm:$0xff]   ;;  %v15785_v33 = vld [vmem:[%s21623_s5 + $0x38] sm:$0xff]  }
 0x1f7   : > { %v890_v21 = vmax.f32 %v854_v35, 0.0  ;;  %v15786_v35 = vld [vmem:[%s21623_s5 + $0x148] sm:$0xff]  }
 0x1f8   : > { %v1030_v0 = vpack.c.bf16 %v892_v45, %v891_v17  ;;  %15546 = vmatpush3.bf16.msra.mxu0 %v1028_v54  ;;  %15694 = vmatpush3.bf16.msra.mxu1 %v1028_v54  ;;  %v15777_v54 = vld [vmem:[%s21623_s5 + $0x18] sm:$0xff]   ;;  %v15787_v17 = vld [vmem:[%s21623_s5 + $0x40] sm:$0xff]   ;;  %v15788_v45 = vld [vmem:[%s21623_s5 + $0x150] sm:$0xff]  }
 0x1f9   : > { %v1029_v58 = vpack.c.bf16 %v890_v21, %v889_v46  ;;  %v15537_v53 = vpop.f32.mrb[12].mxu1  ;;  %v15789_v46 = vld [vmem:[%s21623_s5 + $0x48] sm:$0xff]   ;;  %v15790_v21 = vld [vmem:[%s21623_s5 + $0x158] sm:$0xff]  }
 0x1fa   : > { %v875_v55 = vadd.f32 %v15537_v53, %v16408_v10  ;;  %v866_v63 = vpop.f32.mrb[13].mxu1  ;;  %v16720_v53 = vpop.permute.xlu1 %1318 }
 0x1fb   : > { %v867_v61 = vadd.f32 %v866_v63, %v16392_v4  ;;  %v15538_v44 = vpop.f32.mrb[14].mxu1  ;;  %15547 = vmatprep.subr.bf16.mxu0 %v1029_v58  ;;  %15687 = vmatprep.subr.bf16.mxu1 %v1029_v58  ;;  %21680 = vst [vmem:[#allocation13_spill] sm:$0xff] %v16720_v53  ;;  %v15793_v63 = vld [vmem:[%s21623_s5 + $0x58] sm:$0xff]  }
 0x1fc   : > { %v878_v57 = vadd.f32 %v15538_v44, %v16400_v7  ;;  %v869_v1 = vpop.f32.mrb[15].mxu1  ;;  %15548 = vmatpush3.bf16.msra.mxu0 %v1029_v58  ;;  %15695 = vmatpush3.bf16.msra.mxu1 %v1029_v58  ;;  %v895_v41 = vmax.f32 %v875_v55, 0.0  ;;  %v15774_v7 = vld [vmem:[%s21623_s5 + $0x118] sm:$0xff]   ;;  %v15792_v58 = vld [vmem:[%s21623_s5 + $0x160] sm:$0xff]   ;;  %v16722_v55 = vpop.permute.xlu0 %1313 }
 0x1fd   : > { %v870_v38 = vadd.f32 %v869_v1, %v16390_v3  ;;  %15549 = vmatprep.subr.bf16.mxu0 %v1030_v0  ;;  %15688 = vmatprep.subr.bf16.mxu1 %v1030_v0  ;;  %v893_v28 = vmax.f32 %v867_v61, 0.0  ;;  %v15773_v3 = vld [vmem:[%s21623_s5 + $0x8] sm:$0xff]   ;;  %21681 = vst [vmem:[#allocation14_spill] sm:$0xff] %v16722_v55  ;;  %v15795_v44 = vld [vmem:[%s21623_s5 + $0x60] sm:$0xff]  }
 0x1fe   : > { %v896_v37 = vmax.f32 %v878_v57, 0.0  ;;  %v15794_v61 = vld [vmem:[%s21623_s5 + $0x168] sm:$0xff]   ;;  %v15796_v57 = vld [vmem:[%s21623_s5 + $0x170] sm:$0xff]   ;;  %v16736_v1 = vpop.permute.xlu1 %1328 }
 0x1ff   : > { %v894_v5 = vmax.f32 %v870_v38, 0.0  ;;  %21682 = vst [vmem:[#allocation15_spill] sm:$0xff] %v16736_v1 }
 0x200   : > { %v1032_v10 = vpack.c.bf16 %v896_v37, %v895_v41  ;;  %15550 = vmatpush3.bf16.msra.mxu0 %v1030_v0  ;;  %15696 = vmatpush3.bf16.msra.mxu1 %v1030_v0  ;;  %v15791_v0 = vld [vmem:[%s21623_s5 + $0x50] sm:$0xff]   ;;  %v16738_v38 = vpop.permute.xlu0 %1323  ;;  %v15797_v41 = vld [vmem:[%s21623_s5 + $0x68] sm:$0xff]   ;;  %v15798_v37 = vld [vmem:[%s21623_s5 + $0x178] sm:$0xff]  }
 0x201   : > { %v1031_v4 = vpack.c.bf16 %v894_v5, %v893_v28  ;;  %21683 = vst [vmem:[#allocation16_spill] sm:$0xff] %v16738_v38  ;;  %v15799_v28 = vld [vmem:[%s21623_s5 + $0x70] sm:$0xff]   ;;  %v15800_v5 = vld [vmem:[%s21623_s5 + $0x180] sm:$0xff]  }
 0x203   : > { %15551 = vmatprep.subr.bf16.mxu0 %v1031_v4  ;;  %15689 = vmatprep.subr.bf16.mxu1 %v1031_v4 }
 0x204   : > { %15552 = vmatpush3.bf16.msra.mxu0 %v1031_v4  ;;  %15697 = vmatpush3.bf16.msra.mxu1 %v1031_v4  ;;  %v16754_v4 = vpop.permute.xlu0 %1333 }
 0x205   : > { %15553 = vmatprep.subr.bf16.mxu0 %v1032_v10  ;;  %15690 = vmatprep.subr.bf16.mxu1 %v1032_v10  ;;  %21685 = vst [vmem:[#allocation18_spill] sm:$0xff] %v16754_v4 }
 0x208   : > { %15554 = vmatpush3.bf16.msra.mxu0 %v1032_v10  ;;  %15698 = vmatpush3.bf16.msra.mxu1 %v1032_v10  ;;  %v16752_v10 = vpop.permute.xlu1 %1338 }
 0x209   : > { %21684 = vst [vmem:[#allocation17_spill] sm:$0xff] %v16752_v10 }
 0x20b   : > { %15556 = vmatmul.mubr.bf16.vlgmr.msra.gmra.mrb[8].mxu0 %v15773_v3  ;;  %15624 = vmatmul.mubr.bf16.vlgmr.msra.gmra.mrb[16].mxu1 %v15774_v7  ;;  %v15801_v3 = vld [vmem:[%s21623_s5 + $0x78] sm:$0xff]   ;;  %v15802_v7 = vld [vmem:[%s21623_s5 + $0x188] sm:$0xff]  }
 0x20c   : > { %15559 = vmatprep.mubr.bf16.mxu0 %v15775_v8  ;;  %15627 = vmatprep.mubr.bf16.mxu1 %v15776_v9  ;;  %v15803_v8 = vld [vmem:[%s21623_s5 + $0x80] sm:$0xff]   ;;  %v15804_v9 = vld [vmem:[%s21623_s5 + $0x190] sm:$0xff]  }
 0x213   : > { %15560 = vmatmul.mubr.bf16.gmra.mrb[12].mxu0 %v15777_v54  ;;  %15628 = vmatmul.mubr.bf16.gmra.mrb[20].mxu1 %v15778_v48  ;;  %v16768_v54 = vpop.permute.xlu1 %1348  ;;  %v16770_v48 = vpop.permute.xlu0 %1343 }
 0x214   : > { %15563 = vmatprep.mubr.bf16.mxu0 %v15779_v15  ;;  %15631 = vmatprep.mubr.bf16.mxu1 %v15780_v20  ;;  %21686 = vst [vmem:[#allocation19_spill] sm:$0xff] %v16768_v54  ;;  %21687 = vst [vmem:[#allocation20_spill] sm:$0xff] %v16770_v48 }
 0x217   : > { %v16772_v15 = vpop.permute.xlu1 %1358  ;;  %v16774_v20 = vpop.permute.xlu0 %1353 }
 0x218   : > { %21688 = vst [vmem:[#allocation21_spill] sm:$0xff] %v16772_v15  ;;  %21689 = vst [vmem:[#allocation22_spill] sm:$0xff] %v16774_v20 }
 0x21b   : > { %15564 = vmatmul.mubr.bf16.gmra.mrb[16].mxu0 %v15781_v22  ;;  %15632 = vmatmul.mubr.bf16.gmra.mrb[24].mxu1 %v15782_v51  ;;  %v15805_v22 = vld [vmem:[%s21623_s5 + $0x88] sm:$0xff]   ;;  %v15806_v51 = vld [vmem:[%s21623_s5 + $0x198] sm:$0xff]  }
 0x21c   : > { %15567 = vmatprep.mubr.bf16.mxu0 %v15783_v23  ;;  %15635 = vmatprep.mubr.bf16.mxu1 %v15784_v47  ;;  %v15807_v23 = vld [vmem:[%s21623_s5 + $0x90] sm:$0xff]   ;;  %v15808_v47 = vld [vmem:[%s21623_s5 + $0x1a0] sm:$0xff]  }
 0x223   : > { %15568 = vmatmul.mubr.bf16.gmra.mrb[20].mxu0 %v15785_v33  ;;  %15636 = vmatmul.mubr.bf16.gmra.mrb[28].mxu1 %v15786_v35  ;;  %v16788_v33 = vpop.permute.xlu1 %1368  ;;  %v16790_v35 = vpop.permute.xlu0 %1363 }
 0x224   : > { %15571 = vmatprep.mubr.bf16.mxu0 %v15787_v17  ;;  %15639 = vmatprep.mubr.bf16.mxu1 %v15788_v45  ;;  %21690 = vst [vmem:[#allocation23_spill] sm:$0xff] %v16788_v33  ;;  %21691 = vst [vmem:[#allocation24_spill] sm:$0xff] %v16790_v35  ;;  %v15809_v17 = vld [vmem:[%s21623_s5 + $0x98] sm:$0xff]   ;;  %v15810_v45 = vld [vmem:[%s21623_s5 + $0x1a8] sm:$0xff]  }
 0x22b   : > { %15572 = vmatmul.mubr.bf16.gmra.mrb[24].mxu0 %v15789_v46  ;;  %15640 = vmatmul.mubr.bf16.gmra.mrb[32].mxu1 %v15790_v21  ;;  %v15811_v46 = vld [vmem:[%s21623_s5 + $0xa0] sm:$0xff]   ;;  %v15812_v21 = vld [vmem:[%s21623_s5 + $0x1b0] sm:$0xff]  }
 0x22c   : > { %15575 = vmatprep.mubr.bf16.mxu0 %v15791_v0  ;;  %15643 = vmatprep.mubr.bf16.mxu1 %v15792_v58  ;;  %v16804_v0 = vpop.permute.xlu1 %1378  ;;  %v16806_v58 = vpop.permute.xlu0 %1373 }
 0x22d   : > { %21692 = vst [vmem:[#allocation25_spill] sm:$0xff] %v16804_v0  ;;  %21693 = vst [vmem:[#allocation26_spill] sm:$0xff] %v16806_v58 }
 0x233   : > { %15576 = vmatmul.mubr.bf16.gmra.mrb[28].mxu0 %v15793_v63  ;;  %15644 = vmatmul.mubr.bf16.gmra.mrb[36].mxu1 %v15794_v61  ;;  %v15813_v63 = vld [vmem:[%s21623_s5 + $0xa8] sm:$0xff]   ;;  %v15814_v61 = vld [vmem:[%s21623_s5 + $0x1b8] sm:$0xff]  }
 0x234   : > { %15579 = vmatprep.mubr.bf16.mxu0 %v15795_v44  ;;  %15647 = vmatprep.mubr.bf16.mxu1 %v15796_v57  ;;  %v15815_v44 = vld [vmem:[%s21623_s5 + $0xb0] sm:$0xff]   ;;  %v15816_v57 = vld [vmem:[%s21623_s5 + $0x1c0] sm:$0xff]  }
 0x23b   : > { %15580 = vmatmul.mubr.bf16.gmra.mrb[32].mxu0 %v15797_v41  ;;  %15648 = vmatmul.mubr.bf16.gmra.mrb[40].mxu1 %v15798_v37  ;;  %v16820_v41 = vpop.permute.xlu1 %1388  ;;  %v16822_v37 = vpop.permute.xlu0 %1383 }
 0x23c   : > { %15583 = vmatprep.mubr.bf16.mxu0 %v15799_v28  ;;  %15651 = vmatprep.mubr.bf16.mxu1 %v15800_v5  ;;  %21694 = vst [vmem:[#allocation27_spill] sm:$0xff] %v16820_v41  ;;  %21695 = vst [vmem:[#allocation28_spill] sm:$0xff] %v16822_v37 }
 0x23f   : > { %v16824_v28 = vpop.permute.xlu1 %1398  ;;  %v16826_v5 = vpop.permute.xlu0 %1393 }
 0x240   : > { %21696 = vst [vmem:[#allocation29_spill] sm:$0xff] %v16824_v28  ;;  %21697 = vst [vmem:[#allocation30_spill] sm:$0xff] %v16826_v5 }
 0x243   : > { %15584 = vmatmul.mubr.bf16.gmra.mrb[36].mxu0 %v15801_v3  ;;  %15652 = vmatmul.mubr.bf16.gmra.mrb[44].mxu1 %v15802_v7  ;;  %v15817_v3 = vld [vmem:[%s21623_s5 + $0xb8] sm:$0xff]   ;;  %v15818_v7 = vld [vmem:[%s21623_s5 + $0x1c8] sm:$0xff]  }
 0x244   : > { %15587 = vmatprep.mubr.bf16.mxu0 %v15803_v8  ;;  %15655 = vmatprep.mubr.bf16.mxu1 %v15804_v9  ;;  %v15819_v8 = vld [vmem:[%s21623_s5 + $0xc0] sm:$0xff]   ;;  %v15820_v9 = vld [vmem:[%s21623_s5 + $0x1d0] sm:$0xff]  }
 0x24b   : > { %15588 = vmatmul.mubr.bf16.gmra.mrb[40].mxu0 %v15805_v22  ;;  %15656 = vmatmul.mubr.bf16.gmra.mrb[48].mxu1 %v15806_v51  ;;  %v16840_v22 = vpop.permute.xlu1 %1408  ;;  %v16842_v51 = vpop.permute.xlu0 %1403 }
 0x24c   : > { %15591 = vmatprep.mubr.bf16.mxu0 %v15807_v23  ;;  %15659 = vmatprep.mubr.bf16.mxu1 %v15808_v47  ;;  %21698 = vst [vmem:[#allocation31_spill] sm:$0xff] %v16840_v22  ;;  %21699 = vst [vmem:[#allocation32_spill] sm:$0xff] %v16842_v51  ;;  %v15821_v23 = vld [vmem:[%s21623_s5 + $0xc8] sm:$0xff]   ;;  %v15822_v47 = vld [vmem:[%s21623_s5 + $0x1d8] sm:$0xff]  }
 0x253   : > { %15592 = vmatmul.mubr.bf16.gmra.mrb[44].mxu0 %v15809_v17  ;;  %15660 = vmatmul.mubr.bf16.gmra.mrb[52].mxu1 %v15810_v45  ;;  %v15823_v17 = vld [vmem:[%s21623_s5 + $0xd0] sm:$0xff]   ;;  %v15824_v45 = vld [vmem:[%s21623_s5 + $0x1e0] sm:$0xff]  }
 0x254   : > { %15595 = vmatprep.mubr.bf16.mxu0 %v15811_v46  ;;  %15663 = vmatprep.mubr.bf16.mxu1 %v15812_v21  ;;  %v16856_v46 = vpop.permute.xlu1 %1418  ;;  %v16858_v21 = vpop.permute.xlu0 %1413 }
 0x255   : > { %21700 = vst [vmem:[#allocation33_spill] sm:$0xff] %v16856_v46  ;;  %21701 = vst [vmem:[#allocation34_spill] sm:$0xff] %v16858_v21 }
 0x25b   : > { %15596 = vmatmul.mubr.bf16.gmra.mrb[48].mxu0 %v15813_v63  ;;  %15664 = vmatmul.mubr.bf16.gmra.mrb[56].mxu1 %v15814_v61  ;;  %v15825_v63 = vld [vmem:[%s21623_s5 + $0xd8] sm:$0xff]   ;;  %v15826_v61 = vld [vmem:[%s21623_s5 + $0x1e8] sm:$0xff]  }
 0x25c   : > { %15599 = vmatprep.mubr.bf16.mxu0 %v15815_v44  ;;  %15667 = vmatprep.mubr.bf16.mxu1 %v15816_v57  ;;  %v15827_v44 = vld [vmem:[%s21623_s5 + $0xe0] sm:$0xff]   ;;  %v15828_v57 = vld [vmem:[%s21623_s5 + $0x1f0] sm:$0xff]  }
 0x263   : > { %15600 = vmatmul.mubr.bf16.gmra.mrb[52].mxu0 %v15817_v3  ;;  %15668 = vmatmul.mubr.bf16.gmra.mrb[60].mxu1 %v15818_v7  ;;  %v16872_v3 = vpop.permute.xlu1 %1428  ;;  %v16874_v7 = vpop.permute.xlu0 %1423 }
 0x264   : > { %15603 = vmatprep.mubr.bf16.mxu0 %v15819_v8  ;;  %15671 = vmatprep.mubr.bf16.mxu1 %v15820_v9  ;;  %21702 = vst [vmem:[#allocation35_spill] sm:$0xff] %v16872_v3  ;;  %21703 = vst [vmem:[#allocation36_spill] sm:$0xff] %v16874_v7 }
 0x267   : > { %v16876_v8 = vpop.permute.xlu1 %1438  ;;  %v16878_v9 = vpop.permute.xlu0 %1433 }
 0x268   : > { %21704 = vst [vmem:[#allocation37_spill] sm:$0xff] %v16876_v8  ;;  %21705 = vst [vmem:[#allocation38_spill] sm:$0xff] %v16878_v9 }
 0x26b   : > { %15604 = vmatmul.mubr.bf16.gmra.mrb[56].mxu0 %v15821_v23  ;;  %15672 = vmatmul.mubr.bf16.gmra.mrb[64].mxu1 %v15822_v47  ;;  %v15829_v23 = vld [vmem:[%s21623_s5 + $0xe8] sm:$0xff]   ;;  %v15830_v47 = vld [vmem:[%s21623_s5 + $0x1f8] sm:$0xff]  }
 0x26c   : > { %15607 = vmatprep.mubr.bf16.mxu0 %v15823_v17  ;;  %15675 = vmatprep.mubr.bf16.mxu1 %v15824_v45  ;;  %v15831_v17 = vld [vmem:[%s21623_s5 + $0xf0] sm:$0xff]   ;;  %v16889_v45 = vpop.permute.xlu1 %1448 }
 0x26d   : > { %21706 = vst [vmem:[#allocation39_spill] sm:$0xff] %v16889_v45 }
 0x273   : > { %15608 = vmatmul.mubr.bf16.gmra.mrb[60].mxu0 %v15825_v63  ;;  %15676 = vmatmul.mubr.bf16.gmra.mrb[68].mxu1 %v15826_v61  ;;  %v16891_v63 = vpop.permute.xlu0 %1443  ;;  %v15832_v61 = vld [vmem:[%s21623_s5 + $0xf8] sm:$0xff]  }
 0x274   : > { %15611 = vmatprep.mubr.bf16.mxu0 %v15827_v44  ;;  %15679 = vmatprep.mubr.bf16.mxu1 %v15828_v57  ;;  %21707 = vst [vmem:[#allocation40_spill] sm:$0xff] %v16891_v63  ;;  %v15833_v44 = vld [vmem:[%s21623_s5 + $0x100] sm:$0xff]   ;;  %v16899_v57 = vpop.permute.xlu1 %1458 }
 0x275   : > { %21708 = vst [vmem:[#allocation41_spill] sm:$0xff] %v16899_v57 }
 0x277   : > { %v16901_v3 = vpop.permute.xlu0 %1453 }
 0x278   : > { %21709 = vst [vmem:[#allocation42_spill] sm:$0xff] %v16901_v3 }
 0x27b   : > { %15612 = vmatmul.mubr.bf16.gmra.mrb[64].mxu0 %v15829_v23  ;;  %15680 = vmatmul.mubr.bf16.gmra.mrb[72].mxu1 %v15830_v47  ;;  %v15834_v23 = vld [vmem:[%s21623_s5 + $0x108] sm:$0xff]   ;;  %v16906_v47 = vpop.permute.xlu1 %1468 }
 0x27c   : > { %15615 = vmatprep.mubr.bf16.mxu0 %v15831_v17  ;;  %21710 = vst [vmem:[#allocation43_spill] sm:$0xff] %v16906_v47  ;;  %v16908_v17 = vpop.permute.xlu0 %1463 }
 0x27d   : > { %21711 = vst [vmem:[#allocation44_spill] sm:$0xff] %v16908_v17 }
 0x27f   : > { %v16910_v45 = vpop.permute.xlu1 %1478 }
 0x280   : > { %21712 = vst [vmem:[#allocation45_spill] sm:$0xff] %v16910_v45  ;;  %v16912_v63 = vpop.permute.xlu0 %1473 }
 0x281   : > { %21713 = vst [vmem:[#allocation46_spill] sm:$0xff] %v16912_v63 }
 0x283   : > { %15616 = vmatmul.mubr.bf16.gmra.mrb[68].mxu0 %v15832_v61  ;;  %v16914_v8 = vpop.permute.xlu1 %1488 }
 0x284   : > { %15619 = vmatprep.mubr.bf16.mxu0 %v15833_v44  ;;  %21714 = vst [vmem:[#allocation47_spill] sm:$0xff] %v16914_v8  ;;  %v16916_v57 = vpop.permute.xlu0 %1483 }
 0x285   : > { %21715 = vst [vmem:[#allocation48_spill] sm:$0xff] %v16916_v57 }
 0x287   : > { %v16918_v3 = vpop.permute.xlu1 %1498 }
 0x288   : > { %21716 = vst [vmem:[#allocation49_spill] sm:$0xff] %v16918_v3  ;;  %v16920_v61 = vpop.permute.xlu0 %1493 }
 0x289   : > { %21717 = vst [vmem:[#allocation50_spill] sm:$0xff] %v16920_v61 }
 0x28b   : > { %15620 = vmatmul.mubr.bf16.gmra.mrb[72].mxu0 %v15834_v23  ;;  %v16922_v44 = vpop.permute.xlu1 %1508 }
 0x28c   : > { %v1504_v7 = vpop.permute.xlu0 %1503 }
 0x28f   : > { %v1519_v9 = vpop.permute.xlu1 %1518 }
 0x290   : > { %v1514_v47 = vpop.permute.xlu0 %1513 }
 0x293   : > { %v16924_v22 = vpop.permute.xlu1 %1528 }
 0x294   : > { %v16926_v23 = vpop.permute.xlu0 %1523 }
 0x297   : > { %v16928_v45 = vpop.permute.xlu1 %1538 }
 0x298   : > { %v1534_v17 = vpop.permute.xlu0 %1533 }
 0x29b   : > { %v16930_v63 = vpop.permute.xlu1 %1548 }
 0x29c   : > { %v16932_v8 = vpop.permute.xlu0 %1543 }
 0x29f   : > { %v16934_v57 = vpop.permute.xlu1 %1558 }
 0x2a0   : > { %v16936_v3 = vpop.permute.xlu0 %1553 }
 0x2a3   : > { %v16938_v61 = vpop.permute.xlu1 %1568 }
 0x2a4   : > { %v16940_v46 = vpop.permute.xlu0 %1563 }
 0x2a7   : > { %v16942_v51 = vpop.permute.xlu1 %1578 }
 0x2a8   : > { %v16944_v21 = vpop.permute.xlu0 %1573 }
 0x2ab   : > { %v16946_v41 = vpop.permute.xlu1 %1588 }
 0x2ac   : > { %v16948_v28 = vpop.permute.xlu0 %1583 }
 0x2af   : > { %v16950_v37 = vpop.permute.xlu1 %1598 }
 0x2b0   : > { %v16952_v5 = vpop.permute.xlu0 %1593 }
 0x2b3   : > { %v16954_v33 = vpop.permute.xlu1 %1608 }
 0x2b4   : > { %21718 = vst [vmem:[#allocation51_spill] sm:$0xff] %v16954_v33  ;;  %v16956_v0 = vpop.permute.xlu0 %1603 }
 0x2de   : > { %v15557_v35 = vpop.f32.mrb[8].mxu0  ;;  %v15625_v58 = vpop.f32.mrb[16].mxu1 }
 0x2df   : > { %v2228_v54 = vadd.f32 %v15557_v35, %v16434_v25  ;;  %v2500_v15 = vadd.f32 %v15625_v58, %v1514_v47  ;;  %v2219_v48 = vpop.f32.mrb[9].mxu0  ;;  %v2491_v20 = vpop.f32.mrb[17].mxu1 }
 0x2e0   : > { %v2220_v1 = vadd.f32 %v2219_v48, %v16418_v14  ;;  %v2492_v10 = vadd.f32 %v2491_v20, %v1504_v7  ;;  %v15558_v38 = vpop.f32.mrb[10].mxu0  ;;  %v15626_v4 = vpop.f32.mrb[18].mxu1 }
 0x2e1   : > { %v2732_v56 = vmax.f32 %v2228_v54, 0.0  ;;  %v2800_v53 = vmax.f32 %v2500_v15, 0.0  ;;  %v2222_v62 = vpop.f32.mrb[11].mxu0  ;;  %v2494_v55 = vpop.f32.mrb[19].mxu1  ;;  %v2231_v49 = vadd.f32 %v15558_v38, %v16426_v19  ;;  %v2503_v48 = vadd.f32 %v15626_v4, %v1519_v9 }
 0x2e2   : > { %v2730_v36 = vmax.f32 %v2220_v1, 0.0  ;;  %v2798_v52 = vmax.f32 %v2492_v10, 0.0  ;;  %v2223_v25 = vadd.f32 %v2222_v62, %v16416_v13  ;;  %v16962_v35 = vpop.permute.xlu1 %1618  ;;  %v16964_v58 = vpop.permute.xlu0 %1613 }
 0x2e3   : > { %v2988_v42 = vmax.f32 %v2732_v56, 0.0  ;;  %v3056_v33 = vmax.f32 %v2800_v53, 0.0  ;;  %21719 = vst [vmem:[#allocation52_spill] sm:$0xff] %v16962_v35  ;;  %v2733_v14 = vmax.f32 %v2231_v49, 0.0  ;;  %v2801_v47 = vmax.f32 %v2503_v48, 0.0 }
 0x2e4   : > { %v2986_v20 = vmax.f32 %v2730_v36, 0.0  ;;  %v3054_v7 = vmax.f32 %v2798_v52, 0.0  ;;  %v2731_v1 = vmax.f32 %v2223_v25, 0.0 }
 0x2e5   : > { %3513 = vmax.xlane.f32.xlu1 %v3056_v33  ;;  %3377 = vmax.xlane.f32.xlu0 %v2988_v42  ;;  %v2495_v42 = vadd.f32 %v2494_v55, %v16922_v44  ;;  %v2989_v49 = vmax.f32 %v2733_v14, 0.0 }
 0x2e6   : > { %v15561_v54 = vpop.f32.mrb[12].mxu0  ;;  %v15629_v15 = vpop.f32.mrb[20].mxu1  ;;  %v2987_v4 = vmax.f32 %v2731_v1, 0.0 }
 0x2e7   : > { %v2244_v19 = vadd.f32 %v15561_v54, %v16467_v34  ;;  %v2235_v56 = vpop.f32.mrb[13].mxu0  ;;  %v2507_v53 = vpop.f32.mrb[21].mxu1  ;;  %v2516_v9 = vadd.f32 %v15629_v15, %v1534_v17  ;;  %v3057_v34 = vmax.f32 %v2801_v47, 0.0  ;;  %v2799_v25 = vmax.f32 %v2495_v42, 0.0 }
 0x2e8   : > { %v15562_v38 = vpop.f32.mrb[14].mxu0  ;;  %v15630_v10 = vpop.f32.mrb[22].mxu1  ;;  %v2236_v48 = vadd.f32 %v2235_v56, %v16448_v18  ;;  %v2508_v47 = vadd.f32 %v2507_v53, %v16926_v23 }
 0x2e9   : > { %v2510_v13 = vpop.f32.mrb[23].mxu1  ;;  %3509 = vmax.xlane.f32.xlu1 %v3054_v7  ;;  %v2238_v62 = vpop.f32.mrb[15].mxu0  ;;  %3373 = vmax.xlane.f32.xlu0 %v2986_v20  ;;  %v2736_v33 = vmax.f32 %v2244_v19, 0.0  ;;  %v2804_v35 = vmax.f32 %v2516_v9, 0.0  ;;  %v2247_v55 = vadd.f32 %v15562_v38, %v16465_v2  ;;  %v3055_v19 = vmax.f32 %v2799_v25, 0.0 }
 0x2ea   : > { %v16968_v36 = vpop.permute.xlu1 %1628  ;;  %v16970_v52 = vpop.permute.xlu0 %1623  ;;  %v2519_v18 = vadd.f32 %v15630_v10, %v16928_v45  ;;  %v2802_v38 = vmax.f32 %v2508_v47, 0.0 }
 0x2eb   : > { %21720 = vst [vmem:[#allocation53_spill] sm:$0xff] %v16968_v36  ;;  %v2992_v7 = vmax.f32 %v2736_v33, 0.0  ;;  %v3060_v42 = vmax.f32 %v2804_v35, 0.0  ;;  %v2239_v33 = vadd.f32 %v2238_v62, %v16446_v43  ;;  %v2511_v43 = vadd.f32 %v2510_v13, %v16924_v22 }
 0x2ec   : > { %v2805_v23 = vmax.f32 %v2519_v18, 0.0  ;;  %v3058_v47 = vmax.f32 %v2802_v38, 0.0 }
 0x2ed   : > { %3375 = vmax.xlane.f32.xlu1 %v2987_v4  ;;  %3379 = vmax.xlane.f32.xlu0 %v2989_v49  ;;  %v2734_v49 = vmax.f32 %v2236_v48, 0.0  ;;  %v2737_v4 = vmax.f32 %v2247_v55, 0.0  ;;  %v2735_v62 = vmax.f32 %v2239_v33, 0.0  ;;  %v2803_v18 = vmax.f32 %v2511_v43, 0.0 }
 0x2ee   : > { %v15565_v54 = vpop.f32.mrb[16].mxu0  ;;  %v15633_v11 = vpop.f32.mrb[24].mxu1 }
 0x2ef   : > { %v2251_v44 = vpop.f32.mrb[17].mxu0  ;;  %v2523_v14 = vpop.f32.mrb[25].mxu1  ;;  %v2993_v25 = vmax.f32 %v2737_v4, 0.0  ;;  %v2260_v35 = vadd.f32 %v15565_v54, %v16497_v32  ;;  %v2532_v54 = vadd.f32 %v15633_v11, %v16936_v3  ;;  %v2991_v36 = vmax.f32 %v2735_v62, 0.0 }
 0x2f0   : > { %v15566_v20 = vpop.f32.mrb[18].mxu0  ;;  %v15634_v17 = vpop.f32.mrb[26].mxu1  ;;  %v2252_v13 = vadd.f32 %v2251_v44, %v16478_v16  ;;  %v3059_v62 = vmax.f32 %v2803_v18, 0.0 }
 0x2f1   : > { %v16974_v15 = vpop.f32.mrb[19].mxu0  ;;  %v16976_v1 = vpop.f32.mrb[27].mxu1  ;;  %3385 = vmax.xlane.f32.xlu1 %v2992_v7  ;;  %3515 = vmax.xlane.f32.xlu0 %v3057_v34  ;;  %v2990_v34 = vmax.f32 %v2734_v49, 0.0  ;;  %v2740_v32 = vmax.f32 %v2260_v35, 0.0  ;;  %v2808_v22 = vmax.f32 %v2532_v54, 0.0  ;;  %v2263_v38 = vadd.f32 %v15566_v20, %v16495_v30 }
 0x2f2   : > { %v16980_v56 = vpop.permute.xlu1 %1638  ;;  %v16982_v2 = vpop.permute.xlu0 %1633  ;;  %v2738_v44 = vmax.f32 %v2252_v13, 0.0  ;;  %v2535_v20 = vadd.f32 %v15634_v17, %v16934_v57 }
 0x2f3   : > { %21721 = vst [vmem:[#allocation54_spill] sm:$0xff] %v16980_v56  ;;  %v3064_v16 = vmax.f32 %v2808_v22, 0.0  ;;  %v2741_v30 = vmax.f32 %v2263_v38, 0.0 }
 0x2f4   : > { %v2809_v18 = vmax.f32 %v2535_v20, 0.0 }
 0x2f5   : > { %3521 = vmax.xlane.f32.xlu1 %v3060_v42  ;;  %3511 = vmax.xlane.f32.xlu0 %v3055_v19  ;;  %v3061_v42 = vmax.f32 %v2805_v23, 0.0 }
 0x2f6   : > { %v15569_v9 = vpop.f32.mrb[20].mxu0  ;;  %v16985_v7 = vpop.f32.mrb[28].mxu1 }
 0x2f7   : > { %v16988_v53 = vpop.f32.mrb[21].mxu0  ;;  %v16990_v45 = vpop.f32.mrb[29].mxu1  ;;  %v2276_v22 = vadd.f32 %v15569_v9, %v16535_v24  ;;  %v3065_v24 = vmax.f32 %v2809_v18, 0.0 }
 0x2f8   : > { %v16992_v10 = vpop.f32.mrb[22].mxu0  ;;  %v16994_v48 = vpop.f32.mrb[30].mxu1 }
 0x2f9   : > { %v16996_v55 = vpop.f32.mrb[23].mxu0  ;;  %v16998_v19 = vpop.f32.mrb[31].mxu1  ;;  %3381 = vmax.xlane.f32.xlu1 %v2990_v34  ;;  %3387 = vmax.xlane.f32.xlu0 %v2993_v25  ;;  %v2996_v25 = vmax.f32 %v2740_v32, 0.0  ;;  %v2744_v9 = vmax.f32 %v2276_v22, 0.0 }
 0x2fa   : > { %v17002_v49 = vpop.permute.xlu1 %1648  ;;  %v17004_v4 = vpop.permute.xlu0 %1643 }
 0x2fb   : > { %21722 = vst [vmem:[#allocation55_spill] sm:$0xff] %v17002_v49  ;;  %21723 = vst [vmem:[#allocation56_spill] sm:$0xff] %v17004_v4  ;;  %v2255_v49 = vadd.f32 %v16974_v15, %v16476_v27 }
 0x2fd   : > { %3517 = vmax.xlane.f32.xlu1 %v3058_v47  ;;  %3523 = vmax.xlane.f32.xlu0 %v3061_v42  ;;  %v2524_v47 = vadd.f32 %v2523_v14, %v16932_v8  ;;  %v2994_v8 = vmax.f32 %v2738_v44, 0.0  ;;  %v2997_v14 = vmax.f32 %v2741_v30, 0.0  ;;  %v2739_v15 = vmax.f32 %v2255_v49, 0.0 }
 0x2fe   : > { %v17006_v56 = vpop.f32.mrb[24].mxu0  ;;  %v17008_v34 = vpop.f32.mrb[32].mxu1  ;;  %v2548_v44 = vadd.f32 %v16985_v7, %v16944_v21  ;;  %v2279_v21 = vadd.f32 %v16992_v10, %v16533_v50 }
 0x2ff   : > { %v17012_v33 = vpop.f32.mrb[25].mxu0  ;;  %v17014_v11 = vpop.f32.mrb[33].mxu1  ;;  %v2806_v54 = vmax.f32 %v2524_v47, 0.0  ;;  %v2527_v47 = vadd.f32 %v16976_v1, %v16930_v63  ;;  %v2268_v1 = vadd.f32 %v16988_v53, %v16512_v40  ;;  %v2540_v40 = vadd.f32 %v16990_v45, %v16940_v46 }
 0x300   : > { %v17016_v3 = vpop.f32.mrb[26].mxu0  ;;  %v17018_v23 = vpop.f32.mrb[34].mxu1  ;;  %v2812_v63 = vmax.f32 %v2548_v44, 0.0  ;;  %v2745_v10 = vmax.f32 %v2279_v21, 0.0 }
 0x301   : > { %v17020_v35 = vpop.f32.mrb[27].mxu0  ;;  %v17022_v43 = vpop.f32.mrb[35].mxu1  ;;  %3393 = vmax.xlane.f32.xlu1 %v2996_v25  ;;  %3383 = vmax.xlane.f32.xlu0 %v2991_v36  ;;  %v2807_v4 = vmax.f32 %v2527_v47, 0.0  ;;  %v2742_v50 = vmax.f32 %v2268_v1, 0.0 }
 0x302   : > { %v17026_v42 = vpop.permute.xlu1 %1658  ;;  %v17028_v32 = vpop.permute.xlu0 %1653  ;;  %v3068_v53 = vmax.f32 %v2812_v63, 0.0  ;;  %v3001_v45 = vmax.f32 %v2745_v10, 0.0  ;;  %v2564_v10 = vadd.f32 %v17008_v34, %v16952_v5  ;;  %v2295_v5 = vadd.f32 %v17016_v3, %v16571_v6 }
 0x303   : > { %21724 = vst [vmem:[#allocation57_spill] sm:$0xff] %v17026_v42  ;;  %v2995_v42 = vmax.f32 %v2739_v15, 0.0  ;;  %v2998_v46 = vmax.f32 %v2742_v50, 0.0 }
 0x304   : > { %v2749_v3 = vmax.f32 %v2295_v5, 0.0 }
 0x305   : > { %3529 = vmax.xlane.f32.xlu1 %v3064_v16  ;;  %3519 = vmax.xlane.f32.xlu0 %v3059_v62  ;;  %v3062_v16 = vmax.f32 %v2806_v54, 0.0 }
 0x306   : > { %v17032_v25 = vpop.f32.mrb[28].mxu0  ;;  %v17034_v36 = vpop.f32.mrb[36].mxu1 }
 0x307   : > { %v17037_v57 = vpop.f32.mrb[29].mxu0  ;;  %v17039_v17 = vpop.f32.mrb[37].mxu1 }
 0x308   : > { %v17041_v13 = vpop.f32.mrb[30].mxu0  ;;  %v17043_v38 = vpop.f32.mrb[38].mxu1 }
 0x309   : > { %v17045_v62 = vpop.f32.mrb[31].mxu0  ;;  %v17047_v27 = vpop.f32.mrb[39].mxu1  ;;  %3389 = vmax.xlane.f32.xlu1 %v2994_v8  ;;  %3395 = vmax.xlane.f32.xlu0 %v2997_v14  ;;  %v3000_v14 = vmax.f32 %v2744_v9, 0.0 }
 0x30a   : > { %v17053_v30 = vpop.permute.xlu1 %1668  ;;  %v17055_v20 = vpop.permute.xlu0 %1663 }
 0x30b   : > { %21725 = vst [vmem:[#allocation58_spill] sm:$0xff] %v17053_v30  ;;  %21726 = vst [vmem:[#allocation59_spill] sm:$0xff] %v17055_v20  ;;  %v2810_v30 = vmax.f32 %v2540_v40, 0.0 }
 0x30d   : > { %3525 = vmax.xlane.f32.xlu1 %v3062_v16  ;;  %3531 = vmax.xlane.f32.xlu0 %v3065_v24  ;;  %v3063_v16 = vmax.f32 %v2807_v4, 0.0  ;;  %v2551_v24 = vadd.f32 %v16994_v48, %v16942_v51  ;;  %v2292_v51 = vadd.f32 %v17006_v56, %v16573_v31  ;;  %v3066_v50 = vmax.f32 %v2810_v30, 0.0 }
 0x30e   : > { %v17057_v8 = vpop.f32.mrb[32].mxu0  ;;  %v17059_v49 = vpop.f32.mrb[40].mxu1 }
 0x30f   : > { %v17065_v7 = vpop.f32.mrb[33].mxu0  ;;  %v17067_v54 = vpop.f32.mrb[41].mxu1  ;;  %v2813_v63 = vmax.f32 %v2551_v24, 0.0  ;;  %v2748_v56 = vmax.f32 %v2292_v51, 0.0 }
 0x310   : > { %v17069_v18 = vpop.f32.mrb[34].mxu0  ;;  %v17071_v22 = vpop.f32.mrb[42].mxu1 }
 0x311   : > { %v17073_v15 = vpop.f32.mrb[35].mxu0  ;;  %v17075_v47 = vpop.f32.mrb[43].mxu1  ;;  %3401 = vmax.xlane.f32.xlu1 %v3000_v14  ;;  %3391 = vmax.xlane.f32.xlu0 %v2995_v42  ;;  %v2271_v42 = vadd.f32 %v16996_v55, %v16510_v39  ;;  %v3069_v31 = vmax.f32 %v2813_v63, 0.0 }
 0x312   : > { %v17081_v9 = vpop.permute.xlu1 %1678  ;;  %v17083_v44 = vpop.permute.xlu0 %1673 }
 0x313   : > { %21727 = vst [vmem:[#allocation60_spill] sm:$0xff] %v17081_v9  ;;  %21728 = vst [vmem:[#allocation61_spill] sm:$0xff] %v17083_v44  ;;  %v2743_v55 = vmax.f32 %v2271_v42, 0.0 }
 0x315   : > { %3537 = vmax.xlane.f32.xlu1 %v3068_v53  ;;  %3527 = vmax.xlane.f32.xlu0 %v3063_v16  ;;  %v2543_v53 = vadd.f32 %v16998_v19, %v16938_v61  ;;  %v2999_v20 = vmax.f32 %v2743_v55, 0.0  ;;  %v2816_v61 = vmax.f32 %v2564_v10, 0.0  ;;  %v2284_v19 = vadd.f32 %v17012_v33, %v16552_v60 }
 0x316   : > { %v17087_v4 = vpop.f32.mrb[36].mxu0  ;;  %v17089_v14 = vpop.f32.mrb[44].mxu1  ;;  %v2556_v60 = vadd.f32 %v17014_v11, %v16948_v28  ;;  %v3005_v11 = vmax.f32 %v2749_v3, 0.0  ;;  %v2580_v3 = vadd.f32 %v17034_v36, %v16964_v58  ;;  %v2311_v58 = vadd.f32 %v17041_v13, %v16598_v26 }
 0x317   : > { %v17093_v48 = vpop.f32.mrb[37].mxu0  ;;  %v17095_v1 = vpop.f32.mrb[45].mxu1  ;;  %v2811_v44 = vmax.f32 %v2543_v53, 0.0  ;;  %v3072_v33 = vmax.f32 %v2816_v61, 0.0  ;;  %v2746_v6 = vmax.f32 %v2284_v19, 0.0 }
 0x318   : > { %v17097_v21 = vpop.f32.mrb[38].mxu0  ;;  %v17099_v16 = vpop.f32.mrb[46].mxu1 }
 0x319   : > { %v17101_v40 = vpop.f32.mrb[39].mxu0  ;;  %v17103_v39 = vpop.f32.mrb[47].mxu1  ;;  %3397 = vmax.xlane.f32.xlu1 %v2998_v46  ;;  %3403 = vmax.xlane.f32.xlu0 %v3001_v45  ;;  %v3004_v45 = vmax.f32 %v2748_v56, 0.0  ;;  %v3002_v28 = vmax.f32 %v2746_v6, 0.0 }
 0x31a   : > { %v17109_v24 = vpop.permute.xlu1 %1688  ;;  %v17111_v9 = vpop.permute.xlu0 %1683 }
 0x31b   : > { %21729 = vst [vmem:[#allocation62_spill] sm:$0xff] %v17109_v24  ;;  %v2814_v24 = vmax.f32 %v2556_v60, 0.0 }
 0x31d   : > { %3533 = vmax.xlane.f32.xlu1 %v3066_v50  ;;  %3539 = vmax.xlane.f32.xlu0 %v3069_v31  ;;  %v3067_v50 = vmax.f32 %v2811_v44, 0.0  ;;  %v2567_v31 = vadd.f32 %v17018_v23, %v16950_v37  ;;  %v2308_v37 = vadd.f32 %v17032_v25, %v16600_v29  ;;  %v3070_v6 = vmax.f32 %v2814_v24, 0.0 }
 0x31e   : > { %v17113_v46 = vpop.f32.mrb[40].mxu0  ;;  %v17115_v42 = vpop.f32.mrb[48].mxu1 }
 0x31f   : > { %v17121_v34 = vpop.f32.mrb[41].mxu0  ;;  %v17123_v30 = vpop.f32.mrb[49].mxu1  ;;  %v2817_v61 = vmax.f32 %v2567_v31, 0.0  ;;  %v2752_v25 = vmax.f32 %v2308_v37, 0.0 }
 0x320   : > { %v17125_v63 = vpop.f32.mrb[42].mxu0  ;;  %v17127_v51 = vpop.f32.mrb[50].mxu1 }
 0x321   : > { %v17129_v55 = vpop.f32.mrb[43].mxu0  ;;  %v17131_v53 = vpop.f32.mrb[51].mxu1  ;;  %3409 = vmax.xlane.f32.xlu1 %v3004_v45  ;;  %3399 = vmax.xlane.f32.xlu0 %v2999_v20  ;;  %v2287_v20 = vadd.f32 %v17020_v35, %v16550_v59  ;;  %v3073_v29 = vmax.f32 %v2817_v61, 0.0 }
 0x322   : > { %v17137_v56 = vpop.permute.xlu1 %1698  ;;  %v17139_v10 = vpop.permute.xlu0 %1693 }
 0x323   : > { %21730 = vst [vmem:[#allocation63_spill] sm:$0xff] %v17137_v56  ;;  %v2747_v35 = vmax.f32 %v2287_v20, 0.0 }
 0x325   : > { %3545 = vmax.xlane.f32.xlu1 %v3072_v33  ;;  %3535 = vmax.xlane.f32.xlu0 %v3067_v50  ;;  %v2559_v33 = vadd.f32 %v17022_v43, %v16946_v41  ;;  %v2820_v41 = vmax.f32 %v2580_v3, 0.0  ;;  %v2300_v43 = vadd.f32 %v17037_v57, %v16584_v12  ;;  %v2572_v12 = vadd.f32 %v17039_v17, %v16956_v0 }
 0x326   : > { %v17143_v44 = vpop.f32.mrb[44].mxu0  ;;  %v17145_v45 = vpop.f32.mrb[52].mxu1  ;;  %v21626_v57 = vlaneseq }
 0x327   : > { %v17149_v23 = vpop.f32.mrb[45].mxu0  ;;  %v17151_v19 = vpop.f32.mrb[53].mxu1  ;;  %v3076_v26 = vmax.f32 %v2820_v41, 0.0  ;;  %v2750_v13 = vmax.f32 %v2300_v43, 0.0  ;;  %v15916_v41 = vmov 1966171168  }
 0x328   : > { %v17153_v5 = vpop.f32.mrb[46].mxu0  ;;  %v17155_v50 = vpop.f32.mrb[54].mxu1  ;;  %v17204_v17 = vshrl.u32 %v21626_v57, 7  ;;  %v7858_v43 = vunpack.c.l.s4 %v15916_v41 }
 0x329   : > { %v17157_v60 = vpop.f32.mrb[47].mxu0  ;;  %v17159_v59 = vpop.f32.mrb[55].mxu1  ;;  %3405 = vmax.xlane.f32.xlu1 %v3002_v28  ;;  %3411 = vmax.xlane.f32.xlu0 %v3005_v11  ;;  %v3008_v11 = vmax.f32 %v2752_v25, 0.0  ;;  %v21737_v25 = vld [vmem:[#allocation52_spill] sm:$0xff] }
 0x32a   : > { %21731 = vst [vmem:[#allocation64_spill] sm:$0xff] %v17157_v60  ;;  %21732 = vst [vmem:[#allocation65_spill] sm:$0xff] %v17159_v59  ;;  %v17165_v31 = vpop.permute.xlu1 %1708  ;;  %v17167_v56 = vpop.permute.xlu0 %1703  ;;  %v3003_v60 = vmax.f32 %v2747_v35, 0.0  ;;  %v2815_v59 = vmax.f32 %v2559_v33, 0.0  ;;  %v2583_v3 = vadd.f32 %v17043_v38, %v21737_v25  ;;  %v3006_v38 = vmax.f32 %v2750_v13, 0.0 }
 0x32b   : > { %21733 = vst [vmem:[#allocation66_spill] sm:$0xff] %v17165_v31  ;;  %21741 = vst [vmem:[#allocation70_spill] sm:$0xff] %v17204_v17 }
 0x32c   : > { %v2821_v25 = vmax.f32 %v2583_v3, 0.0 }
 0x32d   : > { %3541 = vmax.xlane.f32.xlu1 %v3070_v6  ;;  %3547 = vmax.xlane.f32.xlu0 %v3073_v29  ;;  %v3071_v6 = vmax.f32 %v2815_v59, 0.0  ;;  %v2753_v29 = vmax.f32 %v2311_v58, 0.0 }
 0x32e   : > { %v17169_v28 = vpop.f32.mrb[48].mxu0  ;;  %v17171_v20 = vpop.f32.mrb[56].mxu1 }
 0x32f   : > { %v17177_v36 = vpop.f32.mrb[49].mxu0  ;;  %v17179_v24 = vpop.f32.mrb[57].mxu1  ;;  %v3009_v58 = vmax.f32 %v2753_v29, 0.0  ;;  %v7859_v29 = vunpack.c.0.s8 %v7858_v43 }
 0x330   : > { %v17181_v61 = vpop.f32.mrb[50].mxu0  ;;  %v17183_v37 = vpop.f32.mrb[58].mxu1 }
 0x331   : > { %21734 = vst [vmem:[#allocation67_spill] sm:$0xff] %v17183_v37  ;;  %v17185_v35 = vpop.f32.mrb[51].mxu0  ;;  %v17187_v33 = vpop.f32.mrb[59].mxu1  ;;  %3417 = vmax.xlane.f32.xlu1 %v3008_v11  ;;  %3407 = vmax.xlane.f32.xlu0 %v3003_v60  ;;  %v21738_v11 = vld [vmem:[#allocation6_spill] sm:$0xff] }
 0x332   : > { %21735 = vst [vmem:[#allocation68_spill] sm:$0xff] %v17185_v35  ;;  %21736 = vst [vmem:[#allocation69_spill] sm:$0xff] %v17187_v33  ;;  %v17193_v31 = vpop.permute.xlu1 %1718  ;;  %v17195_v37 = vpop.permute.xlu0 %1713  ;;  %v2818_v33 = vmax.f32 %v2572_v12, 0.0  ;;  %v2303_v60 = vadd.f32 %v17045_v62, %v21738_v11  ;;  %v21742_v35 = vld [vmem:[#allocation10_spill] sm:$0xff] }
 0x334   : > { %v2751_v13 = vmax.f32 %v2303_v60, 0.0  ;;  %v3074_v3 = vmax.f32 %v2818_v33, 0.0  ;;  %v17235_v60 = vsub.s32 2, %v17204_v17 }
 0x335   : > { %3553 = vmax.xlane.f32.xlu1 %v3076_v26  ;;  %3543 = vmax.xlane.f32.xlu0 %v3071_v6  ;;  %v2324_v26 = vadd.f32 %v17057_v8, %v21742_v35  ;;  %v2596_v8 = vadd.f32 %v17059_v49, %v16982_v2  ;;  %v17225_v35 = vsub.s32 0, %v17204_v17  ;;  %v17238_v2 = vsub.s32 3, %v17204_v17 }
 0x336   : > { %v17199_v59 = vpop.f32.mrb[52].mxu0  ;;  %v17201_v0 = vpop.f32.mrb[60].mxu1  ;;  %21750 = vst [vmem:[#allocation73_spill] sm:$0xff] %v17235_v60  ;;  %v21759_v60 = vld [vmem:[#allocation54_spill] sm:$0xff] }
 0x337   : > { %21739 = vst [vmem:[#allocation52_spill] sm:$0xff] %v17199_v59  ;;  %21740 = vst [vmem:[#allocation6_spill] sm:$0xff] %v17201_v0  ;;  %v17208_v6 = vpop.f32.mrb[53].mxu0  ;;  %v17210_v12 = vpop.f32.mrb[61].mxu1  ;;  %v21746_v0 = vld [vmem:[#allocation51_spill] sm:$0xff] }
 0x338   : > { %21743 = vst [vmem:[#allocation10_spill] sm:$0xff] %v17210_v12  ;;  %v17212_v62 = vpop.f32.mrb[54].mxu0  ;;  %v17214_v11 = vpop.f32.mrb[62].mxu1  ;;  %v2575_v57 = vadd.f32 %v17047_v27, %v21746_v0  ;;  %21747 = vst [vmem:[#allocation51_spill] sm:$0xff] %v17225_v35  ;;  %v21748_v12 = vld [vmem:[#allocation8_spill] sm:$0xff]  ;;  %v2588_v0 = vadd.f32 %v17067_v54, %v16970_v52  ;;  %v17248_v52 = vsub.s32 5, %v17204_v17 }
 0x339   : > { %21744 = vst [vmem:[#allocation71_spill] sm:$0xff] %v17212_v62  ;;  %21745 = vst [vmem:[#allocation72_spill] sm:$0xff] %v17214_v11  ;;  %v17218_v59 = vpop.f32.mrb[55].mxu0  ;;  %v17220_v41 = vpop.f32.mrb[63].mxu1  ;;  %3413 = vmax.xlane.f32.xlu1 %v3006_v38  ;;  %3419 = vmax.xlane.f32.xlu0 %v3009_v58  ;;  %v3077_v62 = vmax.f32 %v2821_v25, 0.0  ;;  %v2756_v11 = vmax.f32 %v2324_v26, 0.0  ;;  %v2316_v27 = vadd.f32 %v17065_v7, %v21748_v12 }
 0x33a   : > { %v17232_v38 = vsub.s32 1, %v17204_v17  ;;  %21751 = vst [vmem:[#allocation74_spill] sm:$0xff] %v17238_v2  ;;  %v17240_v49 = vpop.permute.xlu1 %1728  ;;  %v17242_v33 = vpop.permute.xlu0 %1723  ;;  %v2819_v43 = vmax.f32 %v2575_v57, 0.0  ;;  %v17245_v7 = vsub.s32 4, %v17204_v17  ;;  %21753 = vst [vmem:[#allocation76_spill] sm:$0xff] %v17248_v52  ;;  %v17251_v54 = vsub.s32 6, %v17204_v17 }
 0x33b   : > { %v3007_v58 = vmax.f32 %v2751_v13, 0.0  ;;  %v2824_v25 = vmax.f32 %v2596_v8, 0.0  ;;  %v17258_v2 = vsub.s32 7, %v17204_v17  ;;  %v17261_v57 = vsub.s32 %v7859_v29, %v17204_v17  ;;  %v21762_v35 = vld [vmem:[#allocation7_spill] sm:$0xff]  ;;  %v21764_v17 = vld [vmem:[#allocation14_spill] sm:$0xff] }
 0x33c   : > { %21749 = vst [vmem:[#allocation8_spill] sm:$0xff] %v17232_v38  ;;  %21752 = vst [vmem:[#allocation75_spill] sm:$0xff] %v17245_v7  ;;  %v21758_v7 = vld [vmem:[#allocation9_spill] sm:$0xff]  ;;  %v2822_v38 = vmax.f32 %v2588_v0, 0.0 }
 0x33d   : > { %3549 = vmax.xlane.f32.xlu1 %v3074_v3  ;;  %3555 = vmax.xlane.f32.xlu0 %v3077_v62  ;;  %21754 = vst [vmem:[#allocation77_spill] sm:$0xff] %v17251_v54  ;;  %21756 = vst [vmem:[#allocation79_spill] sm:$0xff] %v17258_v2  ;;  %v3012_v62 = vmax.f32 %v2756_v11, 0.0  ;;  %v2754_v3 = vmax.f32 %v2316_v27, 0.0  ;;  %v2327_v52 = vadd.f32 %v17069_v18, %v21758_v7  ;;  %v21763_v2 = vld [vmem:[#allocation53_spill] sm:$0xff]  ;;  %v3075_v7 = vmax.f32 %v2819_v43, 0.0 }
 0x33e   : > { %v17253_v26 = vpop.f32.mrb[56].mxu0  ;;  %v17255_v12 = vpop.f32.mrb[64].mxu1  ;;  %21757 = vst [vmem:[#allocation80_spill] sm:$0xff] %v17261_v57  ;;  %v2599_v54 = vadd.f32 %v17071_v22, %v21759_v60  ;;  %v2591_v29 = vadd.f32 %v17075_v47, %v21763_v2  ;;  %v2340_v11 = vadd.f32 %v17087_v4, %v21764_v17  ;;  %v2612_v22 = vadd.f32 %v17089_v14, %v17028_v32  ;;  %v21767_v60 = vld [vmem:[#allocation12_spill] sm:$0xff]  ;;  %v21771_v4 = vld [vmem:[#allocation13_spill] sm:$0xff]  ;;  %v21774_v14 = vld [vmem:[#allocation55_spill] sm:$0xff] }
 0x33f   : > { %21755 = vst [vmem:[#allocation78_spill] sm:$0xff] %v17255_v12  ;;  %v17267_v13 = vpop.f32.mrb[57].mxu0  ;;  %v17269_v8 = vpop.f32.mrb[65].mxu1  ;;  %v2319_v12 = vadd.f32 %v17073_v15, %v21762_v35  ;;  %v2332_v0 = vadd.f32 %v17093_v48, %v21767_v60  ;;  %v21768_v57 = vld [vmem:[#allocation56_spill] sm:$0xff]  ;;  %v2343_v17 = vadd.f32 %v17097_v21, %v21771_v4  ;;  %v21772_v2 = vld [vmem:[#allocation57_spill] sm:$0xff]  ;;  %v2607_v48 = vadd.f32 %v17103_v39, %v21774_v14 }
 0x340   : > { %21760 = vst [vmem:[#allocation9_spill] sm:$0xff] %v17267_v13  ;;  %21761 = vst [vmem:[#allocation54_spill] sm:$0xff] %v17269_v8  ;;  %v17277_v27 = vpop.f32.mrb[58].mxu0  ;;  %v17279_v18 = vpop.f32.mrb[66].mxu1  ;;  %v2604_v15 = vadd.f32 %v17095_v1, %v21768_v57  ;;  %v2615_v43 = vadd.f32 %v17099_v16, %v21772_v2  ;;  %v3080_v60 = vmax.f32 %v2824_v25, 0.0  ;;  %v3010_v1 = vmax.f32 %v2754_v3, 0.0 }
 0x341   : > { %21765 = vst [vmem:[#allocation7_spill] sm:$0xff] %v17277_v27  ;;  %21766 = vst [vmem:[#allocation53_spill] sm:$0xff] %v17279_v18  ;;  %v17287_v35 = vpop.f32.mrb[59].mxu0  ;;  %v17289_v47 = vpop.f32.mrb[67].mxu1  ;;  %3425 = vmax.xlane.f32.xlu1 %v3012_v62  ;;  %3415 = vmax.xlane.f32.xlu0 %v3007_v58  ;;  %v21773_v18 = vld [vmem:[#allocation11_spill] sm:$0xff]  ;;  %v2757_v57 = vmax.f32 %v2327_v52, 0.0 }
 0x342   : > { %21769 = vst [vmem:[#allocation14_spill] sm:$0xff] %v17287_v35  ;;  %21770 = vst [vmem:[#allocation12_spill] sm:$0xff] %v17289_v47  ;;  %v2335_v32 = vadd.f32 %v17101_v40, %v21773_v18  ;;  %v2825_v35 = vmax.f32 %v2599_v54, 0.0  ;;  %v3078_v27 = vmax.f32 %v2822_v38, 0.0  ;;  %v2755_v47 = vmax.f32 %v2319_v12, 0.0  ;;  %v17299_v8 = vpop.permute.xlu1 %1738  ;;  %v17301_v21 = vpop.permute.xlu0 %1733  ;;  %v21775_v13 = vld [vmem:[#allocation18_spill] sm:$0xff] }
 0x343   : > { %v2823_v62 = vmax.f32 %v2591_v29, 0.0  ;;  %v2760_v58 = vmax.f32 %v2340_v11, 0.0  ;;  %v2828_v4 = vmax.f32 %v2612_v22, 0.0  ;;  %v2758_v16 = vmax.f32 %v2332_v0, 0.0  ;;  %v21776_v11 = vld [vmem:[#allocation61_spill] sm:$0xff]  ;;  %v21777_v22 = vld [vmem:[#allocation16_spill] sm:$0xff] }
 0x344   : > { %v2826_v2 = vmax.f32 %v2604_v15, 0.0  ;;  %v2356_v40 = vadd.f32 %v17113_v46, %v21775_v13  ;;  %v2761_v39 = vmax.f32 %v2343_v17, 0.0  ;;  %v2829_v25 = vmax.f32 %v2615_v43, 0.0  ;;  %v21778_v43 = vld [vmem:[#allocation59_spill] sm:$0xff] }
 0x345   : > { %3561 = vmax.xlane.f32.xlu1 %v3080_v60  ;;  %3551 = vmax.xlane.f32.xlu0 %v3075_v7  ;;  %v2759_v52 = vmax.f32 %v2335_v32, 0.0  ;;  %v2827_v54 = vmax.f32 %v2607_v48, 0.0  ;;  %v3013_v3 = vmax.f32 %v2757_v57, 0.0  ;;  %v3081_v29 = vmax.f32 %v2825_v35, 0.0 }
 0x346   : > { %v17305_v38 = vpop.f32.mrb[60].mxu0  ;;  %v17307_v12 = vpop.f32.mrb[68].mxu1  ;;  %v2628_v18 = vadd.f32 %v17115_v42, %v21776_v11  ;;  %v2348_v0 = vadd.f32 %v17121_v34, %v21777_v22  ;;  %v3011_v13 = vmax.f32 %v2755_v47, 0.0  ;;  %v17317_v7 = vmax.f32 %v2823_v62, 0.0  ;;  %v21782_v22 = vld [vmem:[#allocation17_spill] sm:$0xff] }
 0x347   : > { %v17313_v15 = vpop.f32.mrb[61].mxu0  ;;  %v17315_v46 = vpop.f32.mrb[69].mxu1  ;;  %v3016_v17 = vmax.f32 %v2760_v58, 0.0  ;;  %v2620_v32 = vadd.f32 %v17123_v30, %v21778_v43  ;;  %v17325_v48 = vmax.f32 %v2828_v4, 0.0  ;;  %v17327_v42 = vmax.f32 %v2758_v16, 0.0 }
 0x348   : > { %v17321_v14 = vpop.f32.mrb[62].mxu0  ;;  %v17323_v35 = vpop.f32.mrb[70].mxu1  ;;  %v17329_v34 = vmax.f32 %v2826_v2, 0.0  ;;  %v2764_v60 = vmax.f32 %v2356_v40, 0.0  ;;  %v17335_v62 = vmax.f32 %v2761_v39, 0.0  ;;  %v17337_v30 = vmax.f32 %v2829_v25, 0.0 }
 0x349   : > { %21779 = vst [vmem:[#allocation56_spill] sm:$0xff] %v17323_v35  ;;  %v17331_v57 = vpop.f32.mrb[63].mxu0  ;;  %v17333_v47 = vpop.f32.mrb[71].mxu1  ;;  %3421 = vmax.xlane.f32.xlu1 %v3010_v1  ;;  %3427 = vmax.xlane.f32.xlu0 %v3013_v3  ;;  %v17339_v58 = vmax.f32 %v2759_v52, 0.0  ;;  %v17341_v11 = vmax.f32 %v2827_v54, 0.0  ;;  %v2832_v4 = vmax.f32 %v2628_v18, 0.0  ;;  %v2359_v2 = vadd.f32 %v17125_v63, %v21782_v22 }
 0x34a   : > { %21780 = vst [vmem:[#allocation13_spill] sm:$0xff] %v17331_v57  ;;  %21781 = vst [vmem:[#allocation57_spill] sm:$0xff] %v17333_v47  ;;  %v2762_v16 = vmax.f32 %v2348_v0, 0.0  ;;  %v21783_v40 = vld [vmem:[#allocation60_spill] sm:$0xff]  ;;  %v17347_v57 = vpop.permute.xlu0 %1743  ;;  %v2830_v1 = vmax.f32 %v2620_v32, 0.0  ;;  %v21784_v3 = vld [vmem:[#allocation15_spill] sm:$0xff]  ;;  %v17355_v18 = vpop.permute.xlu1 %1748  ;;  %v2644_v63 = vadd.f32 %v17145_v45, %v17139_v10  ;;  %v2636_v32 = vadd.f32 %v17151_v19, %v17111_v9 }
 0x34b   : > { %v2631_v43 = vadd.f32 %v17127_v51, %v21783_v40  ;;  %v2351_v39 = vadd.f32 %v17129_v55, %v21784_v3  ;;  %v21785_v25 = vld [vmem:[#allocation58_spill] sm:$0xff]  ;;  %v17357_v0 = vmax.f32 %v2764_v60, 0.0  ;;  %v21787_v51 = vld [vmem:[#allocation20_spill] sm:$0xff]  ;;  %v21788_v55 = vld [vmem:[#allocation21_spill] sm:$0xff]  ;;  %v2765_v19 = vmax.f32 %v2359_v2, 0.0 }
 0x34c   : > { %v2623_v52 = vadd.f32 %v17131_v53, %v21785_v25  ;;  %v21786_v47 = vld [vmem:[#allocation22_spill] sm:$0xff]  ;;  %v2364_v22 = vadd.f32 %v17149_v23, %v21787_v51  ;;  %v2375_v53 = vadd.f32 %v17153_v5, %v21788_v55  ;;  %v21789_v40 = vld [vmem:[#allocation63_spill] sm:$0xff]  ;;  %v21791_v60 = vld [vmem:[#allocation64_spill] sm:$0xff]  ;;  %v17377_v51 = vmax.f32 %v2832_v4, 0.0 }
 0x34d   : > { %v2372_v54 = vadd.f32 %v17143_v44, %v21786_v47  ;;  %3557 = vmax.xlane.f32.xlu1 %v3078_v27  ;;  %3563 = vmax.xlane.f32.xlu0 %v3081_v29  ;;  %v2647_v44 = vadd.f32 %v17155_v50, %v21789_v40  ;;  %v21790_v47 = vld [vmem:[#allocation19_spill] sm:$0xff]  ;;  %v21792_v25 = vld [vmem:[#allocation62_spill] sm:$0xff]  ;;  %v21793_v35 = vld [vmem:[#allocation65_spill] sm:$0xff]  ;;  %v17379_v9 = vmax.f32 %v2762_v16, 0.0  ;;  %v2833_v27 = vmax.f32 %v2631_v43, 0.0 }
 0x34e   : > { %v2367_v3 = vadd.f32 %v21791_v60, %v21790_v47  ;;  %v2639_v10 = vadd.f32 %v21793_v35, %v21792_v25  ;;  %v17373_v45 = vpop.f32.mrb[64].mxu0  ;;  %v17375_v23 = vpop.f32.mrb[72].mxu1  ;;  %v17385_v50 = vmax.f32 %v2830_v1, 0.0  ;;  %v2763_v55 = vmax.f32 %v2351_v39, 0.0  ;;  %v21798_v16 = vld [vmem:[#allocation26_spill] sm:$0xff] }
 0x34f   : > { %21794 = vst [vmem:[#allocation11_spill] sm:$0xff] %v17375_v23  ;;  %v17381_v5 = vpop.f32.mrb[65].mxu0  ;;  %v17383_v29 = vpop.f32.mrb[73].mxu1  ;;  %v2831_v40 = vmax.f32 %v2623_v52, 0.0  ;;  %v2768_v47 = vmax.f32 %v2372_v54, 0.0  ;;  %v2836_v25 = vmax.f32 %v2644_v63, 0.0  ;;  %v2388_v2 = vadd.f32 %v17169_v28, %v21798_v16 }
 0x350   : > { %21795 = vst [vmem:[#allocation55_spill] sm:$0xff] %v17381_v5  ;;  %21796 = vst [vmem:[#allocation18_spill] sm:$0xff] %v17385_v50  ;;  %v17387_v35 = vpop.f32.mrb[66].mxu0  ;;  %v17389_v60 = vpop.f32.mrb[74].mxu1  ;;  %v2766_v4 = vmax.f32 %v2364_v22, 0.0  ;;  %v2834_v23 = vmax.f32 %v2636_v32, 0.0  ;;  %v2660_v22 = vadd.f32 %v17171_v20, %v17195_v37 }
 0x351   : > { %21797 = vst [vmem:[#allocation61_spill] sm:$0xff] %v17387_v35  ;;  %v17393_v43 = vpop.f32.mrb[67].mxu0  ;;  %v17395_v5 = vpop.f32.mrb[75].mxu1  ;;  %3433 = vmax.xlane.f32.xlu1 %v3016_v17  ;;  %3423 = vmax.xlane.f32.xlu0 %v3011_v13  ;;  %v2769_v39 = vmax.f32 %v2375_v53, 0.0  ;;  %v2837_v52 = vmax.f32 %v2647_v44, 0.0  ;;  %v2767_v54 = vmax.f32 %v2367_v3, 0.0  ;;  %v2652_v53 = vadd.f32 %v17179_v24, %v17167_v56 }
 0x352   : > { %v17397_v1 = vpop.permute.xlu0 %1753  ;;  %v2835_v35 = vmax.f32 %v2639_v10, 0.0  ;;  %v17399_v50 = vmax.f32 %v2765_v19, 0.0  ;;  %v17401_v63 = vmax.f32 %v2833_v27, 0.0  ;;  %v21799_v28 = vld [vmem:[#allocation24_spill] sm:$0xff]  ;;  %v17407_v16 = vmax.f32 %v2763_v55, 0.0  ;;  %v17423_v20 = vpop.permute.xlu1 %1758 }
 0x353   : > { %v2380_v32 = vadd.f32 %v17177_v36, %v21799_v28  ;;  %v17409_v17 = vmax.f32 %v2831_v40, 0.0  ;;  %v17411_v13 = vmax.f32 %v2768_v47, 0.0  ;;  %v17415_v44 = vmax.f32 %v2836_v25, 0.0  ;;  %v21807_v40 = vld [vmem:[#allocation25_spill] sm:$0xff] }
 0x354   : > { %v17417_v3 = vmax.f32 %v2766_v4, 0.0  ;;  %v17419_v10 = vmax.f32 %v2834_v23, 0.0  ;;  %v2772_v19 = vmax.f32 %v2388_v2, 0.0  ;;  %v17425_v36 = vmax.f32 %v2769_v39, 0.0  ;;  %v21809_v39 = vld [vmem:[#allocation23_spill] sm:$0xff]  ;;  %v21812_v28 = vld [vmem:[#allocation69_spill] sm:$0xff] }
 0x355   : > { %21800 = vst [vmem:[#allocation16_spill] sm:$0xff] %v17409_v17  ;;  %3569 = vmax.xlane.f32.xlu1 %v17325_v48  ;;  %3559 = vmax.xlane.f32.xlu0 %v17317_v7  ;;  %v17427_v37 = vmax.f32 %v2837_v52, 0.0  ;;  %v17429_v27 = vmax.f32 %v2767_v54, 0.0  ;;  %v17431_v56 = vmax.f32 %v2835_v35, 0.0  ;;  %v2840_v55 = vmax.f32 %v2660_v22, 0.0  ;;  %v21808_v48 = vld [vmem:[#allocation67_spill] sm:$0xff] }
 0x356   : > { %21801 = vst [vmem:[#allocation59_spill] sm:$0xff] %v17417_v3  ;;  %21802 = vst [vmem:[#allocation17_spill] sm:$0xff] %v17419_v10  ;;  %v17433_v24 = vpop.f32.mrb[68].mxu0  ;;  %v2770_v23 = vmax.f32 %v2380_v32, 0.0  ;;  %v2391_v47 = vadd.f32 %v17181_v61, %v21807_v40  ;;  %v2663_v7 = vadd.f32 %v21808_v48, %v17193_v31  ;;  %v17441_v4 = vpop.permute.xlu0 %1763  ;;  %v2838_v2 = vmax.f32 %v2652_v53, 0.0  ;;  %v21810_v52 = vld [vmem:[#allocation68_spill] sm:$0xff] }
 0x357   : > { %21803 = vst [vmem:[#allocation60_spill] sm:$0xff] %v17425_v36  ;;  %21804 = vst [vmem:[#allocation15_spill] sm:$0xff] %v17427_v37  ;;  %v17439_v25 = vpop.f32.mrb[69].mxu0  ;;  %v2383_v54 = vadd.f32 %v21810_v52, %v21809_v39  ;;  %v21811_v35 = vld [vmem:[#allocation66_spill] sm:$0xff]  ;;  %v21814_v22 = vld [vmem:[#allocation52_spill] sm:$0xff]  ;;  %v17451_v61 = vmax.f32 %v2772_v19, 0.0 }
 0x358   : > { %21805 = vst [vmem:[#allocation58_spill] sm:$0xff] %v17429_v27  ;;  %21806 = vst [vmem:[#allocation22_spill] sm:$0xff] %v17431_v56  ;;  %v2655_v56 = vadd.f32 %v21812_v28, %v21811_v35  ;;  %v21813_v27 = vld [vmem:[#allocation30_spill] sm:$0xff]  ;;  %v17449_v37 = vpop.f32.mrb[70].mxu0  ;;  %v21817_v48 = vld [vmem:[#allocation28_spill] sm:$0xff] }
 0x359   : > { %v2404_v32 = vadd.f32 %v21814_v22, %v21813_v27  ;;  %21815 = vst [vmem:[#allocation20_spill] sm:$0xff] %v17451_v61  ;;  %v21816_v31 = vld [vmem:[#allocation6_spill] sm:$0xff]  ;;  %v2396_v10 = vadd.f32 %v17208_v6, %v21817_v48  ;;  %v17459_v39 = vpop.f32.mrb[71].mxu0  ;;  %3429 = vmax.xlane.f32.xlu1 %v17327_v42  ;;  %3435 = vmax.xlane.f32.xlu0 %v17335_v62  ;;  %v21819_v27 = vld [vmem:[#allocation29_spill] sm:$0xff]  ;;  %v21820_v52 = vld [vmem:[#allocation71_spill] sm:$0xff]  ;;  %v2773_v48 = vmax.f32 %v2391_v47, 0.0 }
 0x35a   : > { %v2676_v40 = vadd.f32 %v21816_v31, %v17301_v21  ;;  %v21818_v53 = vld [vmem:[#allocation10_spill] sm:$0xff]  ;;  %v2407_v35 = vadd.f32 %v21820_v52, %v21819_v27  ;;  %v21821_v19 = vld [vmem:[#allocation72_spill] sm:$0xff]  ;;  %v21822_v22 = vld [vmem:[#allocation27_spill] sm:$0xff]  ;;  %v2671_v6 = vadd.f32 %v17220_v41, %v17240_v49  ;;  %v17471_v31 = vmax.f32 %v2840_v55, 0.0  ;;  %v1774_v41 = vpop.permute.xlu0 %1773 }
 0x35b   : > { %v2668_v36 = vadd.f32 %v21818_v53, %v17242_v33  ;;  %v2679_v28 = vadd.f32 %v21821_v19, %v17299_v8  ;;  %v2399_v21 = vadd.f32 %v17218_v59, %v21822_v22  ;;  %v17473_v33 = vmax.f32 %v2770_v23, 0.0  ;;  %v1769_v53 = vpop.permute.xlu1 %1768  ;;  %v21823_v17 = vld [vmem:[#allocation34_spill] sm:$0xff] }
 0x35c   : > { %v2841_v42 = vmax.f32 %v2663_v7, 0.0  ;;  %v17475_v62 = vmax.f32 %v2838_v2, 0.0  ;;  %v2771_v61 = vmax.f32 %v2383_v54, 0.0  ;;  %v2839_v27 = vmax.f32 %v2655_v56, 0.0  ;;  %v21825_v54 = vld [vmem:[#allocation32_spill] sm:$0xff] }
 0x35d   : > { %v2776_v52 = vmax.f32 %v2404_v32, 0.0  ;;  %v2844_v3 = vmax.f32 %v2676_v40, 0.0  ;;  %v2774_v8 = vmax.f32 %v2396_v10, 0.0  ;;  %v2842_v19 = vmax.f32 %v2668_v36, 0.0  ;;  %3565 = vmax.xlane.f32.xlu1 %v17329_v34  ;;  %3571 = vmax.xlane.f32.xlu0 %v17337_v30  ;;  %v21824_v10 = vld [vmem:[#allocation78_spill] sm:$0xff] }
 0x35e   : > { %v2420_v59 = vadd.f32 %v17253_v26, %v21823_v17  ;;  %v2777_v49 = vmax.f32 %v2407_v35, 0.0  ;;  %v2845_v55 = vmax.f32 %v2679_v28, 0.0  ;;  %v2775_v23 = vmax.f32 %v2399_v21, 0.0  ;;  %v17481_v7 = vpop.f32.mrb[72].mxu0  ;;  %v21826_v26 = vld [vmem:[#allocation9_spill] sm:$0xff]  ;;  %v21827_v35 = vld [vmem:[#allocation54_spill] sm:$0xff] }
 0x35f   : > { %v2843_v47 = vmax.f32 %v2671_v6, 0.0  ;;  %v17483_v2 = vmax.f32 %v2773_v48, 0.0  ;;  %v17485_v56 = vmax.f32 %v2841_v42, 0.0  ;;  %v2692_v36 = vadd.f32 %v21824_v10, %v17397_v1  ;;  %v17491_v34 = vpop.f32.mrb[73].mxu0 }
 0x360   : > { %v2412_v17 = vadd.f32 %v21826_v26, %v21825_v54  ;;  %v17493_v30 = vmax.f32 %v2771_v61, 0.0  ;;  %v17495_v32 = vmax.f32 %v2839_v27, 0.0  ;;  %v17497_v40 = vmax.f32 %v2776_v52, 0.0  ;;  %v17501_v22 = vpop.f32.mrb[74].mxu0  ;;  %v1779_v61 = vpop.permute.xlu1 %1778  ;;  %v21833_v54 = vld [vmem:[#allocation7_spill] sm:$0xff]  ;;  %v21834_v26 = vld [vmem:[#allocation53_spill] sm:$0xff] }
 0x361   : > { %v2684_v28 = vadd.f32 %v21827_v35, %v17347_v57  ;;  %v17503_v21 = vmax.f32 %v2844_v3, 0.0  ;;  %v17505_v6 = vmax.f32 %v2774_v8, 0.0  ;;  %v17507_v1 = vmax.f32 %v2842_v19, 0.0  ;;  %v17509_v42 = vpop.f32.mrb[75].mxu0  ;;  %3441 = vmax.xlane.f32.xlu1 %v17357_v0  ;;  %3431 = vmax.xlane.f32.xlu0 %v17339_v58  ;;  %v21832_v19 = vld [vmem:[#allocation33_spill] sm:$0xff]  ;;  %v1784_v0 = vpop.permute.xlu0 %1783  ;;  %v21835_v58 = vld [vmem:[#allocation31_spill] sm:$0xff] }
 0x362   : > { %v2780_v48 = vmax.f32 %v2420_v59, 0.0  ;;  %v17513_v27 = vmax.f32 %v2777_v49, 0.0  ;;  %v17515_v52 = vmax.f32 %v2845_v55, 0.0  ;;  %v17517_v57 = vmax.f32 %v2775_v23, 0.0  ;;  %v21837_v55 = vld [vmem:[#allocation12_spill] sm:$0xff]  ;;  %v21838_v23 = vld [vmem:[#allocation38_spill] sm:$0xff] }
 0x363   : > { %21828 = vst [vmem:[#allocation21_spill] sm:$0xff] %v17505_v6  ;;  %21829 = vst [vmem:[#allocation63_spill] sm:$0xff] %v17507_v1  ;;  %v17519_v3 = vmax.f32 %v2843_v47, 0.0  ;;  %v2848_v8 = vmax.f32 %v2692_v36, 0.0  ;;  %v2778_v10 = vmax.f32 %v2412_v17, 0.0  ;;  %v2423_v59 = vadd.f32 %v21833_v54, %v21832_v19  ;;  %v21836_v6 = vld [vmem:[#allocation14_spill] sm:$0xff] }
 0x364   : > { %21830 = vst [vmem:[#allocation19_spill] sm:$0xff] %v17515_v52  ;;  %v2695_v35 = vadd.f32 %v21834_v26, %v17423_v20  ;;  %v2846_v1 = vmax.f32 %v2684_v28, 0.0  ;;  %v2415_v49 = vadd.f32 %v21836_v6, %v21835_v58  ;;  %v2687_v52 = vadd.f32 %v21837_v55, %v17355_v18  ;;  %v21839_v17 = vld [vmem:[#allocation36_spill] sm:$0xff]  ;;  %v21840_v28 = vld [vmem:[#allocation37_spill] sm:$0xff] }
 0x365   : > { %21831 = vst [vmem:[#allocation64_spill] sm:$0xff] %v17519_v3  ;;  %v2436_v47 = vadd.f32 %v17305_v38, %v21838_v23  ;;  %v17531_v3 = vmax.f32 %v2780_v48, 0.0  ;;  %v2708_v36 = vadd.f32 %v17307_v12, %v1774_v41  ;;  %v2428_v19 = vadd.f32 %v17313_v15, %v21839_v17  ;;  %3577 = vmax.xlane.f32.xlu1 %v17377_v51  ;;  %v21841_v6 = vld [vmem:[#allocation56_spill] sm:$0xff]  ;;  %v21842_v38 = vld [vmem:[#allocation35_spill] sm:$0xff]  ;;  %v21843_v48 = vld [vmem:[#allocation13_spill] sm:$0xff] }
 0x366   : > { %v2700_v20 = vadd.f32 %v17315_v46, %v17441_v4  ;;  %3567 = vmax.xlane.f32.xlu0 %v17341_v11  ;;  %v2439_v18 = vadd.f32 %v17321_v14, %v21840_v28  ;;  %v2711_v54 = vadd.f32 %v21841_v6, %v1779_v61  ;;  %v2431_v26 = vadd.f32 %v21843_v48, %v21842_v38  ;;  %v21844_v58 = vld [vmem:[#allocation57_spill] sm:$0xff]  ;;  %v1789_v4 = vpop.permute.xlu1 %1788  ;;  %v21845_v6 = vld [vmem:[#allocation42_spill] sm:$0xff] }
 0x367   : > { %v2703_v12 = vadd.f32 %v21844_v58, %v1769_v53  ;;  %v17546_v41 = vmax.f32 %v2848_v8, 0.0  ;;  %v17548_v15 = vmax.f32 %v2778_v10, 0.0  ;;  %v2781_v55 = vmax.f32 %v2423_v59, 0.0  ;;  %v1794_v53 = vpop.permute.xlu0 %1793 }
 0x368   : > { %v2849_v46 = vmax.f32 %v2695_v35, 0.0  ;;  %v17550_v51 = vmax.f32 %v2846_v1, 0.0  ;;  %v2779_v11 = vmax.f32 %v2415_v49, 0.0  ;;  %v2847_v23 = vmax.f32 %v2687_v52, 0.0  ;;  %v21846_v52 = vld [vmem:[#allocation11_spill] sm:$0xff] }
 0x369   : > { %v2784_v17 = vmax.f32 %v2436_v47, 0.0  ;;  %v2852_v14 = vmax.f32 %v2708_v36, 0.0  ;;  %v2782_v28 = vmax.f32 %v2428_v19, 0.0  ;;  %v2850_v61 = vmax.f32 %v2700_v20, 0.0  ;;  %3437 = vmax.xlane.f32.xlu1 %v17379_v9  ;;  %v21847_v36 = vld [vmem:[#allocation40_spill] sm:$0xff]  ;;  %v21848_v19 = vld [vmem:[#allocation55_spill] sm:$0xff] }
 0x36a   : > { %v2452_v38 = vadd.f32 %v17373_v45, %v21845_v6  ;;  %3443 = vmax.xlane.f32.xlu0 %v17399_v50  ;;  %v2785_v8 = vmax.f32 %v2439_v18, 0.0  ;;  %v2853_v10 = vmax.f32 %v2711_v54, 0.0  ;;  %v2783_v59 = vmax.f32 %v2431_v26, 0.0 }
 0x36b   : > { %v2851_v35 = vmax.f32 %v2703_v12, 0.0  ;;  %v17556_v1 = vmax.f32 %v2781_v55, 0.0  ;;  %v17558_v49 = vmax.f32 %v2849_v46, 0.0  ;;  %v2724_v47 = vadd.f32 %v21846_v52, %v1794_v53  ;;  %v21853_v12 = vld [vmem:[#allocation18_spill] sm:$0xff]  ;;  %v1799_v55 = vpop.permute.xlu1 %1798  ;;  %v21863_v52 = vld [vmem:[#allocation44_spill] sm:$0xff] }
 0x36c   : > { %v17563_v20 = vadd.f32 %v21848_v19, %v21847_v36  ;;  %v17565_v45 = vmax.f32 %v2779_v11, 0.0  ;;  %v17567_v9 = vmax.f32 %v2847_v23, 0.0  ;;  %v17569_v50 = vmax.f32 %v2784_v17, 0.0  ;;  %v21865_v19 = vld [vmem:[#allocation43_spill] sm:$0xff]  ;;  %v21884_v17 = vld [vmem:[#allocation16_spill] sm:$0xff] }
 0x36d   : > { %v17572_v18 = vadd.f32 %v17383_v29, %v1784_v0  ;;  %v17574_v54 = vmax.f32 %v2852_v14, 0.0  ;;  %v17576_v48 = vmax.f32 %v2782_v28, 0.0  ;;  %v17578_v26 = vmax.f32 %v2850_v61, 0.0  ;;  %3573 = vmax.xlane.f32.xlu1 %v21853_v12  ;;  %v21858_v14 = vld [vmem:[#allocation41_spill] sm:$0xff]  ;;  %v21873_v12 = vld [vmem:[#allocation47_spill] sm:$0xff] }
 0x36e   : > { %21849 = vst [vmem:[#allocation62_spill] sm:$0xff] %v17567_v9  ;;  %v2788_v58 = vmax.f32 %v2452_v38, 0.0  ;;  %3579 = vmax.xlane.f32.xlu0 %v17401_v63  ;;  %v17582_v46 = vmax.f32 %v2785_v8, 0.0  ;;  %v17584_v11 = vmax.f32 %v2853_v10, 0.0  ;;  %v17586_v23 = vmax.f32 %v2783_v59, 0.0  ;;  %v21859_v28 = vld [vmem:[#allocation61_spill] sm:$0xff] }
 0x36f   : > { %21850 = vst [vmem:[#allocation65_spill] sm:$0xff] %v17574_v54  ;;  %21851 = vst [vmem:[#allocation26_spill] sm:$0xff] %v17576_v48  ;;  %v17588_v29 = vmax.f32 %v2851_v35, 0.0  ;;  %v2856_v0 = vmax.f32 %v2724_v47, 0.0  ;;  %v17593_v61 = vadd.f32 %v21859_v28, %v21858_v14  ;;  %v17596_v6 = vadd.f32 %v17389_v60, %v1799_v55  ;;  %v21860_v38 = vld [vmem:[#allocation39_spill] sm:$0xff]  ;;  %v21861_v10 = vld [vmem:[#allocation46_spill] sm:$0xff] }
 0x370   : > { %21852 = vst [vmem:[#allocation24_spill] sm:$0xff] %v17578_v26  ;;  %21854 = vst [vmem:[#allocation25_spill] sm:$0xff] %v17582_v46  ;;  %v17601_v53 = vadd.f32 %v17393_v43, %v21860_v38  ;;  %v17604_v8 = vadd.f32 %v17395_v5, %v1789_v4  ;;  %v17608_v59 = vadd.f32 %v17433_v24, %v21861_v10  ;;  %v17610_v35 = vmax.f32 %v2788_v58, 0.0  ;;  %v21864_v60 = vld [vmem:[#allocation45_spill] sm:$0xff]  ;;  %v21867_v5 = vld [vmem:[#allocation50_spill] sm:$0xff] }
 0x371   : > { %21855 = vst [vmem:[#allocation67_spill] sm:$0xff] %v17584_v11  ;;  %21856 = vst [vmem:[#allocation23_spill] sm:$0xff] %v17586_v23  ;;  %v17614_v47 = vadd.f32 %v17439_v25, %v21863_v52  ;;  %v17618_v36 = vadd.f32 %v17449_v37, %v21864_v60  ;;  %v17622_v43 = vadd.f32 %v17459_v39, %v21865_v19  ;;  %3449 = vmax.xlane.f32.xlu1 %v17411_v13  ;;  %v21869_v4 = vld [vmem:[#allocation48_spill] sm:$0xff]  ;;  %v21871_v58 = vld [vmem:[#allocation49_spill] sm:$0xff] }
 0x372   : > { %21857 = vst [vmem:[#allocation68_spill] sm:$0xff] %v17588_v29  ;;  %21862 = vst [vmem:[#allocation66_spill] sm:$0xff] %v17610_v35  ;;  %3439 = vmax.xlane.f32.xlu0 %v17407_v16  ;;  %v17628_v24 = vadd.f32 %v17481_v7, %v21867_v5  ;;  %v17632_v25 = vadd.f32 %v17491_v34, %v21869_v4  ;;  %v17636_v37 = vadd.f32 %v17501_v22, %v21871_v58  ;;  %v17642_v55 = vpop.xlane.xlu1 %3513  ;;  %v3378_v13 = vpop.xlane.xlu0 %3377  ;;  %v21875_v16 = vld [vmem:[#allocation51_spill] sm:$0xff]  ;;  %v21876_v28 = vld [vmem:[#allocation8_spill] sm:$0xff] }
 0x373   : > { %21866 = vst [vmem:[#allocation69_spill] sm:$0xff] %v17622_v43  ;;  %v17640_v39 = vadd.f32 %v17509_v42, %v21873_v12  ;;  %v3824_v14 = vrot.slane %v3378_v13, %v21875_v16  ;;  %v3828_v7 = vrot.slane %v3378_v13, %v21876_v28  ;;  %v21877_v38 = vld [vmem:[#allocation73_spill] sm:$0xff]  ;;  %v21878_v52 = vld [vmem:[#allocation74_spill] sm:$0xff]  ;;  %v21879_v60 = vld [vmem:[#allocation75_spill] sm:$0xff]  ;;  %v17652_v12 = vmax.f32 %v2856_v0, 0.0 }
 0x374   : > { %21868 = vst [vmem:[#allocation30_spill] sm:$0xff] %v17628_v24  ;;  %21870 = vst [vmem:[#allocation52_spill] sm:$0xff] %v17632_v25  ;;  %v3832_v10 = vrot.slane %v3378_v13, %v21877_v38  ;;  %v3836_v34 = vrot.slane %v3378_v13, %v21878_v52  ;;  %v3840_v19 = vrot.slane %v3378_v13, %v21879_v60  ;;  %v21880_v5 = vld [vmem:[#allocation76_spill] sm:$0xff]  ;;  %v21881_v4 = vld [vmem:[#allocation77_spill] sm:$0xff] }
 0x375   : > { %21872 = vst [vmem:[#allocation6_spill] sm:$0xff] %v17636_v37  ;;  %21874 = vst [vmem:[#allocation28_spill] sm:$0xff] %v17640_v39  ;;  %v3844_v22 = vrot.slane %v3378_v13, %v21880_v5  ;;  %v3848_v58 = vrot.slane %v3378_v13, %v21881_v4  ;;  %v21882_v63 = vld [vmem:[#allocation79_spill] sm:$0xff]  ;;  %3585 = vmax.xlane.f32.xlu1 %v17415_v44  ;;  %v7951_v39 = vcombine.low %v3824_v14, %v3828_v7  ;;  %v21885_v0 = vld [vmem:[#allocation80_spill] sm:$0xff] }
 0x376   : > { %v3852_v42 = vrot.slane %v3378_v13, %v21882_v63  ;;  %21883 = vst [vmem:[#allocation10_spill] sm:$0xff] %v17652_v12  ;;  %3575 = vmax.xlane.f32.xlu0 %v21884_v17  ;;  %v7952_v37 = vcombine.low %v3832_v10, %v3836_v34  ;;  %v3374_v25 = vpop.xlane.xlu0 %3373  ;;  %v17679_v48 = vpop.xlane.xlu1 %3509  ;;  %v21888_v9 = vld [vmem:[#allocation17_spill] sm:$0xff] }
 0x377   : > { %v7953_v23 = vcombine.low %v3840_v19, %v3844_v22  ;;  %v7961_v12 = vrot.slane %v7951_v39, %v21885_v0  ;;  %v3760_v17 = vrot.slane %v3374_v25, %v21875_v16  ;;  %v3764_v14 = vrot.slane %v3374_v25, %v21876_v28 }
 0x378   : > { %v7954_v35 = vcombine.low %v3848_v58, %v3852_v42  ;;  %v7968_v44 = vrot.slane %v7952_v37, %v21885_v0  ;;  %v3768_v34 = vrot.slane %v3374_v25, %v21877_v38  ;;  %v3772_v19 = vrot.slane %v3374_v25, %v21878_v52  ;;  %v21886_v58 = vld [vmem:[#allocation59_spill] sm:$0xff]  ;;  %v21887_v42 = vld [vmem:[#allocation60_spill] sm:$0xff] }
 0x379   : > { %v7975_v7 = vrot.slane %v7953_v23, %v21885_v0  ;;  %3445 = vmax.xlane.f32.xlu1 %v21886_v58  ;;  %v3776_v37 = vrot.slane %v3374_v25, %v21879_v60  ;;  %v3780_v13 = vrot.slane %v3374_v25, %v21880_v5  ;;  %v3784_v23 = vrot.slane %v3374_v25, %v21881_v4 }
 0x37a   : > { %v7982_v10 = vrot.slane %v7954_v35, %v21885_v0  ;;  %3451 = vmax.xlane.f32.xlu0 %v21887_v42  ;;  %v7983_v39 = vcombine.low %v7961_v12, %v7968_v44  ;;  %v3380_v29 = vpop.xlane.xlu0 %3379  ;;  %v3788_v35 = vrot.slane %v3374_v25, %v21882_v63  ;;  %v7853_v11 = vcombine.low %v3760_v17, %v3764_v14  ;;  %v21889_v25 = vld [vmem:[#allocation15_spill] sm:$0xff]  ;;  %v17706_v43 = vpop.xlane.xlu1 %3375 }
 0x37b   : > { %v7854_v46 = vcombine.low %v3768_v34, %v3772_v19  ;;  %v7855_v22 = vcombine.low %v3776_v37, %v3780_v13  ;;  %v3856_v58 = vrot.slane %v3380_v29, %v21875_v16  ;;  %v3864_v14 = vrot.slane %v3380_v29, %v21877_v38 }
 0x37c   : > { %v7984_v24 = vcombine.low %v7975_v7, %v7982_v10  ;;  %v7991_v26 = vrot.slane %v7983_v39, %v21885_v0  ;;  %v7856_v44 = vcombine.low %v3784_v23, %v3788_v35  ;;  %v7863_v42 = vrot.slane %v7853_v11, %v21885_v0 }
 0x37d   : > { %v3860_v7 = vrot.slane %v3380_v29, %v21876_v28  ;;  %3581 = vmax.xlane.f32.xlu1 %v21888_v9  ;;  %v7870_v17 = vrot.slane %v7854_v46, %v21885_v0  ;;  %v7877_v13 = vrot.slane %v7855_v22, %v21885_v0  ;;  %v3868_v11 = vrot.slane %v3380_v29, %v21878_v52 }
 0x37e   : > { %v7998_v12 = vrot.slane %v7984_v24, %v21885_v0  ;;  %3587 = vmax.xlane.f32.xlu0 %v21889_v25  ;;  %v3516_v34 = vpop.xlane.xlu0 %3515  ;;  %v7884_v24 = vrot.slane %v7856_v44, %v21885_v0  ;;  %v3872_v39 = vrot.slane %v3380_v29, %v21879_v60  ;;  %v3876_v9 = vrot.slane %v3380_v29, %v21880_v5  ;;  %v21892_v44 = vld [vmem:[#allocation20_spill] sm:$0xff] }
 0x37f   : > { %v7885_v37 = vcombine.low %v7863_v42, %v7870_v17  ;;  %v3880_v23 = vrot.slane %v3380_v29, %v21881_v4  ;;  %v3884_v46 = vrot.slane %v3380_v29, %v21882_v63  ;;  %v8000_v22 = vcombine.low %v3856_v58, %v3860_v7 }
 0x380   : > { %v17690_v19 = vcombine.low %v7991_v26, %v7998_v12  ;;  %v7886_v35 = vcombine.low %v7877_v13, %v7884_v24  ;;  %v8001_v25 = vcombine.low %v3864_v14, %v3868_v11  ;;  %v6032_v10 = vrot.slane %v3516_v34, %v21875_v16 }
 0x381   : > { %v21891_v26 = vmax.f32 %v17563_v20, 0.0  ;;  %3457 = vmax.xlane.f32.xlu1 %v21892_v44  ;;  %v7893_v42 = vrot.slane %v7885_v37, %v21885_v0  ;;  %v8002_v17 = vcombine.low %v3872_v39, %v3876_v9  ;;  %v8003_v54 = vcombine.low %v3880_v23, %v3884_v46 }
 0x382   : > { %21890 = vst [vmem:[#allocation29_spill] sm:$0xff] %v17690_v19  ;;  %v21893_v19 = vld [vmem:[#allocation58_spill] sm:$0xff]  ;;  %v7900_v29 = vrot.slane %v7886_v35, %v21885_v0  ;;  %v8010_v58 = vrot.slane %v8000_v22, %v21885_v0  ;;  %v8017_v7 = vrot.slane %v8001_v25, %v21885_v0  ;;  %v6036_v20 = vrot.slane %v3516_v34, %v21876_v28 }
 0x383   : > { %v17701_v12 = vmax.f32 %v21891_v26, 0.0  ;;  %3447 = vmax.xlane.f32.xlu0 %v21893_v19  ;;  %v8024_v13 = vrot.slane %v8002_v17, %v21885_v0  ;;  %v8031_v14 = vrot.slane %v8003_v54, %v21885_v0  ;;  %v6040_v19 = vrot.slane %v3516_v34, %v21877_v38  ;;  %v21895_v35 = vld [vmem:[#allocation22_spill] sm:$0xff] }
 0x384   : > { %v6044_v24 = vrot.slane %v3516_v34, %v21878_v52  ;;  %v17716_v11 = vcombine.low %v7893_v42, %v7900_v29  ;;  %v8032_v39 = vcombine.low %v8010_v58, %v8017_v7  ;;  %v6048_v37 = vrot.slane %v3516_v34, %v21879_v60  ;;  %v17734_v7 = vpop.xlane.xlu1 %3385 }
 0x385   : > { %v6052_v9 = vrot.slane %v3516_v34, %v21880_v5  ;;  %v21894_v23 = vmax.f32 %v17572_v18, 0.0  ;;  %3593 = vmax.xlane.f32.xlu1 %v17471_v31  ;;  %v8033_v54 = vcombine.low %v8024_v13, %v8031_v14  ;;  %v6056_v22 = vrot.slane %v3516_v34, %v21881_v4  ;;  %v3512_v13 = vpop.xlane.xlu0 %3511 }
 0x386   : > { %v6060_v25 = vrot.slane %v3516_v34, %v21882_v63  ;;  %v8040_v26 = vrot.slane %v8032_v39, %v21885_v0  ;;  %v11332_v44 = vcombine.low %v6032_v10, %v6036_v20  ;;  %v11333_v42 = vcombine.low %v6040_v19, %v6044_v24 }
 0x387   : > { %v17722_v46 = vmax.f32 %v21894_v23, 0.0  ;;  %3583 = vmax.xlane.f32.xlu0 %v21895_v35  ;;  %v11334_v17 = vcombine.low %v6048_v37, %v6052_v9  ;;  %v8047_v29 = vrot.slane %v8033_v54, %v21885_v0  ;;  %v6012_v18 = vrot.slane %v17642_v55, %v21878_v52 }
 0x388   : > { %v11335_v58 = vcombine.low %v6056_v22, %v6060_v25  ;;  %v6016_v31 = vrot.slane %v17642_v55, %v21879_v60  ;;  %v11342_v14 = vrot.slane %v11332_v44, %v21885_v0  ;;  %v11349_v34 = vrot.slane %v11333_v42, %v21885_v0 }
 0x389   : > { %v11356_v10 = vrot.slane %v11334_v17, %v21885_v0  ;;  %v6020_v20 = vrot.slane %v17642_v55, %v21880_v5  ;;  %v2787_v19 = vmax.f32 %v17601_v53, 0.0  ;;  %3453 = vmax.xlane.f32.xlu1 %v17473_v33  ;;  %v17744_v24 = vcombine.low %v8040_v26, %v8047_v29 }
 0x38a   : > { %v11363_v39 = vrot.slane %v11335_v58, %v21885_v0  ;;  %v6024_v37 = vrot.slane %v17642_v55, %v21881_v4  ;;  %v11364_v9 = vcombine.low %v11342_v14, %v11349_v34  ;;  %v6028_v23 = vrot.slane %v17642_v55, %v21882_v63 }
 0x38b   : > { %3459 = vmax.xlane.f32.xlu0 %v17483_v2  ;;  %v21896_v35 = vrot.slane %v17642_v55, %v21876_v28  ;;  %v21897_v54 = vrot.slane %v17642_v55, %v21875_v16  ;;  %v21898_v2 = vrot.slane %v17642_v55, %v21877_v38  ;;  %v11285_v26 = vcombine.low %v6016_v31, %v6020_v20 }
 0x38c   : > { %v11365_v25 = vcombine.low %v11356_v10, %v11363_v39  ;;  %v5968_v44 = vrot.slane %v3512_v13, %v21875_v16  ;;  %v5972_v42 = vrot.slane %v3512_v13, %v21876_v28  ;;  %v11372_v17 = vrot.slane %v11364_v9, %v21885_v0  ;;  %v17771_v10 = vpop.xlane.xlu1 %3521 }
 0x38d   : > { %v11283_v33 = vcombine.low %v21897_v54, %v21896_v35  ;;  %v11284_v22 = vcombine.low %v21898_v2, %v6012_v18  ;;  %v11286_v29 = vcombine.low %v6024_v37, %v6028_v23  ;;  %v2855_v34 = vmax.f32 %v17604_v8, 0.0  ;;  %3589 = vmax.xlane.f32.xlu1 %v17475_v62 }
 0x38e   : > { %v11379_v55 = vrot.slane %v11365_v25, %v21885_v0  ;;  %v11307_v18 = vrot.slane %v11285_v26, %v21885_v0  ;;  %v5976_v31 = vrot.slane %v3512_v13, %v21877_v38  ;;  %v5980_v37 = vrot.slane %v3512_v13, %v21878_v52 }
 0x38f   : > { %v11293_v58 = vrot.slane %v11283_v33, %v21885_v0  ;;  %v11300_v14 = vrot.slane %v11284_v22, %v21885_v0  ;;  %3595 = vmax.xlane.f32.xlu0 %v17485_v56  ;;  %v11314_v20 = vrot.slane %v11286_v29, %v21885_v0  ;;  %v5984_v9 = vrot.slane %v3512_v13, %v21879_v60 }
 0x390   : > { %v17776_v23 = vcombine.low %v11372_v17, %v11379_v55  ;;  %v5988_v62 = vrot.slane %v3512_v13, %v21880_v5  ;;  %v5992_v56 = vrot.slane %v3512_v13, %v21881_v4  ;;  %v5996_v35 = vrot.slane %v3512_v13, %v21882_v63 }
 0x391   : > { %v11315_v39 = vcombine.low %v11293_v58, %v11300_v14  ;;  %v11316_v54 = vcombine.low %v11307_v18, %v11314_v20  ;;  %v11234_v2 = vcombine.low %v5968_v44, %v5972_v42  ;;  %v11235_v22 = vcombine.low %v5976_v31, %v5980_v37  ;;  %3465 = vmax.xlane.f32.xlu1 %v17497_v40  ;;  %v17801_v18 = vpop.xlane.xlu1 %3381  ;;  %v3388_v31 = vpop.xlane.xlu0 %3387 }
 0x392   : > { %v21899_v25 = vmax.f32 %v17593_v61, 0.0  ;;  %v11236_v17 = vcombine.low %v5984_v9, %v5988_v62  ;;  %v11237_v29 = vcombine.low %v5992_v56, %v5996_v35  ;;  %v5936_v58 = vrot.slane %v17679_v48, %v21875_v16 }
 0x393   : > { %v11323_v33 = vrot.slane %v11315_v39, %v21885_v0  ;;  %3455 = vmax.xlane.f32.xlu0 %v17493_v30  ;;  %v11330_v13 = vrot.slane %v11316_v54, %v21885_v0  ;;  %v11244_v14 = vrot.slane %v11234_v2, %v21885_v0  ;;  %v11251_v44 = vrot.slane %v11235_v22, %v21885_v0 }
 0x394   : > { %v17784_v26 = vmax.f32 %v21899_v25, 0.0  ;;  %v5940_v61 = vrot.slane %v17679_v48, %v21876_v28  ;;  %v11258_v42 = vrot.slane %v11236_v17, %v21885_v0  ;;  %v11265_v40 = vrot.slane %v11237_v29, %v21885_v0 }
 0x395   : > { %v5944_v30 = vrot.slane %v17679_v48, %v21877_v38  ;;  %v5948_v55 = vrot.slane %v17679_v48, %v21878_v52  ;;  %v17803_v20 = vcombine.low %v11323_v33, %v11330_v13  ;;  %v11266_v39 = vcombine.low %v11244_v14, %v11251_v44  ;;  %3601 = vmax.xlane.f32.xlu1 %v17503_v21 }
 0x396   : > { %v5952_v37 = vrot.slane %v17679_v48, %v21879_v60  ;;  %v5956_v9 = vrot.slane %v17679_v48, %v21880_v5  ;;  %v21900_v62 = vmax.f32 %v17596_v6, 0.0  ;;  %v11267_v35 = vcombine.low %v11258_v42, %v11265_v40 }
 0x397   : > { %3591 = vmax.xlane.f32.xlu0 %v17495_v32  ;;  %v5960_v54 = vrot.slane %v17679_v48, %v21881_v4  ;;  %v5964_v33 = vrot.slane %v17679_v48, %v21882_v63  ;;  %v11274_v2 = vrot.slane %v11266_v39, %v21885_v0  ;;  %v11185_v22 = vcombine.low %v5936_v58, %v5940_v61  ;;  %v21901_v61 = vld [vmem:[#allocation21_spill] sm:$0xff] }
 0x398   : > { %v17811_v56 = vmax.f32 %v21900_v62, 0.0  ;;  %v11186_v25 = vcombine.low %v5944_v30, %v5948_v55  ;;  %v11187_v17 = vcombine.low %v5952_v37, %v5956_v9  ;;  %v11281_v6 = vrot.slane %v11267_v35, %v21885_v0  ;;  %v17837_v55 = vpop.xlane.xlu1 %3517 }
 0x399   : > { %v11188_v29 = vcombine.low %v5960_v54, %v5964_v33  ;;  %v3984_v13 = vrot.slane %v3388_v31, %v21875_v16  ;;  %v3988_v21 = vrot.slane %v3388_v31, %v21876_v28  ;;  %v11195_v32 = vrot.slane %v11185_v22, %v21885_v0  ;;  %3461 = vmax.xlane.f32.xlu1 %v21901_v61 }
 0x39a   : > { %v11202_v14 = vrot.slane %v11186_v25, %v21885_v0  ;;  %v11209_v44 = vrot.slane %v11187_v17, %v21885_v0  ;;  %v3992_v48 = vrot.slane %v3388_v31, %v21877_v38  ;;  %v17829_v58 = vmax.f32 %v2787_v19, 0.0  ;;  %v21902_v17 = vld [vmem:[#allocation63_spill] sm:$0xff] }
 0x39b   : > { %3467 = vmax.xlane.f32.xlu0 %v17513_v27  ;;  %v17833_v42 = vcombine.low %v11274_v2, %v11281_v6  ;;  %v11216_v40 = vrot.slane %v11188_v29, %v21885_v0  ;;  %v3996_v30 = vrot.slane %v3388_v31, %v21878_v52  ;;  %v4000_v37 = vrot.slane %v3388_v31, %v21879_v60  ;;  %v21903_v6 = vld [vmem:[#allocation19_spill] sm:$0xff] }
 0x39c   : > { %v11217_v39 = vcombine.low %v11195_v32, %v11202_v14  ;;  %v4004_v9 = vrot.slane %v3388_v31, %v21880_v5  ;;  %v4008_v53 = vrot.slane %v3388_v31, %v21881_v4  ;;  %v4012_v62 = vrot.slane %v3388_v31, %v21882_v63 }
 0x39d   : > { %v11218_v19 = vcombine.low %v11209_v44, %v11216_v40  ;;  %v8196_v35 = vcombine.low %v3984_v13, %v3988_v21  ;;  %v8197_v27 = vcombine.low %v3992_v48, %v3996_v30  ;;  %v3792_v2 = vrot.slane %v17706_v43, %v21875_v16  ;;  %3597 = vmax.xlane.f32.xlu1 %v21902_v17  ;;  %v17869_v30 = vpop.xlane.xlu1 %3393 }
 0x39e   : > { %v11225_v54 = vrot.slane %v11217_v39, %v21885_v0  ;;  %v8198_v33 = vcombine.low %v4000_v37, %v4004_v9  ;;  %v3796_v22 = vrot.slane %v17706_v43, %v21876_v28  ;;  %v17850_v25 = vmax.f32 %v2855_v34, 0.0  ;;  %v3524_v34 = vpop.xlane.xlu0 %3523 }
 0x39f   : > { %3603 = vmax.xlane.f32.xlu0 %v21903_v6  ;;  %v11232_v31 = vrot.slane %v11218_v19, %v21885_v0  ;;  %v8199_v29 = vcombine.low %v4008_v53, %v4012_v62  ;;  %v8206_v13 = vrot.slane %v8196_v35, %v21885_v0  ;;  %v8213_v21 = vrot.slane %v8197_v27, %v21885_v0 }
 0x3a0   : > { %v8220_v32 = vrot.slane %v8198_v33, %v21885_v0  ;;  %v3800_v14 = vrot.slane %v17706_v43, %v21877_v38  ;;  %v3804_v8 = vrot.slane %v17706_v43, %v21878_v52  ;;  %v3808_v61 = vrot.slane %v17706_v43, %v21879_v60 }
 0x3a1   : > { %v17862_v44 = vcombine.low %v11225_v54, %v11232_v31  ;;  %v8227_v48 = vrot.slane %v8199_v29, %v21885_v0  ;;  %v3812_v40 = vrot.slane %v17706_v43, %v21880_v5  ;;  %v8228_v39 = vcombine.low %v8206_v13, %v8213_v21  ;;  %3473 = vmax.xlane.f32.xlu1 %v17531_v3  ;;  %v21904_v21 = vld [vmem:[#allocation64_spill] sm:$0xff] }
 0x3a2   : > { %v3816_v37 = vrot.slane %v17706_v43, %v21881_v4  ;;  %v3820_v9 = vrot.slane %v17706_v43, %v21882_v63  ;;  %v7902_v53 = vcombine.low %v3792_v2, %v3796_v22  ;;  %v2792_v19 = vmax.f32 %v17608_v59, 0.0 }
 0x3a3   : > { %3463 = vmax.xlane.f32.xlu0 %v17517_v57  ;;  %v8229_v62 = vcombine.low %v8220_v32, %v8227_v48  ;;  %v7903_v35 = vcombine.low %v3800_v14, %v3804_v8  ;;  %v7904_v27 = vcombine.low %v3808_v61, %v3812_v40  ;;  %v8236_v54 = vrot.slane %v8228_v39, %v21885_v0  ;;  %v17895_v48 = vpop.xlane.xlu1 %3529 }
 0x3a4   : > { %v7905_v33 = vcombine.low %v3816_v37, %v3820_v9  ;;  %v7912_v17 = vrot.slane %v7902_v53, %v21885_v0  ;;  %v6160_v6 = vrot.slane %v3524_v34, %v21875_v16  ;;  %v6164_v3 = vrot.slane %v3524_v34, %v21876_v28 }
 0x3a5   : > { %v8243_v31 = vrot.slane %v8229_v62, %v21885_v0  ;;  %v7919_v43 = vrot.slane %v7903_v35, %v21885_v0  ;;  %v7926_v59 = vrot.slane %v7904_v27, %v21885_v0  ;;  %v6168_v2 = vrot.slane %v3524_v34, %v21877_v38  ;;  %3609 = vmax.xlane.f32.xlu1 %v17546_v41 }
 0x3a6   : > { %v7933_v57 = vrot.slane %v7905_v33, %v21885_v0  ;;  %v6172_v22 = vrot.slane %v3524_v34, %v21878_v52  ;;  %v6176_v29 = vrot.slane %v3524_v34, %v21879_v60  ;;  %v2790_v13 = vmax.f32 %v17614_v47, 0.0 }
 0x3a7   : > { %3599 = vmax.xlane.f32.xlu0 %v21904_v21  ;;  %v17892_v32 = vcombine.low %v8236_v54, %v8243_v31  ;;  %v7934_v14 = vcombine.low %v7912_v17, %v7919_v43  ;;  %v6180_v8 = vrot.slane %v3524_v34, %v21880_v5  ;;  %v6184_v40 = vrot.slane %v3524_v34, %v21881_v4  ;;  %v3384_v17 = vpop.xlane.xlu0 %3383 }
 0x3a8   : > { %v7935_v61 = vcombine.low %v7926_v59, %v7933_v57  ;;  %v6188_v39 = vrot.slane %v3524_v34, %v21882_v63  ;;  %v11528_v37 = vcombine.low %v6160_v6, %v6164_v3  ;;  %v11529_v47 = vcombine.low %v6168_v2, %v6172_v22  ;;  %v17927_v22 = vpop.xlane.xlu1 %3389 }
 0x3a9   : > { %v7942_v9 = vrot.slane %v7934_v14, %v21885_v0  ;;  %v11530_v53 = vcombine.low %v6176_v29, %v6180_v8  ;;  %v3952_v41 = vrot.slane %v17734_v7, %v21875_v16  ;;  %v3956_v54 = vrot.slane %v17734_v7, %v21876_v28  ;;  %3469 = vmax.xlane.f32.xlu1 %v17548_v15 }
 0x3aa   : > { %v7949_v62 = vrot.slane %v7935_v61, %v21885_v0  ;;  %v11531_v35 = vcombine.low %v6184_v40, %v6188_v39  ;;  %v11538_v27 = vrot.slane %v11528_v37, %v21885_v0  ;;  %v17906_v33 = vmax.f32 %v2792_v19, 0.0 }
 0x3ab   : > { %3475 = vmax.xlane.f32.xlu0 %v17556_v1  ;;  %v11545_v34 = vrot.slane %v11529_v47, %v21885_v0  ;;  %v11552_v6 = vrot.slane %v11530_v53, %v21885_v0  ;;  %v3960_v31 = vrot.slane %v17734_v7, %v21877_v38  ;;  %v3964_v19 = vrot.slane %v17734_v7, %v21878_v52 }
 0x3ac   : > { %v17914_v43 = vcombine.low %v7942_v9, %v7949_v62  ;;  %v11559_v59 = vrot.slane %v11531_v35, %v21885_v0  ;;  %v3968_v3 = vrot.slane %v17734_v7, %v21879_v60  ;;  %v3972_v1 = vrot.slane %v17734_v7, %v21880_v5 }
 0x3ad   : > { %v11560_v15 = vcombine.low %v11538_v27, %v11545_v34  ;;  %v3976_v57 = vrot.slane %v17734_v7, %v21881_v4  ;;  %v3980_v2 = vrot.slane %v17734_v7, %v21882_v63  ;;  %v8147_v21 = vcombine.low %v3952_v41, %v3956_v54  ;;  %3605 = vmax.xlane.f32.xlu1 %v17550_v51  ;;  %v17938_v41 = vpop.xlane.xlu0 %3519 }
 0x3ae   : > { %v11561_v29 = vcombine.low %v11552_v6, %v11559_v59  ;;  %v8148_v14 = vcombine.low %v3960_v31, %v3964_v19  ;;  %v3920_v8 = vrot.slane %v3384_v17, %v21875_v16  ;;  %v2793_v61 = vmax.f32 %v17618_v36, 0.0 }
 0x3af   : > { %3611 = vmax.xlane.f32.xlu0 %v17558_v49  ;;  %v11568_v40 = vrot.slane %v11560_v15, %v21885_v0  ;;  %v8149_v39 = vcombine.low %v3968_v3, %v3972_v1  ;;  %v8150_v37 = vcombine.low %v3976_v57, %v3980_v2  ;;  %v8157_v7 = vrot.slane %v8147_v21, %v21885_v0  ;;  %v17954_v3 = vpop.xlane.xlu1 %3525 }
 0x3b0   : > { %v11575_v9 = vrot.slane %v11561_v29, %v21885_v0  ;;  %v8164_v47 = vrot.slane %v8148_v14, %v21885_v0  ;;  %v3924_v53 = vrot.slane %v3384_v17, %v21876_v28  ;;  %v3928_v49 = vrot.slane %v3384_v17, %v21877_v38 }
 0x3b1   : > { %v8171_v36 = vrot.slane %v8149_v39, %v21885_v0  ;;  %v8178_v51 = vrot.slane %v8150_v37, %v21885_v0  ;;  %v3932_v62 = vrot.slane %v3384_v17, %v21878_v52  ;;  %v3936_v54 = vrot.slane %v3384_v17, %v21879_v60  ;;  %3481 = vmax.xlane.f32.xlu1 %v17569_v50  ;;  %v17968_v37 = vpop.xlane.xlu0 %3395 }
 0x3b2   : > { %v17944_v35 = vcombine.low %v11568_v40, %v11575_v9  ;;  %v8179_v27 = vcombine.low %v8157_v7, %v8164_v47  ;;  %v3940_v34 = vrot.slane %v3384_v17, %v21880_v5  ;;  %v17948_v6 = vmax.f32 %v2790_v13, 0.0  ;;  %v21905_v40 = vld [vmem:[#allocation69_spill] sm:$0xff]  ;;  %v21907_v7 = vld [vmem:[#allocation62_spill] sm:$0xff] }
 0x3b3   : > { %3471 = vmax.xlane.f32.xlu0 %v17565_v45  ;;  %v8180_v31 = vcombine.low %v8171_v36, %v8178_v51  ;;  %v3944_v59 = vrot.slane %v3384_v17, %v21881_v4  ;;  %v3948_v19 = vrot.slane %v3384_v17, %v21882_v63  ;;  %v8098_v1 = vcombine.low %v3920_v8, %v3924_v53  ;;  %v21906_v9 = vld [vmem:[#allocation65_spill] sm:$0xff] }
 0x3b4   : > { %v8187_v15 = vrot.slane %v8179_v27, %v21885_v0  ;;  %v8099_v57 = vcombine.low %v3928_v49, %v3932_v62  ;;  %v8100_v2 = vcombine.low %v3936_v54, %v3940_v34  ;;  %v6128_v50 = vrot.slane %v17771_v10, %v21875_v16 }
 0x3b5   : > { %v8194_v29 = vrot.slane %v8180_v31, %v21885_v0  ;;  %v8101_v13 = vcombine.low %v3944_v59, %v3948_v19  ;;  %v6132_v45 = vrot.slane %v17771_v10, %v21876_v28  ;;  %v8108_v21 = vrot.slane %v8098_v1, %v21885_v0  ;;  %3617 = vmax.xlane.f32.xlu1 %v21906_v9  ;;  %v17985_v19 = vpop.xlane.xlu1 %3401 }
 0x3b6   : > { %v8115_v17 = vrot.slane %v8099_v57, %v21885_v0  ;;  %v8122_v14 = vrot.slane %v8100_v2, %v21885_v0  ;;  %v6136_v8 = vrot.slane %v17771_v10, %v21877_v38  ;;  %v2791_v39 = vmax.f32 %v21905_v40, 0.0  ;;  %v18004_v40 = vpop.xlane.xlu0 %3531 }
 0x3b7   : > { %3607 = vmax.xlane.f32.xlu0 %v21907_v7  ;;  %v17972_v47 = vcombine.low %v8187_v15, %v8194_v29  ;;  %v8129_v53 = vrot.slane %v8101_v13, %v21885_v0  ;;  %v6140_v36 = vrot.slane %v17771_v10, %v21878_v52  ;;  %v6144_v49 = vrot.slane %v17771_v10, %v21879_v60  ;;  %v21908_v13 = vld [vmem:[#allocation26_spill] sm:$0xff] }
 0x3b8   : > { %v8130_v51 = vcombine.low %v8108_v21, %v8115_v17  ;;  %v6148_v62 = vrot.slane %v17771_v10, %v21880_v5  ;;  %v6152_v27 = vrot.slane %v17771_v10, %v21881_v4  ;;  %v6156_v34 = vrot.slane %v17771_v10, %v21882_v63  ;;  %v21909_v21 = vld [vmem:[#allocation25_spill] sm:$0xff] }
 0x3b9   : > { %v8131_v54 = vcombine.low %v8122_v14, %v8129_v53  ;;  %v11479_v31 = vcombine.low %v6128_v50, %v6132_v45  ;;  %v11480_v59 = vcombine.low %v6136_v8, %v6140_v36  ;;  %v6096_v57 = vrot.slane %v17938_v41, %v21875_v16  ;;  %3477 = vmax.xlane.f32.xlu1 %v21908_v13  ;;  %v18021_v13 = vpop.xlane.xlu1 %3537 }
 0x3ba   : > { %v8138_v15 = vrot.slane %v8130_v51, %v21885_v0  ;;  %v11481_v1 = vcombine.low %v6144_v49, %v6148_v62  ;;  %v6100_v2 = vrot.slane %v17938_v41, %v21876_v28  ;;  %v17992_v29 = vmax.f32 %v2793_v61, 0.0 }
 0x3bb   : > { %3483 = vmax.xlane.f32.xlu0 %v21909_v21  ;;  %v8145_v10 = vrot.slane %v8131_v54, %v21885_v0  ;;  %v11482_v50 = vcombine.low %v6152_v27, %v6156_v34  ;;  %v11489_v45 = vrot.slane %v11479_v31, %v21885_v0  ;;  %v11496_v17 = vrot.slane %v11480_v59, %v21885_v0  ;;  %v21910_v34 = vld [vmem:[#allocation24_spill] sm:$0xff]  ;;  %v21911_v31 = vld [vmem:[#allocation67_spill] sm:$0xff] }
 0x3bc   : > { %v11503_v14 = vrot.slane %v11481_v1, %v21885_v0  ;;  %v6104_v8 = vrot.slane %v17938_v41, %v21877_v38  ;;  %v6108_v61 = vrot.slane %v17938_v41, %v21878_v52  ;;  %v6112_v53 = vrot.slane %v17938_v41, %v21879_v60 }
 0x3bd   : > { %v18006_v9 = vcombine.low %v8138_v15, %v8145_v10  ;;  %v11510_v7 = vrot.slane %v11482_v50, %v21885_v0  ;;  %v6116_v36 = vrot.slane %v17938_v41, %v21880_v5  ;;  %v11511_v51 = vcombine.low %v11489_v45, %v11496_v17  ;;  %3613 = vmax.xlane.f32.xlu1 %v21910_v34 }
 0x3be   : > { %v6120_v49 = vrot.slane %v17938_v41, %v21881_v4  ;;  %v6124_v62 = vrot.slane %v17938_v41, %v21882_v63  ;;  %v11430_v27 = vcombine.low %v6096_v57, %v6100_v2  ;;  %v18017_v54 = vmax.f32 %v2791_v39, 0.0 }
 0x3bf   : > { %3619 = vmax.xlane.f32.xlu0 %v21911_v31  ;;  %v11512_v59 = vcombine.low %v11503_v14, %v11510_v7  ;;  %v11431_v15 = vcombine.low %v6104_v8, %v6108_v61  ;;  %v11432_v1 = vcombine.low %v6112_v53, %v6116_v36  ;;  %v11519_v21 = vrot.slane %v11511_v51, %v21885_v0  ;;  %v21912_v7 = vld [vmem:[#allocation30_spill] sm:$0xff]  ;;  %v18040_v36 = vpop.xlane.xlu0 %3391 }
 0x3c0   : > { %v11433_v10 = vcombine.low %v6120_v49, %v6124_v62  ;;  %v11440_v50 = vrot.slane %v11430_v27, %v21885_v0  ;;  %v3888_v41 = vrot.slane %v17801_v18, %v21875_v16  ;;  %v3892_v45 = vrot.slane %v17801_v18, %v21876_v28  ;;  %v21913_v51 = vld [vmem:[#allocation66_spill] sm:$0xff]  ;;  %v21914_v49 = vld [vmem:[#allocation23_spill] sm:$0xff] }
 0x3c1   : > { %v11526_v39 = vrot.slane %v11512_v59, %v21885_v0  ;;  %v11447_v57 = vrot.slane %v11431_v15, %v21885_v0  ;;  %v11454_v2 = vrot.slane %v11432_v1, %v21885_v0  ;;  %v3896_v14 = vrot.slane %v17801_v18, %v21877_v38  ;;  %3489 = vmax.xlane.f32.xlu1 %v21913_v51 }
 0x3c2   : > { %v11461_v17 = vrot.slane %v11433_v10, %v21885_v0  ;;  %v3900_v8 = vrot.slane %v17801_v18, %v21878_v52  ;;  %v3904_v61 = vrot.slane %v17801_v18, %v21879_v60  ;;  %v2796_v53 = vmax.f32 %v21912_v7, 0.0 }
 0x3c3   : > { %3479 = vmax.xlane.f32.xlu0 %v21914_v49  ;;  %v18044_v62 = vcombine.low %v11519_v21, %v11526_v39  ;;  %v11462_v27 = vcombine.low %v11440_v50, %v11447_v57  ;;  %v3908_v34 = vrot.slane %v17801_v18, %v21880_v5  ;;  %v3912_v59 = vrot.slane %v17801_v18, %v21881_v4  ;;  %v18055_v39 = vpop.xlane.xlu1 %3397  ;;  %v21916_v49 = vld [vmem:[#allocation52_spill] sm:$0xff] }
 0x3c4   : > { %v11463_v31 = vcombine.low %v11454_v2, %v11461_v17  ;;  %v3916_v15 = vrot.slane %v17801_v18, %v21882_v63  ;;  %v8049_v1 = vcombine.low %v3888_v41, %v3892_v45  ;;  %v8050_v7 = vcombine.low %v3896_v14, %v3900_v8  ;;  %21915 = vst [vmem:[#allocation71_spill] sm:$0xff] %v18055_v39  ;;  %v21917_v41 = vld [vmem:[#allocation10_spill] sm:$0xff]  ;;  %v21918_v45 = vld [vmem:[#allocation68_spill] sm:$0xff] }
 0x3c5   : > { %v11470_v10 = vrot.slane %v11462_v27, %v21885_v0  ;;  %v8051_v51 = vcombine.low %v3904_v61, %v3908_v34  ;;  %v4112_v21 = vrot.slane %v17968_v37, %v21875_v16  ;;  %v4116_v17 = vrot.slane %v17968_v37, %v21876_v28  ;;  %3625 = vmax.xlane.f32.xlu1 %v21917_v41 }
 0x3c6   : > { %v11477_v50 = vrot.slane %v11463_v31, %v21885_v0  ;;  %v8052_v57 = vcombine.low %v3912_v59, %v3916_v15  ;;  %v8059_v2 = vrot.slane %v8049_v1, %v21885_v0  ;;  %v2794_v18 = vmax.f32 %v21916_v49, 0.0  ;;  %v18075_v15 = vpop.xlane.xlu0 %3527 }
 0x3c7   : > { %3615 = vmax.xlane.f32.xlu0 %v21918_v45  ;;  %v8066_v14 = vrot.slane %v8050_v7, %v21885_v0  ;;  %v8073_v8 = vrot.slane %v8051_v51, %v21885_v0  ;;  %v4120_v61 = vrot.slane %v17968_v37, %v21877_v38  ;;  %v4124_v31 = vrot.slane %v17968_v37, %v21878_v52 }
 0x3c8   : > { %v18068_v27 = vcombine.low %v11470_v10, %v11477_v50  ;;  %v8080_v34 = vrot.slane %v8052_v57, %v21885_v0  ;;  %v4128_v59 = vrot.slane %v17968_v37, %v21879_v60  ;;  %v4132_v7 = vrot.slane %v17968_v37, %v21880_v5 }
 0x3c9   : > { %v8081_v1 = vcombine.low %v8059_v2, %v8066_v14  ;;  %v4136_v51 = vrot.slane %v17968_v37, %v21881_v4  ;;  %v4140_v10 = vrot.slane %v17968_v37, %v21882_v63  ;;  %v8392_v57 = vcombine.low %v4112_v21, %v4116_v17  ;;  %3485 = vmax.xlane.f32.xlu1 %v17701_v12 }
 0x3ca   : > { %21919 = vst [vmem:[#allocation72_spill] sm:$0xff] %v18068_v27  ;;  %v8082_v50 = vcombine.low %v8073_v8, %v8080_v34  ;;  %v8393_v49 = vcombine.low %v4120_v61, %v4124_v31  ;;  %v6064_v41 = vrot.slane %v17837_v55, %v21875_v16  ;;  %v18085_v45 = vmax.f32 %v2796_v53, 0.0  ;;  %v18090_v27 = vpop.xlane.xlu1 %3533 }
 0x3cb   : > { %3491 = vmax.xlane.f32.xlu0 %v17784_v26  ;;  %v8089_v2 = vrot.slane %v8081_v1, %v21885_v0  ;;  %v8394_v14 = vcombine.low %v4128_v59, %v4132_v7  ;;  %v8395_v39 = vcombine.low %v4136_v51, %v4140_v10  ;;  %v8402_v21 = vrot.slane %v8392_v57, %v21885_v0  ;;  %v21920_v7 = vld [vmem:[#allocation6_spill] sm:$0xff]  ;;  %v18110_v10 = vpop.xlane.xlu0 %3403 }
 0x3cc   : > { %v8096_v37 = vrot.slane %v8082_v50, %v21885_v0  ;;  %v8409_v17 = vrot.slane %v8393_v49, %v21885_v0  ;;  %v6068_v53 = vrot.slane %v17837_v55, %v21876_v28  ;;  %v6072_v26 = vrot.slane %v17837_v55, %v21877_v38 }
 0x3cd   : > { %v8416_v8 = vrot.slane %v8394_v14, %v21885_v0  ;;  %v8423_v12 = vrot.slane %v8395_v39, %v21885_v0  ;;  %v6076_v61 = vrot.slane %v17837_v55, %v21878_v52  ;;  %v6080_v59 = vrot.slane %v17837_v55, %v21879_v60  ;;  %3621 = vmax.xlane.f32.xlu1 %v17722_v46 }
 0x3ce   : > { %v18103_v34 = vcombine.low %v8089_v2, %v8096_v37  ;;  %v8424_v31 = vcombine.low %v8402_v21, %v8409_v17  ;;  %v6084_v1 = vrot.slane %v17837_v55, %v21880_v5  ;;  %v2797_v51 = vmax.f32 %v21920_v7, 0.0 }
 0x3cf   : > { %3627 = vmax.xlane.f32.xlu0 %v17811_v56  ;;  %v8425_v39 = vcombine.low %v8416_v8, %v8423_v12  ;;  %v6088_v50 = vrot.slane %v17837_v55, %v21881_v4  ;;  %v6092_v57 = vrot.slane %v17837_v55, %v21882_v63  ;;  %v11381_v2 = vcombine.low %v6064_v41, %v6068_v53  ;;  %v18124_v8 = vpop.xlane.xlu1 %3409 }
 0x3d0   : > { %v8432_v49 = vrot.slane %v8424_v31, %v21885_v0  ;;  %v11382_v14 = vcombine.low %v6072_v26, %v6076_v61  ;;  %v11383_v37 = vcombine.low %v6080_v59, %v6084_v1  ;;  %v6288_v46 = vrot.slane %v18004_v40, %v21875_v16 }
 0x3d1   : > { %v8439_v21 = vrot.slane %v8425_v39, %v21885_v0  ;;  %v11384_v17 = vcombine.low %v6088_v50, %v6092_v57  ;;  %v6292_v56 = vrot.slane %v18004_v40, %v21876_v28  ;;  %v11391_v12 = vrot.slane %v11381_v2, %v21885_v0  ;;  %3497 = vmax.xlane.f32.xlu1 %v17906_v33  ;;  %v18144_v33 = vpop.xlane.xlu0 %3539 }
 0x3d2   : > { %v11398_v55 = vrot.slane %v11382_v14, %v21885_v0  ;;  %v11405_v31 = vrot.slane %v11383_v37, %v21885_v0  ;;  %v6296_v41 = vrot.slane %v18004_v40, %v21877_v38  ;;  %v3050_v53 = vmax.f32 %v2794_v18, 0.0 }
 0x3d3   : > { %3487 = vmax.xlane.f32.xlu0 %v17829_v58  ;;  %v18133_v26 = vcombine.low %v8432_v49, %v8439_v21  ;;  %v11412_v61 = vrot.slane %v11384_v17, %v21885_v0  ;;  %v6300_v59 = vrot.slane %v18004_v40, %v21878_v52  ;;  %v6304_v7 = vrot.slane %v18004_v40, %v21879_v60  ;;  %v21921_v17 = vld [vmem:[#allocation28_spill] sm:$0xff] }
 0x3d4   : > { %v11413_v1 = vcombine.low %v11391_v12, %v11398_v55  ;;  %v6308_v39 = vrot.slane %v18004_v40, %v21880_v5  ;;  %v6312_v18 = vrot.slane %v18004_v40, %v21881_v4  ;;  %v6316_v50 = vrot.slane %v18004_v40, %v21882_v63 }
 0x3d5   : > { %v11414_v58 = vcombine.low %v11405_v31, %v11412_v61  ;;  %v11724_v57 = vcombine.low %v6288_v46, %v6292_v56  ;;  %v11725_v49 = vcombine.low %v6296_v41, %v6300_v59  ;;  %v4080_v37 = vrot.slane %v17869_v30, %v21875_v16  ;;  %3493 = vmax.xlane.f32.xlu1 %v17948_v6  ;;  %v18158_v56 = vpop.xlane.xlu1 %3545 }
 0x3d6   : > { %v11421_v2 = vrot.slane %v11413_v1, %v21885_v0  ;;  %v11726_v14 = vcombine.low %v6304_v7, %v6308_v39  ;;  %v4084_v21 = vrot.slane %v17869_v30, %v21876_v28  ;;  %v2795_v12 = vmax.f32 %v21921_v17, 0.0 }
 0x3d7   : > { %3623 = vmax.xlane.f32.xlu0 %v17850_v25  ;;  %v11428_v55 = vrot.slane %v11414_v58, %v21885_v0  ;;  %v11727_v40 = vcombine.low %v6312_v18, %v6316_v50  ;;  %v11734_v46 = vrot.slane %v11724_v57, %v21885_v0  ;;  %v11741_v31 = vrot.slane %v11725_v49, %v21885_v0  ;;  %v18177_v49 = vpop.xlane.xlu0 %3399 }
 0x3d8   : > { %v11748_v41 = vrot.slane %v11726_v14, %v21885_v0  ;;  %v4088_v61 = vrot.slane %v17869_v30, %v21877_v38  ;;  %v4092_v59 = vrot.slane %v17869_v30, %v21878_v52  ;;  %v4096_v1 = vrot.slane %v17869_v30, %v21879_v60 }
 0x3d9   : > { %v18166_v6 = vcombine.low %v11421_v2, %v11428_v55  ;;  %v11755_v25 = vrot.slane %v11727_v40, %v21885_v0  ;;  %v4100_v7 = vrot.slane %v17869_v30, %v21880_v5  ;;  %v11756_v39 = vcombine.low %v11734_v46, %v11741_v31  ;;  %3505 = vmax.xlane.f32.xlu1 %v18085_v45  ;;  %v18190_v45 = vpop.xlane.xlu1 %3405 }
 0x3da   : > { %v4104_v18 = vrot.slane %v17869_v30, %v21881_v4  ;;  %v4108_v58 = vrot.slane %v17869_v30, %v21882_v63  ;;  %v8343_v50 = vcombine.low %v4080_v37, %v4084_v21  ;;  %v3053_v57 = vmax.f32 %v2797_v51, 0.0 }
 0x3db   : > { %3499 = vmax.xlane.f32.xlu0 %v17992_v29  ;;  %v11757_v2 = vcombine.low %v11748_v41, %v11755_v25  ;;  %v8344_v14 = vcombine.low %v4088_v61, %v4092_v59  ;;  %v8345_v17 = vcombine.low %v4096_v1, %v4100_v7  ;;  %v11764_v55 = vrot.slane %v11756_v39, %v21885_v0 }
 0x3dc   : > { %v8346_v40 = vcombine.low %v4104_v18, %v4108_v58  ;;  %v8353_v46 = vrot.slane %v8343_v50, %v21885_v0  ;;  %v4048_v31 = vrot.slane %v18040_v36, %v21875_v16  ;;  %v4052_v29 = vrot.slane %v18040_v36, %v21876_v28 }
 0x3dd   : > { %v11771_v30 = vrot.slane %v11757_v2, %v21885_v0  ;;  %v8360_v51 = vrot.slane %v8344_v14, %v21885_v0  ;;  %v8367_v37 = vrot.slane %v8345_v17, %v21885_v0  ;;  %v4056_v41 = vrot.slane %v18040_v36, %v21877_v38  ;;  %3501 = vmax.xlane.f32.xlu1 %v3050_v53  ;;  %v18208_v14 = vpop.xlane.xlu0 %3535 }
 0x3de   : > { %v8374_v21 = vrot.slane %v8346_v40, %v21885_v0  ;;  %v4060_v61 = vrot.slane %v18040_v36, %v21878_v52  ;;  %v4064_v59 = vrot.slane %v18040_v36, %v21879_v60  ;;  %v3051_v25 = vmax.f32 %v2795_v12, 0.0 }
 0x3df   : > { %3495 = vmax.xlane.f32.xlu0 %v18017_v54  ;;  %v18200_v1 = vcombine.low %v11764_v55, %v11771_v30  ;;  %v8375_v7 = vcombine.low %v8353_v46, %v8360_v51  ;;  %v4068_v39 = vrot.slane %v18040_v36, %v21880_v5  ;;  %v4072_v58 = vrot.slane %v18040_v36, %v21881_v4 }
 0x3e0   : > { %v8376_v18 = vcombine.low %v8367_v37, %v8374_v21  ;;  %v4076_v50 = vrot.slane %v18040_v36, %v21882_v63  ;;  %v8294_v2 = vcombine.low %v4048_v31, %v4052_v29  ;;  %v8295_v12 = vcombine.low %v4056_v41, %v4060_v61  ;;  %v18223_v29 = vpop.xlane.xlu1 %3541 }
 0x3e1   : > { %v8383_v53 = vrot.slane %v8375_v7, %v21885_v0  ;;  %v8296_v54 = vcombine.low %v4064_v59, %v4068_v39  ;;  %v6256_v17 = vrot.slane %v17895_v48, %v21875_v16  ;;  %v6260_v30 = vrot.slane %v17895_v48, %v21876_v28  ;;  %21922 = vst [vmem:[#allocation27_spill] sm:$0xff] %v18223_v29 }
 0x3e2   : > { %v8390_v55 = vrot.slane %v8376_v18, %v21885_v0  ;;  %v8297_v40 = vcombine.low %v4072_v58, %v4076_v50  ;;  %v8304_v46 = vrot.slane %v8294_v2, %v21885_v0  ;;  %v8311_v36 = vrot.slane %v8295_v12, %v21885_v0  ;;  %v18238_v12 = vpop.xlane.xlu0 %3411 }
 0x3e3   : > { %3507 = vmax.xlane.f32.xlu0 %v3053_v57  ;;  %v8318_v31 = vrot.slane %v8296_v54, %v21885_v0  ;;  %v6264_v51 = vrot.slane %v17895_v48, %v21877_v38  ;;  %v6268_v37 = vrot.slane %v17895_v48, %v21878_v52  ;;  %v6272_v61 = vrot.slane %v17895_v48, %v21879_v60 }
 0x3e4   : > { %v18225_v21 = vcombine.low %v8383_v53, %v8390_v55  ;;  %v8325_v41 = vrot.slane %v8297_v40, %v21885_v0  ;;  %v6276_v57 = vrot.slane %v17895_v48, %v21880_v5  ;;  %v8326_v59 = vcombine.low %v8304_v46, %v8311_v36 }
 0x3e5   : > { %v6280_v7 = vrot.slane %v17895_v48, %v21881_v4  ;;  %v6284_v39 = vrot.slane %v17895_v48, %v21882_v63  ;;  %v11675_v18 = vcombine.low %v6256_v17, %v6260_v30  ;;  %v11676_v50 = vcombine.low %v6264_v51, %v6268_v37 }
 0x3e6   : > { %v8327_v58 = vcombine.low %v8318_v31, %v8325_v41  ;;  %v11677_v2 = vcombine.low %v6272_v61, %v6276_v57  ;;  %v6224_v53 = vrot.slane %v18075_v15, %v21875_v16  ;;  %v8334_v54 = vrot.slane %v8326_v59, %v21885_v0  ;;  %v18256_v41 = vpop.xlane.xlu1 %3417 }
 0x3e7   : > { %3503 = vmax.xlane.f32.xlu0 %v3051_v25  ;;  %v11678_v55 = vcombine.low %v6280_v7, %v6284_v39  ;;  %v11685_v40 = vrot.slane %v11675_v18, %v21885_v0  ;;  %v6228_v46 = vrot.slane %v18075_v15, %v21876_v28  ;;  %v11692_v17 = vrot.slane %v11676_v50, %v21885_v0 }
 0x3e8   : > { %v8341_v48 = vrot.slane %v8327_v58, %v21885_v0  ;;  %v11699_v30 = vrot.slane %v11677_v2, %v21885_v0  ;;  %v6232_v36 = vrot.slane %v18075_v15, %v21877_v38  ;;  %v6236_v25 = vrot.slane %v18075_v15, %v21878_v52  ;;  %21923 = vst [vmem:[#allocation34_spill] sm:$0xff] %v18256_v41 }
 0x3e9   : > { %v11706_v31 = vrot.slane %v11678_v55, %v21885_v0  ;;  %v6240_v51 = vrot.slane %v18075_v15, %v21879_v60  ;;  %v6244_v37 = vrot.slane %v18075_v15, %v21880_v5  ;;  %v11707_v57 = vcombine.low %v11685_v40, %v11692_v17  ;;  %v18269_v40 = vpop.xlane.xlu0 %3547 }
 0x3ea   : > { %v18258_v61 = vcombine.low %v8334_v54, %v8341_v48  ;;  %v6248_v59 = vrot.slane %v18075_v15, %v21881_v4  ;;  %v6252_v7 = vrot.slane %v18075_v15, %v21882_v63  ;;  %v11626_v18 = vcombine.low %v6224_v53, %v6228_v46 }
 0x3eb   : > { %v11708_v39 = vcombine.low %v11699_v30, %v11706_v31  ;;  %v11627_v58 = vcombine.low %v6232_v36, %v6236_v25  ;;  %v11628_v50 = vcombine.low %v6240_v51, %v6244_v37  ;;  %v11715_v2 = vrot.slane %v11707_v57, %v21885_v0 }
 0x3ec   : > { %v11629_v55 = vcombine.low %v6248_v59, %v6252_v7  ;;  %v4016_v29 = vrot.slane %v17927_v22, %v21875_v16  ;;  %v4020_v54 = vrot.slane %v17927_v22, %v21876_v28  ;;  %v11636_v17 = vrot.slane %v11626_v18, %v21885_v0  ;;  %v18288_v59 = vpop.xlane.xlu1 %3553  ;;  %v21925_v7 = vld [vmem:[#allocation29_spill] sm:$0xff] }
 0x3ed   : > { %v11722_v48 = vrot.slane %v11708_v39, %v21885_v0  ;;  %v11643_v15 = vrot.slane %v11627_v58, %v21885_v0  ;;  %v11650_v53 = vrot.slane %v11628_v50, %v21885_v0  ;;  %v4024_v30 = vrot.slane %v17927_v22, %v21877_v38  ;;  %21924 = vst [vmem:[#allocation78_spill] sm:$0xff] %v18288_v59 }
 0x3ee   : > { %v11657_v46 = vrot.slane %v11629_v55, %v21885_v0  ;;  %v4028_v36 = vrot.slane %v17927_v22, %v21878_v52  ;;  %v4032_v31 = vrot.slane %v17927_v22, %v21879_v60  ;;  %v4036_v37 = vrot.slane %v17927_v22, %v21880_v5  ;;  %14132 = vperm.xlu1 %15757, %v21925_v7  }
 0x3ef   : > { %v18282_v25 = vcombine.low %v11715_v2, %v11722_v48  ;;  %v11658_v51 = vcombine.low %v11636_v17, %v11643_v15  ;;  %v4040_v57 = vrot.slane %v17927_v22, %v21881_v4  ;;  %v4044_v18 = vrot.slane %v17927_v22, %v21882_v63 }
 0x3f0   : > { %v11659_v39 = vcombine.low %v11650_v53, %v11657_v46  ;;  %v8245_v58 = vcombine.low %v4016_v29, %v4020_v54  ;;  %v8246_v50 = vcombine.low %v4024_v30, %v4028_v36  ;;  %v8247_v55 = vcombine.low %v4032_v31, %v4036_v37  ;;  %v18301_v46 = vpop.xlane.xlu0 %3407 }
 0x3f1   : > { %v11666_v2 = vrot.slane %v11658_v51, %v21885_v0  ;;  %v4240_v48 = vrot.slane %v18110_v10, %v21875_v16  ;;  %v4244_v17 = vrot.slane %v18110_v10, %v21876_v28  ;;  %v8248_v59 = vcombine.low %v4040_v57, %v4044_v18 }
 0x3f2   : > { %v11673_v15 = vrot.slane %v11659_v39, %v21885_v0  ;;  %v8255_v7 = vrot.slane %v8245_v58, %v21885_v0  ;;  %v8262_v53 = vrot.slane %v8246_v50, %v21885_v0  ;;  %v8269_v22 = vrot.slane %v8247_v55, %v21885_v0  ;;  %14126 = vperm.xlu1 %15757, %v17716_v11   ;;  %v18320_v50 = vpop.xlane.xlu1 %3413 }
 0x3f3   : > { %v4248_v29 = vrot.slane %v18110_v10, %v21877_v38  ;;  %v4252_v54 = vrot.slane %v18110_v10, %v21878_v52  ;;  %v4256_v30 = vrot.slane %v18110_v10, %v21879_v60  ;;  %v8276_v31 = vrot.slane %v8248_v59, %v21885_v0 }
 0x3f4   : > { %v18311_v36 = vcombine.low %v11666_v2, %v11673_v15  ;;  %v8277_v51 = vcombine.low %v8255_v7, %v8262_v53  ;;  %v4260_v37 = vrot.slane %v18110_v10, %v21880_v5  ;;  %v4264_v57 = vrot.slane %v18110_v10, %v21881_v4 }
 0x3f5   : > { %v4268_v39 = vrot.slane %v18110_v10, %v21882_v63  ;;  %v8588_v18 = vcombine.low %v4240_v48, %v4244_v17  ;;  %v8589_v58 = vcombine.low %v4248_v29, %v4252_v54  ;;  %v8278_v55 = vcombine.low %v8269_v22, %v8276_v31  ;;  %v18336_v29 = vpop.xlane.xlu0 %3543 }
 0x3f6   : > { %v8285_v11 = vrot.slane %v8277_v51, %v21885_v0  ;;  %v8590_v2 = vcombine.low %v4256_v30, %v4260_v37  ;;  %v6192_v59 = vrot.slane %v17954_v3, %v21875_v16  ;;  %v6196_v41 = vrot.slane %v17954_v3, %v21876_v28  ;;  %14135 = vperm.xlu1 %15757, %v17744_v24  }
 0x3f7   : > { %v8591_v15 = vcombine.low %v4264_v57, %v4268_v39  ;;  %v8598_v7 = vrot.slane %v8588_v18, %v21885_v0  ;;  %v8605_v53 = vrot.slane %v8589_v58, %v21885_v0  ;;  %v8292_v10 = vrot.slane %v8278_v55, %v21885_v0 }
 0x3f8   : > { %v8612_v48 = vrot.slane %v8590_v2, %v21885_v0  ;;  %v6200_v17 = vrot.slane %v17954_v3, %v21877_v38  ;;  %v6204_v22 = vrot.slane %v17954_v3, %v21878_v52  ;;  %v6208_v31 = vrot.slane %v17954_v3, %v21879_v60 }
 0x3f9   : > { %v8619_v54 = vrot.slane %v8591_v15, %v21885_v0  ;;  %v8620_v30 = vcombine.low %v8598_v7, %v8605_v53  ;;  %v6212_v24 = vrot.slane %v17954_v3, %v21880_v5  ;;  %v18343_v51 = vcombine.low %v8285_v11, %v8292_v10  ;;  %v18350_v15 = vpop.xlane.xlu1 %3549 }
 0x3fa   : > { %v6216_v37 = vrot.slane %v17954_v3, %v21881_v4  ;;  %v6220_v57 = vrot.slane %v17954_v3, %v21882_v63  ;;  %v11577_v39 = vcombine.low %v6192_v59, %v6196_v41  ;;  %v11578_v55 = vcombine.low %v6200_v17, %v6204_v22  ;;  %14339 = vperm.xlu1 %15757, %v17776_v23  }
 0x3fb   : > { %v8621_v18 = vcombine.low %v8612_v48, %v8619_v54  ;;  %v8628_v58 = vrot.slane %v8620_v30, %v21885_v0  ;;  %v11579_v2 = vcombine.low %v6208_v31, %v6212_v24  ;;  %v6416_v53 = vrot.slane %v18144_v33, %v21875_v16  ;;  %v18371_v54 = vpop.xlane.xlu0 %3419 }
 0x3fc   : > { %v11580_v7 = vcombine.low %v6216_v37, %v6220_v57  ;;  %v11587_v11 = vrot.slane %v11577_v39, %v21885_v0  ;;  %v6420_v10 = vrot.slane %v18144_v33, %v21876_v28  ;;  %v11594_v41 = vrot.slane %v11578_v55, %v21885_v0 }
 0x3fd   : > { %14336 = vperm.xlu0 %15756, %v17803_v20   ;;  %v8635_v3 = vrot.slane %v8621_v18, %v21885_v0  ;;  %v11601_v59 = vrot.slane %v11579_v2, %v21885_v0  ;;  %v6424_v23 = vrot.slane %v18144_v33, %v21877_v38  ;;  %v6428_v17 = vrot.slane %v18144_v33, %v21878_v52 }
 0x3fe   : > { %v11608_v48 = vrot.slane %v11580_v7, %v21885_v0  ;;  %v6432_v22 = vrot.slane %v18144_v33, %v21879_v60  ;;  %v6436_v20 = vrot.slane %v18144_v33, %v21880_v5  ;;  %v11609_v31 = vcombine.low %v11587_v11, %v11594_v41  ;;  %14333 = vperm.xlu1 %15757, %v17833_v42  }
 0x3ff   : > { %v18373_v30 = vcombine.low %v8628_v58, %v8635_v3  ;;  %v6440_v24 = vrot.slane %v18144_v33, %v21881_v4  ;;  %v6444_v37 = vrot.slane %v18144_v33, %v21882_v63  ;;  %v11920_v39 = vcombine.low %v6416_v53, %v6420_v10  ;;  %v18386_v3 = vpop.xlane.xlu1 %3425 }
 0x400   : > { %v11610_v57 = vcombine.low %v11601_v59, %v11608_v48  ;;  %v11921_v18 = vcombine.low %v6424_v23, %v6428_v17  ;;  %v11922_v55 = vcombine.low %v6432_v22, %v6436_v20  ;;  %v11617_v2 = vrot.slane %v11609_v31, %v21885_v0  ;;  %v18406_v31 = vpop.xlane.xlu0 %3555 }
 0x401   : > { %14330 = vperm.xlu0 %15756, %v17862_v44   ;;  %v11923_v7 = vcombine.low %v6440_v24, %v6444_v37  ;;  %v4208_v58 = vrot.slane %v17985_v19, %v21875_v16  ;;  %v4212_v11 = vrot.slane %v17985_v19, %v21876_v28  ;;  %v11930_v42 = vrot.slane %v11920_v39, %v21885_v0 }
 0x402   : > { %v11624_v33 = vrot.slane %v11610_v57, %v21885_v0  ;;  %v11937_v53 = vrot.slane %v11921_v18, %v21885_v0  ;;  %v11944_v10 = vrot.slane %v11922_v55, %v21885_v0  ;;  %v4216_v41 = vrot.slane %v17985_v19, %v21877_v38  ;;  %14147 = vperm.xlu1 %15757, %v17892_v32  }
 0x403   : > { %v11951_v44 = vrot.slane %v11923_v7, %v21885_v0  ;;  %v4220_v59 = vrot.slane %v17985_v19, %v21878_v52  ;;  %v4224_v23 = vrot.slane %v17985_v19, %v21879_v60  ;;  %v4228_v22 = vrot.slane %v17985_v19, %v21880_v5 }
 0x404   : > { %v18400_v48 = vcombine.low %v11617_v2, %v11624_v33  ;;  %v11952_v17 = vcombine.low %v11930_v42, %v11937_v53  ;;  %v4232_v20 = vrot.slane %v17985_v19, %v21881_v4  ;;  %v4236_v37 = vrot.slane %v17985_v19, %v21882_v63  ;;  %v18419_v53 = vpop.xlane.xlu1 %3561 }
 0x405   : > { %14129 = vperm.xlu0 %15756, %v17914_v43   ;;  %v11953_v24 = vcombine.low %v11944_v10, %v11951_v44  ;;  %v8539_v57 = vcombine.low %v4208_v58, %v4212_v11  ;;  %v8540_v39 = vcombine.low %v4216_v41, %v4220_v59  ;;  %v8541_v18 = vcombine.low %v4224_v23, %v4228_v22 }
 0x406   : > { %v11960_v32 = vrot.slane %v11952_v17, %v21885_v0  ;;  %v4176_v55 = vrot.slane %v18177_v49, %v21875_v16  ;;  %v4180_v2 = vrot.slane %v18177_v49, %v21876_v28  ;;  %v8542_v33 = vcombine.low %v4232_v20, %v4236_v37  ;;  %14351 = vperm.xlu1 %15757, %v17944_v35  }
 0x407   : > { %v11967_v7 = vrot.slane %v11953_v24, %v21885_v0  ;;  %v8549_v43 = vrot.slane %v8539_v57, %v21885_v0  ;;  %v8556_v42 = vrot.slane %v8540_v39, %v21885_v0  ;;  %v8563_v19 = vrot.slane %v8541_v18, %v21885_v0  ;;  %v18439_v24 = vpop.xlane.xlu0 %3415 }
 0x408   : > { %v4184_v58 = vrot.slane %v18177_v49, %v21877_v38  ;;  %v4188_v11 = vrot.slane %v18177_v49, %v21878_v52  ;;  %v4192_v10 = vrot.slane %v18177_v49, %v21879_v60  ;;  %v8570_v41 = vrot.slane %v8542_v33, %v21885_v0 }
 0x409   : > { %14144 = vperm.xlu0 %15756, %v17972_v47   ;;  %v18430_v44 = vcombine.low %v11960_v32, %v11967_v7  ;;  %v8571_v59 = vcombine.low %v8549_v43, %v8556_v42  ;;  %v4196_v35 = vrot.slane %v18177_v49, %v21880_v5  ;;  %v4200_v23 = vrot.slane %v18177_v49, %v21881_v4  ;;  %v18456_v43 = vpop.xlane.xlu1 %3421 }
 0x40a   : > { %v4204_v17 = vrot.slane %v18177_v49, %v21882_v63  ;;  %v8490_v22 = vcombine.low %v4176_v55, %v4180_v2  ;;  %v8491_v20 = vcombine.low %v4184_v58, %v4188_v11  ;;  %v8572_v37 = vcombine.low %v8563_v19, %v8570_v41  ;;  %14141 = vperm.xlu1 %15757, %v18006_v9  }
 0x40b   : > { %v8579_v47 = vrot.slane %v8571_v59, %v21885_v0  ;;  %v8492_v57 = vcombine.low %v4192_v10, %v4196_v35  ;;  %v6384_v39 = vrot.slane %v18021_v13, %v21875_v16  ;;  %v6388_v49 = vrot.slane %v18021_v13, %v21876_v28  ;;  %v21926_v35 = vld [vmem:[#allocation72_spill] sm:$0xff] }
 0x40c   : > { %v8493_v32 = vcombine.low %v4200_v23, %v4204_v17  ;;  %v8500_v18 = vrot.slane %v8490_v22, %v21885_v0  ;;  %v8507_v7 = vrot.slane %v8491_v20, %v21885_v0  ;;  %v8586_v55 = vrot.slane %v8572_v37, %v21885_v0  ;;  %v18471_v37 = vpop.xlane.xlu0 %3551 }
 0x40d   : > { %14348 = vperm.xlu0 %15756, %v18044_v62   ;;  %v8514_v2 = vrot.slane %v8492_v57, %v21885_v0  ;;  %v6392_v33 = vrot.slane %v18021_v13, %v21877_v38  ;;  %v6396_v9 = vrot.slane %v18021_v13, %v21878_v52  ;;  %v6400_v58 = vrot.slane %v18021_v13, %v21879_v60 }
 0x40e   : > { %v8521_v42 = vrot.slane %v8493_v32, %v21885_v0  ;;  %v8522_v19 = vcombine.low %v8500_v18, %v8507_v7  ;;  %v6404_v62 = vrot.slane %v18021_v13, %v21880_v5  ;;  %v18463_v11 = vcombine.low %v8579_v47, %v8586_v55  ;;  %14345 = vperm.xlu1 %15757, %v21926_v35  }
 0x40f   : > { %v6408_v10 = vrot.slane %v18021_v13, %v21881_v4  ;;  %v6412_v41 = vrot.slane %v18021_v13, %v21882_v63  ;;  %v11871_v59 = vcombine.low %v6384_v39, %v6388_v49  ;;  %v11872_v22 = vcombine.low %v6392_v33, %v6396_v9  ;;  %v18491_v9 = vpop.xlane.xlu1 %3557 }
 0x410   : > { %v8523_v23 = vcombine.low %v8514_v2, %v8521_v42  ;;  %v8530_v17 = vrot.slane %v8522_v19, %v21885_v0  ;;  %v11873_v20 = vcombine.low %v6400_v58, %v6404_v62  ;;  %v6352_v32 = vrot.slane %v18208_v14, %v21875_v16 }
 0x411   : > { %14138 = vperm.xlu0 %15756, %v18103_v34   ;;  %v11874_v47 = vcombine.low %v6408_v10, %v6412_v41  ;;  %v11881_v57 = vrot.slane %v11871_v59, %v21885_v0  ;;  %v6356_v13 = vrot.slane %v18208_v14, %v21876_v28  ;;  %v11888_v18 = vrot.slane %v11872_v22, %v21885_v0 }
 0x412   : > { %v8537_v39 = vrot.slane %v8523_v23, %v21885_v0  ;;  %v11895_v7 = vrot.slane %v11873_v20, %v21885_v0  ;;  %v6360_v49 = vrot.slane %v18208_v14, %v21877_v38  ;;  %v6364_v55 = vrot.slane %v18208_v14, %v21878_v52  ;;  %14159 = vperm.xlu1 %15757, %v18133_v26   ;;  %v21927_v26 = vld [vmem:[#allocation71_spill] sm:$0xff] }
 0x413   : > { %v11902_v34 = vrot.slane %v11874_v47, %v21885_v0  ;;  %v6368_v2 = vrot.slane %v18208_v14, %v21879_v60  ;;  %v6372_v33 = vrot.slane %v18208_v14, %v21880_v5  ;;  %v11903_v19 = vcombine.low %v11881_v57, %v11888_v18  ;;  %v18506_v47 = vpop.xlane.xlu0 %3427 }
 0x414   : > { %v18494_v42 = vcombine.low %v8530_v17, %v8537_v39  ;;  %v6376_v58 = vrot.slane %v18208_v14, %v21881_v4  ;;  %v6380_v62 = vrot.slane %v18208_v14, %v21882_v63  ;;  %v11822_v41 = vcombine.low %v6352_v32, %v6356_v13 }
 0x415   : > { %14342 = vperm.xlu0 %15756, %v18166_v6   ;;  %v11904_v10 = vcombine.low %v11895_v7, %v11902_v34  ;;  %v11823_v59 = vcombine.low %v6360_v49, %v6364_v55  ;;  %v11824_v35 = vcombine.low %v6368_v2, %v6372_v33  ;;  %v11911_v23 = vrot.slane %v11903_v19, %v21885_v0  ;;  %v18527_v2 = vpop.xlane.xlu1 %3433 }
 0x416   : > { %v11825_v22 = vcombine.low %v6376_v58, %v6380_v62  ;;  %v4144_v17 = vrot.slane %v21927_v26, %v21875_v16  ;;  %v4148_v20 = vrot.slane %v21927_v26, %v21876_v28  ;;  %v11832_v14 = vrot.slane %v11822_v41, %v21885_v0  ;;  %14363 = vperm.xlu1 %15757, %v18200_v1  }
 0x417   : > { %v11918_v57 = vrot.slane %v11904_v10, %v21885_v0  ;;  %v11839_v6 = vrot.slane %v11823_v59, %v21885_v0  ;;  %v11846_v32 = vrot.slane %v11824_v35, %v21885_v0  ;;  %v4152_v39 = vrot.slane %v21927_v26, %v21877_v38 }
 0x418   : > { %v11853_v13 = vrot.slane %v11825_v22, %v21885_v0  ;;  %v4156_v18 = vrot.slane %v21927_v26, %v21878_v52  ;;  %v4160_v7 = vrot.slane %v21927_v26, %v21879_v60  ;;  %v4164_v55 = vrot.slane %v21927_v26, %v21880_v5 }
 0x419   : > { %14156 = vperm.xlu0 %15756, %v18225_v21   ;;  %v18521_v49 = vcombine.low %v11911_v23, %v11918_v57  ;;  %v11854_v34 = vcombine.low %v11832_v14, %v11839_v6  ;;  %v4168_v1 = vrot.slane %v21927_v26, %v21881_v4  ;;  %v4172_v19 = vrot.slane %v21927_v26, %v21882_v63 }
 0x41a   : > { %v11855_v33 = vcombine.low %v11846_v32, %v11853_v13  ;;  %v8441_v58 = vcombine.low %v4144_v17, %v4148_v20  ;;  %v8442_v62 = vcombine.low %v4152_v39, %v4156_v18  ;;  %v8443_v21 = vcombine.low %v4160_v7, %v4164_v55  ;;  %14153 = vperm.xlu1 %15757, %v18258_v61   ;;  %v18540_v17 = vpop.xlane.xlu0 %3563  ;;  %v18559_v55 = vpop.xlane.xlu1 %3569 }
 0x41b   : > { %v11862_v10 = vrot.slane %v11854_v34, %v21885_v0  ;;  %v4368_v41 = vrot.slane %v18238_v12, %v21875_v16  ;;  %v4372_v59 = vrot.slane %v18238_v12, %v21876_v28  ;;  %v8444_v23 = vcombine.low %v4168_v1, %v4172_v19 }
 0x41c   : > { %v11869_v35 = vrot.slane %v11855_v33, %v21885_v0  ;;  %v8451_v22 = vrot.slane %v8441_v58, %v21885_v0  ;;  %v8458_v26 = vrot.slane %v8442_v62, %v21885_v0  ;;  %v8465_v20 = vrot.slane %v8443_v21, %v21885_v0 }
 0x41d   : > { %14360 = vperm.xlu0 %15756, %v18282_v25   ;;  %v4376_v57 = vrot.slane %v18238_v12, %v21877_v38  ;;  %v4380_v14 = vrot.slane %v18238_v12, %v21878_v52  ;;  %v4384_v61 = vrot.slane %v18238_v12, %v21879_v60  ;;  %v8472_v32 = vrot.slane %v8444_v23, %v21885_v0 }
 0x41e   : > { %v18550_v6 = vcombine.low %v11862_v10, %v11869_v35  ;;  %v8473_v13 = vcombine.low %v8451_v22, %v8458_v26  ;;  %v4388_v39 = vrot.slane %v18238_v12, %v21880_v5  ;;  %v4392_v25 = vrot.slane %v18238_v12, %v21881_v4  ;;  %14357 = vperm.xlu1 %15757, %v18311_v36   ;;  %v18576_v23 = vpop.xlane.xlu0 %3423 }
 0x41f   : > { %v4396_v18 = vrot.slane %v18238_v12, %v21882_v63  ;;  %v8784_v7 = vcombine.low %v4368_v41, %v4372_v59  ;;  %v8785_v34 = vcombine.low %v4376_v57, %v4380_v14  ;;  %v8474_v1 = vcombine.low %v8465_v20, %v8472_v32 }
 0x420   : > { %v8481_v33 = vrot.slane %v8473_v13, %v21885_v0  ;;  %v8786_v19 = vcombine.low %v4384_v61, %v4388_v39  ;;  %v6320_v58 = vrot.slane %v18090_v27, %v21875_v16  ;;  %v6324_v21 = vrot.slane %v18090_v27, %v21876_v28 }
 0x421   : > { %14150 = vperm.xlu0 %15756, %v18343_v51   ;;  %v8787_v62 = vcombine.low %v4392_v25, %v4396_v18  ;;  %v8794_v10 = vrot.slane %v8784_v7, %v21885_v0  ;;  %v8801_v12 = vrot.slane %v8785_v34, %v21885_v0  ;;  %v8488_v41 = vrot.slane %v8474_v1, %v21885_v0  ;;  %v18590_v7 = vpop.xlane.xlu1 %3429 }
 0x422   : > { %v8808_v36 = vrot.slane %v8786_v19, %v21885_v0  ;;  %v6328_v59 = vrot.slane %v18090_v27, %v21877_v38  ;;  %v6332_v35 = vrot.slane %v18090_v27, %v21878_v52  ;;  %v6336_v26 = vrot.slane %v18090_v27, %v21879_v60  ;;  %14171 = vperm.xlu1 %15757, %v18373_v30  }
 0x423   : > { %v8815_v51 = vrot.slane %v8787_v62, %v21885_v0  ;;  %v8816_v22 = vcombine.low %v8794_v10, %v8801_v12  ;;  %v6340_v20 = vrot.slane %v18090_v27, %v21880_v5  ;;  %v8489_v57 = vcombine.low %v8481_v33, %v8488_v41  ;;  %v18610_v41 = vpop.xlane.xlu0 %3559 }
 0x424   : > { %v6344_v14 = vrot.slane %v18090_v27, %v21881_v4  ;;  %v6348_v61 = vrot.slane %v18090_v27, %v21882_v63  ;;  %v11773_v32 = vcombine.low %v6320_v58, %v6324_v21  ;;  %v11774_v25 = vcombine.low %v6328_v59, %v6332_v35 }
 0x425   : > { %14354 = vperm.xlu0 %15756, %v18400_v48   ;;  %v8817_v13 = vcombine.low %v8808_v36, %v8815_v51  ;;  %v8824_v39 = vrot.slane %v8816_v22, %v21885_v0  ;;  %v11775_v18 = vcombine.low %v6336_v26, %v6340_v20  ;;  %v6544_v1 = vrot.slane %v18269_v40, %v21875_v16 }
 0x426   : > { %v11776_v34 = vcombine.low %v6344_v14, %v6348_v61  ;;  %v11783_v30 = vrot.slane %v11773_v32, %v21885_v0  ;;  %v6548_v33 = vrot.slane %v18269_v40, %v21876_v28  ;;  %v11790_v48 = vrot.slane %v11774_v25, %v21885_v0  ;;  %14375 = vperm.xlu1 %15757, %v18430_v44  }
 0x427   : > { %v8831_v27 = vrot.slane %v8817_v13, %v21885_v0  ;;  %v11797_v19 = vrot.slane %v11775_v18, %v21885_v0  ;;  %v6552_v58 = vrot.slane %v18269_v40, %v21877_v38  ;;  %v6556_v10 = vrot.slane %v18269_v40, %v21878_v52  ;;  %v18622_v13 = vpop.xlane.xlu1 %3565 }
 0x428   : > { %v11804_v62 = vrot.slane %v11776_v34, %v21885_v0  ;;  %v6560_v12 = vrot.slane %v18269_v40, %v21879_v60  ;;  %v6564_v21 = vrot.slane %v18269_v40, %v21880_v5  ;;  %v11805_v59 = vcombine.low %v11783_v30, %v11790_v48 }
 0x429   : > { %14168 = vperm.xlu0 %15756, %v18463_v11   ;;  %v8832_v36 = vcombine.low %v8824_v39, %v8831_v27  ;;  %v6568_v44 = vrot.slane %v18269_v40, %v21881_v4  ;;  %v6572_v35 = vrot.slane %v18269_v40, %v21882_v63  ;;  %v12116_v22 = vcombine.low %v6544_v1, %v6548_v33 }
 0x42a   : > { %v11806_v51 = vcombine.low %v11797_v19, %v11804_v62  ;;  %v12117_v26 = vcombine.low %v6552_v58, %v6556_v10  ;;  %v12118_v20 = vcombine.low %v6560_v12, %v6564_v21  ;;  %v11813_v14 = vrot.slane %v11805_v59, %v21885_v0  ;;  %14165 = vperm.xlu1 %15757, %v18494_v42  }
 0x42b   : > { %v12119_v61 = vcombine.low %v6568_v44, %v6572_v35  ;;  %v4336_v32 = vrot.slane %v18124_v8, %v21875_v16  ;;  %v4340_v11 = vrot.slane %v18124_v8, %v21876_v28  ;;  %v12126_v40 = vrot.slane %v12116_v22, %v21885_v0 }
 0x42c   : > { %v11820_v39 = vrot.slane %v11806_v51, %v21885_v0  ;;  %v12133_v25 = vrot.slane %v12117_v26, %v21885_v0  ;;  %v12140_v18 = vrot.slane %v12118_v20, %v21885_v0  ;;  %v4344_v30 = vrot.slane %v18124_v8, %v21877_v38  ;;  %v18654_v20 = vpop.xlane.xlu1 %3441 }
 0x42d   : > { %14372 = vperm.xlu0 %15756, %v18521_v49   ;;  %v12147_v34 = vrot.slane %v12119_v61, %v21885_v0  ;;  %v4348_v1 = vrot.slane %v18124_v8, %v21878_v52  ;;  %v4352_v42 = vrot.slane %v18124_v8, %v21879_v60  ;;  %v4356_v48 = vrot.slane %v18124_v8, %v21880_v5  ;;  %v18641_v49 = vpop.xlane.xlu0 %3435 }
 0x42e   : > { %v11821_v33 = vcombine.low %v11813_v14, %v11820_v39  ;;  %v12148_v27 = vcombine.low %v12126_v40, %v12133_v25  ;;  %v4360_v19 = vrot.slane %v18124_v8, %v21881_v4  ;;  %v4364_v62 = vrot.slane %v18124_v8, %v21882_v63  ;;  %14369 = vperm.xlu1 %15757, %v18550_v6  }
 0x42f   : > { %v12149_v58 = vcombine.low %v12140_v18, %v12147_v34  ;;  %v8735_v10 = vcombine.low %v4336_v32, %v4340_v11  ;;  %v8736_v12 = vcombine.low %v4344_v30, %v4348_v1  ;;  %v8737_v59 = vcombine.low %v4352_v42, %v4356_v48 }
 0x430   : > { %v12156_v21 = vrot.slane %v12148_v27, %v21885_v0  ;;  %v4304_v44 = vrot.slane %v18301_v46, %v21875_v16  ;;  %v4308_v35 = vrot.slane %v18301_v46, %v21876_v28  ;;  %v8738_v22 = vcombine.low %v4360_v19, %v4364_v62 }
 0x431   : > { %14162 = vperm.xlu0 %15756, %v8489_v57   ;;  %v12163_v51 = vrot.slane %v12149_v58, %v21885_v0  ;;  %v8745_v26 = vrot.slane %v8735_v10, %v21885_v0  ;;  %v8752_v8 = vrot.slane %v8736_v12, %v21885_v0  ;;  %v8759_v6 = vrot.slane %v8737_v59, %v21885_v0  ;;  %v18670_v1 = vpop.xlane.xlu0 %3571  ;;  %v18685_v59 = vpop.xlane.xlu1 %3577 }
 0x432   : > { %v4312_v14 = vrot.slane %v18301_v46, %v21877_v38  ;;  %v4316_v61 = vrot.slane %v18301_v46, %v21878_v52  ;;  %v4320_v57 = vrot.slane %v18301_v46, %v21879_v60  ;;  %v8766_v11 = vrot.slane %v8738_v22, %v21885_v0  ;;  %14183 = vperm.xlu1 %15757, %v8832_v36  }
 0x433   : > { %v12164_v32 = vcombine.low %v12156_v21, %v12163_v51  ;;  %v8767_v39 = vcombine.low %v8745_v26, %v8752_v8  ;;  %v4324_v40 = vrot.slane %v18301_v46, %v21880_v5  ;;  %v4328_v25 = vrot.slane %v18301_v46, %v21881_v4 }
 0x434   : > { %v4332_v18 = vrot.slane %v18301_v46, %v21882_v63  ;;  %v8686_v34 = vcombine.low %v4304_v44, %v4308_v35  ;;  %v8687_v30 = vcombine.low %v4312_v14, %v4316_v61  ;;  %v8768_v42 = vcombine.low %v8759_v6, %v8766_v11 }
 0x435   : > { %14366 = vperm.xlu0 %15756, %v11821_v33   ;;  %v8775_v27 = vrot.slane %v8767_v39, %v21885_v0  ;;  %v8688_v48 = vcombine.low %v4320_v57, %v4324_v40  ;;  %v6512_v19 = vrot.slane %v18158_v56, %v21875_v16  ;;  %v6516_v46 = vrot.slane %v18158_v56, %v21876_v28  ;;  %v18697_v39 = vpop.xlane.xlu0 %3431 }
 0x436   : > { %v8689_v58 = vcombine.low %v4328_v25, %v4332_v18  ;;  %v8696_v36 = vrot.slane %v8686_v34, %v21885_v0  ;;  %v8703_v62 = vrot.slane %v8687_v30, %v21885_v0  ;;  %v8782_v10 = vrot.slane %v8768_v42, %v21885_v0  ;;  %14387 = vperm.xlu1 %15757, %v12164_v32  }
 0x437   : > { %v8710_v12 = vrot.slane %v8688_v48, %v21885_v0  ;;  %v6520_v33 = vrot.slane %v18158_v56, %v21877_v38  ;;  %v6524_v21 = vrot.slane %v18158_v56, %v21878_v52  ;;  %v6528_v51 = vrot.slane %v18158_v56, %v21879_v60 }
 0x438   : > { %v8717_v44 = vrot.slane %v8689_v58, %v21885_v0  ;;  %v8718_v35 = vcombine.low %v8696_v36, %v8703_v62  ;;  %v6532_v22 = vrot.slane %v18158_v56, %v21880_v5  ;;  %v8783_v26 = vcombine.low %v8775_v27, %v8782_v10 }
 0x439   : > { %v6536_v8 = vrot.slane %v18158_v56, %v21881_v4  ;;  %v6540_v6 = vrot.slane %v18158_v56, %v21882_v63  ;;  %v12067_v14 = vcombine.low %v6512_v19, %v6516_v46  ;;  %v12068_v32 = vcombine.low %v6520_v33, %v6524_v21 }
 0x43a   : > { %v8719_v61 = vcombine.low %v8710_v12, %v8717_v44  ;;  %v8726_v57 = vrot.slane %v8718_v35, %v21885_v0  ;;  %v12069_v11 = vcombine.low %v6528_v51, %v6532_v22  ;;  %14180 = vperm.xlu0 %15756, %v8783_v26   ;;  %v6480_v18 = vrot.slane %v18336_v29, %v21875_v16  ;;  %v18720_v51 = vpop.xlane.xlu1 %3437 }
 0x43b   : > { %v12070_v40 = vcombine.low %v6536_v8, %v6540_v6  ;;  %v12077_v25 = vrot.slane %v12067_v14, %v21885_v0  ;;  %v6484_v34 = vrot.slane %v18336_v29, %v21876_v28  ;;  %v12084_v30 = vrot.slane %v12068_v32, %v21885_v0 }
 0x43c   : > { %v8733_v56 = vrot.slane %v8719_v61, %v21885_v0  ;;  %v12091_v42 = vrot.slane %v12069_v11, %v21885_v0  ;;  %v6488_v27 = vrot.slane %v18336_v29, %v21877_v38  ;;  %v6492_v19 = vrot.slane %v18336_v29, %v21878_v52 }
 0x43d   : > { %v12098_v48 = vrot.slane %v12070_v40, %v21885_v0  ;;  %v6496_v58 = vrot.slane %v18336_v29, %v21879_v60  ;;  %v6500_v36 = vrot.slane %v18336_v29, %v21880_v5  ;;  %v12099_v46 = vcombine.low %v12077_v25, %v12084_v30 }
 0x43e   : > { %v8734_v62 = vcombine.low %v8726_v57, %v8733_v56  ;;  %v6504_v10 = vrot.slane %v18336_v29, %v21881_v4  ;;  %v6508_v12 = vrot.slane %v18336_v29, %v21882_v63  ;;  %v12018_v21 = vcombine.low %v6480_v18, %v6484_v34 }
 0x43f   : > { %v12100_v33 = vcombine.low %v12091_v42, %v12098_v48  ;;  %v12019_v44 = vcombine.low %v6488_v27, %v6492_v19  ;;  %v12020_v35 = vcombine.low %v6496_v58, %v6500_v36  ;;  %v12107_v22 = vrot.slane %v12099_v46, %v21885_v0  ;;  %v18744_v58 = vpop.xlane.xlu0 %3567 }
 0x440   : > { %14177 = vperm.xlu1 %15757, %v8734_v62   ;;  %v12021_v26 = vcombine.low %v6504_v10, %v6508_v12  ;;  %v4272_v8 = vrot.slane %v18190_v45, %v21875_v16  ;;  %v4276_v6 = vrot.slane %v18190_v45, %v21876_v28  ;;  %v12028_v29 = vrot.slane %v12018_v21, %v21885_v0 }
 0x441   : > { %v12114_v14 = vrot.slane %v12100_v33, %v21885_v0  ;;  %v12035_v61 = vrot.slane %v12019_v44, %v21885_v0  ;;  %v12042_v57 = vrot.slane %v12020_v35, %v21885_v0  ;;  %v4280_v11 = vrot.slane %v18190_v45, %v21877_v38 }
 0x442   : > { %v12049_v32 = vrot.slane %v12021_v26, %v21885_v0  ;;  %v4284_v40 = vrot.slane %v18190_v45, %v21878_v52  ;;  %v4288_v25 = vrot.slane %v18190_v45, %v21879_v60  ;;  %v4292_v56 = vrot.slane %v18190_v45, %v21880_v5 }
 0x443   : > { %v12115_v18 = vcombine.low %v12107_v22, %v12114_v14  ;;  %v12050_v34 = vcombine.low %v12028_v29, %v12035_v61  ;;  %v4296_v30 = vrot.slane %v18190_v45, %v21881_v4  ;;  %v4300_v27 = vrot.slane %v18190_v45, %v21882_v63 }
 0x444   : > { %v12051_v42 = vcombine.low %v12042_v57, %v12049_v32  ;;  %v8637_v48 = vcombine.low %v4272_v8, %v4276_v6  ;;  %v8638_v19 = vcombine.low %v4280_v11, %v4284_v40  ;;  %v8639_v62 = vcombine.low %v4288_v25, %v4292_v56  ;;  %v18768_v40 = vpop.xlane.xlu1 %3573  ;;  %v21928_v56 = vld [vmem:[#allocation27_spill] sm:$0xff] }
 0x445   : > { %14384 = vperm.xlu0 %15756, %v12115_v18   ;;  %v12058_v36 = vrot.slane %v12050_v34, %v21885_v0  ;;  %v4496_v46 = vrot.slane %v18371_v54, %v21875_v16  ;;  %v4500_v10 = vrot.slane %v18371_v54, %v21876_v28  ;;  %v8640_v33 = vcombine.low %v4296_v30, %v4300_v27 }
 0x446   : > { %v12065_v12 = vrot.slane %v12051_v42, %v21885_v0  ;;  %v8647_v21 = vrot.slane %v8637_v48, %v21885_v0  ;;  %v8654_v45 = vrot.slane %v8638_v19, %v21885_v0  ;;  %v8661_v44 = vrot.slane %v8639_v62, %v21885_v0 }
 0x447   : > { %v4504_v35 = vrot.slane %v18371_v54, %v21877_v38  ;;  %v4508_v22 = vrot.slane %v18371_v54, %v21878_v52  ;;  %v4512_v26 = vrot.slane %v18371_v54, %v21879_v60  ;;  %v8668_v6 = vrot.slane %v8640_v33, %v21885_v0 }
 0x448   : > { %v12066_v8 = vcombine.low %v12058_v36, %v12065_v12  ;;  %v8669_v14 = vcombine.low %v8647_v21, %v8654_v45  ;;  %v4516_v29 = vrot.slane %v18371_v54, %v21880_v5  ;;  %v4520_v61 = vrot.slane %v18371_v54, %v21881_v4 }
 0x449   : > { %v4524_v57 = vrot.slane %v18371_v54, %v21882_v63  ;;  %v8980_v32 = vcombine.low %v4496_v46, %v4500_v10  ;;  %v8981_v11 = vcombine.low %v4504_v35, %v4508_v22  ;;  %v8670_v25 = vcombine.low %v8661_v44, %v8668_v6 }
 0x44a   : > { %14381 = vperm.xlu1 %15757, %v12066_v8   ;;  %v8677_v18 = vrot.slane %v8669_v14, %v21885_v0  ;;  %v8982_v34 = vcombine.low %v4512_v26, %v4516_v29  ;;  %v6448_v30 = vrot.slane %v21928_v56, %v21875_v16  ;;  %v6452_v54 = vrot.slane %v21928_v56, %v21876_v28  ;;  %v18793_v29 = vpop.xlane.xlu0 %3443 }
 0x44b   : > { %v8983_v42 = vcombine.low %v4520_v61, %v4524_v57  ;;  %v8990_v27 = vrot.slane %v8980_v32, %v21885_v0  ;;  %v8997_v48 = vrot.slane %v8981_v11, %v21885_v0  ;;  %v8684_v19 = vrot.slane %v8670_v25, %v21885_v0 }
 0x44c   : > { %v9004_v36 = vrot.slane %v8982_v34, %v21885_v0  ;;  %v6456_v62 = vrot.slane %v21928_v56, %v21877_v38  ;;  %v6460_v46 = vrot.slane %v21928_v56, %v21878_v52  ;;  %v6464_v33 = vrot.slane %v21928_v56, %v21879_v60 }
 0x44d   : > { %v9011_v10 = vrot.slane %v8983_v42, %v21885_v0  ;;  %v9012_v12 = vcombine.low %v8990_v27, %v8997_v48  ;;  %v6468_v21 = vrot.slane %v21928_v56, %v21880_v5  ;;  %v8685_v45 = vcombine.low %v8677_v18, %v8684_v19 }
 0x44e   : > { %v6472_v44 = vrot.slane %v21928_v56, %v21881_v4  ;;  %v6476_v35 = vrot.slane %v21928_v56, %v21882_v63  ;;  %v11969_v22 = vcombine.low %v6448_v30, %v6452_v54  ;;  %v11970_v6 = vcombine.low %v6456_v62, %v6460_v46 }
 0x44f   : > { %v9013_v26 = vcombine.low %v9004_v36, %v9011_v10  ;;  %v9020_v8 = vrot.slane %v9012_v12, %v21885_v0  ;;  %v11971_v14 = vcombine.low %v6464_v33, %v6468_v21  ;;  %14174 = vperm.xlu0 %15756, %v8685_v45   ;;  %v6672_v32 = vrot.slane %v18406_v31, %v21875_v16  ;;  %v18816_v21 = vpop.xlane.xlu1 %3449 }
 0x450   : > { %v11972_v61 = vcombine.low %v6472_v44, %v6476_v35  ;;  %v11979_v57 = vrot.slane %v11969_v22, %v21885_v0  ;;  %v6676_v11 = vrot.slane %v18406_v31, %v21876_v28  ;;  %v11986_v18 = vrot.slane %v11970_v6, %v21885_v0  ;;  %v21929_v35 = vld [vmem:[#allocation34_spill] sm:$0xff] }
 0x451   : > { %v9027_v25 = vrot.slane %v9013_v26, %v21885_v0  ;;  %v11993_v34 = vrot.slane %v11971_v14, %v21885_v0  ;;  %v6680_v56 = vrot.slane %v18406_v31, %v21877_v38  ;;  %v6684_v42 = vrot.slane %v18406_v31, %v21878_v52 }
 0x452   : > { %v12000_v30 = vrot.slane %v11972_v61, %v21885_v0  ;;  %v6688_v27 = vrot.slane %v18406_v31, %v21879_v60  ;;  %v6692_v48 = vrot.slane %v18406_v31, %v21880_v5  ;;  %v12001_v19 = vcombine.low %v11979_v57, %v11986_v18 }
 0x453   : > { %v9028_v54 = vcombine.low %v9020_v8, %v9027_v25  ;;  %v6696_v36 = vrot.slane %v18406_v31, %v21881_v4  ;;  %v6700_v62 = vrot.slane %v18406_v31, %v21882_v63  ;;  %v12312_v10 = vcombine.low %v6672_v32, %v6676_v11 }
 0x454   : > { %v12002_v46 = vcombine.low %v11993_v34, %v12000_v30  ;;  %v12313_v12 = vcombine.low %v6680_v56, %v6684_v42  ;;  %v12314_v33 = vcombine.low %v6688_v27, %v6692_v48  ;;  %v12009_v45 = vrot.slane %v12001_v19, %v21885_v0 }
 0x455   : > { %14195 = vperm.xlu1 %15757, %v9028_v54   ;;  %v12315_v44 = vcombine.low %v6696_v36, %v6700_v62  ;;  %v4464_v22 = vrot.slane %v21929_v35, %v21875_v16  ;;  %v4468_v26 = vrot.slane %v21929_v35, %v21876_v28  ;;  %v12322_v31 = vrot.slane %v12312_v10, %v21885_v0  ;;  %v18840_v54 = vpop.xlane.xlu0 %3579 }
 0x456   : > { %v12016_v8 = vrot.slane %v12002_v46, %v21885_v0  ;;  %v12329_v6 = vrot.slane %v12313_v12, %v21885_v0  ;;  %v12336_v14 = vrot.slane %v12314_v33, %v21885_v0  ;;  %v4472_v57 = vrot.slane %v21929_v35, %v21877_v38 }
 0x457   : > { %v12343_v61 = vrot.slane %v12315_v44, %v21885_v0  ;;  %v4476_v32 = vrot.slane %v21929_v35, %v21878_v52  ;;  %v4480_v11 = vrot.slane %v21929_v35, %v21879_v60  ;;  %v4484_v34 = vrot.slane %v21929_v35, %v21880_v5 }
 0x458   : > { %v12017_v25 = vcombine.low %v12009_v45, %v12016_v8  ;;  %v12344_v18 = vcombine.low %v12322_v31, %v12329_v6  ;;  %v4488_v56 = vrot.slane %v21929_v35, %v21881_v4  ;;  %v4492_v42 = vrot.slane %v21929_v35, %v21882_v63 }
 0x459   : > { %v12345_v30 = vcombine.low %v12336_v14, %v12343_v61  ;;  %v8931_v27 = vcombine.low %v4464_v22, %v4468_v26  ;;  %v8932_v48 = vcombine.low %v4472_v57, %v4476_v32  ;;  %v8933_v36 = vcombine.low %v4480_v11, %v4484_v34 }
 0x45a   : > { %14378 = vperm.xlu0 %15756, %v12017_v25   ;;  %v12352_v19 = vrot.slane %v12344_v18, %v21885_v0  ;;  %v4432_v62 = vrot.slane %v18439_v24, %v21875_v16  ;;  %v4436_v46 = vrot.slane %v18439_v24, %v21876_v28  ;;  %v8934_v12 = vcombine.low %v4488_v56, %v4492_v42  ;;  %v18864_v25 = vpop.xlane.xlu1 %3585 }
 0x45b   : > { %v12359_v10 = vrot.slane %v12345_v30, %v21885_v0  ;;  %v8941_v33 = vrot.slane %v8931_v27, %v21885_v0  ;;  %v8948_v45 = vrot.slane %v8932_v48, %v21885_v0  ;;  %v8955_v44 = vrot.slane %v8933_v36, %v21885_v0  ;;  %v21930_v30 = vld [vmem:[#allocation78_spill] sm:$0xff] }
 0x45c   : > { %v4440_v35 = vrot.slane %v18439_v24, %v21877_v38  ;;  %v4444_v22 = vrot.slane %v18439_v24, %v21878_v52  ;;  %v4448_v26 = vrot.slane %v18439_v24, %v21879_v60  ;;  %v8962_v31 = vrot.slane %v8934_v12, %v21885_v0 }
 0x45d   : > { %v12360_v8 = vcombine.low %v12352_v19, %v12359_v10  ;;  %v8963_v6 = vcombine.low %v8941_v33, %v8948_v45  ;;  %v4452_v14 = vrot.slane %v18439_v24, %v21880_v5  ;;  %v4456_v61 = vrot.slane %v18439_v24, %v21881_v4 }
 0x45e   : > { %v4460_v57 = vrot.slane %v18439_v24, %v21882_v63  ;;  %v8882_v32 = vcombine.low %v4432_v62, %v4436_v46  ;;  %v8883_v11 = vcombine.low %v4440_v35, %v4444_v22  ;;  %v8964_v18 = vcombine.low %v8955_v44, %v8962_v31 }
 0x45f   : > { %14399 = vperm.xlu1 %15757, %v12360_v8   ;;  %v8971_v34 = vrot.slane %v8963_v6, %v21885_v0  ;;  %v8884_v56 = vcombine.low %v4448_v26, %v4452_v14  ;;  %v6640_v42 = vrot.slane %v21930_v30, %v21875_v16  ;;  %v6644_v24 = vrot.slane %v21930_v30, %v21876_v28 }
 0x460   : > { %v8885_v27 = vcombine.low %v4456_v61, %v4460_v57  ;;  %v8892_v48 = vrot.slane %v8882_v32, %v21885_v0  ;;  %v8899_v19 = vrot.slane %v8883_v11, %v21885_v0  ;;  %v8978_v36 = vrot.slane %v8964_v18, %v21885_v0  ;;  %v18889_v57 = vpop.xlane.xlu0 %3439 }
 0x461   : > { %v8906_v62 = vrot.slane %v8884_v56, %v21885_v0  ;;  %v6648_v46 = vrot.slane %v21930_v30, %v21877_v38  ;;  %v6652_v10 = vrot.slane %v21930_v30, %v21878_v52  ;;  %v6656_v45 = vrot.slane %v21930_v30, %v21879_v60 }
 0x462   : > { %v8913_v12 = vrot.slane %v8885_v27, %v21885_v0  ;;  %v8914_v33 = vcombine.low %v8892_v48, %v8899_v19  ;;  %v6660_v44 = vrot.slane %v21930_v30, %v21880_v5  ;;  %v8979_v35 = vcombine.low %v8971_v34, %v8978_v36 }
 0x463   : > { %v6664_v22 = vrot.slane %v21930_v30, %v21881_v4  ;;  %v6668_v26 = vrot.slane %v21930_v30, %v21882_v63  ;;  %v12263_v8 = vcombine.low %v6640_v42, %v6644_v24  ;;  %v12264_v14 = vcombine.low %v6648_v46, %v6652_v10 }
 0x464   : > { %v8915_v31 = vcombine.low %v8906_v62, %v8913_v12  ;;  %v8922_v6 = vrot.slane %v8914_v33, %v21885_v0  ;;  %v12265_v61 = vcombine.low %v6656_v45, %v6660_v44  ;;  %14192 = vperm.xlu0 %15756, %v8979_v35   ;;  %v6608_v18 = vrot.slane %v18471_v37, %v21875_v16 }
 0x465   : > { %v12266_v32 = vcombine.low %v6664_v22, %v6668_v26  ;;  %v12273_v11 = vrot.slane %v12263_v8, %v21885_v0  ;;  %v6612_v34 = vrot.slane %v18471_v37, %v21876_v28  ;;  %v12280_v30 = vrot.slane %v12264_v14, %v21885_v0  ;;  %v18912_v22 = vpop.xlane.xlu1 %3445 }
 0x466   : > { %v8929_v56 = vrot.slane %v8915_v31, %v21885_v0  ;;  %v12287_v42 = vrot.slane %v12265_v61, %v21885_v0  ;;  %v6616_v27 = vrot.slane %v18471_v37, %v21877_v38  ;;  %v6620_v19 = vrot.slane %v18471_v37, %v21878_v52 }
 0x467   : > { %v12294_v48 = vrot.slane %v12266_v32, %v21885_v0  ;;  %v6624_v24 = vrot.slane %v18471_v37, %v21879_v60  ;;  %v6628_v36 = vrot.slane %v18471_v37, %v21880_v5  ;;  %v12295_v46 = vcombine.low %v12273_v11, %v12280_v30 }
 0x468   : > { %v8930_v62 = vcombine.low %v8922_v6, %v8929_v56  ;;  %v6632_v10 = vrot.slane %v18471_v37, %v21881_v4  ;;  %v6636_v12 = vrot.slane %v18471_v37, %v21882_v63  ;;  %v12214_v45 = vcombine.low %v6608_v18, %v6612_v34 }
 0x469   : > { %v12296_v33 = vcombine.low %v12287_v42, %v12294_v48  ;;  %v12215_v44 = vcombine.low %v6616_v27, %v6620_v19  ;;  %v12216_v35 = vcombine.low %v6624_v24, %v6628_v36  ;;  %v12303_v26 = vrot.slane %v12295_v46, %v21885_v0  ;;  %v18936_v46 = vpop.xlane.xlu0 %3575 }
 0x46a   : > { %14189 = vperm.xlu1 %15757, %v8930_v62   ;;  %v12217_v8 = vcombine.low %v6632_v10, %v6636_v12  ;;  %v4400_v31 = vrot.slane %v18320_v50, %v21875_v16  ;;  %v4404_v6 = vrot.slane %v18320_v50, %v21876_v28  ;;  %v12224_v37 = vrot.slane %v12214_v45, %v21885_v0 }
 0x46b   : > { %v12310_v14 = vrot.slane %v12296_v33, %v21885_v0  ;;  %v12231_v61 = vrot.slane %v12215_v44, %v21885_v0  ;;  %v12238_v32 = vrot.slane %v12216_v35, %v21885_v0  ;;  %v4408_v18 = vrot.slane %v18320_v50, %v21877_v38 }
 0x46c   : > { %v12245_v11 = vrot.slane %v12217_v8, %v21885_v0  ;;  %v4412_v34 = vrot.slane %v18320_v50, %v21878_v52  ;;  %v4416_v56 = vrot.slane %v18320_v50, %v21879_v60  ;;  %v4420_v27 = vrot.slane %v18320_v50, %v21880_v5 }
 0x46d   : > { %v12311_v30 = vcombine.low %v12303_v26, %v12310_v14  ;;  %v12246_v42 = vcombine.low %v12224_v37, %v12231_v61  ;;  %v4424_v48 = vrot.slane %v18320_v50, %v21881_v4  ;;  %v4428_v24 = vrot.slane %v18320_v50, %v21882_v63 }
 0x46e   : > { %v12247_v19 = vcombine.low %v12238_v32, %v12245_v11  ;;  %v8833_v36 = vcombine.low %v4400_v31, %v4404_v6  ;;  %v8834_v62 = vcombine.low %v4408_v18, %v4412_v34  ;;  %v8835_v12 = vcombine.low %v4416_v56, %v4420_v27 }
 0x46f   : > { %14396 = vperm.xlu0 %15756, %v12311_v30   ;;  %v12254_v10 = vrot.slane %v12246_v42, %v21885_v0  ;;  %v4624_v33 = vrot.slane %v18506_v47, %v21875_v16  ;;  %v4628_v45 = vrot.slane %v18506_v47, %v21876_v28  ;;  %v8836_v35 = vcombine.low %v4424_v48, %v4428_v24  ;;  %v18960_v42 = vpop.xlane.xlu1 %3581 }
 0x470   : > { %v12261_v44 = vrot.slane %v12247_v19, %v21885_v0  ;;  %v8843_v26 = vrot.slane %v8833_v36, %v21885_v0  ;;  %v8850_v50 = vrot.slane %v8834_v62, %v21885_v0  ;;  %v8857_v8 = vrot.slane %v8835_v12, %v21885_v0 }
 0x471   : > { %v4632_v31 = vrot.slane %v18506_v47, %v21877_v38  ;;  %v4636_v6 = vrot.slane %v18506_v47, %v21878_v52  ;;  %v4640_v14 = vrot.slane %v18506_v47, %v21879_v60  ;;  %v8864_v61 = vrot.slane %v8836_v35, %v21885_v0 }
 0x472   : > { %v12262_v37 = vcombine.low %v12254_v10, %v12261_v44  ;;  %v8865_v32 = vcombine.low %v8843_v26, %v8850_v50  ;;  %v4644_v11 = vrot.slane %v18506_v47, %v21880_v5  ;;  %v4648_v18 = vrot.slane %v18506_v47, %v21881_v4 }
 0x473   : > { %v4652_v34 = vrot.slane %v18506_v47, %v21882_v63  ;;  %v9176_v56 = vcombine.low %v4624_v33, %v4628_v45  ;;  %v9177_v30 = vcombine.low %v4632_v31, %v4636_v6  ;;  %v8866_v27 = vcombine.low %v8857_v8, %v8864_v61 }
 0x474   : > { %14393 = vperm.xlu1 %15757, %v12262_v37   ;;  %v8873_v48 = vrot.slane %v8865_v32, %v21885_v0  ;;  %v9178_v19 = vcombine.low %v4640_v14, %v4644_v11  ;;  %v6576_v24 = vrot.slane %v18350_v15, %v21875_v16  ;;  %v6580_v47 = vrot.slane %v18350_v15, %v21876_v28 }
 0x475   : > { %v9179_v36 = vcombine.low %v4648_v18, %v4652_v34  ;;  %v9186_v62 = vrot.slane %v9176_v56, %v21885_v0  ;;  %v9193_v10 = vrot.slane %v9177_v30, %v21885_v0  ;;  %v8880_v12 = vrot.slane %v8866_v27, %v21885_v0  ;;  %v18985_v34 = vpop.xlane.xlu0 %3451 }
 0x476   : > { %v9200_v33 = vrot.slane %v9178_v19, %v21885_v0  ;;  %v6584_v45 = vrot.slane %v18350_v15, %v21877_v38  ;;  %v6588_v44 = vrot.slane %v18350_v15, %v21878_v52  ;;  %v6592_v50 = vrot.slane %v18350_v15, %v21879_v60 }
 0x477   : > { %v9207_v35 = vrot.slane %v9179_v36, %v21885_v0  ;;  %v9208_v26 = vcombine.low %v9186_v62, %v9193_v10  ;;  %v6596_v8 = vrot.slane %v18350_v15, %v21880_v5  ;;  %v8881_v31 = vcombine.low %v8873_v48, %v8880_v12 }
 0x478   : > { %v6600_v6 = vrot.slane %v18350_v15, %v21881_v4  ;;  %v6604_v14 = vrot.slane %v18350_v15, %v21882_v63  ;;  %v12165_v37 = vcombine.low %v6576_v24, %v6580_v47  ;;  %v12166_v11 = vcombine.low %v6584_v45, %v6588_v44 }
 0x479   : > { %v9209_v61 = vcombine.low %v9200_v33, %v9207_v35  ;;  %v9216_v32 = vrot.slane %v9208_v26, %v21885_v0  ;;  %v12167_v18 = vcombine.low %v6592_v50, %v6596_v8  ;;  %14186 = vperm.xlu0 %15756, %v8881_v31   ;;  %v6800_v27 = vrot.slane %v18540_v17, %v21875_v16 }
 0x47a   : > { %v12168_v56 = vcombine.low %v6600_v6, %v6604_v14  ;;  %v12175_v30 = vrot.slane %v12165_v37, %v21885_v0  ;;  %v6804_v48 = vrot.slane %v18540_v17, %v21876_v28  ;;  %v12182_v19 = vrot.slane %v12166_v11, %v21885_v0  ;;  %v19008_v6 = vpop.xlane.xlu1 %3457 }
 0x47b   : > { %v9223_v15 = vrot.slane %v9209_v61, %v21885_v0  ;;  %v12189_v24 = vrot.slane %v12167_v18, %v21885_v0  ;;  %v6808_v36 = vrot.slane %v18540_v17, %v21877_v38  ;;  %v6812_v10 = vrot.slane %v18540_v17, %v21878_v52 }
 0x47c   : > { %v12196_v62 = vrot.slane %v12168_v56, %v21885_v0  ;;  %v6816_v47 = vrot.slane %v18540_v17, %v21879_v60  ;;  %v6820_v12 = vrot.slane %v18540_v17, %v21880_v5  ;;  %v12197_v45 = vcombine.low %v12175_v30, %v12182_v19 }
 0x47d   : > { %v9224_v33 = vcombine.low %v9216_v32, %v9223_v15  ;;  %v6824_v44 = vrot.slane %v18540_v17, %v21881_v4  ;;  %v6828_v35 = vrot.slane %v18540_v17, %v21882_v63  ;;  %v12508_v50 = vcombine.low %v6800_v27, %v6804_v48 }
 0x47e   : > { %v12198_v26 = vcombine.low %v12189_v24, %v12196_v62  ;;  %v12509_v8 = vcombine.low %v6808_v36, %v6812_v10  ;;  %v12510_v31 = vcombine.low %v6816_v47, %v6820_v12  ;;  %v12205_v14 = vrot.slane %v12197_v45, %v21885_v0  ;;  %v19032_v45 = vpop.xlane.xlu0 %3587 }
 0x47f   : > { %14207 = vperm.xlu1 %15757, %v9224_v33   ;;  %v12511_v37 = vcombine.low %v6824_v44, %v6828_v35  ;;  %v4592_v61 = vrot.slane %v18386_v3, %v21875_v16  ;;  %v4596_v32 = vrot.slane %v18386_v3, %v21876_v28  ;;  %v12518_v17 = vrot.slane %v12508_v50, %v21885_v0 }
 0x480   : > { %v12212_v11 = vrot.slane %v12198_v26, %v21885_v0  ;;  %v12525_v18 = vrot.slane %v12509_v8, %v21885_v0  ;;  %v12532_v56 = vrot.slane %v12510_v31, %v21885_v0  ;;  %v4600_v27 = vrot.slane %v18386_v3, %v21877_v38 }
 0x481   : > { %v12539_v30 = vrot.slane %v12511_v37, %v21885_v0  ;;  %v4604_v48 = vrot.slane %v18386_v3, %v21878_v52  ;;  %v4608_v15 = vrot.slane %v18386_v3, %v21879_v60  ;;  %v4612_v36 = vrot.slane %v18386_v3, %v21880_v5 }
 0x482   : > { %v12213_v19 = vcombine.low %v12205_v14, %v12212_v11  ;;  %v12540_v24 = vcombine.low %v12518_v17, %v12525_v18  ;;  %v4616_v62 = vrot.slane %v18386_v3, %v21881_v4  ;;  %v4620_v47 = vrot.slane %v18386_v3, %v21882_v63 }
 0x483   : > { %v12541_v10 = vcombine.low %v12532_v56, %v12539_v30  ;;  %v9127_v12 = vcombine.low %v4592_v61, %v4596_v32  ;;  %v9128_v33 = vcombine.low %v4600_v27, %v4604_v48  ;;  %v9129_v35 = vcombine.low %v4608_v15, %v4612_v36 }
 0x484   : > { %14390 = vperm.xlu0 %15756, %v12213_v19   ;;  %v12548_v44 = vrot.slane %v12540_v24, %v21885_v0  ;;  %v4560_v26 = vrot.slane %v18576_v23, %v21875_v16  ;;  %v4564_v50 = vrot.slane %v18576_v23, %v21876_v28  ;;  %v9130_v31 = vcombine.low %v4616_v62, %v4620_v47  ;;  %v19056_v24 = vpop.xlane.xlu1 %3593 }
 0x485   : > { %v12555_v8 = vrot.slane %v12541_v10, %v21885_v0  ;;  %v9137_v14 = vrot.slane %v9127_v12, %v21885_v0  ;;  %v9144_v3 = vrot.slane %v9128_v33, %v21885_v0  ;;  %v9151_v37 = vrot.slane %v9129_v35, %v21885_v0  ;;  %21931 = vst [vmem:[#allocation32_spill] sm:$0xff] %v19056_v24 }
 0x486   : > { %v4568_v61 = vrot.slane %v18576_v23, %v21877_v38  ;;  %v4572_v32 = vrot.slane %v18576_v23, %v21878_v52  ;;  %v4576_v11 = vrot.slane %v18576_v23, %v21879_v60  ;;  %v9158_v18 = vrot.slane %v9130_v31, %v21885_v0 }
 0x487   : > { %v12556_v17 = vcombine.low %v12548_v44, %v12555_v8  ;;  %v9159_v56 = vcombine.low %v9137_v14, %v9144_v3  ;;  %v4580_v30 = vrot.slane %v18576_v23, %v21880_v5  ;;  %v4584_v27 = vrot.slane %v18576_v23, %v21881_v4 }
 0x488   : > { %v4588_v48 = vrot.slane %v18576_v23, %v21882_v63  ;;  %v9078_v15 = vcombine.low %v4560_v26, %v4564_v50  ;;  %v9079_v19 = vcombine.low %v4568_v61, %v4572_v32  ;;  %v9160_v36 = vcombine.low %v9151_v37, %v9158_v18 }
 0x489   : > { %14411 = vperm.xlu1 %15757, %v12556_v17   ;;  %v9167_v62 = vrot.slane %v9159_v56, %v21885_v0  ;;  %v9080_v10 = vcombine.low %v4576_v11, %v4580_v30  ;;  %v6768_v47 = vrot.slane %v18419_v53, %v21875_v16  ;;  %v6772_v23 = vrot.slane %v18419_v53, %v21876_v28 }
 0x48a   : > { %v9081_v12 = vcombine.low %v4584_v27, %v4588_v48  ;;  %v9088_v33 = vrot.slane %v9078_v15, %v21885_v0  ;;  %v9095_v44 = vrot.slane %v9079_v19, %v21885_v0  ;;  %v9174_v35 = vrot.slane %v9160_v36, %v21885_v0  ;;  %v19081_v48 = vpop.xlane.xlu0 %3447 }
 0x48b   : > { %v9102_v26 = vrot.slane %v9080_v10, %v21885_v0  ;;  %v6776_v50 = vrot.slane %v18419_v53, %v21877_v38  ;;  %v6780_v8 = vrot.slane %v18419_v53, %v21878_v52  ;;  %v6784_v3 = vrot.slane %v18419_v53, %v21879_v60 }
 0x48c   : > { %v9109_v31 = vrot.slane %v9081_v12, %v21885_v0  ;;  %v9110_v14 = vcombine.low %v9088_v33, %v9095_v44  ;;  %v6788_v37 = vrot.slane %v18419_v53, %v21880_v5  ;;  %v9175_v61 = vcombine.low %v9167_v62, %v9174_v35 }
 0x48d   : > { %v6792_v32 = vrot.slane %v18419_v53, %v21881_v4  ;;  %v6796_v11 = vrot.slane %v18419_v53, %v21882_v63  ;;  %v12459_v17 = vcombine.low %v6768_v47, %v6772_v23  ;;  %v12460_v30 = vcombine.low %v6776_v50, %v6780_v8 }
 0x48e   : > { %v9111_v18 = vcombine.low %v9102_v26, %v9109_v31  ;;  %v9118_v56 = vrot.slane %v9110_v14, %v21885_v0  ;;  %v12461_v27 = vcombine.low %v6784_v3, %v6788_v37  ;;  %14204 = vperm.xlu0 %15756, %v9175_v61   ;;  %v6736_v36 = vrot.slane %v18610_v41, %v21875_v16 }
 0x48f   : > { %v12462_v15 = vcombine.low %v6792_v32, %v6796_v11  ;;  %v12469_v19 = vrot.slane %v12459_v17, %v21885_v0  ;;  %v6740_v62 = vrot.slane %v18610_v41, %v21876_v28  ;;  %v12476_v10 = vrot.slane %v12460_v30, %v21885_v0  ;;  %v19104_v32 = vpop.xlane.xlu1 %3453 }
 0x490   : > { %v9125_v53 = vrot.slane %v9111_v18, %v21885_v0  ;;  %v12483_v47 = vrot.slane %v12461_v27, %v21885_v0  ;;  %v6744_v12 = vrot.slane %v18610_v41, %v21877_v38  ;;  %v6748_v44 = vrot.slane %v18610_v41, %v21878_v52 }
 0x491   : > { %v12490_v33 = vrot.slane %v12462_v15, %v21885_v0  ;;  %v6752_v23 = vrot.slane %v18610_v41, %v21879_v60  ;;  %v6756_v35 = vrot.slane %v18610_v41, %v21880_v5  ;;  %v12491_v50 = vcombine.low %v12469_v19, %v12476_v10 }
 0x492   : > { %v9126_v26 = vcombine.low %v9118_v56, %v9125_v53  ;;  %v6760_v8 = vrot.slane %v18610_v41, %v21881_v4  ;;  %v6764_v31 = vrot.slane %v18610_v41, %v21882_v63  ;;  %v12410_v3 = vcombine.low %v6736_v36, %v6740_v62 }
 0x493   : > { %v12492_v14 = vcombine.low %v12483_v47, %v12490_v33  ;;  %v12411_v37 = vcombine.low %v6744_v12, %v6748_v44  ;;  %v12412_v61 = vcombine.low %v6752_v23, %v6756_v35  ;;  %v12499_v11 = vrot.slane %v12491_v50, %v21885_v0  ;;  %v19128_v50 = vpop.xlane.xlu0 %3583 }
 0x494   : > { %14201 = vperm.xlu1 %15757, %v9126_v26   ;;  %v12413_v17 = vcombine.low %v6760_v8, %v6764_v31  ;;  %v4528_v18 = vrot.slane %v18456_v43, %v21875_v16  ;;  %v4532_v56 = vrot.slane %v18456_v43, %v21876_v28  ;;  %v12420_v41 = vrot.slane %v12410_v3, %v21885_v0 }
 0x495   : > { %v12506_v30 = vrot.slane %v12492_v14, %v21885_v0  ;;  %v12427_v27 = vrot.slane %v12411_v37, %v21885_v0  ;;  %v12434_v15 = vrot.slane %v12412_v61, %v21885_v0  ;;  %v4536_v36 = vrot.slane %v18456_v43, %v21877_v38 }
 0x496   : > { %v12441_v19 = vrot.slane %v12413_v17, %v21885_v0  ;;  %v4540_v62 = vrot.slane %v18456_v43, %v21878_v52  ;;  %v4544_v53 = vrot.slane %v18456_v43, %v21879_v60  ;;  %v4548_v12 = vrot.slane %v18456_v43, %v21880_v5 }
 0x497   : > { %v12507_v10 = vcombine.low %v12499_v11, %v12506_v30  ;;  %v12442_v47 = vcombine.low %v12420_v41, %v12427_v27  ;;  %v4552_v33 = vrot.slane %v18456_v43, %v21881_v4  ;;  %v4556_v23 = vrot.slane %v18456_v43, %v21882_v63 }
 0x498   : > { %v12443_v44 = vcombine.low %v12434_v15, %v12441_v19  ;;  %v9029_v35 = vcombine.low %v4528_v18, %v4532_v56  ;;  %v9030_v26 = vcombine.low %v4536_v36, %v4540_v62  ;;  %v9031_v31 = vcombine.low %v4544_v53, %v4548_v12 }
 0x499   : > { %14408 = vperm.xlu0 %15756, %v12507_v10   ;;  %v12450_v8 = vrot.slane %v12442_v47, %v21885_v0  ;;  %v4752_v14 = vrot.slane %v18641_v49, %v21875_v16  ;;  %v4756_v3 = vrot.slane %v18641_v49, %v21876_v28  ;;  %v9032_v61 = vcombine.low %v4552_v33, %v4556_v23  ;;  %v19152_v47 = vpop.xlane.xlu1 %3589 }
 0x49a   : > { %v12457_v37 = vrot.slane %v12443_v44, %v21885_v0  ;;  %v9039_v11 = vrot.slane %v9029_v35, %v21885_v0  ;;  %v9046_v43 = vrot.slane %v9030_v26, %v21885_v0  ;;  %v9053_v17 = vrot.slane %v9031_v31, %v21885_v0  ;;  %21932 = vst [vmem:[#allocation9_spill] sm:$0xff] %v19152_v47 }
 0x49b   : > { %v4760_v18 = vrot.slane %v18641_v49, %v21877_v38  ;;  %v4764_v56 = vrot.slane %v18641_v49, %v21878_v52  ;;  %v4768_v30 = vrot.slane %v18641_v49, %v21879_v60  ;;  %v9060_v27 = vrot.slane %v9032_v61, %v21885_v0 }
 0x49c   : > { %v12458_v41 = vcombine.low %v12450_v8, %v12457_v37  ;;  %v9061_v15 = vcombine.low %v9039_v11, %v9046_v43  ;;  %v4772_v19 = vrot.slane %v18641_v49, %v21880_v5  ;;  %v4776_v36 = vrot.slane %v18641_v49, %v21881_v4 }
 0x49d   : > { %v4780_v62 = vrot.slane %v18641_v49, %v21882_v63  ;;  %v9372_v53 = vcombine.low %v4752_v14, %v4756_v3  ;;  %v9373_v10 = vcombine.low %v4760_v18, %v4764_v56  ;;  %v9062_v12 = vcombine.low %v9053_v17, %v9060_v27 }
 0x49e   : > { %14405 = vperm.xlu1 %15757, %v12458_v41   ;;  %v9069_v33 = vrot.slane %v9061_v15, %v21885_v0  ;;  %v9374_v44 = vcombine.low %v4768_v30, %v4772_v19  ;;  %v6704_v23 = vrot.slane %v18491_v9, %v21875_v16  ;;  %v6708_v49 = vrot.slane %v18491_v9, %v21876_v28 }
 0x49f   : > { %v9375_v35 = vcombine.low %v4776_v36, %v4780_v62  ;;  %v9382_v26 = vrot.slane %v9372_v53, %v21885_v0  ;;  %v9389_v8 = vrot.slane %v9373_v10, %v21885_v0  ;;  %v9076_v31 = vrot.slane %v9062_v12, %v21885_v0  ;;  %v19177_v62 = vpop.xlane.xlu0 %3459 }
 0x4a0   : > { %v9396_v14 = vrot.slane %v9374_v44, %v21885_v0  ;;  %v6712_v3 = vrot.slane %v18491_v9, %v21877_v38  ;;  %v6716_v37 = vrot.slane %v18491_v9, %v21878_v52  ;;  %v6720_v43 = vrot.slane %v18491_v9, %v21879_v60 }
 0x4a1   : > { %v9403_v61 = vrot.slane %v9375_v35, %v21885_v0  ;;  %v9404_v11 = vcombine.low %v9382_v26, %v9389_v8  ;;  %v6724_v17 = vrot.slane %v18491_v9, %v21880_v5  ;;  %v9077_v18 = vcombine.low %v9069_v33, %v9076_v31 }
 0x4a2   : > { %v6728_v56 = vrot.slane %v18491_v9, %v21881_v4  ;;  %v6732_v30 = vrot.slane %v18491_v9, %v21882_v63  ;;  %v12361_v41 = vcombine.low %v6704_v23, %v6708_v49  ;;  %v12362_v19 = vcombine.low %v6712_v3, %v6716_v37 }
 0x4a3   : > { %v9405_v27 = vcombine.low %v9396_v14, %v9403_v61  ;;  %v9412_v15 = vrot.slane %v9404_v11, %v21885_v0  ;;  %v12363_v36 = vcombine.low %v6720_v43, %v6724_v17  ;;  %14198 = vperm.xlu0 %15756, %v9077_v18   ;;  %v6928_v12 = vrot.slane %v18670_v1, %v21875_v16 }
 0x4a4   : > { %v12364_v53 = vcombine.low %v6728_v56, %v6732_v30  ;;  %v12371_v10 = vrot.slane %v12361_v41, %v21885_v0  ;;  %v6932_v33 = vrot.slane %v18670_v1, %v21876_v28  ;;  %v12378_v44 = vrot.slane %v12362_v19, %v21885_v0  ;;  %v19200_v56 = vpop.xlane.xlu1 %3465 }
 0x4a5   : > { %v9419_v9 = vrot.slane %v9405_v27, %v21885_v0  ;;  %v12385_v23 = vrot.slane %v12363_v36, %v21885_v0  ;;  %v6936_v35 = vrot.slane %v18670_v1, %v21877_v38  ;;  %v6940_v8 = vrot.slane %v18670_v1, %v21878_v52 }
 0x4a6   : > { %v12392_v26 = vrot.slane %v12364_v53, %v21885_v0  ;;  %v6944_v49 = vrot.slane %v18670_v1, %v21879_v60  ;;  %v6948_v31 = vrot.slane %v18670_v1, %v21880_v5  ;;  %v12393_v3 = vcombine.low %v12371_v10, %v12378_v44 }
 0x4a7   : > { %v9420_v14 = vcombine.low %v9412_v15, %v9419_v9  ;;  %v6952_v37 = vrot.slane %v18670_v1, %v21881_v4  ;;  %v6956_v61 = vrot.slane %v18670_v1, %v21882_v63  ;;  %v12704_v43 = vcombine.low %v6928_v12, %v6932_v33 }
 0x4a8   : > { %v12394_v11 = vcombine.low %v12385_v23, %v12392_v26  ;;  %v12705_v17 = vcombine.low %v6936_v35, %v6940_v8  ;;  %v12706_v18 = vcombine.low %v6944_v49, %v6948_v31  ;;  %v12401_v30 = vrot.slane %v12393_v3, %v21885_v0  ;;  %v19224_v3 = vpop.xlane.xlu0 %3595 }
 0x4a9   : > { %14219 = vperm.xlu1 %15757, %v9420_v14   ;;  %v12707_v41 = vcombine.low %v6952_v37, %v6956_v61  ;;  %v4720_v27 = vrot.slane %v18527_v2, %v21875_v16  ;;  %v4724_v15 = vrot.slane %v18527_v2, %v21876_v28  ;;  %v12714_v1 = vrot.slane %v12704_v43, %v21885_v0 }
 0x4aa   : > { %v12408_v19 = vrot.slane %v12394_v11, %v21885_v0  ;;  %v12721_v36 = vrot.slane %v12705_v17, %v21885_v0  ;;  %v12728_v53 = vrot.slane %v12706_v18, %v21885_v0  ;;  %v4728_v12 = vrot.slane %v18527_v2, %v21877_v38  ;;  %21933 = vst [vmem:[#allocation54_spill] sm:$0xff] %v19224_v3 }
 0x4ab   : > { %v12735_v10 = vrot.slane %v12707_v41, %v21885_v0  ;;  %v4732_v33 = vrot.slane %v18527_v2, %v21878_v52  ;;  %v4736_v9 = vrot.slane %v18527_v2, %v21879_v60  ;;  %v4740_v35 = vrot.slane %v18527_v2, %v21880_v5 }
 0x4ac   : > { %v12409_v44 = vcombine.low %v12401_v30, %v12408_v19  ;;  %v12736_v23 = vcombine.low %v12714_v1, %v12721_v36  ;;  %v4744_v26 = vrot.slane %v18527_v2, %v21881_v4  ;;  %v4748_v49 = vrot.slane %v18527_v2, %v21882_v63 }
 0x4ad   : > { %v12737_v8 = vcombine.low %v12728_v53, %v12735_v10  ;;  %v9323_v31 = vcombine.low %v4720_v27, %v4724_v15  ;;  %v9324_v14 = vcombine.low %v4728_v12, %v4732_v33  ;;  %v9325_v61 = vcombine.low %v4736_v9, %v4740_v35 }
 0x4ae   : > { %14402 = vperm.xlu0 %15756, %v12409_v44   ;;  %v12744_v37 = vrot.slane %v12736_v23, %v21885_v0  ;;  %v4688_v11 = vrot.slane %v18697_v39, %v21875_v16  ;;  %v4692_v43 = vrot.slane %v18697_v39, %v21876_v28  ;;  %v9326_v18 = vcombine.low %v4744_v26, %v4748_v49  ;;  %v19248_v23 = vpop.xlane.xlu1 %3601 }
 0x4af   : > { %v12751_v17 = vrot.slane %v12737_v8, %v21885_v0  ;;  %v9333_v30 = vrot.slane %v9323_v31, %v21885_v0  ;;  %v9340_v2 = vrot.slane %v9324_v14, %v21885_v0  ;;  %v9347_v41 = vrot.slane %v9325_v61, %v21885_v0 }
 0x4b0   : > { %v4696_v27 = vrot.slane %v18697_v39, %v21877_v38  ;;  %v4700_v15 = vrot.slane %v18697_v39, %v21878_v52  ;;  %v4704_v19 = vrot.slane %v18697_v39, %v21879_v60  ;;  %v9354_v36 = vrot.slane %v9326_v18, %v21885_v0 }
 0x4b1   : > { %v12752_v1 = vcombine.low %v12744_v37, %v12751_v17  ;;  %v9355_v53 = vcombine.low %v9333_v30, %v9340_v2  ;;  %v4708_v10 = vrot.slane %v18697_v39, %v21880_v5  ;;  %v4712_v12 = vrot.slane %v18697_v39, %v21881_v4 }
 0x4b2   : > { %v4716_v33 = vrot.slane %v18697_v39, %v21882_v63  ;;  %v9274_v9 = vcombine.low %v4688_v11, %v4692_v43  ;;  %v9275_v44 = vcombine.low %v4696_v27, %v4700_v15  ;;  %v9356_v35 = vcombine.low %v9347_v41, %v9354_v36 }
 0x4b3   : > { %14423 = vperm.xlu1 %15757, %v12752_v1   ;;  %v9363_v26 = vrot.slane %v9355_v53, %v21885_v0  ;;  %v9276_v8 = vcombine.low %v4704_v19, %v4708_v10  ;;  %v6896_v49 = vrot.slane %v18559_v55, %v21875_v16  ;;  %v6900_v39 = vrot.slane %v18559_v55, %v21876_v28 }
 0x4b4   : > { %v9277_v31 = vcombine.low %v4712_v12, %v4716_v33  ;;  %v9284_v14 = vrot.slane %v9274_v9, %v21885_v0  ;;  %v9291_v37 = vrot.slane %v9275_v44, %v21885_v0  ;;  %v9370_v61 = vrot.slane %v9356_v35, %v21885_v0  ;;  %v19273_v33 = vpop.xlane.xlu0 %3455 }
 0x4b5   : > { %v9298_v11 = vrot.slane %v9276_v8, %v21885_v0  ;;  %v6904_v43 = vrot.slane %v18559_v55, %v21877_v38  ;;  %v6908_v17 = vrot.slane %v18559_v55, %v21878_v52  ;;  %v6912_v2 = vrot.slane %v18559_v55, %v21879_v60 }
 0x4b6   : > { %v9305_v18 = vrot.slane %v9277_v31, %v21885_v0  ;;  %v9306_v30 = vcombine.low %v9284_v14, %v9291_v37  ;;  %v6916_v41 = vrot.slane %v18559_v55, %v21880_v5  ;;  %v9371_v27 = vcombine.low %v9363_v26, %v9370_v61 }
 0x4b7   : > { %v6920_v15 = vrot.slane %v18559_v55, %v21881_v4  ;;  %v6924_v19 = vrot.slane %v18559_v55, %v21882_v63  ;;  %v12655_v1 = vcombine.low %v6896_v49, %v6900_v39  ;;  %v12656_v10 = vcombine.low %v6904_v43, %v6908_v17 }
 0x4b8   : > { %v9307_v36 = vcombine.low %v9298_v11, %v9305_v18  ;;  %v9314_v53 = vrot.slane %v9306_v30, %v21885_v0  ;;  %v12657_v12 = vcombine.low %v6912_v2, %v6916_v41  ;;  %14216 = vperm.xlu0 %15756, %v9371_v27   ;;  %v6864_v35 = vrot.slane %v18744_v58, %v21875_v16  ;;  %v19296_v2 = vpop.xlane.xlu1 %3461 }
 0x4b9   : > { %v12658_v9 = vcombine.low %v6920_v15, %v6924_v19  ;;  %v12665_v44 = vrot.slane %v12655_v1, %v21885_v0  ;;  %v12672_v8 = vrot.slane %v12656_v10, %v21885_v0  ;;  %v6868_v49 = vrot.slane %v18744_v58, %v21876_v28 }
 0x4ba   : > { %v9321_v26 = vrot.slane %v9307_v36, %v21885_v0  ;;  %v12679_v55 = vrot.slane %v12657_v12, %v21885_v0  ;;  %v6872_v14 = vrot.slane %v18744_v58, %v21877_v38  ;;  %v6876_v37 = vrot.slane %v18744_v58, %v21878_v52 }
 0x4bb   : > { %v12686_v31 = vrot.slane %v12658_v9, %v21885_v0  ;;  %v12687_v61 = vcombine.low %v12665_v44, %v12672_v8  ;;  %v6880_v11 = vrot.slane %v18744_v58, %v21879_v60  ;;  %v6884_v43 = vrot.slane %v18744_v58, %v21880_v5 }
 0x4bc   : > { %v9322_v39 = vcombine.low %v9314_v53, %v9321_v26  ;;  %v6888_v18 = vrot.slane %v18744_v58, %v21881_v4  ;;  %v6892_v30 = vrot.slane %v18744_v58, %v21882_v63  ;;  %v12606_v27 = vcombine.low %v6864_v35, %v6868_v49 }
 0x4bd   : > { %v12688_v17 = vcombine.low %v12679_v55, %v12686_v31  ;;  %v12695_v41 = vrot.slane %v12687_v61, %v21885_v0  ;;  %v12607_v15 = vcombine.low %v6872_v14, %v6876_v37  ;;  %v12608_v19 = vcombine.low %v6880_v11, %v6884_v43  ;;  %v19318_v37 = vpop.xlane.xlu0 %3591 }
 0x4be   : > { %14213 = vperm.xlu1 %15757, %v9322_v39   ;;  %v12609_v36 = vcombine.low %v6888_v18, %v6892_v30  ;;  %v4656_v53 = vrot.slane %v18590_v7, %v21875_v16  ;;  %v12616_v10 = vrot.slane %v12606_v27, %v21885_v0  ;;  %v4660_v9 = vrot.slane %v18590_v7, %v21876_v28 }
 0x4bf   : > { %v12702_v1 = vrot.slane %v12688_v17, %v21885_v0  ;;  %v12623_v12 = vrot.slane %v12607_v15, %v21885_v0  ;;  %v12630_v58 = vrot.slane %v12608_v19, %v21885_v0  ;;  %v4664_v26 = vrot.slane %v18590_v7, %v21877_v38  ;;  %21934 = vst [vmem:[#allocation33_spill] sm:$0xff] %v19318_v37 }
 0x4c0   : > { %v12637_v35 = vrot.slane %v12609_v36, %v21885_v0  ;;  %v4668_v8 = vrot.slane %v18590_v7, %v21878_v52  ;;  %v4672_v49 = vrot.slane %v18590_v7, %v21879_v60  ;;  %v4676_v31 = vrot.slane %v18590_v7, %v21880_v5 }
 0x4c1   : > { %v12703_v44 = vcombine.low %v12695_v41, %v12702_v1  ;;  %v12638_v55 = vcombine.low %v12616_v10, %v12623_v12  ;;  %v4680_v14 = vrot.slane %v18590_v7, %v21881_v4  ;;  %v4684_v61 = vrot.slane %v18590_v7, %v21882_v63 }
 0x4c2   : > { %v12639_v39 = vcombine.low %v12630_v58, %v12637_v35  ;;  %v9225_v11 = vcombine.low %v4656_v53, %v4660_v9  ;;  %v9226_v43 = vcombine.low %v4664_v26, %v4668_v8  ;;  %v9227_v18 = vcombine.low %v4672_v49, %v4676_v31  ;;  %v19344_v8 = vpop.xlane.xlu1 %3597 }
 0x4c3   : > { %14420 = vperm.xlu0 %15756, %v12703_v44   ;;  %v12646_v17 = vrot.slane %v12638_v55, %v21885_v0  ;;  %v4880_v30 = vrot.slane %v18793_v29, %v21875_v16  ;;  %v9228_v27 = vcombine.low %v4680_v14, %v4684_v61  ;;  %v4884_v7 = vrot.slane %v18793_v29, %v21876_v28 }
 0x4c4   : > { %v12653_v41 = vrot.slane %v12639_v39, %v21885_v0  ;;  %v9235_v15 = vrot.slane %v9225_v11, %v21885_v0  ;;  %v9242_v19 = vrot.slane %v9226_v43, %v21885_v0  ;;  %v9249_v1 = vrot.slane %v9227_v18, %v21885_v0 }
 0x4c5   : > { %v4888_v36 = vrot.slane %v18793_v29, %v21877_v38  ;;  %v9256_v10 = vrot.slane %v9228_v27, %v21885_v0  ;;  %v4892_v58 = vrot.slane %v18793_v29, %v21878_v52  ;;  %v4896_v9 = vrot.slane %v18793_v29, %v21879_v60 }
 0x4c6   : > { %v12654_v53 = vcombine.low %v12646_v17, %v12653_v41  ;;  %v9257_v12 = vcombine.low %v9235_v15, %v9242_v19  ;;  %v4900_v44 = vrot.slane %v18793_v29, %v21880_v5  ;;  %v4904_v35 = vrot.slane %v18793_v29, %v21881_v4 }
 0x4c7   : > { %v4908_v26 = vrot.slane %v18793_v29, %v21882_v63  ;;  %v9258_v55 = vcombine.low %v9249_v1, %v9256_v10  ;;  %v9568_v31 = vcombine.low %v4880_v30, %v4884_v7  ;;  %v9569_v14 = vcombine.low %v4888_v36, %v4892_v58 }
 0x4c8   : > { %14417 = vperm.xlu1 %15757, %v12654_v53   ;;  %v9265_v49 = vrot.slane %v9257_v12, %v21885_v0  ;;  %v9570_v39 = vcombine.low %v4896_v9, %v4900_v44  ;;  %v6832_v11 = vrot.slane %v18622_v13, %v21875_v16  ;;  %v6836_v43 = vrot.slane %v18622_v13, %v21876_v28  ;;  %v19368_v44 = vpop.xlane.xlu0 %3467 }
 0x4c9   : > { %v9571_v61 = vcombine.low %v4904_v35, %v4908_v26  ;;  %v9272_v17 = vrot.slane %v9258_v55, %v21885_v0  ;;  %v9578_v29 = vrot.slane %v9568_v31, %v21885_v0  ;;  %v9585_v18 = vrot.slane %v9569_v14, %v21885_v0 }
 0x4ca   : > { %v6840_v41 = vrot.slane %v18622_v13, %v21877_v38  ;;  %v9592_v30 = vrot.slane %v9570_v39, %v21885_v0  ;;  %v6844_v15 = vrot.slane %v18622_v13, %v21878_v52  ;;  %v6848_v19 = vrot.slane %v18622_v13, %v21879_v60 }
 0x4cb   : > { %v9599_v27 = vrot.slane %v9571_v61, %v21885_v0  ;;  %v9273_v1 = vcombine.low %v9265_v49, %v9272_v17  ;;  %v9600_v7 = vcombine.low %v9578_v29, %v9585_v18  ;;  %v6852_v36 = vrot.slane %v18622_v13, %v21880_v5 }
 0x4cc   : > { %v6856_v53 = vrot.slane %v18622_v13, %v21881_v4  ;;  %v6860_v12 = vrot.slane %v18622_v13, %v21882_v63  ;;  %v12557_v58 = vcombine.low %v6832_v11, %v6836_v43  ;;  %v12558_v9 = vcombine.low %v6840_v41, %v6844_v15  ;;  %v19390_v15 = vpop.xlane.xlu1 %3473 }
 0x4cd   : > { %v9601_v10 = vcombine.low %v9592_v30, %v9599_v27  ;;  %14210 = vperm.xlu0 %15756, %v9273_v1   ;;  %v9608_v35 = vrot.slane %v9600_v7, %v21885_v0  ;;  %v12559_v26 = vcombine.low %v6848_v19, %v6852_v36  ;;  %v7056_v55 = vrot.slane %v18840_v54, %v21875_v16 }
 0x4ce   : > { %v12560_v31 = vcombine.low %v6856_v53, %v6860_v12  ;;  %v12567_v14 = vrot.slane %v12557_v58, %v21885_v0  ;;  %v12574_v39 = vrot.slane %v12558_v9, %v21885_v0  ;;  %v7060_v61 = vrot.slane %v18840_v54, %v21876_v28  ;;  %v19395_v53 = vpop.xlane.xlu0 %3603 }
 0x4cf   : > { %v9615_v49 = vrot.slane %v9601_v10, %v21885_v0  ;;  %v12581_v13 = vrot.slane %v12559_v26, %v21885_v0  ;;  %v7064_v11 = vrot.slane %v18840_v54, %v21877_v38  ;;  %v7068_v18 = vrot.slane %v18840_v54, %v21878_v52 }
 0x4d0   : > { %v12588_v17 = vrot.slane %v12560_v31, %v21885_v0  ;;  %v12589_v29 = vcombine.low %v12567_v14, %v12574_v39  ;;  %v7072_v41 = vrot.slane %v18840_v54, %v21879_v60  ;;  %v7076_v30 = vrot.slane %v18840_v54, %v21880_v5 }
 0x4d1   : > { %v9616_v43 = vcombine.low %v9608_v35, %v9615_v49  ;;  %v7080_v27 = vrot.slane %v18840_v54, %v21881_v4  ;;  %v7084_v7 = vrot.slane %v18840_v54, %v21882_v63  ;;  %v12900_v36 = vcombine.low %v7056_v55, %v7060_v61 }
 0x4d2   : > { %v12590_v19 = vcombine.low %v12581_v13, %v12588_v17  ;;  %v12597_v1 = vrot.slane %v12589_v29, %v21885_v0  ;;  %v12901_v10 = vcombine.low %v7064_v11, %v7068_v18  ;;  %v12902_v12 = vcombine.low %v7072_v41, %v7076_v30 }
 0x4d3   : > { %14231 = vperm.xlu1 %15757, %v9616_v43   ;;  %v4848_v58 = vrot.slane %v18654_v20, %v21875_v16  ;;  %v4852_v9 = vrot.slane %v18654_v20, %v21876_v28  ;;  %v12903_v26 = vcombine.low %v7080_v27, %v7084_v7  ;;  %v12910_v49 = vrot.slane %v12900_v36, %v21885_v0 }
 0x4d4   : > { %v12604_v35 = vrot.slane %v12590_v19, %v21885_v0  ;;  %v4856_v31 = vrot.slane %v18654_v20, %v21877_v38  ;;  %v12917_v54 = vrot.slane %v12901_v10, %v21885_v0  ;;  %v12924_v55 = vrot.slane %v12902_v12, %v21885_v0  ;;  %v19418_v19 = vpop.xlane.xlu0 %3463 }
 0x4d5   : > { %v4860_v14 = vrot.slane %v18654_v20, %v21878_v52  ;;  %v4864_v39 = vrot.slane %v18654_v20, %v21879_v60  ;;  %v12931_v61 = vrot.slane %v12903_v26, %v21885_v0  ;;  %v4868_v11 = vrot.slane %v18654_v20, %v21880_v5 }
 0x4d6   : > { %v12605_v13 = vcombine.low %v12597_v1, %v12604_v35  ;;  %v4872_v43 = vrot.slane %v18654_v20, %v21881_v4  ;;  %v12932_v17 = vcombine.low %v12910_v49, %v12917_v54  ;;  %v4876_v29 = vrot.slane %v18654_v20, %v21882_v63 }
 0x4d7   : > { %v9519_v18 = vcombine.low %v4848_v58, %v4852_v9  ;;  %v9520_v41 = vcombine.low %v4856_v31, %v4860_v14  ;;  %v12933_v30 = vcombine.low %v12924_v55, %v12931_v61  ;;  %v9521_v27 = vcombine.low %v4864_v39, %v4868_v11  ;;  %v19429_v9 = vpop.xlane.xlu1 %3609 }
 0x4d8   : > { %14414 = vperm.xlu0 %15756, %v12605_v13   ;;  %v12940_v1 = vrot.slane %v12932_v17, %v21885_v0  ;;  %v9522_v7 = vcombine.low %v4872_v43, %v4876_v29  ;;  %v4816_v20 = vrot.slane %v18889_v57, %v21875_v16  ;;  %v4820_v58 = vrot.slane %v18889_v57, %v21876_v28 }
 0x4d9   : > { %v9529_v36 = vrot.slane %v9519_v18, %v21885_v0  ;;  %v9536_v10 = vrot.slane %v9520_v41, %v21885_v0  ;;  %v12947_v12 = vrot.slane %v12933_v30, %v21885_v0  ;;  %v9543_v35 = vrot.slane %v9521_v27, %v21885_v0  ;;  %v19445_v41 = vpop.xlane.xlu0 %3599 }
 0x4da   : > { %v9550_v26 = vrot.slane %v9522_v7, %v21885_v0  ;;  %v4824_v31 = vrot.slane %v18889_v57, %v21877_v38  ;;  %v4828_v54 = vrot.slane %v18889_v57, %v21878_v52  ;;  %v4832_v14 = vrot.slane %v18889_v57, %v21879_v60 }
 0x4db   : > { %v9551_v49 = vcombine.low %v9529_v36, %v9536_v10  ;;  %v12948_v55 = vcombine.low %v12940_v1, %v12947_v12  ;;  %v4836_v39 = vrot.slane %v18889_v57, %v21880_v5  ;;  %v4840_v11 = vrot.slane %v18889_v57, %v21881_v4  ;;  %v19455_v12 = vpop.xlane.xlu1 %3469 }
 0x4dc   : > { %v9552_v13 = vcombine.low %v9543_v35, %v9550_v26  ;;  %v4844_v43 = vrot.slane %v18889_v57, %v21882_v63  ;;  %v9470_v17 = vcombine.low %v4816_v20, %v4820_v58  ;;  %v9471_v29 = vcombine.low %v4824_v31, %v4828_v54 }
 0x4dd   : > { %v9559_v61 = vrot.slane %v9551_v49, %v21885_v0  ;;  %14435 = vperm.xlu1 %15757, %v12948_v55   ;;  %v9472_v18 = vcombine.low %v4832_v14, %v4836_v39  ;;  %v7024_v1 = vrot.slane %v18685_v59, %v21875_v16  ;;  %v7028_v7 = vrot.slane %v18685_v59, %v21876_v28 }
 0x4de   : > { %v9566_v30 = vrot.slane %v9552_v13, %v21885_v0  ;;  %v9473_v27 = vcombine.low %v4840_v11, %v4844_v43  ;;  %v9480_v36 = vrot.slane %v9470_v17, %v21885_v0  ;;  %v9487_v10 = vrot.slane %v9471_v29, %v21885_v0  ;;  %v19471_v17 = vpop.xlane.xlu0 %3475 }
 0x4df   : > { %v9494_v57 = vrot.slane %v9472_v18, %v21885_v0  ;;  %v7032_v58 = vrot.slane %v18685_v59, %v21877_v38  ;;  %v7036_v26 = vrot.slane %v18685_v59, %v21878_v52  ;;  %v7040_v31 = vrot.slane %v18685_v59, %v21879_v60 }
 0x4e0   : > { %v9567_v35 = vcombine.low %v9559_v61, %v9566_v30  ;;  %v9501_v20 = vrot.slane %v9473_v27, %v21885_v0  ;;  %v9502_v49 = vcombine.low %v9480_v36, %v9487_v10  ;;  %v7044_v54 = vrot.slane %v18685_v59, %v21880_v5 }
 0x4e1   : > { %v7048_v14 = vrot.slane %v18685_v59, %v21881_v4  ;;  %v7052_v39 = vrot.slane %v18685_v59, %v21882_v63  ;;  %v12851_v13 = vcombine.low %v7024_v1, %v7028_v7  ;;  %v12852_v11 = vcombine.low %v7032_v58, %v7036_v26  ;;  %v19481_v1 = vpop.xlane.xlu1 %3605 }
 0x4e2   : > { %14228 = vperm.xlu0 %15756, %v9567_v35   ;;  %v9503_v55 = vcombine.low %v9494_v57, %v9501_v20  ;;  %v9510_v61 = vrot.slane %v9502_v49, %v21885_v0  ;;  %v12853_v43 = vcombine.low %v7040_v31, %v7044_v54  ;;  %v6992_v27 = vrot.slane %v18936_v46, %v21875_v16 }
 0x4e3   : > { %v12854_v18 = vcombine.low %v7048_v14, %v7052_v39  ;;  %v12861_v30 = vrot.slane %v12851_v13, %v21885_v0  ;;  %v12868_v36 = vrot.slane %v12852_v11, %v21885_v0  ;;  %v6996_v59 = vrot.slane %v18936_v46, %v21876_v28  ;;  %v19497_v11 = vpop.xlane.xlu0 %3611 }
 0x4e4   : > { %v9517_v29 = vrot.slane %v9503_v55, %v21885_v0  ;;  %v12875_v10 = vrot.slane %v12853_v43, %v21885_v0  ;;  %v7000_v35 = vrot.slane %v18936_v46, %v21877_v38  ;;  %v7004_v20 = vrot.slane %v18936_v46, %v21878_v52 }
 0x4e5   : > { %v12882_v57 = vrot.slane %v12854_v18, %v21885_v0  ;;  %v12883_v58 = vcombine.low %v12861_v30, %v12868_v36  ;;  %v7008_v26 = vrot.slane %v18936_v46, %v21879_v60  ;;  %v7012_v49 = vrot.slane %v18936_v46, %v21880_v5 }
 0x4e6   : > { %v9518_v7 = vcombine.low %v9510_v61, %v9517_v29  ;;  %v7016_v54 = vrot.slane %v18936_v46, %v21881_v4  ;;  %v7020_v55 = vrot.slane %v18936_v46, %v21882_v63  ;;  %v12802_v14 = vcombine.low %v6992_v27, %v6996_v59  ;;  %v19507_v27 = vpop.xlane.xlu1 %3481 }
 0x4e7   : > { %v12884_v31 = vcombine.low %v12875_v10, %v12882_v57  ;;  %v12891_v39 = vrot.slane %v12883_v58, %v21885_v0  ;;  %v12803_v13 = vcombine.low %v7000_v35, %v7004_v20  ;;  %v12804_v61 = vcombine.low %v7008_v26, %v7012_v49 }
 0x4e8   : > { %14225 = vperm.xlu1 %15757, %v9518_v7   ;;  %v12805_v29 = vcombine.low %v7016_v54, %v7020_v55  ;;  %v12812_v18 = vrot.slane %v12802_v14, %v21885_v0  ;;  %v4784_v30 = vrot.slane %v18720_v51, %v21875_v16  ;;  %v4788_v46 = vrot.slane %v18720_v51, %v21876_v28 }
 0x4e9   : > { %v12898_v43 = vrot.slane %v12884_v31, %v21885_v0  ;;  %v12819_v36 = vrot.slane %v12803_v13, %v21885_v0  ;;  %v12826_v10 = vrot.slane %v12804_v61, %v21885_v0  ;;  %v4792_v57 = vrot.slane %v18720_v51, %v21877_v38  ;;  %v19523_v61 = vpop.xlane.xlu0 %3471 }
 0x4ea   : > { %v12833_v7 = vrot.slane %v12805_v29, %v21885_v0  ;;  %v4796_v35 = vrot.slane %v18720_v51, %v21878_v52  ;;  %v4800_v58 = vrot.slane %v18720_v51, %v21879_v60  ;;  %v4804_v26 = vrot.slane %v18720_v51, %v21880_v5 }
 0x4eb   : > { %v12899_v59 = vcombine.low %v12891_v39, %v12898_v43  ;;  %v12834_v20 = vcombine.low %v12812_v18, %v12819_v36  ;;  %v4808_v31 = vrot.slane %v18720_v51, %v21881_v4  ;;  %v4812_v54 = vrot.slane %v18720_v51, %v21882_v63 }
 0x4ec   : > { %v12835_v49 = vcombine.low %v12826_v10, %v12833_v7  ;;  %v9421_v55 = vcombine.low %v4784_v30, %v4788_v46  ;;  %v9422_v39 = vcombine.low %v4792_v57, %v4796_v35  ;;  %v9423_v13 = vcombine.low %v4800_v58, %v4804_v26  ;;  %v19535_v46 = vpop.xlane.xlu1 %3617 }
 0x4ed   : > { %14432 = vperm.xlu0 %15756, %v12899_v59   ;;  %v12842_v14 = vrot.slane %v12834_v20, %v21885_v0  ;;  %v9424_v29 = vcombine.low %v4808_v31, %v4812_v54  ;;  %v5008_v36 = vrot.slane %v18985_v34, %v21875_v16  ;;  %v5012_v51 = vrot.slane %v18985_v34, %v21876_v28 }
 0x4ee   : > { %v12849_v43 = vrot.slane %v12835_v49, %v21885_v0  ;;  %v9431_v18 = vrot.slane %v9421_v55, %v21885_v0  ;;  %v9438_v10 = vrot.slane %v9422_v39, %v21885_v0  ;;  %v9445_v59 = vrot.slane %v9423_v13, %v21885_v0 }
 0x4ef   : > { %v5016_v30 = vrot.slane %v18985_v34, %v21877_v38  ;;  %v9452_v57 = vrot.slane %v9424_v29, %v21885_v0  ;;  %v5020_v35 = vrot.slane %v18985_v34, %v21878_v52  ;;  %v5024_v20 = vrot.slane %v18985_v34, %v21879_v60  ;;  %v19549_v29 = vpop.xlane.xlu0 %3607 }
 0x4f0   : > { %v12850_v7 = vcombine.low %v12842_v14, %v12849_v43  ;;  %v9453_v58 = vcombine.low %v9431_v18, %v9438_v10  ;;  %v5028_v26 = vrot.slane %v18985_v34, %v21880_v5  ;;  %v5032_v49 = vrot.slane %v18985_v34, %v21881_v4 }
 0x4f1   : > { %v5036_v31 = vrot.slane %v18985_v34, %v21882_v63  ;;  %v9454_v54 = vcombine.low %v9445_v59, %v9452_v57  ;;  %v9764_v55 = vcombine.low %v5008_v36, %v5012_v51  ;;  %v9765_v14 = vcombine.low %v5016_v30, %v5020_v35  ;;  %v19558_v59 = vpop.xlane.xlu1 %3477 }
 0x4f2   : > { %14429 = vperm.xlu1 %15757, %v12850_v7   ;;  %v9461_v39 = vrot.slane %v9453_v58, %v21885_v0  ;;  %v9766_v13 = vcombine.low %v5024_v20, %v5028_v26  ;;  %v6960_v36 = vrot.slane %v18768_v40, %v21875_v16  ;;  %v6964_v7 = vrot.slane %v18768_v40, %v21876_v28 }
 0x4f3   : > { %v9767_v43 = vcombine.low %v5032_v49, %v5036_v31  ;;  %v9468_v18 = vrot.slane %v9454_v54, %v21885_v0  ;;  %v9774_v10 = vrot.slane %v9764_v55, %v21885_v0  ;;  %v9781_v3 = vrot.slane %v9765_v14, %v21885_v0  ;;  %v19576_v55 = vpop.xlane.xlu0 %3483 }
 0x4f4   : > { %v9788_v24 = vrot.slane %v9766_v13, %v21885_v0  ;;  %v6968_v35 = vrot.slane %v18768_v40, %v21877_v38  ;;  %v6972_v20 = vrot.slane %v18768_v40, %v21878_v52  ;;  %v6976_v58 = vrot.slane %v18768_v40, %v21879_v60 }
 0x4f5   : > { %v9795_v34 = vrot.slane %v9767_v43, %v21885_v0  ;;  %v9469_v51 = vcombine.low %v9461_v39, %v9468_v18  ;;  %v9796_v30 = vcombine.low %v9774_v10, %v9781_v3  ;;  %v6980_v49 = vrot.slane %v18768_v40, %v21880_v5 }
 0x4f6   : > { %v6984_v3 = vrot.slane %v18768_v40, %v21881_v4  ;;  %v6988_v31 = vrot.slane %v18768_v40, %v21882_v63  ;;  %v12753_v54 = vcombine.low %v6960_v36, %v6964_v7  ;;  %v12754_v14 = vcombine.low %v6968_v35, %v6972_v20 }
 0x4f7   : > { %v9797_v57 = vcombine.low %v9788_v24, %v9795_v34  ;;  %14222 = vperm.xlu0 %15756, %v9469_v51   ;;  %v9804_v26 = vrot.slane %v9796_v30, %v21885_v0  ;;  %v12755_v39 = vcombine.low %v6976_v58, %v6980_v49  ;;  %v4944_v13 = vrot.slane %v19081_v48, %v21875_v16  ;;  %v19583_v51 = vpop.xlane.xlu1 %3613 }
 0x4f8   : > { %v12756_v18 = vcombine.low %v6984_v3, %v6988_v31  ;;  %v12763_v10 = vrot.slane %v12753_v54, %v21885_v0  ;;  %v4948_v34 = vrot.slane %v19081_v48, %v21876_v28  ;;  %v12770_v30 = vrot.slane %v12754_v14, %v21885_v0  ;;  %v19600_v14 = vpop.xlane.xlu0 %3619 }
 0x4f9   : > { %v9811_v24 = vrot.slane %v9797_v57, %v21885_v0  ;;  %v12777_v40 = vrot.slane %v12755_v39, %v21885_v0  ;;  %v4952_v36 = vrot.slane %v19081_v48, %v21877_v38  ;;  %v4956_v57 = vrot.slane %v19081_v48, %v21878_v52 }
 0x4fa   : > { %v12784_v7 = vrot.slane %v12756_v18, %v21885_v0  ;;  %v4960_v35 = vrot.slane %v19081_v48, %v21879_v60  ;;  %v4964_v20 = vrot.slane %v19081_v48, %v21880_v5  ;;  %v12785_v58 = vcombine.low %v12763_v10, %v12770_v30 }
 0x4fb   : > { %v9812_v43 = vcombine.low %v9804_v26, %v9811_v24  ;;  %v4968_v26 = vrot.slane %v19081_v48, %v21881_v4  ;;  %v4972_v49 = vrot.slane %v19081_v48, %v21882_v63  ;;  %v9666_v24 = vcombine.low %v4944_v13, %v4948_v34 }
 0x4fc   : > { %v12786_v3 = vcombine.low %v12777_v40, %v12784_v7  ;;  %v9667_v31 = vcombine.low %v4952_v36, %v4956_v57  ;;  %v9668_v54 = vcombine.low %v4960_v35, %v4964_v20  ;;  %v12793_v39 = vrot.slane %v12785_v58, %v21885_v0  ;;  %v19609_v40 = vpop.xlane.xlu1 %3489 }
 0x4fd   : > { %14243 = vperm.xlu1 %15757, %v9812_v43   ;;  %v9669_v43 = vcombine.low %v4968_v26, %v4972_v49  ;;  %v4976_v18 = vrot.slane %v18816_v21, %v21875_v16  ;;  %v9676_v30 = vrot.slane %v9666_v24, %v21885_v0  ;;  %21935 = vst [vmem:[#allocation7_spill] sm:$0xff] %v19609_v40 }
 0x4fe   : > { %v12800_v10 = vrot.slane %v12786_v3, %v21885_v0  ;;  %v9683_v37 = vrot.slane %v9667_v31, %v21885_v0  ;;  %v9690_v48 = vrot.slane %v9668_v54, %v21885_v0  ;;  %v4980_v34 = vrot.slane %v18816_v21, %v21876_v28 }
 0x4ff   : > { %v9697_v13 = vrot.slane %v9669_v43, %v21885_v0  ;;  %v4984_v36 = vrot.slane %v18816_v21, %v21877_v38  ;;  %v4988_v7 = vrot.slane %v18816_v21, %v21878_v52  ;;  %v4992_v20 = vrot.slane %v18816_v21, %v21879_v60 }
 0x500   : > { %v12801_v57 = vcombine.low %v12793_v39, %v12800_v10  ;;  %v9698_v35 = vcombine.low %v9676_v30, %v9683_v37  ;;  %v4996_v58 = vrot.slane %v18816_v21, %v21880_v5  ;;  %v5000_v49 = vrot.slane %v18816_v21, %v21881_v4  ;;  %v19627_v37 = vpop.xlane.xlu0 %3479 }
 0x501   : > { %v9699_v26 = vcombine.low %v9690_v48, %v9697_v13  ;;  %v5004_v3 = vrot.slane %v18816_v21, %v21882_v63  ;;  %v9715_v24 = vcombine.low %v4976_v18, %v4980_v34  ;;  %v9716_v54 = vcombine.low %v4984_v36, %v4988_v7  ;;  %v19639_v36 = vpop.xlane.xlu1 %3625 }
 0x502   : > { %14426 = vperm.xlu0 %15756, %v12801_v57   ;;  %v9706_v31 = vrot.slane %v9698_v35, %v21885_v0  ;;  %v9717_v39 = vcombine.low %v4992_v20, %v4996_v58  ;;  %v5136_v48 = vrot.slane %v19177_v62, %v21875_v16  ;;  %v5140_v18 = vrot.slane %v19177_v62, %v21876_v28 }
 0x503   : > { %v9713_v43 = vrot.slane %v9699_v26, %v21885_v0  ;;  %v9718_v10 = vcombine.low %v5000_v49, %v5004_v3  ;;  %v9725_v30 = vrot.slane %v9715_v24, %v21885_v0  ;;  %v9732_v13 = vrot.slane %v9716_v54, %v21885_v0  ;;  %21936 = vst [vmem:[#allocation53_spill] sm:$0xff] %v19639_v36 }
 0x504   : > { %v9739_v21 = vrot.slane %v9717_v39, %v21885_v0  ;;  %v5144_v34 = vrot.slane %v19177_v62, %v21877_v38  ;;  %v5148_v35 = vrot.slane %v19177_v62, %v21878_v52  ;;  %v5152_v20 = vrot.slane %v19177_v62, %v21879_v60  ;;  %v19653_v36 = vpop.xlane.xlu0 %3615 }
 0x505   : > { %v9714_v7 = vcombine.low %v9706_v31, %v9713_v43  ;;  %v9746_v57 = vrot.slane %v9718_v10, %v21885_v0  ;;  %v9747_v58 = vcombine.low %v9725_v30, %v9732_v13  ;;  %v5156_v26 = vrot.slane %v19177_v62, %v21880_v5 }
 0x506   : > { %v5160_v49 = vrot.slane %v19177_v62, %v21881_v4  ;;  %v5164_v3 = vrot.slane %v19177_v62, %v21882_v63  ;;  %v9960_v31 = vcombine.low %v5136_v48, %v5140_v18  ;;  %v9961_v54 = vcombine.low %v5144_v34, %v5148_v35  ;;  %v19666_v34 = vpop.xlane.xlu1 %3485 }
 0x507   : > { %14237 = vperm.xlu1 %15757, %v9714_v7   ;;  %v9748_v24 = vcombine.low %v9739_v21, %v9746_v57  ;;  %v9755_v39 = vrot.slane %v9747_v58, %v21885_v0  ;;  %v9962_v43 = vcombine.low %v5152_v20, %v5156_v26  ;;  %v7152_v40 = vrot.slane %v18864_v25, %v21875_v16 }
 0x508   : > { %v9963_v10 = vcombine.low %v5160_v49, %v5164_v3  ;;  %v9970_v13 = vrot.slane %v9960_v31, %v21885_v0  ;;  %v9977_v47 = vrot.slane %v9961_v54, %v21885_v0  ;;  %v7156_v21 = vrot.slane %v18864_v25, %v21876_v28  ;;  %21937 = vst [vmem:[#allocation31_spill] sm:$0xff] %v19666_v34 }
 0x509   : > { %v9762_v30 = vrot.slane %v9748_v24, %v21885_v0  ;;  %v9984_v62 = vrot.slane %v9962_v43, %v21885_v0  ;;  %v7160_v18 = vrot.slane %v18864_v25, %v21877_v38  ;;  %v7164_v35 = vrot.slane %v18864_v25, %v21878_v52 }
 0x50a   : > { %v9991_v48 = vrot.slane %v9963_v10, %v21885_v0  ;;  %v9992_v57 = vcombine.low %v9970_v13, %v9977_v47  ;;  %v7168_v58 = vrot.slane %v18864_v25, %v21879_v60  ;;  %v7172_v26 = vrot.slane %v18864_v25, %v21880_v5  ;;  %v19682_v10 = vpop.xlane.xlu0 %3491 }
 0x50b   : > { %v9763_v7 = vcombine.low %v9755_v39, %v9762_v30  ;;  %v7176_v49 = vrot.slane %v18864_v25, %v21881_v4  ;;  %v7180_v24 = vrot.slane %v18864_v25, %v21882_v63  ;;  %v13047_v47 = vcombine.low %v7152_v40, %v7156_v21  ;;  %v19691_v21 = vpop.xlane.xlu1 %3621 }
 0x50c   : > { %v9993_v20 = vcombine.low %v9984_v62, %v9991_v48  ;;  %v10000_v3 = vrot.slane %v9992_v57, %v21885_v0  ;;  %v13048_v31 = vcombine.low %v7160_v18, %v7164_v35  ;;  %v13049_v39 = vcombine.low %v7168_v58, %v7172_v26  ;;  %21938 = vst [vmem:[#allocation14_spill] sm:$0xff] %v19691_v21 }
 0x50d   : > { %14240 = vperm.xlu0 %15756, %v9763_v7   ;;  %v5072_v43 = vrot.slane %v19273_v33, %v21875_v16  ;;  %v13050_v30 = vcombine.low %v7176_v49, %v7180_v24  ;;  %v13057_v13 = vrot.slane %v13047_v47, %v21885_v0  ;;  %v5076_v48 = vrot.slane %v19273_v33, %v21876_v28 }
 0x50e   : > { %v10007_v54 = vrot.slane %v9993_v20, %v21885_v0  ;;  %v13064_v62 = vrot.slane %v13048_v31, %v21885_v0  ;;  %v13071_v25 = vrot.slane %v13049_v39, %v21885_v0  ;;  %v5080_v40 = vrot.slane %v19273_v33, %v21877_v38 }
 0x50f   : > { %v13078_v18 = vrot.slane %v13050_v30, %v21885_v0  ;;  %v5084_v35 = vrot.slane %v19273_v33, %v21878_v52  ;;  %v5088_v20 = vrot.slane %v19273_v33, %v21879_v60  ;;  %v5092_v58 = vrot.slane %v19273_v33, %v21880_v5  ;;  %v19705_v30 = vpop.xlane.xlu0 %3627 }
 0x510   : > { %v10008_v7 = vcombine.low %v10000_v3, %v10007_v54  ;;  %v13079_v57 = vcombine.low %v13057_v13, %v13064_v62  ;;  %v5096_v26 = vrot.slane %v19273_v33, %v21881_v4  ;;  %v5100_v49 = vrot.slane %v19273_v33, %v21882_v63  ;;  %21939 = vst [vmem:[#allocation12_spill] sm:$0xff] %v19705_v30  ;;  %v19712_v33 = vpop.xlane.xlu1 %3497 }
 0x511   : > { %v13080_v3 = vcombine.low %v13071_v25, %v13078_v18  ;;  %v9862_v47 = vcombine.low %v5072_v43, %v5076_v48  ;;  %v9863_v31 = vcombine.low %v5080_v40, %v5084_v35  ;;  %v9864_v54 = vcombine.low %v5088_v20, %v5092_v58 }
 0x512   : > { %14255 = vperm.xlu1 %15757, %v10008_v7   ;;  %v13087_v24 = vrot.slane %v13079_v57, %v21885_v0  ;;  %v9865_v39 = vcombine.low %v5096_v26, %v5100_v49  ;;  %v4912_v43 = vrot.slane %v18912_v22, %v21875_v16  ;;  %v4916_v48 = vrot.slane %v18912_v22, %v21876_v28 }
 0x513   : > { %v13094_v13 = vrot.slane %v13080_v3, %v21885_v0  ;;  %v9872_v62 = vrot.slane %v9862_v47, %v21885_v0  ;;  %v9879_v7 = vrot.slane %v9863_v31, %v21885_v0  ;;  %v9886_v21 = vrot.slane %v9864_v54, %v21885_v0 }
 0x514   : > { %v9893_v34 = vrot.slane %v9865_v39, %v21885_v0  ;;  %v4920_v57 = vrot.slane %v18912_v22, %v21877_v38  ;;  %v4924_v35 = vrot.slane %v18912_v22, %v21878_v52  ;;  %v4928_v58 = vrot.slane %v18912_v22, %v21879_v60 }
 0x515   : > { %v13095_v25 = vcombine.low %v13087_v24, %v13094_v13  ;;  %v9894_v18 = vcombine.low %v9872_v62, %v9879_v7  ;;  %v4932_v26 = vrot.slane %v18912_v22, %v21880_v5  ;;  %v9617_v3 = vcombine.low %v4912_v43, %v4916_v48  ;;  %v19732_v24 = vpop.xlane.xlu0 %3487 }
 0x516   : > { %v9895_v40 = vcombine.low %v9886_v21, %v9893_v34  ;;  %v4936_v34 = vrot.slane %v18912_v22, %v21881_v4  ;;  %v4940_v21 = vrot.slane %v18912_v22, %v21882_v63  ;;  %v9618_v47 = vcombine.low %v4920_v57, %v4924_v35 }
 0x517   : > { %14444 = vperm.xlu0 %15756, %v13095_v25   ;;  %v9902_v20 = vrot.slane %v9894_v18, %v21885_v0  ;;  %v9619_v31 = vcombine.low %v4928_v58, %v4932_v26  ;;  %v7408_v54 = vrot.slane %v19248_v23, %v21875_v16  ;;  %v9627_v62 = vrot.slane %v9617_v3, %v21885_v0  ;;  %v19739_v25 = vpop.xlane.xlu1 %3493 }
 0x518   : > { %v9909_v49 = vrot.slane %v9895_v40, %v21885_v0  ;;  %v9620_v13 = vcombine.low %v4936_v34, %v4940_v21  ;;  %v7412_v7 = vrot.slane %v19248_v23, %v21876_v28  ;;  %21940 = vst [vmem:[#allocation38_spill] sm:$0xff] %v19739_v25  ;;  %v9634_v18 = vrot.slane %v9618_v47, %v21885_v0 }
 0x519   : > { %v9641_v22 = vrot.slane %v9619_v31, %v21885_v0  ;;  %v7416_v43 = vrot.slane %v19248_v23, %v21877_v38  ;;  %v7420_v48 = vrot.slane %v19248_v23, %v21878_v52  ;;  %v7424_v57 = vrot.slane %v19248_v23, %v21879_v60  ;;  %v19756_v47 = vpop.xlane.xlu0 %3623 }
 0x51a   : > { %v9910_v39 = vcombine.low %v9902_v20, %v9909_v49  ;;  %v9648_v40 = vrot.slane %v9620_v13, %v21885_v0  ;;  %v7428_v35 = vrot.slane %v19248_v23, %v21880_v5  ;;  %v7432_v20 = vrot.slane %v19248_v23, %v21881_v4  ;;  %21941 = vst [vmem:[#allocation36_spill] sm:$0xff] %v19756_v47 }
 0x51b   : > { %v9649_v58 = vcombine.low %v9627_v62, %v9634_v18  ;;  %v7436_v26 = vrot.slane %v19248_v23, %v21882_v63  ;;  %v13439_v49 = vcombine.low %v7408_v54, %v7412_v7  ;;  %v13440_v34 = vcombine.low %v7416_v43, %v7420_v48  ;;  %v19767_v7 = vpop.xlane.xlu1 %3505 }
 0x51c   : > { %14249 = vperm.xlu1 %15757, %v9910_v39   ;;  %v9650_v21 = vcombine.low %v9641_v22, %v9648_v40  ;;  %v13441_v3 = vcombine.low %v7424_v57, %v7428_v35  ;;  %v7088_v23 = vrot.slane %v18960_v42, %v21875_v16  ;;  %v7092_v54 = vrot.slane %v18960_v42, %v21876_v28 }
 0x51d   : > { %v9657_v31 = vrot.slane %v9649_v58, %v21885_v0  ;;  %v13442_v39 = vcombine.low %v7432_v20, %v7436_v26  ;;  %v13449_v13 = vrot.slane %v13439_v49, %v21885_v0  ;;  %v13456_v30 = vrot.slane %v13440_v34, %v21885_v0 }
 0x51e   : > { %v9664_v25 = vrot.slane %v9650_v21, %v21885_v0  ;;  %v13463_v62 = vrot.slane %v13441_v3, %v21885_v0  ;;  %v7096_v43 = vrot.slane %v18960_v42, %v21877_v38  ;;  %v7100_v48 = vrot.slane %v18960_v42, %v21878_v52 }
 0x51f   : > { %v13470_v18 = vrot.slane %v13442_v39, %v21885_v0  ;;  %v13471_v22 = vcombine.low %v13449_v13, %v13456_v30  ;;  %v7104_v57 = vrot.slane %v18960_v42, %v21879_v60  ;;  %v7108_v35 = vrot.slane %v18960_v42, %v21880_v5 }
 0x520   : > { %v9665_v40 = vcombine.low %v9657_v31, %v9664_v25  ;;  %v7112_v26 = vrot.slane %v18960_v42, %v21881_v4  ;;  %v7116_v30 = vrot.slane %v18960_v42, %v21882_v63  ;;  %v12949_v49 = vcombine.low %v7088_v23, %v7092_v54  ;;  %v19783_v25 = vpop.xlane.xlu0 %3499  ;;  %v19793_v23 = vpop.xlane.xlu1 %3501 }
 0x521   : > { %v13472_v20 = vcombine.low %v13463_v62, %v13470_v18  ;;  %v13479_v58 = vrot.slane %v13471_v22, %v21885_v0  ;;  %v12950_v34 = vcombine.low %v7096_v43, %v7100_v48  ;;  %v12951_v21 = vcombine.low %v7104_v57, %v7108_v35  ;;  %21942 = vst [vmem:[#allocation37_spill] sm:$0xff] %v19793_v23 }
 0x522   : > { %14234 = vperm.xlu0 %15756, %v9665_v40   ;;  %v12952_v31 = vcombine.low %v7112_v26, %v7116_v30  ;;  %v7344_v39 = vrot.slane %v19344_v8, %v21875_v16  ;;  %v7348_v13 = vrot.slane %v19344_v8, %v21876_v28  ;;  %v12959_v62 = vrot.slane %v12949_v49, %v21885_v0 }
 0x523   : > { %v13486_v3 = vrot.slane %v13472_v20, %v21885_v0  ;;  %v12966_v18 = vrot.slane %v12950_v34, %v21885_v0  ;;  %v12973_v42 = vrot.slane %v12951_v21, %v21885_v0  ;;  %v7352_v43 = vrot.slane %v19344_v8, %v21877_v38 }
 0x524   : > { %v12980_v22 = vrot.slane %v12952_v31, %v21885_v0  ;;  %v7356_v48 = vrot.slane %v19344_v8, %v21878_v52  ;;  %v7360_v57 = vrot.slane %v19344_v8, %v21879_v60  ;;  %v7364_v35 = vrot.slane %v19344_v8, %v21880_v5 }
 0x525   : > { %v13487_v54 = vcombine.low %v13479_v58, %v13486_v3  ;;  %v12981_v40 = vcombine.low %v12959_v62, %v12966_v18  ;;  %v7368_v58 = vrot.slane %v19344_v8, %v21881_v4  ;;  %v7372_v26 = vrot.slane %v19344_v8, %v21882_v63  ;;  %v19809_v3 = vpop.xlane.xlu0 %3495 }
 0x526   : > { %v12982_v20 = vcombine.low %v12973_v42, %v12980_v22  ;;  %v13341_v30 = vcombine.low %v7344_v39, %v7348_v13  ;;  %v13342_v34 = vcombine.low %v7352_v43, %v7356_v48  ;;  %v13343_v21 = vcombine.low %v7360_v57, %v7364_v35  ;;  %v19821_v13 = vpop.permute.xlu1 %14132 }
 0x527   : > { %14468 = vperm.xlu1 %15757, %v13487_v54   ;;  %v12989_v49 = vrot.slane %v12981_v40, %v21885_v0  ;;  %v13344_v62 = vcombine.low %v7368_v58, %v7372_v26  ;;  %v7184_v42 = vrot.slane %v19032_v45, %v21875_v16  ;;  %v7188_v8 = vrot.slane %v19032_v45, %v21876_v28 }
 0x528   : > { %v12996_v31 = vrot.slane %v12982_v20, %v21885_v0  ;;  %v13351_v18 = vrot.slane %v13341_v30, %v21885_v0  ;;  %v13358_v54 = vrot.slane %v13342_v34, %v21885_v0  ;;  %v13365_v22 = vrot.slane %v13343_v21, %v21885_v0  ;;  %21943 = vst [vmem:[#allocation56_spill] sm:$0xff] %v19821_v13 }
 0x529   : > { %v7192_v39 = vrot.slane %v19032_v45, %v21877_v38  ;;  %v13372_v48 = vrot.slane %v13344_v62, %v21885_v0  ;;  %v7196_v40 = vrot.slane %v19032_v45, %v21878_v52  ;;  %v7200_v57 = vrot.slane %v19032_v45, %v21879_v60 }
 0x52a   : > { %v12997_v43 = vcombine.low %v12989_v49, %v12996_v31  ;;  %v13373_v35 = vcombine.low %v13351_v18, %v13358_v54  ;;  %v7204_v20 = vrot.slane %v19032_v45, %v21880_v5  ;;  %v7208_v58 = vrot.slane %v19032_v45, %v21881_v4  ;;  %v19837_v54 = vpop.xlane.xlu0 %3507 }
 0x52b   : > { %v7212_v26 = vrot.slane %v19032_v45, %v21882_v63  ;;  %v13374_v30 = vcombine.low %v13365_v22, %v13372_v48  ;;  %v13096_v49 = vcombine.low %v7184_v42, %v7188_v8  ;;  %v13097_v34 = vcombine.low %v7192_v39, %v7196_v40 }
 0x52c   : > { %14438 = vperm.xlu0 %15756, %v12997_v43   ;;  %v13381_v21 = vrot.slane %v13373_v35, %v21885_v0  ;;  %v13098_v31 = vcombine.low %v7200_v57, %v7204_v20  ;;  %v5264_v18 = vrot.slane %v19368_v44, %v21875_v16  ;;  %v5268_v45 = vrot.slane %v19368_v44, %v21876_v28  ;;  %v19850_v43 = vpop.permute.xlu1 %14126 }
 0x52d   : > { %v13099_v62 = vcombine.low %v7208_v58, %v7212_v26  ;;  %v13388_v13 = vrot.slane %v13374_v30, %v21885_v0  ;;  %v13106_v47 = vrot.slane %v13096_v49, %v21885_v0  ;;  %v13113_v23 = vrot.slane %v13097_v34, %v21885_v0 }
 0x52e   : > { %v13120_v42 = vrot.slane %v13098_v31, %v21885_v0  ;;  %v5272_v8 = vrot.slane %v19368_v44, %v21877_v38  ;;  %v5276_v39 = vrot.slane %v19368_v44, %v21878_v52  ;;  %v5280_v57 = vrot.slane %v19368_v44, %v21879_v60 }
 0x52f   : > { %v13127_v22 = vrot.slane %v13099_v62, %v21885_v0  ;;  %v13389_v48 = vcombine.low %v13381_v21, %v13388_v13  ;;  %v13128_v40 = vcombine.low %v13106_v47, %v13113_v23  ;;  %v5284_v35 = vrot.slane %v19368_v44, %v21880_v5  ;;  %v19865_v62 = vpop.xlane.xlu0 %3503 }
 0x530   : > { %v5288_v58 = vrot.slane %v19368_v44, %v21881_v4  ;;  %v5292_v26 = vrot.slane %v19368_v44, %v21882_v63  ;;  %v10156_v30 = vcombine.low %v5264_v18, %v5268_v45  ;;  %v10157_v34 = vcombine.low %v5272_v8, %v5276_v39 }
 0x531   : > { %v13129_v20 = vcombine.low %v13120_v42, %v13127_v22  ;;  %14462 = vperm.xlu1 %15757, %v13389_v48   ;;  %v13136_v49 = vrot.slane %v13128_v40, %v21885_v0  ;;  %v10158_v13 = vcombine.low %v5280_v57, %v5284_v35  ;;  %v7120_v31 = vrot.slane %v19128_v50, %v21875_v16  ;;  %v19876_v48 = vpop.permute.xlu1 %14135 }
 0x532   : > { %v10159_v23 = vcombine.low %v5288_v58, %v5292_v26  ;;  %v10166_v21 = vrot.slane %v10156_v30, %v21885_v0  ;;  %v10173_v42 = vrot.slane %v10157_v34, %v21885_v0  ;;  %v7124_v18 = vrot.slane %v19128_v50, %v21876_v28  ;;  %21944 = vst [vmem:[#allocation35_spill] sm:$0xff] %v19876_v48 }
 0x533   : > { %v13143_v47 = vrot.slane %v13129_v20, %v21885_v0  ;;  %v10180_v44 = vrot.slane %v10158_v13, %v21885_v0  ;;  %v7128_v8 = vrot.slane %v19128_v50, %v21877_v38  ;;  %v7132_v39 = vrot.slane %v19128_v50, %v21878_v52 }
 0x534   : > { %v10187_v22 = vrot.slane %v10159_v23, %v21885_v0  ;;  %v10188_v40 = vcombine.low %v10166_v21, %v10173_v42  ;;  %v7136_v57 = vrot.slane %v19128_v50, %v21879_v60  ;;  %v7140_v35 = vrot.slane %v19128_v50, %v21880_v5 }
 0x535   : > { %v13144_v45 = vcombine.low %v13136_v49, %v13143_v47  ;;  %v7144_v58 = vrot.slane %v19128_v50, %v21881_v4  ;;  %v7148_v26 = vrot.slane %v19128_v50, %v21882_v63  ;;  %v12998_v30 = vcombine.low %v7120_v31, %v7124_v18  ;;  %v19886_v49 = vpop.permute.xlu0 %14336 }
 0x536   : > { %v10189_v20 = vcombine.low %v10180_v44, %v10187_v22  ;;  %21945 = vst [vmem:[#allocation13_spill] sm:$0xff] %v19886_v49  ;;  %v10196_v34 = vrot.slane %v10188_v40, %v21885_v0  ;;  %v12999_v13 = vcombine.low %v7128_v8, %v7132_v39  ;;  %v13000_v47 = vcombine.low %v7136_v57, %v7140_v35  ;;  %v19902_v40 = vpop.permute.xlu1 %14339 }
 0x537   : > { %14447 = vperm.xlu0 %15756, %v13144_v45   ;;  %v13001_v21 = vcombine.low %v7144_v58, %v7148_v26  ;;  %v13008_v42 = vrot.slane %v12998_v30, %v21885_v0  ;;  %v5200_v44 = vrot.slane %v19418_v19, %v21875_v16  ;;  %v5204_v50 = vrot.slane %v19418_v19, %v21876_v28 }
 0x538   : > { %v10203_v23 = vrot.slane %v10189_v20, %v21885_v0  ;;  %v13015_v45 = vrot.slane %v12999_v13, %v21885_v0  ;;  %v13022_v22 = vrot.slane %v13000_v47, %v21885_v0  ;;  %v5208_v8 = vrot.slane %v19418_v19, %v21877_v38  ;;  %21946 = vst [vmem:[#allocation57_spill] sm:$0xff] %v19902_v40 }
 0x539   : > { %v13029_v18 = vrot.slane %v13001_v21, %v21885_v0  ;;  %v5212_v39 = vrot.slane %v19418_v19, %v21878_v52  ;;  %v5216_v35 = vrot.slane %v19418_v19, %v21879_v60  ;;  %v5220_v20 = vrot.slane %v19418_v19, %v21880_v5  ;;  %v19912_v13 = vpop.permute.xlu0 %14330 }
 0x53a   : > { %v10204_v31 = vcombine.low %v10196_v34, %v10203_v23  ;;  %v13030_v57 = vcombine.low %v13008_v42, %v13015_v45  ;;  %v5224_v26 = vrot.slane %v19418_v19, %v21881_v4  ;;  %v5228_v30 = vrot.slane %v19418_v19, %v21882_v63  ;;  %21947 = vst [vmem:[#allocation42_spill] sm:$0xff] %v19912_v13  ;;  %v19920_v19 = vpop.permute.xlu1 %14333 }
 0x53b   : > { %v13031_v58 = vcombine.low %v13022_v22, %v13029_v18  ;;  %v10058_v34 = vcombine.low %v5200_v44, %v5204_v50  ;;  %v10059_v23 = vcombine.low %v5208_v8, %v5212_v39  ;;  %v10060_v21 = vcombine.low %v5216_v35, %v5220_v20  ;;  %21948 = vst [vmem:[#allocation11_spill] sm:$0xff] %v19920_v19 }
 0x53c   : > { %14267 = vperm.xlu1 %15757, %v10204_v31   ;;  %v13038_v47 = vrot.slane %v13030_v57, %v21885_v0  ;;  %v10061_v45 = vcombine.low %v5224_v26, %v5228_v30  ;;  %v5104_v50 = vrot.slane %v19008_v6, %v21875_v16  ;;  %v5108_v8 = vrot.slane %v19008_v6, %v21876_v28 }
 0x53d   : > { %v13045_v42 = vrot.slane %v13031_v58, %v21885_v0  ;;  %v10068_v49 = vrot.slane %v10058_v34, %v21885_v0  ;;  %v10075_v22 = vrot.slane %v10059_v23, %v21885_v0  ;;  %v10082_v31 = vrot.slane %v10060_v21, %v21885_v0  ;;  %v19932_v58 = vpop.permute.xlu0 %14129 }
 0x53e   : > { %v10089_v40 = vrot.slane %v10061_v45, %v21885_v0  ;;  %v5112_v57 = vrot.slane %v19008_v6, %v21877_v38  ;;  %v5116_v35 = vrot.slane %v19008_v6, %v21878_v52  ;;  %v5120_v20 = vrot.slane %v19008_v6, %v21879_v60 }
 0x53f   : > { %v13046_v18 = vcombine.low %v13038_v47, %v13045_v42  ;;  %v10090_v44 = vcombine.low %v10068_v49, %v10075_v22  ;;  %v5124_v26 = vrot.slane %v19008_v6, %v21880_v5  ;;  %v5128_v30 = vrot.slane %v19008_v6, %v21881_v4 }
 0x540   : > { %v10091_v39 = vcombine.low %v10082_v31, %v10089_v40  ;;  %v5132_v34 = vrot.slane %v19008_v6, %v21882_v63  ;;  %v9911_v47 = vcombine.low %v5104_v50, %v5108_v8  ;;  %v9912_v23 = vcombine.low %v5112_v57, %v5116_v35 }
 0x541   : > { %14441 = vperm.xlu0 %15756, %v13046_v18   ;;  %v10098_v49 = vrot.slane %v10090_v44, %v21885_v0  ;;  %v9913_v21 = vcombine.low %v5120_v20, %v5124_v26  ;;  %v7536_v42 = vrot.slane %v19429_v9, %v21875_v16  ;;  %v7540_v18 = vrot.slane %v19429_v9, %v21876_v28  ;;  %v19947_v44 = vpop.permute.xlu1 %14147 }
 0x542   : > { %v10105_v40 = vrot.slane %v10091_v39, %v21885_v0  ;;  %v9914_v22 = vcombine.low %v5128_v30, %v5132_v34  ;;  %v9921_v31 = vrot.slane %v9911_v47, %v21885_v0  ;;  %21949 = vst [vmem:[#allocation40_spill] sm:$0xff] %v19947_v44  ;;  %v9928_v39 = vrot.slane %v9912_v23, %v21885_v0 }
 0x543   : > { %v9935_v13 = vrot.slane %v9913_v21, %v21885_v0  ;;  %v7544_v6 = vrot.slane %v19429_v9, %v21877_v38  ;;  %v7548_v50 = vrot.slane %v19429_v9, %v21878_v52  ;;  %v7552_v57 = vrot.slane %v19429_v9, %v21879_v60 }
 0x544   : > { %v10106_v45 = vcombine.low %v10098_v49, %v10105_v40  ;;  %v9942_v8 = vrot.slane %v9914_v22, %v21885_v0  ;;  %v7556_v35 = vrot.slane %v19429_v9, %v21880_v5  ;;  %v7560_v20 = vrot.slane %v19429_v9, %v21881_v4  ;;  %v19962_v49 = vpop.permute.xlu0 %14144 }
 0x545   : > { %v9943_v26 = vcombine.low %v9921_v31, %v9928_v39  ;;  %v7564_v30 = vrot.slane %v19429_v9, %v21882_v63  ;;  %v13635_v40 = vcombine.low %v7536_v42, %v7540_v18  ;;  %v13636_v34 = vcombine.low %v7544_v6, %v7548_v50  ;;  %v19975_v42 = vpop.permute.xlu1 %14351 }
 0x546   : > { %14261 = vperm.xlu1 %15757, %v10106_v45   ;;  %v9944_v47 = vcombine.low %v9935_v13, %v9942_v8  ;;  %v13637_v23 = vcombine.low %v7552_v57, %v7556_v35  ;;  %v5040_v31 = vrot.slane %v19104_v32, %v21875_v16  ;;  %v5044_v9 = vrot.slane %v19104_v32, %v21876_v28 }
 0x547   : > { %v9951_v21 = vrot.slane %v9943_v26, %v21885_v0  ;;  %v13638_v45 = vcombine.low %v7560_v20, %v7564_v30  ;;  %v13645_v22 = vrot.slane %v13635_v40, %v21885_v0  ;;  %v13652_v19 = vrot.slane %v13636_v34, %v21885_v0  ;;  %21950 = vst [vmem:[#allocation55_spill] sm:$0xff] %v19975_v42 }
 0x548   : > { %v9958_v44 = vrot.slane %v9944_v47, %v21885_v0  ;;  %v13659_v48 = vrot.slane %v13637_v23, %v21885_v0  ;;  %v5048_v39 = vrot.slane %v19104_v32, %v21877_v38  ;;  %v5052_v6 = vrot.slane %v19104_v32, %v21878_v52  ;;  %v19986_v35 = vpop.permute.xlu0 %14348 }
 0x549   : > { %v13666_v13 = vrot.slane %v13638_v45, %v21885_v0  ;;  %v13667_v18 = vcombine.low %v13645_v22, %v13652_v19  ;;  %v5056_v8 = vrot.slane %v19104_v32, %v21879_v60  ;;  %v5060_v57 = vrot.slane %v19104_v32, %v21880_v5  ;;  %21951 = vst [vmem:[#allocation18_spill] sm:$0xff] %v19986_v35 }
 0x54a   : > { %v9959_v50 = vcombine.low %v9951_v21, %v9958_v44  ;;  %v5064_v19 = vrot.slane %v19104_v32, %v21881_v4  ;;  %v5068_v30 = vrot.slane %v19104_v32, %v21882_v63  ;;  %v9813_v40 = vcombine.low %v5040_v31, %v5044_v9  ;;  %v20003_v31 = vpop.permute.xlu1 %14141 }
 0x54b   : > { %v13668_v20 = vcombine.low %v13659_v48, %v13666_v13  ;;  %v13675_v26 = vrot.slane %v13667_v18, %v21885_v0  ;;  %v9814_v44 = vcombine.low %v5048_v39, %v5052_v6  ;;  %v9815_v34 = vcombine.low %v5056_v8, %v5060_v57 }
 0x54c   : > { %14252 = vperm.xlu0 %15756, %v9959_v50   ;;  %v9816_v23 = vcombine.low %v5064_v19, %v5068_v30  ;;  %v7472_v21 = vrot.slane %v19481_v1, %v21875_v16  ;;  %v7476_v48 = vrot.slane %v19481_v1, %v21876_v28  ;;  %v9823_v45 = vrot.slane %v9813_v40, %v21885_v0  ;;  %v20016_v19 = vpop.permute.xlu0 %14138 }
 0x54d   : > { %v13682_v47 = vrot.slane %v13668_v20, %v21885_v0  ;;  %v9830_v22 = vrot.slane %v9814_v44, %v21885_v0  ;;  %v9837_v13 = vrot.slane %v9815_v34, %v21885_v0  ;;  %v7480_v32 = vrot.slane %v19481_v1, %v21877_v38 }
 0x54e   : > { %v9844_v18 = vrot.slane %v9816_v23, %v21885_v0  ;;  %v7484_v39 = vrot.slane %v19481_v1, %v21878_v52  ;;  %v7488_v6 = vrot.slane %v19481_v1, %v21879_v60  ;;  %v7492_v8 = vrot.slane %v19481_v1, %v21880_v5 }
 0x54f   : > { %v13683_v9 = vcombine.low %v13675_v26, %v13682_v47  ;;  %v9845_v50 = vcombine.low %v9823_v45, %v9830_v22  ;;  %v7496_v57 = vrot.slane %v19481_v1, %v21881_v4  ;;  %v7500_v20 = vrot.slane %v19481_v1, %v21882_v63 }
 0x550   : > { %v9846_v26 = vcombine.low %v9837_v13, %v9844_v18  ;;  %v13537_v30 = vcombine.low %v7472_v21, %v7476_v48  ;;  %v13538_v40 = vcombine.low %v7480_v32, %v7484_v39  ;;  %v13539_v34 = vcombine.low %v7488_v6, %v7492_v8 }
 0x551   : > { %14480 = vperm.xlu1 %15757, %v13683_v9   ;;  %v9853_v44 = vrot.slane %v9845_v50, %v21885_v0  ;;  %v13540_v47 = vcombine.low %v7496_v57, %v7500_v20  ;;  %v5232_v23 = vrot.slane %v19200_v56, %v21875_v16  ;;  %v5236_v1 = vrot.slane %v19200_v56, %v21876_v28  ;;  %v20032_v9 = vpop.permute.xlu1 %14345 }
 0x552   : > { %v9860_v45 = vrot.slane %v9846_v26, %v21885_v0  ;;  %v13547_v22 = vrot.slane %v13537_v30, %v21885_v0  ;;  %v13554_v35 = vrot.slane %v13538_v40, %v21885_v0  ;;  %v13561_v13 = vrot.slane %v13539_v34, %v21885_v0  ;;  %21952 = vst [vmem:[#allocation41_spill] sm:$0xff] %v20032_v9  ;;  %v20042_v30 = vpop.permute.xlu0 %14342 }
 0x553   : > { %v13568_v21 = vrot.slane %v13540_v47, %v21885_v0  ;;  %v5240_v48 = vrot.slane %v19200_v56, %v21877_v38  ;;  %v5244_v32 = vrot.slane %v19200_v56, %v21878_v52  ;;  %v5248_v6 = vrot.slane %v19200_v56, %v21879_v60  ;;  %21953 = vst [vmem:[#allocation61_spill] sm:$0xff] %v20042_v30 }
 0x554   : > { %v9861_v18 = vcombine.low %v9853_v44, %v9860_v45  ;;  %v13569_v39 = vcombine.low %v13547_v22, %v13554_v35  ;;  %v5252_v50 = vrot.slane %v19200_v56, %v21880_v5  ;;  %v5256_v57 = vrot.slane %v19200_v56, %v21881_v4 }
 0x555   : > { %v13570_v8 = vcombine.low %v13561_v13, %v13568_v21  ;;  %v5260_v20 = vrot.slane %v19200_v56, %v21882_v63  ;;  %v10107_v26 = vcombine.low %v5232_v23, %v5236_v1  ;;  %v10108_v35 = vcombine.low %v5240_v48, %v5244_v32 }
 0x556   : > { %14246 = vperm.xlu0 %15756, %v9861_v18   ;;  %v13577_v40 = vrot.slane %v13569_v39, %v21885_v0  ;;  %v10109_v44 = vcombine.low %v5248_v6, %v5252_v50  ;;  %v5392_v22 = vrot.slane %v19471_v17, %v21875_v16  ;;  %v5396_v23 = vrot.slane %v19471_v17, %v21876_v28  ;;  %v20060_v39 = vpop.permute.xlu1 %14159 }
 0x557   : > { %v13584_v34 = vrot.slane %v13570_v8, %v21885_v0  ;;  %v10110_v47 = vcombine.low %v5256_v57, %v5260_v20  ;;  %v10117_v45 = vrot.slane %v10107_v26, %v21885_v0  ;;  %v10124_v13 = vrot.slane %v10108_v35, %v21885_v0  ;;  %v20068_v35 = vpop.permute.xlu0 %14156 }
 0x558   : > { %v10131_v56 = vrot.slane %v10109_v44, %v21885_v0  ;;  %v5400_v1 = vrot.slane %v19471_v17, %v21877_v38  ;;  %v5404_v32 = vrot.slane %v19471_v17, %v21878_v52  ;;  %v5408_v18 = vrot.slane %v19471_v17, %v21879_v60 }
 0x559   : > { %v13585_v21 = vcombine.low %v13577_v40, %v13584_v34  ;;  %v10138_v48 = vrot.slane %v10110_v47, %v21885_v0  ;;  %v10139_v6 = vcombine.low %v10117_v45, %v10124_v13  ;;  %v5412_v50 = vrot.slane %v19471_v17, %v21880_v5 }
 0x55a   : > { %v5416_v8 = vrot.slane %v19471_v17, %v21881_v4  ;;  %v5420_v57 = vrot.slane %v19471_v17, %v21882_v63  ;;  %v10352_v26 = vcombine.low %v5392_v22, %v5396_v23  ;;  %v10353_v40 = vcombine.low %v5400_v1, %v5404_v32 }
 0x55b   : > { %14474 = vperm.xlu1 %15757, %v13585_v21   ;;  %v10140_v20 = vcombine.low %v10131_v56, %v10138_v48  ;;  %v10147_v44 = vrot.slane %v10139_v6, %v21885_v0  ;;  %v10354_v34 = vcombine.low %v5408_v18, %v5412_v50  ;;  %v5168_v45 = vrot.slane %v19296_v2, %v21875_v16  ;;  %v20088_v6 = vpop.permute.xlu1 %14363 }
 0x55c   : > { %v10355_v47 = vcombine.low %v5416_v8, %v5420_v57  ;;  %v10362_v30 = vrot.slane %v10352_v26, %v21885_v0  ;;  %v10369_v9 = vrot.slane %v10353_v40, %v21885_v0  ;;  %v5172_v17 = vrot.slane %v19296_v2, %v21876_v28  ;;  %21954 = vst [vmem:[#allocation39_spill] sm:$0xff] %v20088_v6  ;;  %v20095_v40 = vpop.permute.xlu0 %14360 }
 0x55d   : > { %v10154_v13 = vrot.slane %v10140_v20, %v21885_v0  ;;  %v10376_v22 = vrot.slane %v10354_v34, %v21885_v0  ;;  %v5176_v23 = vrot.slane %v19296_v2, %v21877_v38  ;;  %v5180_v1 = vrot.slane %v19296_v2, %v21878_v52  ;;  %21955 = vst [vmem:[#allocation46_spill] sm:$0xff] %v20095_v40 }
 0x55e   : > { %v10383_v56 = vrot.slane %v10355_v47, %v21885_v0  ;;  %v10384_v48 = vcombine.low %v10362_v30, %v10369_v9  ;;  %v5184_v32 = vrot.slane %v19296_v2, %v21879_v60  ;;  %v5188_v18 = vrot.slane %v19296_v2, %v21880_v5 }
 0x55f   : > { %v10155_v21 = vcombine.low %v10147_v44, %v10154_v13  ;;  %v5192_v8 = vrot.slane %v19296_v2, %v21881_v4  ;;  %v5196_v57 = vrot.slane %v19296_v2, %v21882_v63  ;;  %v10009_v20 = vcombine.low %v5168_v45, %v5172_v17 }
 0x560   : > { %v10385_v50 = vcombine.low %v10376_v22, %v10383_v56  ;;  %v10392_v26 = vrot.slane %v10384_v48, %v21885_v0  ;;  %v10010_v9 = vcombine.low %v5176_v23, %v5180_v1  ;;  %v10011_v30 = vcombine.low %v5184_v32, %v5188_v18 }
 0x561   : > { %14264 = vperm.xlu0 %15756, %v10155_v21   ;;  %v10012_v34 = vcombine.low %v5192_v8, %v5196_v57  ;;  %v10019_v47 = vrot.slane %v10009_v20, %v21885_v0  ;;  %v5328_v13 = vrot.slane %v19523_v61, %v21875_v16  ;;  %v5332_v45 = vrot.slane %v19523_v61, %v21876_v28  ;;  %v20118_v8 = vpop.permute.xlu1 %14153 }
 0x562   : > { %v10399_v44 = vrot.slane %v10385_v50, %v21885_v0  ;;  %v10026_v22 = vrot.slane %v10010_v9, %v21885_v0  ;;  %v10033_v2 = vrot.slane %v10011_v30, %v21885_v0  ;;  %v5336_v17 = vrot.slane %v19523_v61, %v21877_v38 }
 0x563   : > { %v10040_v23 = vrot.slane %v10012_v34, %v21885_v0  ;;  %v5340_v1 = vrot.slane %v19523_v61, %v21878_v52  ;;  %v5344_v21 = vrot.slane %v19523_v61, %v21879_v60  ;;  %v5348_v32 = vrot.slane %v19523_v61, %v21880_v5  ;;  %v20121_v34 = vpop.permute.xlu0 %14150 }
 0x564   : > { %v10400_v56 = vcombine.low %v10392_v26, %v10399_v44  ;;  %v10041_v48 = vcombine.low %v10019_v47, %v10026_v22  ;;  %v5352_v18 = vrot.slane %v19523_v61, %v21881_v4  ;;  %v5356_v50 = vrot.slane %v19523_v61, %v21882_v63 }
 0x565   : > { %v10042_v57 = vcombine.low %v10033_v2, %v10040_v23  ;;  %v10254_v20 = vcombine.low %v5328_v13, %v5332_v45  ;;  %v10255_v26 = vcombine.low %v5336_v17, %v5340_v1  ;;  %v10256_v30 = vcombine.low %v5344_v21, %v5348_v32  ;;  %v20130_v17 = vpop.permute.xlu1 %14357 }
 0x566   : > { %14279 = vperm.xlu1 %15757, %v10400_v56   ;;  %v10049_v9 = vrot.slane %v10041_v48, %v21885_v0  ;;  %v10257_v44 = vcombine.low %v5352_v18, %v5356_v50  ;;  %v7440_v45 = vrot.slane %v19395_v53, %v21875_v16  ;;  %21956 = vst [vmem:[#allocation44_spill] sm:$0xff] %v20130_v17 }
 0x567   : > { %v10056_v47 = vrot.slane %v10042_v57, %v21885_v0  ;;  %v10264_v22 = vrot.slane %v10254_v20, %v21885_v0  ;;  %v10271_v40 = vrot.slane %v10255_v26, %v21885_v0  ;;  %v10278_v61 = vrot.slane %v10256_v30, %v21885_v0  ;;  %v20144_v18 = vpop.permute.xlu0 %14354 }
 0x568   : > { %v10285_v6 = vrot.slane %v10257_v44, %v21885_v0  ;;  %v7444_v1 = vrot.slane %v19395_v53, %v21876_v28  ;;  %v7448_v21 = vrot.slane %v19395_v53, %v21877_v38  ;;  %v7452_v48 = vrot.slane %v19395_v53, %v21878_v52  ;;  %21957 = vst [vmem:[#allocation45_spill] sm:$0xff] %v20144_v18 }
 0x569   : > { %v10057_v56 = vcombine.low %v10049_v9, %v10056_v47  ;;  %v10286_v2 = vcombine.low %v10264_v22, %v10271_v40  ;;  %v7460_v32 = vrot.slane %v19395_v53, %v21880_v5  ;;  %v7464_v50 = vrot.slane %v19395_v53, %v21881_v4 }
 0x56a   : > { %v10287_v13 = vcombine.low %v10278_v61, %v10285_v6  ;;  %v7456_v6 = vrot.slane %v19395_v53, %v21879_v60  ;;  %v7468_v57 = vrot.slane %v19395_v53, %v21882_v63  ;;  %v13488_v20 = vcombine.low %v7440_v45, %v7444_v1 }
 0x56b   : > { %14258 = vperm.xlu0 %15756, %v10057_v56   ;;  %v10294_v23 = vrot.slane %v10286_v2, %v21885_v0  ;;  %v13489_v9 = vcombine.low %v7448_v21, %v7452_v48  ;;  %v7664_v56 = vrot.slane %v19535_v46, %v21875_v16  ;;  %v7668_v2 = vrot.slane %v19535_v46, %v21876_v28 }
 0x56c   : > { %v10301_v40 = vrot.slane %v10287_v13, %v21885_v0  ;;  %v13490_v30 = vcombine.low %v7456_v6, %v7460_v32  ;;  %v13491_v44 = vcombine.low %v7464_v50, %v7468_v57  ;;  %v13498_v47 = vrot.slane %v13488_v20, %v21885_v0  ;;  %v20157_v13 = vpop.permute.xlu1 %14171  ;;  %v20172_v32 = vpop.permute.xlu0 %14168 }
 0x56d   : > { %v13505_v22 = vrot.slane %v13489_v9, %v21885_v0  ;;  %21958 = vst [vmem:[#allocation43_spill] sm:$0xff] %v20157_v13  ;;  %v7672_v45 = vrot.slane %v19535_v46, %v21877_v38  ;;  %v7680_v1 = vrot.slane %v19535_v46, %v21879_v60  ;;  %v7684_v48 = vrot.slane %v19535_v46, %v21880_v5 }
 0x56e   : > { %v10302_v26 = vcombine.low %v10294_v23, %v10301_v40  ;;  %v13512_v61 = vrot.slane %v13490_v30, %v21885_v0  ;;  %v13519_v53 = vrot.slane %v13491_v44, %v21885_v0  ;;  %v7676_v23 = vrot.slane %v19535_v46, %v21878_v52  ;;  %21959 = vst [vmem:[#allocation50_spill] sm:$0xff] %v20172_v32 }
 0x56f   : > { %v13520_v21 = vcombine.low %v13498_v47, %v13505_v22  ;;  %v7688_v40 = vrot.slane %v19535_v46, %v21881_v4  ;;  %v7692_v6 = vrot.slane %v19535_v46, %v21882_v63  ;;  %v13831_v57 = vcombine.low %v7664_v56, %v7668_v2 }
 0x570   : > { %14273 = vperm.xlu1 %15757, %v10302_v26   ;;  %v13521_v50 = vcombine.low %v13512_v61, %v13519_v53  ;;  %v13832_v20 = vcombine.low %v7672_v45, %v7676_v23  ;;  %v13833_v9 = vcombine.low %v7680_v1, %v7684_v48  ;;  %v7376_v18 = vrot.slane %v19445_v41, %v21875_v16  ;;  %v20184_v56 = vpop.permute.xlu1 %14375 }
 0x571   : > { %v13528_v26 = vrot.slane %v13520_v21, %v21885_v0  ;;  %v13834_v30 = vcombine.low %v7688_v40, %v7692_v6  ;;  %v13841_v47 = vrot.slane %v13831_v57, %v21885_v0  ;;  %v7380_v61 = vrot.slane %v19445_v41, %v21876_v28  ;;  %v20196_v6 = vpop.permute.xlu0 %14372 }
 0x572   : > { %v13535_v44 = vrot.slane %v13521_v50, %v21885_v0  ;;  %v13848_v22 = vrot.slane %v13832_v20, %v21885_v0  ;;  %v13855_v46 = vrot.slane %v13833_v9, %v21885_v0  ;;  %v7384_v45 = vrot.slane %v19445_v41, %v21877_v38 }
 0x573   : > { %v13862_v13 = vrot.slane %v13834_v30, %v21885_v0  ;;  %v7388_v23 = vrot.slane %v19445_v41, %v21878_v52  ;;  %v7392_v21 = vrot.slane %v19445_v41, %v21879_v60  ;;  %v7396_v48 = vrot.slane %v19445_v41, %v21880_v5 }
 0x574   : > { %v13536_v2 = vcombine.low %v13528_v26, %v13535_v44  ;;  %v13863_v53 = vcombine.low %v13841_v47, %v13848_v22  ;;  %v7400_v40 = vrot.slane %v19445_v41, %v21881_v4  ;;  %v7404_v57 = vrot.slane %v19445_v41, %v21882_v63 }
 0x575   : > { %v13864_v1 = vcombine.low %v13855_v46, %v13862_v13  ;;  %v13390_v20 = vcombine.low %v7376_v18, %v7380_v61  ;;  %v13391_v26 = vcombine.low %v7384_v45, %v7388_v23  ;;  %v13392_v9 = vcombine.low %v7392_v21, %v7396_v48  ;;  %v20213_v61 = vpop.permute.xlu1 %14165 }
 0x576   : > { %14471 = vperm.xlu0 %15756, %v13536_v2   ;;  %v13871_v50 = vrot.slane %v13863_v53, %v21885_v0  ;;  %v7600_v30 = vrot.slane %v19583_v51, %v21875_v16  ;;  %v13393_v44 = vcombine.low %v7400_v40, %v7404_v57  ;;  %v7604_v46 = vrot.slane %v19583_v51, %v21876_v28 }
 0x577   : > { %v13878_v13 = vrot.slane %v13864_v1, %v21885_v0  ;;  %v13400_v47 = vrot.slane %v13390_v20, %v21885_v0  ;;  %v13407_v22 = vrot.slane %v13391_v26, %v21885_v0  ;;  %v13414_v53 = vrot.slane %v13392_v9, %v21885_v0  ;;  %v20224_v20 = vpop.permute.xlu0 %14162 }
 0x578   : > { %v7608_v41 = vrot.slane %v19583_v51, %v21877_v38  ;;  %v7612_v18 = vrot.slane %v19583_v51, %v21878_v52  ;;  %v13421_v45 = vrot.slane %v13393_v44, %v21885_v0  ;;  %v7616_v1 = vrot.slane %v19583_v51, %v21879_v60 }
 0x579   : > { %v13879_v2 = vcombine.low %v13871_v50, %v13878_v13  ;;  %v13422_v23 = vcombine.low %v13400_v47, %v13407_v22  ;;  %v7620_v21 = vrot.slane %v19583_v51, %v21880_v5  ;;  %v7624_v48 = vrot.slane %v19583_v51, %v21881_v4 }
 0x57a   : > { %v7628_v40 = vrot.slane %v19583_v51, %v21882_v63  ;;  %v13733_v50 = vcombine.low %v7600_v30, %v7604_v46  ;;  %v13734_v57 = vcombine.low %v7608_v41, %v7612_v18  ;;  %v13423_v26 = vcombine.low %v13414_v53, %v13421_v45 }
 0x57b   : > { %14492 = vperm.xlu1 %15757, %v13879_v2   ;;  %v13430_v13 = vrot.slane %v13422_v23, %v21885_v0  ;;  %v13735_v9 = vcombine.low %v7616_v1, %v7620_v21  ;;  %v5360_v2 = vrot.slane %v19390_v15, %v21875_v16  ;;  %v5364_v30 = vrot.slane %v19390_v15, %v21876_v28  ;;  %v20242_v23 = vpop.permute.xlu1 %14369 }
 0x57c   : > { %v13736_v44 = vcombine.low %v7624_v48, %v7628_v40  ;;  %v13743_v47 = vrot.slane %v13733_v50, %v21885_v0  ;;  %v13750_v22 = vrot.slane %v13734_v57, %v21885_v0  ;;  %v13437_v17 = vrot.slane %v13423_v26, %v21885_v0 }
 0x57d   : > { %v13757_v51 = vrot.slane %v13735_v9, %v21885_v0  ;;  %v5368_v46 = vrot.slane %v19390_v15, %v21877_v38  ;;  %v5372_v18 = vrot.slane %v19390_v15, %v21878_v52  ;;  %v5376_v45 = vrot.slane %v19390_v15, %v21879_v60 }
 0x57e   : > { %v13764_v53 = vrot.slane %v13736_v44, %v21885_v0  ;;  %v13765_v41 = vcombine.low %v13743_v47, %v13750_v22  ;;  %v13438_v1 = vcombine.low %v13430_v13, %v13437_v17  ;;  %v5380_v21 = vrot.slane %v19390_v15, %v21880_v5  ;;  %v20251_v44 = vpop.permute.xlu0 %14366 }
 0x57f   : > { %v5384_v48 = vrot.slane %v19390_v15, %v21881_v4  ;;  %v5388_v40 = vrot.slane %v19390_v15, %v21882_v63  ;;  %v10303_v26 = vcombine.low %v5360_v2, %v5364_v30  ;;  %v10304_v9 = vcombine.low %v5368_v46, %v5372_v18 }
 0x580   : > { %v13766_v50 = vcombine.low %v13757_v51, %v13764_v53  ;;  %v13773_v57 = vrot.slane %v13765_v41, %v21885_v0  ;;  %14465 = vperm.xlu0 %15756, %v13438_v1   ;;  %v10305_v47 = vcombine.low %v5376_v45, %v5380_v21  ;;  %v5520_v17 = vrot.slane %v19576_v55, %v21875_v16  ;;  %v20270_v1 = vpop.permute.xlu1 %14183 }
 0x581   : > { %v10306_v22 = vcombine.low %v5384_v48, %v5388_v40  ;;  %v10313_v32 = vrot.slane %v10303_v26, %v21885_v0  ;;  %v10320_v42 = vrot.slane %v10304_v9, %v21885_v0  ;;  %v5524_v15 = vrot.slane %v19576_v55, %v21876_v28  ;;  %21960 = vst [vmem:[#allocation48_spill] sm:$0xff] %v20270_v1 }
 0x582   : > { %v13780_v13 = vrot.slane %v13766_v50, %v21885_v0  ;;  %v10327_v2 = vrot.slane %v10305_v47, %v21885_v0  ;;  %v5528_v30 = vrot.slane %v19576_v55, %v21877_v38  ;;  %v5532_v46 = vrot.slane %v19576_v55, %v21878_v52  ;;  %v20277_v26 = vpop.permute.xlu0 %14180 }
 0x583   : > { %v10334_v51 = vrot.slane %v10306_v22, %v21885_v0  ;;  %v10335_v41 = vcombine.low %v10313_v32, %v10320_v42  ;;  %v5536_v18 = vrot.slane %v19576_v55, %v21879_v60  ;;  %v5540_v45 = vrot.slane %v19576_v55, %v21880_v5 }
 0x584   : > { %v13781_v53 = vcombine.low %v13773_v57, %v13780_v13  ;;  %v5544_v48 = vrot.slane %v19576_v55, %v21881_v4  ;;  %v5548_v40 = vrot.slane %v19576_v55, %v21882_v63  ;;  %v10548_v50 = vcombine.low %v5520_v17, %v5524_v15 }
 0x585   : > { %v10336_v21 = vcombine.low %v10327_v2, %v10334_v51  ;;  %v10343_v57 = vrot.slane %v10335_v41, %v21885_v0  ;;  %v10549_v42 = vcombine.low %v5528_v30, %v5532_v46  ;;  %v10550_v32 = vcombine.low %v5536_v18, %v5540_v45 }
 0x586   : > { %14486 = vperm.xlu1 %15757, %v13781_v53   ;;  %v10551_v47 = vcombine.low %v5544_v48, %v5548_v40  ;;  %v10558_v22 = vrot.slane %v10548_v50, %v21885_v0  ;;  %v5296_v13 = vrot.slane %v19455_v12, %v21875_v16  ;;  %v5300_v17 = vrot.slane %v19455_v12, %v21876_v28  ;;  %v20300_v48 = vpop.permute.xlu1 %14387 }
 0x587   : > { %v10350_v9 = vrot.slane %v10336_v21, %v21885_v0  ;;  %v10565_v2 = vrot.slane %v10549_v42, %v21885_v0  ;;  %v10572_v55 = vrot.slane %v10550_v32, %v21885_v0  ;;  %v5304_v15 = vrot.slane %v19455_v12, %v21877_v38  ;;  %21961 = vst [vmem:[#allocation49_spill] sm:$0xff] %v20300_v48 }
 0x588   : > { %v10579_v30 = vrot.slane %v10551_v47, %v21885_v0  ;;  %v5308_v46 = vrot.slane %v19455_v12, %v21878_v52  ;;  %v5312_v53 = vrot.slane %v19455_v12, %v21879_v60  ;;  %v5316_v18 = vrot.slane %v19455_v12, %v21880_v5 }
 0x589   : > { %v10351_v51 = vcombine.low %v10343_v57, %v10350_v9  ;;  %v10580_v41 = vcombine.low %v10558_v22, %v10565_v2  ;;  %v5320_v45 = vrot.slane %v19455_v12, %v21881_v4  ;;  %v5324_v21 = vrot.slane %v19455_v12, %v21882_v63  ;;  %v20306_v2 = vpop.permute.xlu0 %14384 }
 0x58a   : > { %v10581_v40 = vcombine.low %v10572_v55, %v10579_v30  ;;  %v10205_v50 = vcombine.low %v5296_v13, %v5300_v17  ;;  %v10206_v57 = vcombine.low %v5304_v15, %v5308_v46  ;;  %v10207_v32 = vcombine.low %v5312_v53, %v5316_v18  ;;  %21962 = vst [vmem:[#allocation47_spill] sm:$0xff] %v20306_v2 }
 0x58b   : > { %14276 = vperm.xlu0 %15756, %v10351_v51   ;;  %v10588_v42 = vrot.slane %v10580_v41, %v21885_v0  ;;  %v10208_v9 = vcombine.low %v5320_v45, %v5324_v21  ;;  %v7696_v47 = vrot.slane %v19600_v14, %v21875_v16  ;;  %v7700_v55 = vrot.slane %v19600_v14, %v21876_v28 }
 0x58c   : > { %v10595_v22 = vrot.slane %v10581_v40, %v21885_v0  ;;  %v10215_v1 = vrot.slane %v10205_v50, %v21885_v0  ;;  %v10222_v12 = vrot.slane %v10206_v57, %v21885_v0  ;;  %v10229_v13 = vrot.slane %v10207_v32, %v21885_v0  ;;  %v20326_v50 = vpop.permute.xlu1 %14177 }
 0x58d   : > { %v10236_v17 = vrot.slane %v10208_v9, %v21885_v0  ;;  %v7704_v15 = vrot.slane %v19600_v14, %v21877_v38  ;;  %v7708_v51 = vrot.slane %v19600_v14, %v21878_v52  ;;  %v7712_v53 = vrot.slane %v19600_v14, %v21879_v60 }
 0x58e   : > { %v10596_v30 = vcombine.low %v10588_v42, %v10595_v22  ;;  %v10237_v46 = vcombine.low %v10215_v1, %v10222_v12  ;;  %v7716_v41 = vrot.slane %v19600_v14, %v21880_v5  ;;  %v7720_v45 = vrot.slane %v19600_v14, %v21881_v4 }
 0x58f   : > { %v10238_v18 = vcombine.low %v10229_v13, %v10236_v17  ;;  %v7724_v21 = vrot.slane %v19600_v14, %v21882_v63  ;;  %v13880_v40 = vcombine.low %v7696_v47, %v7700_v55  ;;  %v13881_v1 = vcombine.low %v7704_v15, %v7708_v51  ;;  %v20335_v47 = vpop.permute.xlu0 %14174 }
 0x590   : > { %14291 = vperm.xlu1 %15757, %v10596_v30   ;;  %v10245_v57 = vrot.slane %v10237_v46, %v21885_v0  ;;  %v13882_v42 = vcombine.low %v7712_v53, %v7716_v41  ;;  %v7568_v12 = vrot.slane %v19497_v11, %v21875_v16  ;;  %v7572_v55 = vrot.slane %v19497_v11, %v21876_v28 }
 0x591   : > { %v10252_v32 = vrot.slane %v10238_v18, %v21885_v0  ;;  %v13883_v9 = vcombine.low %v7720_v45, %v7724_v21  ;;  %v13890_v22 = vrot.slane %v13880_v40, %v21885_v0  ;;  %v13897_v13 = vrot.slane %v13881_v1, %v21885_v0 }
 0x592   : > { %v13904_v14 = vrot.slane %v13882_v42, %v21885_v0  ;;  %v7576_v51 = vrot.slane %v19497_v11, %v21877_v38  ;;  %v7580_v46 = vrot.slane %v19497_v11, %v21878_v52  ;;  %v7584_v53 = vrot.slane %v19497_v11, %v21879_v60 }
 0x593   : > { %v10253_v17 = vcombine.low %v10245_v57, %v10252_v32  ;;  %v13911_v15 = vrot.slane %v13883_v9, %v21885_v0  ;;  %v13912_v30 = vcombine.low %v13890_v22, %v13897_v13  ;;  %v7588_v41 = vrot.slane %v19497_v11, %v21880_v5  ;;  %v20352_v57 = vpop.permute.xlu1 %14381 }
 0x594   : > { %v7592_v45 = vrot.slane %v19497_v11, %v21881_v4  ;;  %v7596_v21 = vrot.slane %v19497_v11, %v21882_v63  ;;  %v13684_v40 = vcombine.low %v7568_v12, %v7572_v55  ;;  %21963 = vst [vmem:[#allocation51_spill] sm:$0xff] %v20352_v57  ;;  %v13685_v42 = vcombine.low %v7576_v51, %v7580_v46  ;;  %v20365_v55 = vpop.permute.xlu0 %14378 }
 0x595   : > { %14270 = vperm.xlu0 %15756, %v10253_v17   ;;  %v13913_v18 = vcombine.low %v13904_v14, %v13911_v15  ;;  %v13920_v1 = vrot.slane %v13912_v30, %v21885_v0  ;;  %v13686_v32 = vcombine.low %v7584_v53, %v7588_v41  ;;  %v5456_v14 = vrot.slane %v19627_v37, %v21875_v16 }
 0x596   : > { %v13687_v22 = vcombine.low %v7592_v45, %v7596_v21  ;;  %v13694_v13 = vrot.slane %v13684_v40, %v21885_v0  ;;  %v13701_v17 = vrot.slane %v13685_v42, %v21885_v0  ;;  %v5460_v11 = vrot.slane %v19627_v37, %v21876_v28 }
 0x597   : > { %v13927_v9 = vrot.slane %v13913_v18, %v21885_v0  ;;  %v13708_v15 = vrot.slane %v13686_v32, %v21885_v0  ;;  %v5464_v12 = vrot.slane %v19627_v37, %v21877_v38  ;;  %v5468_v46 = vrot.slane %v19627_v37, %v21878_v52 }
 0x598   : > { %v13715_v30 = vrot.slane %v13687_v22, %v21885_v0  ;;  %v5472_v53 = vrot.slane %v19627_v37, %v21879_v60  ;;  %v13716_v41 = vcombine.low %v13694_v13, %v13701_v17  ;;  %v5476_v18 = vrot.slane %v19627_v37, %v21880_v5 }
 0x599   : > { %v13928_v51 = vcombine.low %v13920_v1, %v13927_v9  ;;  %v5480_v45 = vrot.slane %v19627_v37, %v21881_v4  ;;  %v5484_v21 = vrot.slane %v19627_v37, %v21882_v63  ;;  %v10450_v1 = vcombine.low %v5456_v14, %v5460_v11  ;;  %v20379_v9 = vpop.permute.xlu1 %14195  ;;  %v20390_v11 = vpop.permute.xlu0 %14192 }
 0x59a   : > { %v13717_v40 = vcombine.low %v13708_v15, %v13715_v30  ;;  %v10451_v42 = vcombine.low %v5464_v12, %v5468_v46  ;;  %v13724_v32 = vrot.slane %v13716_v41, %v21885_v0  ;;  %v10452_v22 = vcombine.low %v5472_v53, %v5476_v18  ;;  %21964 = vst [vmem:[#allocation8_spill] sm:$0xff] %v20390_v11 }
 0x59b   : > { %14495 = vperm.xlu1 %15757, %v13928_v51   ;;  %v10453_v48 = vcombine.low %v5480_v45, %v5484_v21  ;;  %v10460_v17 = vrot.slane %v10450_v1, %v21885_v0  ;;  %v7504_v57 = vrot.slane %v19549_v29, %v21875_v16  ;;  %v7508_v15 = vrot.slane %v19549_v29, %v21876_v28 }
 0x59c   : > { %v13731_v13 = vrot.slane %v13717_v40, %v21885_v0  ;;  %v10467_v2 = vrot.slane %v10451_v42, %v21885_v0  ;;  %v10474_v37 = vrot.slane %v10452_v22, %v21885_v0  ;;  %v7512_v30 = vrot.slane %v19549_v29, %v21877_v38 }
 0x59d   : > { %v10481_v14 = vrot.slane %v10453_v48, %v21885_v0  ;;  %v7516_v53 = vrot.slane %v19549_v29, %v21878_v52  ;;  %v7520_v41 = vrot.slane %v19549_v29, %v21879_v60  ;;  %v7524_v48 = vrot.slane %v19549_v29, %v21880_v5 }
 0x59e   : > { %v13732_v12 = vcombine.low %v13724_v32, %v13731_v13  ;;  %v10482_v51 = vcombine.low %v10460_v17, %v10467_v2  ;;  %v7528_v45 = vrot.slane %v19549_v29, %v21881_v4  ;;  %v7532_v2 = vrot.slane %v19549_v29, %v21882_v63  ;;  %v20406_v32 = vpop.permute.xlu1 %14399 }
 0x59f   : > { %v10483_v46 = vcombine.low %v10474_v37, %v10481_v14  ;;  %v13586_v21 = vcombine.low %v7504_v57, %v7508_v15  ;;  %v13587_v1 = vcombine.low %v7512_v30, %v7516_v53  ;;  %v13588_v42 = vcombine.low %v7520_v41, %v7524_v48  ;;  %v20417_v15 = vpop.permute.xlu0 %14396 }
 0x5a0   : > { %14483 = vperm.xlu0 %15756, %v13732_v12   ;;  %v10490_v18 = vrot.slane %v10482_v51, %v21885_v0  ;;  %v13589_v22 = vcombine.low %v7528_v45, %v7532_v2  ;;  %v7632_v17 = vrot.slane %v19653_v36, %v21875_v16  ;;  %v7636_v37 = vrot.slane %v19653_v36, %v21876_v28 }
 0x5a1   : > { %v10497_v40 = vrot.slane %v10483_v46, %v21885_v0  ;;  %v13596_v13 = vrot.slane %v13586_v21, %v21885_v0  ;;  %v13603_v12 = vrot.slane %v13587_v1, %v21885_v0  ;;  %v13610_v29 = vrot.slane %v13588_v42, %v21885_v0  ;;  %21965 = vst [vmem:[#allocation73_spill] sm:$0xff] %v20417_v15 }
 0x5a2   : > { %v7640_v57 = vrot.slane %v19653_v36, %v21877_v38  ;;  %v13617_v51 = vrot.slane %v13589_v22, %v21885_v0  ;;  %v7644_v30 = vrot.slane %v19653_v36, %v21878_v52  ;;  %v7648_v46 = vrot.slane %v19653_v36, %v21879_v60 }
 0x5a3   : > { %v10498_v14 = vcombine.low %v10490_v18, %v10497_v40  ;;  %v7652_v53 = vrot.slane %v19653_v36, %v21880_v5  ;;  %v13618_v41 = vcombine.low %v13596_v13, %v13603_v12  ;;  %v7656_v48 = vrot.slane %v19653_v36, %v21881_v4 }
 0x5a4   : > { %v7660_v18 = vrot.slane %v19653_v36, %v21882_v63  ;;  %v13782_v45 = vcombine.low %v7632_v17, %v7636_v37  ;;  %v13619_v2 = vcombine.low %v13610_v29, %v13617_v51  ;;  %v13783_v21 = vcombine.low %v7640_v57, %v7644_v30  ;;  %v20448_v30 = vpop.permute.xlu0 %14186 }
 0x5a5   : > { %14285 = vperm.xlu1 %15757, %v10498_v14   ;;  %v13784_v40 = vcombine.low %v7648_v46, %v7652_v53  ;;  %v13626_v1 = vrot.slane %v13618_v41, %v21885_v0  ;;  %v5488_v15 = vrot.slane %v19507_v27, %v21875_v16  ;;  %v20434_v14 = vpop.permute.xlu1 %14189  ;;  %v5492_v17 = vrot.slane %v19507_v27, %v21876_v28 }
 0x5a6   : > { %v13785_v42 = vcombine.low %v7656_v48, %v7660_v18  ;;  %v13792_v22 = vrot.slane %v13782_v45, %v21885_v0  ;;  %v13633_v13 = vrot.slane %v13619_v2, %v21885_v0  ;;  %v13799_v12 = vrot.slane %v13783_v21, %v21885_v0 }
 0x5a7   : > { %v13806_v36 = vrot.slane %v13784_v40, %v21885_v0  ;;  %v5496_v29 = vrot.slane %v19507_v27, %v21877_v38  ;;  %v5500_v57 = vrot.slane %v19507_v27, %v21878_v52  ;;  %v5504_v51 = vrot.slane %v19507_v27, %v21879_v60 }
 0x5a8   : > { %v13813_v37 = vrot.slane %v13785_v42, %v21885_v0  ;;  %v13634_v46 = vcombine.low %v13626_v1, %v13633_v13  ;;  %v13814_v53 = vcombine.low %v13792_v22, %v13799_v12  ;;  %v5508_v41 = vrot.slane %v19507_v27, %v21880_v5 }
 0x5a9   : > { %v5512_v48 = vrot.slane %v19507_v27, %v21881_v4  ;;  %v5516_v45 = vrot.slane %v19507_v27, %v21882_v63  ;;  %v10499_v2 = vcombine.low %v5488_v15, %v5492_v17  ;;  %v10500_v21 = vcombine.low %v5496_v29, %v5500_v57 }
 0x5aa   : > { %v13815_v18 = vcombine.low %v13806_v36, %v13813_v37  ;;  %14477 = vperm.xlu0 %15756, %v13634_v46   ;;  %v13822_v40 = vrot.slane %v13814_v53, %v21885_v0  ;;  %v10501_v42 = vcombine.low %v5504_v51, %v5508_v41  ;;  %v5648_v1 = vrot.slane %v19682_v10, %v21875_v16  ;;  %v20462_v36 = vpop.permute.xlu1 %14393  ;;  %v20474_v53 = vpop.permute.xlu0 %14390 }
 0x5ab   : > { %v10502_v13 = vcombine.low %v5512_v48, %v5516_v45  ;;  %v10509_v12 = vrot.slane %v10499_v2, %v21885_v0  ;;  %v10516_v11 = vrot.slane %v10500_v21, %v21885_v0  ;;  %21966 = vst [vmem:[#allocation74_spill] sm:$0xff] %v20462_v36  ;;  %v5652_v15 = vrot.slane %v19682_v10, %v21876_v28 }
 0x5ac   : > { %v13829_v22 = vrot.slane %v13815_v18, %v21885_v0  ;;  %v10523_v27 = vrot.slane %v10501_v42, %v21885_v0  ;;  %v5656_v17 = vrot.slane %v19682_v10, %v21877_v38  ;;  %v5660_v37 = vrot.slane %v19682_v10, %v21878_v52 }
 0x5ad   : > { %v10530_v57 = vrot.slane %v10502_v13, %v21885_v0  ;;  %v10531_v51 = vcombine.low %v10509_v12, %v10516_v11  ;;  %v5664_v46 = vrot.slane %v19682_v10, %v21879_v60  ;;  %v5668_v41 = vrot.slane %v19682_v10, %v21880_v5 }
 0x5ae   : > { %v13830_v29 = vcombine.low %v13822_v40, %v13829_v22  ;;  %v5672_v48 = vrot.slane %v19682_v10, %v21881_v4  ;;  %v5676_v18 = vrot.slane %v19682_v10, %v21882_v63  ;;  %v10744_v45 = vcombine.low %v5648_v1, %v5652_v15 }
 0x5af   : > { %v10532_v2 = vcombine.low %v10523_v27, %v10530_v57  ;;  %v10539_v21 = vrot.slane %v10531_v51, %v21885_v0  ;;  %v10745_v11 = vcombine.low %v5656_v17, %v5660_v37  ;;  %v10746_v40 = vcombine.low %v5664_v46, %v5668_v41  ;;  %v20492_v27 = vpop.permute.xlu1 %14207 }
 0x5b0   : > { %14489 = vperm.xlu1 %15757, %v13830_v29   ;;  %v10747_v42 = vcombine.low %v5672_v48, %v5676_v18  ;;  %v10754_v22 = vrot.slane %v10744_v45, %v21885_v0  ;;  %v5424_v13 = vrot.slane %v19558_v59, %v21875_v16  ;;  %v5428_v10 = vrot.slane %v19558_v59, %v21876_v28  ;;  %v20504_v48 = vpop.permute.xlu0 %14204 }
 0x5b1   : > { %v10546_v12 = vrot.slane %v10532_v2, %v21885_v0  ;;  %v10761_v36 = vrot.slane %v10745_v11, %v21885_v0  ;;  %v5432_v1 = vrot.slane %v19558_v59, %v21877_v38  ;;  %21967 = vst [vmem:[#allocation75_spill] sm:$0xff] %v20492_v27  ;;  %v10768_v15 = vrot.slane %v10746_v40, %v21885_v0 }
 0x5b2   : > { %v10775_v17 = vrot.slane %v10747_v42, %v21885_v0  ;;  %v5436_v37 = vrot.slane %v19558_v59, %v21878_v52  ;;  %v5440_v29 = vrot.slane %v19558_v59, %v21879_v60  ;;  %v5444_v46 = vrot.slane %v19558_v59, %v21880_v5  ;;  %21968 = vst [vmem:[#allocation76_spill] sm:$0xff] %v20504_v48 }
 0x5b3   : > { %v10547_v57 = vcombine.low %v10539_v21, %v10546_v12  ;;  %v10776_v51 = vcombine.low %v10754_v22, %v10761_v36  ;;  %v5448_v41 = vrot.slane %v19558_v59, %v21881_v4  ;;  %v5452_v45 = vrot.slane %v19558_v59, %v21882_v63 }
 0x5b4   : > { %v10777_v18 = vcombine.low %v10768_v15, %v10775_v17  ;;  %v10401_v2 = vcombine.low %v5424_v13, %v5428_v10  ;;  %v10402_v11 = vcombine.low %v5432_v1, %v5436_v37  ;;  %v10403_v42 = vcombine.low %v5440_v29, %v5444_v46  ;;  %v20521_v1 = vpop.permute.xlu1 %14411 }
 0x5b5   : > { %14288 = vperm.xlu0 %15756, %v10547_v57   ;;  %v10784_v40 = vrot.slane %v10776_v51, %v21885_v0  ;;  %v5584_v36 = vrot.slane %v19732_v24, %v21875_v16  ;;  %v10404_v22 = vcombine.low %v5448_v41, %v5452_v45  ;;  %v5588_v59 = vrot.slane %v19732_v24, %v21876_v28  ;;  %v20532_v45 = vpop.permute.xlu0 %14408 }
 0x5b6   : > { %v10791_v21 = vrot.slane %v10777_v18, %v21885_v0  ;;  %v10411_v12 = vrot.slane %v10401_v2, %v21885_v0  ;;  %v10418_v48 = vrot.slane %v10402_v11, %v21885_v0  ;;  %v10425_v15 = vrot.slane %v10403_v42, %v21885_v0  ;;  %21969 = vst [vmem:[#allocation77_spill] sm:$0xff] %v20521_v1  ;;  %v21971_v1 = vld [vmem:[#allocation7_spill] sm:$0xff] }
 0x5b7   : > { %v5592_v13 = vrot.slane %v19732_v24, %v21877_v38  ;;  %v5596_v10 = vrot.slane %v19732_v24, %v21878_v52  ;;  %v10432_v37 = vrot.slane %v10404_v22, %v21885_v0  ;;  %v5600_v57 = vrot.slane %v19732_v24, %v21879_v60  ;;  %21970 = vst [vmem:[#allocation79_spill] sm:$0xff] %v20532_v45  ;;  %v21975_v45 = vld [vmem:[#allocation31_spill] sm:$0xff] }
 0x5b8   : > { %v10792_v17 = vcombine.low %v10784_v40, %v10791_v21  ;;  %v10433_v29 = vcombine.low %v10411_v12, %v10418_v48  ;;  %v5604_v51 = vrot.slane %v19732_v24, %v21880_v5  ;;  %v5608_v46 = vrot.slane %v19732_v24, %v21881_v4 }
 0x5b9   : > { %v5612_v41 = vrot.slane %v19732_v24, %v21882_v63  ;;  %v10646_v18 = vcombine.low %v5584_v36, %v5588_v59  ;;  %v10434_v2 = vcombine.low %v10425_v15, %v10432_v37  ;;  %v10647_v48 = vcombine.low %v5592_v13, %v5596_v10  ;;  %v20546_v13 = vpop.permute.xlu1 %14201 }
 0x5ba   : > { %14303 = vperm.xlu1 %15757, %v10792_v17   ;;  %v10441_v11 = vrot.slane %v10433_v29, %v21885_v0  ;;  %v10648_v40 = vcombine.low %v5600_v57, %v5604_v51  ;;  %v5616_v27 = vrot.slane %v21971_v1, %v21875_v16  ;;  %v5620_v24 = vrot.slane %v21971_v1, %v21876_v28 }
 0x5bb   : > { %v10649_v42 = vcombine.low %v5608_v46, %v5612_v41  ;;  %v10656_v21 = vrot.slane %v10646_v18, %v21885_v0  ;;  %v10448_v22 = vrot.slane %v10434_v2, %v21885_v0  ;;  %v10663_v12 = vrot.slane %v10647_v48, %v21885_v0  ;;  %21972 = vst [vmem:[#allocation16_spill] sm:$0xff] %v20546_v13  ;;  %v20556_v41 = vpop.permute.xlu0 %14198 }
 0x5bc   : > { %v10670_v36 = vrot.slane %v10648_v40, %v21885_v0  ;;  %v5624_v59 = vrot.slane %v21971_v1, %v21877_v38  ;;  %v5628_v37 = vrot.slane %v21971_v1, %v21878_v52  ;;  %v5632_v57 = vrot.slane %v21971_v1, %v21879_v60 }
 0x5bd   : > { %v10677_v15 = vrot.slane %v10649_v42, %v21885_v0  ;;  %v10449_v10 = vcombine.low %v10441_v11, %v10448_v22  ;;  %v10678_v17 = vcombine.low %v10656_v21, %v10663_v12  ;;  %v5636_v51 = vrot.slane %v21971_v1, %v21880_v5 }
 0x5be   : > { %v5640_v46 = vrot.slane %v21971_v1, %v21881_v4  ;;  %v5644_v2 = vrot.slane %v21971_v1, %v21882_v63  ;;  %v10695_v11 = vcombine.low %v5616_v27, %v5620_v24  ;;  %v10696_v48 = vcombine.low %v5624_v59, %v5628_v37  ;;  %v20573_v24 = vpop.permute.xlu1 %14405 }
 0x5bf   : > { %v10679_v29 = vcombine.low %v10670_v36, %v10677_v15  ;;  %14282 = vperm.xlu0 %15756, %v10449_v10   ;;  %v10686_v18 = vrot.slane %v10678_v17, %v21885_v0  ;;  %v10697_v42 = vcombine.low %v5632_v57, %v5636_v51  ;;  %v5776_v21 = vrot.slane %v19783_v25, %v21875_v16 }
 0x5c0   : > { %v10698_v22 = vcombine.low %v5640_v46, %v5644_v2  ;;  %v10705_v12 = vrot.slane %v10695_v11, %v21885_v0  ;;  %v10712_v36 = vrot.slane %v10696_v48, %v21885_v0  ;;  %v5780_v15 = vrot.slane %v19783_v25, %v21876_v28  ;;  %21973 = vst [vmem:[#allocation59_spill] sm:$0xff] %v20573_v24  ;;  %v20584_v11 = vpop.permute.xlu0 %14402 }
 0x5c1   : > { %v10693_v40 = vrot.slane %v10679_v29, %v21885_v0  ;;  %v10719_v17 = vrot.slane %v10697_v42, %v21885_v0  ;;  %v5784_v27 = vrot.slane %v19783_v25, %v21877_v38  ;;  %v5788_v1 = vrot.slane %v19783_v25, %v21878_v52  ;;  %21974 = vst [vmem:[#allocation60_spill] sm:$0xff] %v20584_v11 }
 0x5c2   : > { %v10726_v59 = vrot.slane %v10698_v22, %v21885_v0  ;;  %v10727_v37 = vcombine.low %v10705_v12, %v10712_v36  ;;  %v5792_v29 = vrot.slane %v19783_v25, %v21879_v60  ;;  %v5796_v57 = vrot.slane %v19783_v25, %v21880_v5 }
 0x5c3   : > { %v10694_v10 = vcombine.low %v10686_v18, %v10693_v40  ;;  %v5800_v51 = vrot.slane %v19783_v25, %v21881_v4  ;;  %v5804_v46 = vrot.slane %v19783_v25, %v21882_v63  ;;  %v10940_v18 = vcombine.low %v5776_v21, %v5780_v15 }
 0x5c4   : > { %v10941_v2 = vcombine.low %v5784_v27, %v5788_v1  ;;  %v10728_v48 = vcombine.low %v10719_v17, %v10726_v59  ;;  %v10735_v40 = vrot.slane %v10727_v37, %v21885_v0  ;;  %v10942_v42 = vcombine.low %v5792_v29, %v5796_v57  ;;  %v20598_v1 = vpop.permute.xlu1 %14219 }
 0x5c5   : > { %14297 = vperm.xlu1 %15757, %v10694_v10   ;;  %v10943_v22 = vcombine.low %v5800_v51, %v5804_v46  ;;  %v10950_v12 = vrot.slane %v10940_v18, %v21885_v0  ;;  %v5552_v25 = vrot.slane %v21975_v45, %v21875_v16  ;;  %v5556_v17 = vrot.slane %v21975_v45, %v21876_v28  ;;  %v20607_v18 = vpop.permute.xlu0 %14216 }
 0x5c6   : > { %v10957_v36 = vrot.slane %v10941_v2, %v21885_v0  ;;  %v10742_v10 = vrot.slane %v10728_v48, %v21885_v0  ;;  %v10964_v24 = vrot.slane %v10942_v42, %v21885_v0  ;;  %v5560_v27 = vrot.slane %v21975_v45, %v21877_v38  ;;  %21976 = vst [vmem:[#allocation17_spill] sm:$0xff] %v20598_v1 }
 0x5c7   : > { %v10971_v21 = vrot.slane %v10943_v22, %v21885_v0  ;;  %v5564_v37 = vrot.slane %v21975_v45, %v21878_v52  ;;  %v5568_v29 = vrot.slane %v21975_v45, %v21879_v60  ;;  %v5572_v46 = vrot.slane %v21975_v45, %v21880_v5  ;;  %21977 = vst [vmem:[#allocation15_spill] sm:$0xff] %v20607_v18 }
 0x5c8   : > { %v10972_v15 = vcombine.low %v10950_v12, %v10957_v36  ;;  %v10743_v59 = vcombine.low %v10735_v40, %v10742_v10  ;;  %v5576_v2 = vrot.slane %v21975_v45, %v21881_v4  ;;  %v5580_v48 = vrot.slane %v21975_v45, %v21882_v63 }
 0x5c9   : > { %v10973_v57 = vcombine.low %v10964_v24, %v10971_v21  ;;  %v10597_v40 = vcombine.low %v5552_v25, %v5556_v17  ;;  %v10598_v42 = vcombine.low %v5560_v27, %v5564_v37  ;;  %v10599_v12 = vcombine.low %v5568_v29, %v5572_v46  ;;  %v20625_v17 = vpop.permute.xlu1 %14423 }
 0x5ca   : > { %v10980_v51 = vrot.slane %v10972_v15, %v21885_v0  ;;  %14300 = vperm.xlu0 %15756, %v10743_v59   ;;  %v5712_v24 = vrot.slane %v19809_v3, %v21875_v16  ;;  %v10600_v36 = vcombine.low %v5576_v2, %v5580_v48  ;;  %v5716_v15 = vrot.slane %v19809_v3, %v21876_v28 }
 0x5cb   : > { %v10987_v22 = vrot.slane %v10973_v57, %v21885_v0  ;;  %v10607_v10 = vrot.slane %v10597_v40, %v21885_v0  ;;  %v10614_v21 = vrot.slane %v10598_v42, %v21885_v0  ;;  %v10621_v1 = vrot.slane %v10599_v12, %v21885_v0  ;;  %21978 = vst [vmem:[#allocation20_spill] sm:$0xff] %v20625_v17  ;;  %v20636_v40 = vpop.permute.xlu0 %14420 }
 0x5cc   : > { %v5720_v45 = vrot.slane %v19809_v3, %v21877_v38  ;;  %v5724_v25 = vrot.slane %v19809_v3, %v21878_v52  ;;  %v10628_v27 = vrot.slane %v10600_v36, %v21885_v0  ;;  %v5728_v29 = vrot.slane %v19809_v3, %v21879_v60  ;;  %21979 = vst [vmem:[#allocation58_spill] sm:$0xff] %v20636_v40 }
 0x5cd   : > { %v10988_v59 = vcombine.low %v10980_v51, %v10987_v22  ;;  %v10629_v37 = vcombine.low %v10607_v10, %v10614_v21  ;;  %v5732_v57 = vrot.slane %v19809_v3, %v21880_v5  ;;  %v5736_v51 = vrot.slane %v19809_v3, %v21881_v4 }
 0x5ce   : > { %v5740_v46 = vrot.slane %v19809_v3, %v21882_v63  ;;  %v10842_v2 = vcombine.low %v5712_v24, %v5716_v15  ;;  %v10843_v48 = vcombine.low %v5720_v45, %v5724_v25  ;;  %v10630_v42 = vcombine.low %v10621_v1, %v10628_v27 }
 0x5cf   : > { %14315 = vperm.xlu1 %15757, %v10988_v59   ;;  %v10637_v22 = vrot.slane %v10629_v37, %v21885_v0  ;;  %v10844_v12 = vcombine.low %v5728_v29, %v5732_v57  ;;  %v5744_v59 = vrot.slane %v19712_v33, %v21875_v16  ;;  %v5748_v24 = vrot.slane %v19712_v33, %v21876_v28  ;;  %v20654_v37 = vpop.permute.xlu1 %14213 }
 0x5d0   : > { %v10845_v36 = vcombine.low %v5736_v51, %v5740_v46  ;;  %v10852_v10 = vrot.slane %v10842_v2, %v21885_v0  ;;  %v10859_v21 = vrot.slane %v10843_v48, %v21885_v0  ;;  %v10644_v18 = vrot.slane %v10630_v42, %v21885_v0  ;;  %21980 = vst [vmem:[#allocation22_spill] sm:$0xff] %v20654_v37 }
 0x5d1   : > { %v10866_v3 = vrot.slane %v10844_v12, %v21885_v0  ;;  %v5752_v1 = vrot.slane %v19712_v33, %v21877_v38  ;;  %v5756_v25 = vrot.slane %v19712_v33, %v21878_v52  ;;  %v5760_v27 = vrot.slane %v19712_v33, %v21879_v60 }
 0x5d2   : > { %v10873_v15 = vrot.slane %v10845_v36, %v21885_v0  ;;  %v10874_v45 = vcombine.low %v10852_v10, %v10859_v21  ;;  %v10645_v29 = vcombine.low %v10637_v22, %v10644_v18  ;;  %v5764_v57 = vrot.slane %v19712_v33, %v21880_v5  ;;  %v20663_v36 = vpop.permute.xlu0 %14210 }
 0x5d3   : > { %v5768_v51 = vrot.slane %v19712_v33, %v21881_v4  ;;  %v5772_v46 = vrot.slane %v19712_v33, %v21882_v63  ;;  %v10891_v42 = vcombine.low %v5744_v59, %v5748_v24  ;;  %v10892_v12 = vcombine.low %v5752_v1, %v5756_v25  ;;  %21981 = vst [vmem:[#allocation21_spill] sm:$0xff] %v20663_v36 }
 0x5d4   : > { %v10875_v2 = vcombine.low %v10866_v3, %v10873_v15  ;;  %v10882_v48 = vrot.slane %v10874_v45, %v21885_v0  ;;  %14294 = vperm.xlu0 %15756, %v10645_v29   ;;  %v10893_v10 = vcombine.low %v5760_v27, %v5764_v57  ;;  %v5904_v18 = vrot.slane %v19837_v54, %v21875_v16  ;;  %v20682_v29 = vpop.permute.xlu1 %14417 }
 0x5d5   : > { %v10894_v21 = vcombine.low %v5768_v51, %v5772_v46  ;;  %v10901_v11 = vrot.slane %v10891_v42, %v21885_v0  ;;  %v10908_v37 = vrot.slane %v10892_v12, %v21885_v0  ;;  %v5908_v33 = vrot.slane %v19837_v54, %v21876_v28  ;;  %21982 = vst [vmem:[#allocation63_spill] sm:$0xff] %v20682_v29 }
 0x5d6   : > { %v10889_v22 = vrot.slane %v10875_v2, %v21885_v0  ;;  %v10915_v59 = vrot.slane %v10893_v10, %v21885_v0  ;;  %v5912_v24 = vrot.slane %v19837_v54, %v21877_v38  ;;  %v5916_v1 = vrot.slane %v19837_v54, %v21878_v52  ;;  %v20689_v42 = vpop.permute.xlu0 %14414 }
 0x5d7   : > { %v10922_v3 = vrot.slane %v10894_v21, %v21885_v0  ;;  %v10923_v45 = vcombine.low %v10901_v11, %v10908_v37  ;;  %v5920_v25 = vrot.slane %v19837_v54, %v21879_v60  ;;  %v5924_v27 = vrot.slane %v19837_v54, %v21880_v5  ;;  %21983 = vst [vmem:[#allocation19_spill] sm:$0xff] %v20689_v42 }
 0x5d8   : > { %v10890_v15 = vcombine.low %v10882_v48, %v10889_v22  ;;  %v5928_v51 = vrot.slane %v19837_v54, %v21881_v4  ;;  %v5932_v46 = vrot.slane %v19837_v54, %v21882_v63  ;;  %v11136_v2 = vcombine.low %v5904_v18, %v5908_v33  ;;  %v21984_v22 = vld [vmem:[#allocation38_spill] sm:$0xff] }
 0x5d9   : > { %v10924_v57 = vcombine.low %v10915_v59, %v10922_v3  ;;  %v10931_v48 = vrot.slane %v10923_v45, %v21885_v0  ;;  %v11137_v11 = vcombine.low %v5912_v24, %v5916_v1  ;;  %v11138_v37 = vcombine.low %v5920_v25, %v5924_v27 }
 0x5da   : > { %14309 = vperm.xlu1 %15757, %v10890_v15   ;;  %v11139_v10 = vcombine.low %v5928_v51, %v5932_v46  ;;  %v11146_v21 = vrot.slane %v11136_v2, %v21885_v0  ;;  %v5680_v59 = vrot.slane %v21984_v22, %v21875_v16  ;;  %v5684_v18 = vrot.slane %v21984_v22, %v21876_v28  ;;  %v20712_v46 = vpop.permute.xlu1 %14231 }
 0x5db   : > { %v10938_v12 = vrot.slane %v10924_v57, %v21885_v0  ;;  %v11153_v3 = vrot.slane %v11137_v11, %v21885_v0  ;;  %v11160_v54 = vrot.slane %v11138_v37, %v21885_v0  ;;  %v5688_v33 = vrot.slane %v21984_v22, %v21877_v38 }
 0x5dc   : > { %v11167_v1 = vrot.slane %v11139_v10, %v21885_v0  ;;  %v5692_v15 = vrot.slane %v21984_v22, %v21878_v52  ;;  %v5696_v45 = vrot.slane %v21984_v22, %v21879_v60  ;;  %v5700_v27 = vrot.slane %v21984_v22, %v21880_v5 }
 0x5dd   : > { %v10939_v24 = vcombine.low %v10931_v48, %v10938_v12  ;;  %v11168_v25 = vcombine.low %v11146_v21, %v11153_v3  ;;  %v5704_v57 = vrot.slane %v21984_v22, %v21881_v4  ;;  %v5708_v51 = vrot.slane %v21984_v22, %v21882_v63  ;;  %v20717_v3 = vpop.permute.xlu0 %14228 }
 0x5de   : > { %v11169_v2 = vcombine.low %v11160_v54, %v11167_v1  ;;  %v10793_v48 = vcombine.low %v5680_v59, %v5684_v18  ;;  %v10794_v11 = vcombine.low %v5688_v33, %v5692_v15  ;;  %v10795_v12 = vcombine.low %v5696_v45, %v5700_v27 }
 0x5df   : > { %14312 = vperm.xlu0 %15756, %v10939_v24   ;;  %v11176_v37 = vrot.slane %v11168_v25, %v21885_v0  ;;  %v10796_v10 = vcombine.low %v5704_v57, %v5708_v51  ;;  %v5840_v21 = vrot.slane %v19865_v62, %v21875_v16  ;;  %v5844_v54 = vrot.slane %v19865_v62, %v21876_v28 }
 0x5e0   : > { %v11183_v36 = vrot.slane %v11169_v2, %v21885_v0  ;;  %v10803_v40 = vrot.slane %v10793_v48, %v21885_v0  ;;  %v10810_v22 = vrot.slane %v10794_v11, %v21885_v0  ;;  %v10817_v59 = vrot.slane %v10795_v12, %v21885_v0  ;;  %v20738_v48 = vpop.permute.xlu1 %14435 }
 0x5e1   : > { %v10824_v18 = vrot.slane %v10796_v10, %v21885_v0  ;;  %v5848_v33 = vrot.slane %v19865_v62, %v21877_v38  ;;  %v5852_v24 = vrot.slane %v19865_v62, %v21878_v52  ;;  %v5856_v45 = vrot.slane %v19865_v62, %v21879_v60  ;;  %21985 = vst [vmem:[#allocation64_spill] sm:$0xff] %v20738_v48 }
 0x5e2   : > { %v11184_v1 = vcombine.low %v11176_v37, %v11183_v36  ;;  %v10825_v15 = vcombine.low %v10803_v40, %v10810_v22  ;;  %v5860_v25 = vrot.slane %v19865_v62, %v21880_v5  ;;  %v5864_v57 = vrot.slane %v19865_v62, %v21881_v4  ;;  %v20743_v22 = vpop.permute.xlu0 %14432 }
 0x5e3   : > { %v10826_v27 = vcombine.low %v10817_v59, %v10824_v18  ;;  %v5868_v51 = vrot.slane %v19865_v62, %v21882_v63  ;;  %v11038_v2 = vcombine.low %v5840_v21, %v5844_v54  ;;  %v11039_v40 = vcombine.low %v5848_v33, %v5852_v24  ;;  %21986 = vst [vmem:[#allocation69_spill] sm:$0xff] %v20743_v22 }
 0x5e4   : > { %14327 = vperm.xlu1 %15757, %v11184_v1   ;;  %v10833_v36 = vrot.slane %v10825_v15, %v21885_v0  ;;  %v11040_v11 = vcombine.low %v5856_v45, %v5860_v25  ;;  %v5872_v62 = vrot.slane %v19767_v7, %v21875_v16  ;;  %v5876_v33 = vrot.slane %v19767_v7, %v21876_v28 }
 0x5e5   : > { %v10840_v37 = vrot.slane %v10826_v27, %v21885_v0  ;;  %v11041_v12 = vcombine.low %v5864_v57, %v5868_v51  ;;  %v11048_v10 = vrot.slane %v11038_v2, %v21885_v0  ;;  %v11055_v59 = vrot.slane %v11039_v40, %v21885_v0  ;;  %v20762_v51 = vpop.permute.xlu1 %14225 }
 0x5e6   : > { %v11062_v18 = vrot.slane %v11040_v11, %v21885_v0  ;;  %v5880_v24 = vrot.slane %v19767_v7, %v21877_v38  ;;  %v5884_v15 = vrot.slane %v19767_v7, %v21878_v52  ;;  %v5888_v45 = vrot.slane %v19767_v7, %v21879_v60 }
 0x5e7   : > { %v10841_v21 = vcombine.low %v10833_v36, %v10840_v37  ;;  %v11069_v54 = vrot.slane %v11041_v12, %v21885_v0  ;;  %v11070_v1 = vcombine.low %v11048_v10, %v11055_v59  ;;  %v5892_v27 = vrot.slane %v19767_v7, %v21880_v5  ;;  %v21987_v10 = vld [vmem:[#allocation14_spill] sm:$0xff] }
 0x5e8   : > { %v5896_v57 = vrot.slane %v19767_v7, %v21881_v4  ;;  %v5900_v36 = vrot.slane %v19767_v7, %v21882_v63  ;;  %v11087_v40 = vcombine.low %v5872_v62, %v5876_v33  ;;  %v11088_v11 = vcombine.low %v5880_v24, %v5884_v15 }
 0x5e9   : > { %14306 = vperm.xlu0 %15756, %v10841_v21   ;;  %v11071_v25 = vcombine.low %v11062_v18, %v11069_v54  ;;  %v11078_v2 = vrot.slane %v11070_v1, %v21885_v0  ;;  %v11089_v12 = vcombine.low %v5888_v45, %v5892_v27  ;;  %v7728_v59 = vrot.slane %v21987_v10, %v21875_v16  ;;  %v20770_v18 = vpop.permute.xlu0 %14222 }
 0x5ea   : > { %v11090_v21 = vcombine.low %v5896_v57, %v5900_v36  ;;  %v11097_v54 = vrot.slane %v11087_v40, %v21885_v0  ;;  %v11104_v48 = vrot.slane %v11088_v11, %v21885_v0  ;;  %v7732_v1 = vrot.slane %v21987_v10, %v21876_v28  ;;  %v20790_v40 = vpop.permute.xlu1 %14429 }
 0x5eb   : > { %v11085_v37 = vrot.slane %v11071_v25, %v21885_v0  ;;  %v11111_v7 = vrot.slane %v11089_v12, %v21885_v0  ;;  %v7736_v62 = vrot.slane %v21987_v10, %v21877_v38  ;;  %v7740_v33 = vrot.slane %v21987_v10, %v21878_v52  ;;  %21988 = vst [vmem:[#allocation65_spill] sm:$0xff] %v20790_v40 }
 0x5ec   : > { %v11118_v24 = vrot.slane %v11090_v21, %v21885_v0  ;;  %v11119_v15 = vcombine.low %v11097_v54, %v11104_v48  ;;  %v7744_v45 = vrot.slane %v21987_v10, %v21879_v60  ;;  %v7748_v25 = vrot.slane %v21987_v10, %v21880_v5 }
 0x5ed   : > { %v11086_v22 = vcombine.low %v11078_v2, %v11085_v37  ;;  %v7752_v27 = vrot.slane %v21987_v10, %v21881_v4  ;;  %v7756_v57 = vrot.slane %v21987_v10, %v21882_v63  ;;  %v13929_v2 = vcombine.low %v7728_v59, %v7732_v1  ;;  %v21990_v10 = vld [vmem:[#allocation37_spill] sm:$0xff] }
 0x5ee   : > { %v13930_v36 = vcombine.low %v7736_v62, %v7740_v33  ;;  %v11120_v11 = vcombine.low %v11111_v7, %v11118_v24  ;;  %v11127_v48 = vrot.slane %v11119_v15, %v21885_v0  ;;  %v13931_v37 = vcombine.low %v7744_v45, %v7748_v25 }
 0x5ef   : > { %14321 = vperm.xlu1 %15757, %v11086_v22   ;;  %v13932_v12 = vcombine.low %v7752_v27, %v7756_v57  ;;  %v13939_v21 = vrot.slane %v13929_v2, %v21885_v0  ;;  %v20795_v22 = vpop.permute.xlu0 %14426  ;;  %v5808_v59 = vrot.slane %v21990_v10, %v21875_v16  ;;  %v5812_v62 = vrot.slane %v21990_v10, %v21876_v28  ;;  %v20813_v2 = vpop.permute.xlu1 %14243 }
 0x5f0   : > { %v13946_v54 = vrot.slane %v13930_v36, %v21885_v0  ;;  %21989 = vst [vmem:[#allocation62_spill] sm:$0xff] %v20795_v22  ;;  %v11134_v17 = vrot.slane %v11120_v11, %v21885_v0  ;;  %v13953_v29 = vrot.slane %v13931_v37, %v21885_v0  ;;  %v5816_v33 = vrot.slane %v21990_v10, %v21877_v38 }
 0x5f1   : > { %v13960_v1 = vrot.slane %v13932_v12, %v21885_v0  ;;  %v5820_v15 = vrot.slane %v21990_v10, %v21878_v52  ;;  %v5824_v45 = vrot.slane %v21990_v10, %v21879_v60  ;;  %v5828_v57 = vrot.slane %v21990_v10, %v21880_v5  ;;  %21991 = vst [vmem:[#allocation26_spill] sm:$0xff] %v20813_v2 }
 0x5f2   : > { %v13961_v7 = vcombine.low %v13939_v21, %v13946_v54  ;;  %v11135_v24 = vcombine.low %v11127_v48, %v11134_v17  ;;  %v5832_v36 = vrot.slane %v21990_v10, %v21881_v4  ;;  %v5836_v17 = vrot.slane %v21990_v10, %v21882_v63 }
 0x5f3   : > { %v13962_v25 = vcombine.low %v13953_v29, %v13960_v1  ;;  %v10989_v11 = vcombine.low %v5808_v59, %v5812_v62  ;;  %v10990_v37 = vcombine.low %v5816_v33, %v5820_v15  ;;  %v10991_v12 = vcombine.low %v5824_v45, %v5828_v57  ;;  %v20820_v29 = vpop.permute.xlu0 %14240  ;;  %v21993_v1 = vld [vmem:[#allocation36_spill] sm:$0xff] }
 0x5f4   : > { %v13969_v27 = vrot.slane %v13961_v7, %v21885_v0  ;;  %14324 = vperm.xlu0 %15756, %v11135_v24   ;;  %21992 = vst [vmem:[#allocation25_spill] sm:$0xff] %v20820_v29  ;;  %v10992_v21 = vcombine.low %v5832_v36, %v5836_v17  ;;  %v7760_v7 = vrot.slane %v21993_v1, %v21875_v16  ;;  %v20842_v36 = vpop.permute.xlu1 %14237 }
 0x5f5   : > { %v13976_v48 = vrot.slane %v13962_v25, %v21885_v0  ;;  %v10999_v54 = vrot.slane %v10989_v11, %v21885_v0  ;;  %v11006_v40 = vrot.slane %v10990_v37, %v21885_v0  ;;  %v11013_v22 = vrot.slane %v10991_v12, %v21885_v0  ;;  %21994 = vst [vmem:[#allocation24_spill] sm:$0xff] %v20842_v36 }
 0x5f6   : > { %v7764_v10 = vrot.slane %v21993_v1, %v21876_v28  ;;  %v11020_v59 = vrot.slane %v10992_v21, %v21885_v0  ;;  %v7768_v62 = vrot.slane %v21993_v1, %v21877_v38  ;;  %v7772_v33 = vrot.slane %v21993_v1, %v21878_v52 }
 0x5f7   : > { %v13977_v24 = vcombine.low %v13969_v27, %v13976_v48  ;;  %v7776_v15 = vrot.slane %v21993_v1, %v21879_v60  ;;  %v11021_v45 = vcombine.low %v10999_v54, %v11006_v40  ;;  %v7780_v25 = vrot.slane %v21993_v1, %v21880_v5  ;;  %v21995_v40 = vld [vmem:[#allocation9_spill] sm:$0xff] }
 0x5f8   : > { %v7784_v27 = vrot.slane %v21993_v1, %v21881_v4  ;;  %v7788_v57 = vrot.slane %v21993_v1, %v21882_v63  ;;  %v11022_v17 = vcombine.low %v11013_v22, %v11020_v59  ;;  %v13978_v11 = vcombine.low %v7760_v7, %v7764_v10 }
 0x5f9   : > { %14498 = vperm.xlu1 %15757, %v13977_v24   ;;  %v13979_v48 = vcombine.low %v7768_v62, %v7772_v33  ;;  %v11029_v37 = vrot.slane %v11021_v45, %v21885_v0  ;;  %v13980_v12 = vcombine.low %v7776_v15, %v7780_v25  ;;  %v7216_v54 = vrot.slane %v21995_v40, %v21875_v16  ;;  %v20847_v24 = vpop.permute.xlu0 %14444 }
 0x5fa   : > { %v13981_v21 = vcombine.low %v7784_v27, %v7788_v57  ;;  %21996 = vst [vmem:[#allocation67_spill] sm:$0xff] %v20847_v24  ;;  %v11036_v2 = vrot.slane %v11022_v17, %v21885_v0  ;;  %v13988_v29 = vrot.slane %v13978_v11, %v21885_v0  ;;  %v7220_v22 = vrot.slane %v21995_v40, %v21876_v28 }
 0x5fb   : > { %v13995_v1 = vrot.slane %v13979_v48, %v21885_v0  ;;  %v14002_v7 = vrot.slane %v13980_v12, %v21885_v0  ;;  %v7224_v59 = vrot.slane %v21995_v40, %v21877_v38  ;;  %v7228_v62 = vrot.slane %v21995_v40, %v21878_v52  ;;  %v20868_v48 = vpop.permute.xlu1 %14255 }
 0x5fc   : > { %v14009_v10 = vrot.slane %v13981_v21, %v21885_v0  ;;  %v11037_v33 = vcombine.low %v11029_v37, %v11036_v2  ;;  %v7232_v45 = vrot.slane %v21995_v40, %v21879_v60  ;;  %v7236_v25 = vrot.slane %v21995_v40, %v21880_v5  ;;  %21997 = vst [vmem:[#allocation30_spill] sm:$0xff] %v20868_v48 }
 0x5fd   : > { %v14010_v15 = vcombine.low %v13988_v29, %v13995_v1  ;;  %v7240_v57 = vrot.slane %v21995_v40, %v21881_v4  ;;  %v7244_v17 = vrot.slane %v21995_v40, %v21882_v63  ;;  %v13145_v11 = vcombine.low %v7216_v54, %v7220_v22  ;;  %v20875_v24 = vpop.permute.xlu0 %14234 }
 0x5fe   : > { %v14011_v27 = vcombine.low %v14002_v7, %v14009_v10  ;;  %14318 = vperm.xlu0 %15756, %v11037_v33   ;;  %v13146_v29 = vcombine.low %v7224_v59, %v7228_v62  ;;  %v13147_v37 = vcombine.low %v7232_v45, %v7236_v25  ;;  %v21998_v7 = vld [vmem:[#allocation53_spill] sm:$0xff] }
 0x5ff   : > { %v14018_v2 = vrot.slane %v14010_v15, %v21885_v0  ;;  %v13148_v21 = vcombine.low %v7240_v57, %v7244_v17  ;;  %v13155_v1 = vrot.slane %v13145_v11, %v21885_v0  ;;  %v7792_v10 = vrot.slane %v21998_v7, %v21875_v16 }
 0x600   : > { %v14025_v12 = vrot.slane %v14011_v27, %v21885_v0  ;;  %v13162_v40 = vrot.slane %v13146_v29, %v21885_v0  ;;  %v13169_v54 = vrot.slane %v13147_v37, %v21885_v0  ;;  %v7796_v22 = vrot.slane %v21998_v7, %v21876_v28  ;;  %v20894_v37 = vpop.permute.xlu1 %14249 }
 0x601   : > { %v7800_v59 = vrot.slane %v21998_v7, %v21877_v38  ;;  %v13176_v33 = vrot.slane %v13148_v21, %v21885_v0  ;;  %v7804_v15 = vrot.slane %v21998_v7, %v21878_v52  ;;  %v7808_v45 = vrot.slane %v21998_v7, %v21879_v60  ;;  %21999 = vst [vmem:[#allocation66_spill] sm:$0xff] %v20894_v37 }
 0x602   : > { %v14026_v62 = vcombine.low %v14018_v2, %v14025_v12  ;;  %v13177_v25 = vcombine.low %v13155_v1, %v13162_v40  ;;  %v7812_v27 = vrot.slane %v21998_v7, %v21880_v5  ;;  %v7816_v57 = vrot.slane %v21998_v7, %v21881_v4  ;;  %v22000_v1 = vld [vmem:[#allocation33_spill] sm:$0xff] }
 0x603   : > { %v7820_v17 = vrot.slane %v21998_v7, %v21882_v63  ;;  %v13178_v11 = vcombine.low %v13169_v54, %v13176_v33  ;;  %v14027_v2 = vcombine.low %v7792_v10, %v7796_v22  ;;  %v14028_v29 = vcombine.low %v7800_v59, %v7804_v15  ;;  %v20904_v10 = vpop.permute.xlu0 %14438 }
 0x604   : > { %14501 = vperm.xlu1 %15757, %v14026_v62   ;;  %v13185_v12 = vrot.slane %v13177_v25, %v21885_v0  ;;  %v14029_v21 = vcombine.low %v7808_v45, %v7812_v27  ;;  %v7248_v40 = vrot.slane %v22000_v1, %v21875_v16  ;;  %v7252_v7 = vrot.slane %v22000_v1, %v21876_v28 }
 0x605   : > { %v14030_v48 = vcombine.low %v7816_v57, %v7820_v17  ;;  %v13192_v36 = vrot.slane %v13178_v11, %v21885_v0  ;;  %v14037_v42 = vrot.slane %v14027_v2, %v21885_v0  ;;  %v14044_v13 = vrot.slane %v14028_v29, %v21885_v0  ;;  %22001 = vst [vmem:[#allocation23_spill] sm:$0xff] %v20904_v10 }
 0x606   : > { %v14051_v54 = vrot.slane %v14029_v21, %v21885_v0  ;;  %v7256_v59 = vrot.slane %v22000_v1, %v21877_v38  ;;  %v7260_v62 = vrot.slane %v22000_v1, %v21878_v52  ;;  %v7264_v45 = vrot.slane %v22000_v1, %v21879_v60  ;;  %v22002_v21 = vld [vmem:[#allocation12_spill] sm:$0xff] }
 0x607   : > { %v14058_v22 = vrot.slane %v14030_v48, %v21885_v0  ;;  %v13193_v33 = vcombine.low %v13185_v12, %v13192_v36  ;;  %v14059_v15 = vcombine.low %v14037_v42, %v14044_v13  ;;  %v7268_v25 = vrot.slane %v22000_v1, %v21880_v5  ;;  %v20921_v13 = vpop.permute.xlu1 %14468 }
 0x608   : > { %v7272_v57 = vrot.slane %v22000_v1, %v21881_v4  ;;  %v7276_v48 = vrot.slane %v22000_v1, %v21882_v63  ;;  %v13194_v17 = vcombine.low %v7248_v40, %v7252_v7  ;;  %v13195_v2 = vcombine.low %v7256_v59, %v7260_v62  ;;  %v20933_v59 = vpop.permute.xlu0 %14447 }
 0x609   : > { %v14060_v27 = vcombine.low %v14051_v54, %v14058_v22  ;;  %14450 = vperm.xlu0 %15756, %v13193_v33   ;;  %v14067_v11 = vrot.slane %v14059_v15, %v21885_v0  ;;  %v13196_v36 = vcombine.low %v7264_v45, %v7268_v25  ;;  %v7824_v54 = vrot.slane %v22002_v21, %v21875_v16 }
 0x60a   : > { %v13197_v29 = vcombine.low %v7272_v57, %v7276_v48  ;;  %v13204_v12 = vrot.slane %v13194_v17, %v21885_v0  ;;  %v13211_v22 = vrot.slane %v13195_v2, %v21885_v0  ;;  %v7828_v40 = vrot.slane %v22002_v21, %v21876_v28  ;;  %22003 = vst [vmem:[#allocation52_spill] sm:$0xff] %v20933_v59 }
 0x60b   : > { %v14074_v42 = vrot.slane %v14060_v27, %v21885_v0  ;;  %v13218_v1 = vrot.slane %v13196_v36, %v21885_v0  ;;  %v7832_v7 = vrot.slane %v22002_v21, %v21877_v38  ;;  %v7836_v15 = vrot.slane %v22002_v21, %v21878_v52  ;;  %v20947_v59 = vpop.permute.xlu1 %14462 }
 0x60c   : > { %v13225_v33 = vrot.slane %v13197_v29, %v21885_v0  ;;  %v7840_v45 = vrot.slane %v22002_v21, %v21879_v60  ;;  %v13226_v25 = vcombine.low %v13204_v12, %v13211_v22  ;;  %v7844_v27 = vrot.slane %v22002_v21, %v21880_v5 }
 0x60d   : > { %v14075_v62 = vcombine.low %v14067_v11, %v14074_v42  ;;  %v7848_v57 = vrot.slane %v22002_v21, %v21881_v4  ;;  %v7852_v48 = vrot.slane %v22002_v21, %v21882_v63  ;;  %v14076_v11 = vcombine.low %v7824_v54, %v7828_v40 }
 0x60e   : > { %v13227_v17 = vcombine.low %v13218_v1, %v13225_v33  ;;  %v14077_v2 = vcombine.low %v7832_v7, %v7836_v15  ;;  %v13234_v36 = vrot.slane %v13226_v25, %v21885_v0  ;;  %v14078_v42 = vcombine.low %v7840_v45, %v7844_v27  ;;  %v22004_v1 = vld [vmem:[#allocation32_spill] sm:$0xff]  ;;  %v20958_v7 = vpop.permute.xlu0 %14441 }
 0x60f   : > { %14504 = vperm.xlu1 %15757, %v14075_v62   ;;  %v14079_v29 = vcombine.low %v7848_v57, %v7852_v48  ;;  %v14086_v22 = vrot.slane %v14076_v11, %v21885_v0  ;;  %v7280_v54 = vrot.slane %v22004_v1, %v21875_v16  ;;  %v7284_v40 = vrot.slane %v22004_v1, %v21876_v28 }
 0x610   : > { %v13241_v12 = vrot.slane %v13227_v17, %v21885_v0  ;;  %v14093_v10 = vrot.slane %v14077_v2, %v21885_v0  ;;  %v14100_v37 = vrot.slane %v14078_v42, %v21885_v0  ;;  %22005 = vst [vmem:[#allocation10_spill] sm:$0xff] %v20958_v7  ;;  %v7288_v15 = vrot.slane %v22004_v1, %v21877_v38  ;;  %v20974_v2 = vpop.permute.xlu1 %14267 }
 0x611   : > { %v14107_v21 = vrot.slane %v14079_v29, %v21885_v0  ;;  %v7292_v25 = vrot.slane %v22004_v1, %v21878_v52  ;;  %v7296_v27 = vrot.slane %v22004_v1, %v21879_v60  ;;  %v7300_v48 = vrot.slane %v22004_v1, %v21880_v5  ;;  %22006 = vst [vmem:[#allocation68_spill] sm:$0xff] %v20974_v2 }
 0x612   : > { %v13242_v62 = vcombine.low %v13234_v36, %v13241_v12  ;;  %v14108_v33 = vcombine.low %v14086_v22, %v14093_v10  ;;  %v7304_v17 = vrot.slane %v22004_v1, %v21881_v4  ;;  %v13243_v11 = vcombine.low %v7280_v54, %v7284_v40 }
 0x613   : > { %v14109_v45 = vcombine.low %v14100_v37, %v14107_v21  ;;  %v7308_v37 = vrot.slane %v22004_v1, %v21882_v63  ;;  %v13244_v36 = vcombine.low %v7288_v15, %v7292_v25  ;;  %v13245_v42 = vcombine.low %v7296_v27, %v7300_v48  ;;  %v20977_v21 = vpop.permute.xlu0 %14252 }
 0x614   : > { %14453 = vperm.xlu0 %15756, %v13242_v62   ;;  %v14116_v57 = vrot.slane %v14108_v33, %v21885_v0  ;;  %v13253_v22 = vrot.slane %v13243_v11, %v21885_v0  ;;  %22007 = vst [vmem:[#allocation6_spill] sm:$0xff] %v20977_v21 }
 0x615   : > { %v14123_v10 = vrot.slane %v14109_v45, %v21885_v0  ;;  %v13246_v12 = vcombine.low %v7304_v17, %v7308_v37  ;;  %v13260_v62 = vrot.slane %v13244_v36, %v21885_v0  ;;  %v13267_v33 = vrot.slane %v13245_v42, %v21885_v0  ;;  %v22008_v45 = vld [vmem:[#allocation54_spill] sm:$0xff] }
 0x616   : > { %v7312_v7 = vrot.slane %v22008_v45, %v21875_v16  ;;  %v7316_v1 = vrot.slane %v22008_v45, %v21876_v28  ;;  %v7320_v40 = vrot.slane %v22008_v45, %v21877_v38  ;;  %v7324_v15 = vrot.slane %v22008_v45, %v21878_v52 }
 0x617   : > { %v14124_v29 = vcombine.low %v14116_v57, %v14123_v10  ;;  %v13274_v54 = vrot.slane %v13246_v12, %v21885_v0  ;;  %v13275_v25 = vcombine.low %v13253_v22, %v13260_v62  ;;  %v7328_v27 = vrot.slane %v22008_v45, %v21879_v60  ;;  %v20998_v10 = vpop.permute.xlu1 %14261 }
 0x618   : > { %v7332_v57 = vrot.slane %v22008_v45, %v21880_v5  ;;  %v7336_v28 = vrot.slane %v22008_v45, %v21881_v4  ;;  %v7340_v48 = vrot.slane %v22008_v45, %v21882_v63  ;;  %v13292_v17 = vcombine.low %v7312_v7, %v7316_v1  ;;  %22009 = vst [vmem:[#allocation28_spill] sm:$0xff] %v20998_v10  ;;  %v21003_v5 = vpop.permute.xlu0 %14246 }
 0x619   : > { %14507 = vperm.xlu1 %15757, %v14124_v29   ;;  %v13276_v16 = vcombine.low %v13267_v33, %v13274_v54  ;;  %v13283_v38 = vrot.slane %v13275_v25, %v21885_v0  ;;  %v13293_v52 = vcombine.low %v7320_v40, %v7324_v15 }
 0x61a   : > { %v13294_v37 = vcombine.low %v7328_v27, %v7332_v57  ;;  %v13295_v60 = vcombine.low %v7336_v28, %v7340_v48  ;;  %v13302_v36 = vrot.slane %v13292_v17, %v21885_v0 }
 0x61b   : > { %v13290_v11 = vrot.slane %v13276_v16, %v21885_v0  ;;  %v13309_v42 = vrot.slane %v13293_v52, %v21885_v0  ;;  %v21008_v22 = vpop.permute.xlu1 %14480 }
 0x61c   : > { %v13316_v4 = vrot.slane %v13294_v37, %v21885_v0  ;;  %v13323_v63 = vrot.slane %v13295_v60, %v21885_v0  ;;  %22010 = vst [vmem:[#allocation29_spill] sm:$0xff] %v21008_v22  ;;  %v21012_v45 = vpop.permute.xlu0 %14264  ;;  %v22017_v37 = vlaneseq }
 0x61d   : > { %v13291_v29 = vcombine.low %v13283_v38, %v13290_v11  ;;  %v13324_v7 = vcombine.low %v13302_v36, %v13309_v42  ;;  %22011 = vst [vmem:[#allocation72_spill] sm:$0xff] %v21012_v45 }
 0x61e   : > { %v13325_v12 = vcombine.low %v13316_v4, %v13323_v63  ;;  %v21039_v11 = vand.u32 127, %v22017_v37  ;;  %v22020_v4 = vld [vmem:[#allocation70_spill] sm:$0xff] }
 0x61f   : > { %14456 = vperm.xlu0 %15756, %v13291_v29   ;;  %v13332_v62 = vrot.slane %v13324_v7, %v21885_v0  ;;  %v21014_v54 = vpop.permute.xlu1 %14474 }
 0x620   : > { %v13339_v33 = vrot.slane %v13325_v12, %v21885_v0  ;;  %22012 = vst [vmem:[#allocation71_spill] sm:$0xff] %v21014_v54  ;;  %v21016_v40 = vpop.permute.xlu0 %14258  ;;  %v14515_v60 = vadd.s32 4294967288, %v21039_v11  ;;  %v14522_v63 = vadd.s32 4294967280, %v21039_v11  ;;  %v21052_v7 = vsub.s32 %v21039_v11, %v22020_v4 }
 0x621   : > { %22013 = vst [vmem:[#allocation27_spill] sm:$0xff] %v21016_v40  ;;  %v14536_v37 = vadd.s32 4294967264, %v21039_v11  ;;  %v14543_v10 = vadd.s32 4294967256, %v21039_v11 }
 0x622   : > { %v13340_v1 = vcombine.low %v13332_v62, %v13339_v33  ;;  %v21047_v29 = vsub.s32 %v14515_v60, %v22020_v4  ;;  %v14529_v62 = vadd.s32 4294967272, %v21039_v11  ;;  %v14514_v0 = vrot.slane %v19850_v43, %v21052_v7 }
 0x623   : > { %v21018_v15 = vpop.permute.xlu1 %14279 }
 0x624   : > { %14459 = vperm.xlu0 %15756, %v13340_v1   ;;  %v21020_v25 = vpop.permute.xlu0 %14471  ;;  %v14519_v33 = vrot.slane %v19932_v58, %v21047_v29  ;;  %v21060_v1 = vsub.s32 %v14522_v63, %v22020_v4  ;;  %v21074_v63 = vsub.s32 %v14536_v37, %v22020_v4  ;;  %v21088_v37 = vsub.s32 %v14543_v10, %v22020_v4 }
 0x626   : > { %v14521_v2 = vsel %vm14520_vm2, %v14519_v33, %v14514_v0  ;;  %v14540_v43 = vrot.slane %v20016_v19, %v21074_v63  ;;  %v22023_v0 = vld [vmem:[#allocation35_spill] sm:$0xff]  ;;  %v14557_v19 = vadd.s32 4294967240, %v21039_v11 }
 0x627   : > { %v21022_v27 = vpop.permute.xlu1 %14273 }
 0x628   : > { %v21024_v57 = vpop.permute.xlu0 %14465 }
 0x62b   : > { %v21026_v16 = vpop.permute.xlu1 %14492 }
 0x62c   : > { %22014 = vst [vmem:[#allocation34_spill] sm:$0xff] %v21026_v16  ;;  %v21028_v28 = vpop.permute.xlu0 %14276  ;;  %v22021_v16 = vld [vmem:[#allocation56_spill] sm:$0xff] }
 0x62d   : > { %v14526_v58 = vrot.slane %v22021_v16, %v21060_v1  ;;  %v14550_v16 = vadd.s32 4294967248, %v21039_v11 }
 0x62f   : > { %v21030_v48 = vpop.permute.xlu1 %14486  ;;  %v21099_v40 = vsub.s32 %v14550_v16, %v22020_v4 }
 0x630   : > { %22015 = vst [vmem:[#allocation78_spill] sm:$0xff] %v21030_v48  ;;  %v21032_v17 = vpop.permute.xlu0 %14270  ;;  %v14528_v48 = vsel %vm14527_vm3, %v14526_v58, %v14521_v2  ;;  %v14564_v58 = vadd.s32 4294967232, %v21039_v11 }
 0x633   : > { %v21034_v38 = vpop.permute.xlu1 %14291 }
 0x634   : > { %v21036_v52 = vpop.permute.xlu0 %14483 }
 0x635   : > { %22016 = vst [vmem:[#allocation7_spill] sm:$0xff] %v21036_v52 }
 0x637   : > { %v21042_v36 = vpop.permute.xlu1 %14495 }
 0x638   : > { %22018 = vst [vmem:[#allocation31_spill] sm:$0xff] %v21042_v36  ;;  %v21044_v42 = vpop.permute.xlu0 %14477  ;;  %v21068_v36 = vsub.s32 %v14529_v62, %v22020_v4 }
 0x639   : > { %22019 = vst [vmem:[#allocation38_spill] sm:$0xff] %v21044_v42 }
 0x63a   : > { %v14533_v33 = vrot.slane %v22023_v0, %v21068_v36  ;;  %v14547_v0 = vrot.slane %v20003_v31, %v21088_v37 }
 0x63b   : > { %v21054_v12 = vpop.permute.xlu1 %14285 }
 0x63c   : > { %v21063_v60 = vpop.permute.xlu0 %14288 }
 0x63f   : > { %v21076_v45 = vpop.permute.xlu1 %14489 }
 0x640   : > { %22022 = vst [vmem:[#allocation14_spill] sm:$0xff] %v21076_v45  ;;  %v21082_v62 = vpop.permute.xlu0 %14282  ;;  %v14535_v45 = vsel %vm14534_vm4, %v14533_v33, %v14528_v48  ;;  %v21107_v48 = vsub.s32 %v14564_v58, %v22020_v4  ;;  %v14571_v33 = vadd.s32 4294967224, %v21039_v11 }
 0x641   : > { %v14542_v2 = vsel %vm14541_vm5, %v14540_v43, %v14535_v45  ;;  %v14554_v45 = vrot.slane %v19962_v49, %v21099_v40  ;;  %v21110_v43 = vsub.s32 %v14557_v19, %v22020_v4  ;;  %v14578_v49 = vadd.s32 4294967216, %v21039_v11 }
 0x642   : > { %v14549_v10 = vsel %vm14548_vm6, %v14547_v0, %v14542_v2  ;;  %v14568_v16 = vrot.slane %v20121_v34, %v21107_v48  ;;  %v22027_v2 = vld [vmem:[#allocation40_spill] sm:$0xff]  ;;  %v21124_v19 = vsub.s32 %v14571_v33, %v22020_v4  ;;  %v14592_v34 = vadd.s32 4294967200, %v21039_v11 }
 0x643   : > { %v21093_v52 = vpop.permute.xlu1 %14303  ;;  %v14556_v31 = vsel %vm14555_vm7, %v14554_v45, %v14549_v10  ;;  %v14561_v0 = vrot.slane %v22027_v2, %v21110_v43  ;;  %v14585_v45 = vadd.s32 4294967208, %v21039_v11 }
 0x644   : > { %22024 = vst [vmem:[#allocation37_spill] sm:$0xff] %v21093_v52  ;;  %v14575_v2 = vrot.slane %v20118_v8, %v21124_v19 }
 0x645   : > { %v14563_v21 = vsel %vm14562_vm8, %v14561_v0, %v14556_v31  ;;  %v14939_v31 = vrot.slane %v20251_v44, %v21052_v7  ;;  %v21148_v8 = vsub.s32 %v14585_v45, %v22020_v4 }
 0x646   : > { %v14570_v10 = vsel %vm14569_vm9, %v14568_v16, %v14563_v21  ;;  %v21143_v16 = vsub.s32 %v14592_v34, %v22020_v4  ;;  %v22034_v34 = vld [vmem:[#allocation11_spill] sm:$0xff] }
 0x647   : > { %v21116_v52 = vpop.permute.xlu1 %14297  ;;  %v14577_v33 = vsel %vm14576_vm10, %v14575_v2, %v14570_v10  ;;  %v14943_v10 = vrot.slane %v20242_v23, %v21047_v29  ;;  %v14948_v23 = vrot.slane %v20196_v6, %v21060_v1  ;;  %v14627_v6 = vrot.slane %v20326_v50, %v21047_v29  ;;  %v22050_v50 = vld [vmem:[#allocation49_spill] sm:$0xff] }
 0x648   : > { %22026 = vst [vmem:[#allocation9_spill] sm:$0xff] %v21116_v52  ;;  %v14596_v44 = vrot.slane %v20224_v20, %v21143_v16  ;;  %v14606_v52 = vadd.s32 4294967184, %v21039_v11 }
 0x649   : > { %v21101_v22 = vpop.permute.xlu0 %14300  ;;  %v14944_v45 = vsel %vm14520_vm2, %v14943_v10, %v14939_v31 }
 0x64a   : > { %22025 = vst [vmem:[#allocation36_spill] sm:$0xff] %v21101_v22  ;;  %v21133_v22 = vsub.s32 %v14578_v49, %v22020_v4  ;;  %v14599_v49 = vadd.s32 4294967192, %v21039_v11 }
 0x64c   : > { %v14582_v21 = vrot.slane %v20068_v35, %v21133_v22 }
 0x64e   : > { %v21135_v54 = vpop.permute.xlu1 %14315  ;;  %v14584_v2 = vsel %vm14583_vm11, %v14582_v21, %v14577_v33  ;;  %v14623_v33 = vrot.slane %v20335_v47, %v21052_v7  ;;  %v22032_v21 = vld [vmem:[#allocation13_spill] sm:$0xff]  ;;  %v14958_v47 = vrot.slane %v20365_v55, %v21074_v63  ;;  %v21197_v55 = vsub.s32 %v14606_v52, %v22020_v4 }
 0x64f   : > { %22028 = vst [vmem:[#allocation53_spill] sm:$0xff] %v21135_v54  ;;  %v14589_v54 = vrot.slane %v20060_v39, %v21148_v8  ;;  %v21172_v39 = vsub.s32 %v14599_v49, %v22020_v4  ;;  %v22035_v49 = vld [vmem:[#allocation42_spill] sm:$0xff] }
 0x651   : > { %v14591_v31 = vsel %vm14590_vm12, %v14589_v54, %v14584_v2  ;;  %v14953_v54 = vrot.slane %v20184_v56, %v21068_v36  ;;  %v14603_v2 = vrot.slane %v20213_v61, %v21172_v39  ;;  %v14632_v56 = vrot.slane %v20277_v26, %v21060_v1 }
 0x652   : > { %v14598_v10 = vsel %vm14597_vm13, %v14596_v44, %v14591_v31  ;;  %v22039_v44 = vld [vmem:[#allocation50_spill] sm:$0xff] }
 0x653   : > { %v21121_v58 = vpop.permute.xlu0 %14294  ;;  %v14605_v31 = vsel %vm14604_vm14, %v14603_v2, %v14598_v10  ;;  %v14610_v52 = vrot.slane %v22039_v44, %v21197_v55  ;;  %v22041_v2 = vld [vmem:[#allocation51_spill] sm:$0xff]  ;;  %v14973_v10 = vrot.slane %v22050_v50, %v21110_v43  ;;  %v14657_v50 = vrot.slane %v20379_v9, %v21110_v43 }
 0x654   : > { %v14963_v26 = vrot.slane %v22041_v2, %v21088_v37  ;;  %v22045_v2 = vld [vmem:[#allocation44_spill] sm:$0xff] }
 0x655   : > { %v14612_v44 = vsel %vm14611_vm15, %v14610_v52, %v14605_v31  ;;  %v22048_v31 = vld [vmem:[#allocation47_spill] sm:$0xff] }
 0x656   : > { %v14968_v52 = vrot.slane %v22048_v31, %v21099_v40  ;;  %v14978_v31 = vrot.slane %v20474_v53, %v21107_v48  ;;  %v22053_v53 = vld [vmem:[#allocation74_spill] sm:$0xff] }
 0x659   : > { %v21167_v20 = vpop.permute.xlu1 %14309 }
 0x65a   : > { %22031 = vst [vmem:[#allocation12_spill] sm:$0xff] %v21167_v20 }
 0x65e   : > { %v21145_v0 = vpop.permute.xlu0 %14312 }
 0x65f   : > { %22029 = vst [vmem:[#allocation33_spill] sm:$0xff] %v21145_v0  ;;  %v14613_v0 = vadd.s32 4294967176, %v21039_v11  ;;  %v14949_v11 = vsel %vm14527_vm3, %v14948_v23, %v14944_v45  ;;  %v14628_v23 = vsel %vm14520_vm2, %v14627_v6, %v14623_v33  ;;  %v14781_v6 = vrot.slane %v21032_v17, %v21052_v7 }
 0x660   : > { %v14954_v42 = vsel %vm14534_vm4, %v14953_v54, %v14949_v11  ;;  %v14633_v11 = vsel %vm14527_vm3, %v14632_v56, %v14628_v23  ;;  %v14642_v54 = vrot.slane %v20448_v30, %v21074_v63  ;;  %v22046_v23 = vld [vmem:[#allocation43_spill] sm:$0xff]  ;;  %v14785_v17 = vrot.slane %v21022_v27, %v21047_v29 }
 0x661   : > { %v21194_v45 = vsub.s32 %v14613_v0, %v22020_v4  ;;  %v14959_v4 = vsel %vm14541_vm5, %v14958_v47, %v14954_v42  ;;  %v22043_v42 = vld [vmem:[#allocation48_spill] sm:$0xff]  ;;  %v22047_v0 = vld [vmem:[#allocation45_spill] sm:$0xff]  ;;  %v14706_v27 = vrot.slane %v20762_v51, %v21047_v29 }
 0x662   : > { %v14637_v47 = vrot.slane %v22043_v42, %v21068_v36  ;;  %v14964_v30 = vsel %vm14548_vm6, %v14963_v26, %v14959_v4  ;;  %v14647_v4 = vrot.slane %v20434_v14, %v21088_v37  ;;  %v14993_v14 = vrot.slane %v20406_v32, %v21148_v8 }
 0x663   : > { %v14328_v33 = vpop.permute.xlu1 %14327  ;;  %v14617_v56 = vrot.slane %v22046_v23, %v21194_v45  ;;  %v14969_v23 = vsel %vm14555_vm7, %v14968_v52, %v14964_v30  ;;  %v14983_v52 = vrot.slane %v22053_v53, %v21124_v19  ;;  %v14790_v32 = vrot.slane %v21028_v28, %v21060_v1  ;;  %v22055_v53 = vld [vmem:[#allocation77_spill] sm:$0xff] }
 0x664   : > { %v14638_v42 = vsel %vm14534_vm4, %v14637_v47, %v14633_v11  ;;  %v14702_v11 = vrot.slane %v20770_v18, %v21052_v7  ;;  %v14974_v35 = vsel %vm14562_vm8, %v14973_v10, %v14969_v23  ;;  %v14800_v10 = vrot.slane %v21082_v62, %v21074_v63 }
 0x665   : > { %v14643_v26 = vsel %vm14541_vm5, %v14642_v54, %v14638_v42  ;;  %v22051_v54 = vld [vmem:[#allocation8_spill] sm:$0xff]  ;;  %v14786_v42 = vsel %vm14520_vm2, %v14785_v17, %v14781_v6  ;;  %v14874_v28 = vrot.slane %v14328_v33, %v21068_v36  ;;  %v14721_v62 = vrot.slane %v20875_v24, %v21074_v63 }
 0x666   : > { %v14652_v47 = vrot.slane %v22051_v54, %v21099_v40  ;;  %v14648_v18 = vsel %vm14548_vm6, %v14647_v4, %v14643_v26  ;;  %v14711_v4 = vrot.slane %v20717_v3, %v21060_v1  ;;  %v14707_v26 = vsel %vm14520_vm2, %v14706_v27, %v14702_v11  ;;  %v22056_v27 = vld [vmem:[#allocation76_spill] sm:$0xff] }
 0x667   : > { %v14791_v6 = vsel %vm14527_vm3, %v14790_v32, %v14786_v42  ;;  %v14795_v3 = vrot.slane %v21018_v15, %v21068_v36  ;;  %v14716_v15 = vrot.slane %v20712_v46, %v21068_v36  ;;  %v14672_v42 = vrot.slane %v22056_v27, %v21133_v22 }
 0x668   : > { %v21181_v20 = vpop.permute.xlu0 %14306  ;;  %v14653_v17 = vsel %vm14555_vm7, %v14652_v47, %v14648_v18  ;;  %v22057_v24 = vrot.slane %v22035_v49, %v21074_v63  ;;  %v15101_v46 = vrot.slane %v21024_v57, %v21047_v29  ;;  %v22060_v49 = vld [vmem:[#allocation19_spill] sm:$0xff]  ;;  %v15097_v57 = vrot.slane %v20947_v59, %v21052_v7 }
 0x669   : > { %22033 = vst [vmem:[#allocation32_spill] sm:$0xff] %v21181_v20  ;;  %v21238_v20 = vsel %vm14618_vm0, %v14617_v56, %v14612_v44  ;;  %v22052_v56 = vld [vmem:[#allocation73_spill] sm:$0xff]  ;;  %v14796_v18 = vsel %vm14534_vm4, %v14795_v3, %v14791_v6  ;;  %v15018_v6 = vrot.slane %v22060_v49, %v21052_v7  ;;  %v22063_v3 = vld [vmem:[#allocation59_spill] sm:$0xff] }
 0x66a   : > { %22049 = vst [vmem:[#allocation54_spill] sm:$0xff] %v21238_v20  ;;  %v14988_v30 = vrot.slane %v22052_v56, %v21133_v22  ;;  %v14979_v20 = vsel %vm14569_vm9, %v14978_v31, %v14974_v35  ;;  %v14662_v35 = vrot.slane %v20556_v41, %v21107_v48  ;;  %v15013_v41 = vrot.slane %v22055_v53, %v21194_v45 }
 0x66b   : > { %v14984_v47 = vsel %vm14576_vm10, %v14983_v52, %v14979_v20  ;;  %v14801_v32 = vsel %vm14541_vm5, %v14800_v10, %v14796_v18  ;;  %v15102_v27 = vsel %vm14520_vm2, %v15101_v46, %v15097_v57 }
 0x66e   : > { %v14322_v44 = vpop.permute.xlu1 %14321 }
 0x66f   : > { %v14864_v54 = vrot.slane %v14322_v44, %v21047_v29  ;;  %v14712_v44 = vsel %vm14527_vm3, %v14711_v4, %v14707_v26  ;;  %v22058_v4 = vld [vmem:[#allocation16_spill] sm:$0xff]  ;;  %v22059_v26 = vld [vmem:[#allocation79_spill] sm:$0xff] }
 0x673   : > { %v14325_v61 = vpop.permute.xlu0 %14324 }
 0x674   : > { %v14869_v51 = vrot.slane %v14325_v61, %v21060_v1  ;;  %v22054_v61 = vld [vmem:[#allocation75_spill] sm:$0xff] }
 0x675   : > { %v14677_v11 = vrot.slane %v22054_v61, %v21148_v8 }
 0x67d   : > { %v14319_v9 = vpop.permute.xlu0 %14318 }
 0x67e   : > { %v14860_v56 = vrot.slane %v14319_v9, %v21052_v7  ;;  %v14658_v9 = vsel %vm14562_vm8, %v14657_v50, %v14653_v17  ;;  %v14667_v50 = vrot.slane %v22058_v4, %v21124_v19  ;;  %v22065_v7 = vld [vmem:[#allocation25_spill] sm:$0xff] }
 0x67f   : > { %v14663_v52 = vsel %vm14569_vm9, %v14662_v35, %v14658_v9  ;;  %v14731_v18 = vrot.slane %v22065_v7, %v21099_v40  ;;  %v15106_v9 = vrot.slane %v20921_v13, %v21060_v1  ;;  %v14815_v13 = vrot.slane %v21034_v38, %v21110_v43  ;;  %v21389_v7 = vpop.permute.xlu1 %14498 }
 0x680   : > { %v14865_v23 = vsel %vm14520_vm2, %v14864_v54, %v14860_v56  ;;  %v14717_v54 = vsel %vm14534_vm4, %v14716_v15, %v14712_v44  ;;  %v14805_v56 = vrot.slane %v21054_v12, %v21088_v37  ;;  %v22062_v12 = vrot.slane %v22034_v34, %v21088_v37  ;;  %v22064_v15 = vld [vmem:[#allocation63_spill] sm:$0xff] }
 0x681   : > { %v14870_v31 = vsel %vm14527_vm3, %v14869_v51, %v14865_v23  ;;  %v15008_v51 = vrot.slane %v22059_v26, %v21197_v55  ;;  %v14722_v10 = vsel %vm14541_vm5, %v14721_v62, %v14717_v54  ;;  %v14668_v44 = vsel %vm14576_vm10, %v14667_v50, %v14663_v52  ;;  %v22068_v54 = vld [vmem:[#allocation58_spill] sm:$0xff] }
 0x682   : > { %v14875_v33 = vsel %vm14534_vm4, %v14874_v28, %v14870_v31  ;;  %v22061_v28 = vld [vmem:[#allocation24_spill] sm:$0xff]  ;;  %v14806_v17 = vsel %vm14548_vm6, %v14805_v56, %v14801_v32  ;;  %v15003_v31 = vrot.slane %v22063_v3, %v21172_v39  ;;  %v14989_v62 = vsel %vm14583_vm11, %v14988_v30, %v14984_v47 }
 0x683   : > { %v14880_v20 = vsel %vm14541_vm5, %v22057_v24, %v14875_v33  ;;  %v14726_v23 = vrot.slane %v22061_v28, %v21088_v37  ;;  %v14810_v33 = vrot.slane %v21063_v60, %v21099_v40  ;;  %v15022_v59 = vrot.slane %v22064_v15, %v21047_v29  ;;  %v22067_v24 = vld [vmem:[#allocation20_spill] sm:$0xff]  ;;  %v22076_v15 = vld [vmem:[#allocation71_spill] sm:$0xff] }
 0x684   : > { %v14885_v35 = vsel %vm14548_vm6, %v22062_v12, %v14880_v20  ;;  %v14820_v30 = vrot.slane %v21121_v58, %v21107_v48  ;;  %v22066_v60 = vrot.slane %v22032_v21, %v21099_v40  ;;  %v21351_v47 = vsel %vm14590_vm12, %v14993_v14, %v14989_v62  ;;  %v22069_v14 = vld [vmem:[#allocation26_spill] sm:$0xff] }
 0x685   : > { %v14727_v34 = vsel %vm14548_vm6, %v14726_v23, %v14722_v10  ;;  %v14811_v32 = vsel %vm14555_vm7, %v14810_v33, %v14806_v17  ;;  %v15032_v20 = vrot.slane %v22067_v24, %v21068_v36  ;;  %v15023_v52 = vsel %vm14520_vm2, %v15022_v59, %v15018_v6  ;;  %v22070_v6 = vld [vmem:[#allocation57_spill] sm:$0xff]  ;;  %v22075_v33 = vld [vmem:[#allocation22_spill] sm:$0xff] }
 0x686   : > { %v14890_v29 = vsel %vm14555_vm7, %v22066_v60, %v14885_v35  ;;  %v15027_v46 = vrot.slane %v22068_v54, %v21060_v1  ;;  %v14732_v58 = vsel %vm14555_vm7, %v14731_v18, %v14727_v34  ;;  %v14741_v21 = vrot.slane %v21003_v5, %v21107_v48  ;;  %v22072_v5 = vld [vmem:[#allocation62_spill] sm:$0xff]  ;;  %v22074_v35 = vld [vmem:[#allocation9_spill] sm:$0xff]  ;;  %v22081_v54 = vld [vmem:[#allocation36_spill] sm:$0xff] }
 0x687   : > { %v15107_v56 = vsel %vm14527_vm3, %v15106_v9, %v15102_v27  ;;  %v14736_v4 = vrot.slane %v22069_v14, %v21110_v43  ;;  %v15111_v50 = vrot.slane %v21020_v25, %v21068_v36  ;;  %v14816_v49 = vsel %vm14562_vm8, %v14815_v13, %v14811_v32  ;;  %v22073_v36 = vld [vmem:[#allocation38_spill] sm:$0xff]  ;;  %v22077_v18 = vld [vmem:[#allocation61_spill] sm:$0xff] }
 0x688   : > { %v22071_v38 = vrot.slane %v22070_v6, %v21110_v43  ;;  %v14673_v10 = vsel %vm14583_vm11, %v14672_v42, %v14668_v44  ;;  %v15028_v28 = vsel %vm14527_vm3, %v15027_v46, %v15023_v52  ;;  %v15037_v23 = vrot.slane %v22072_v5, %v21074_v63  ;;  %v22079_v9 = vld [vmem:[#allocation21_spill] sm:$0xff]  ;;  %v22080_v60 = vld [vmem:[#allocation66_spill] sm:$0xff] }
 0x689   : > { %v14821_v57 = vsel %vm14569_vm9, %v14820_v30, %v14816_v49  ;;  %v14737_v17 = vsel %vm14562_vm8, %v14736_v4, %v14732_v58  ;;  %v15112_v25 = vsel %vm14534_vm4, %v15111_v50, %v15107_v56  ;;  %v15121_v12 = vrot.slane %v22073_v36, %v21088_v37  ;;  %v22082_v58 = vld [vmem:[#allocation65_spill] sm:$0xff] }
 0x68a   : > { %v14895_v1 = vsel %vm14562_vm8, %v22071_v38, %v14890_v29  ;;  %v14825_v62 = vrot.slane %v22074_v35, %v21124_v19  ;;  %v14687_v42 = vrot.slane %v22075_v33, %v21172_v39  ;;  %v14742_v44 = vsel %vm14569_vm9, %v14741_v21, %v14737_v17  ;;  %v22083_v14 = vld [vmem:[#allocation41_spill] sm:$0xff]  ;;  %v22091_v33 = vld [vmem:[#allocation18_spill] sm:$0xff] }
 0x68b   : > { %v15116_v59 = vrot.slane %v22076_v15, %v21074_v63  ;;  %v22078_v34 = vrot.slane %v22077_v18, %v21107_v48  ;;  %v14682_v32 = vrot.slane %v22079_v9, %v21143_v16  ;;  %v15033_v30 = vsel %vm14534_vm4, %v15032_v20, %v15028_v28  ;;  %v22086_v49 = vld [vmem:[#allocation29_spill] sm:$0xff]  ;;  %v22095_v9 = vld [vmem:[#allocation7_spill] sm:$0xff] }
 0x68c   : > { %v14746_v29 = vrot.slane %v22080_v60, %v21124_v19  ;;  %v14826_v24 = vsel %vm14576_vm10, %v14825_v62, %v14821_v57  ;;  %v14678_v63 = vsel %vm14590_vm12, %v14677_v11, %v14673_v10  ;;  %v15038_v52 = vsel %vm14541_vm5, %v15037_v23, %v15033_v30  ;;  %v22085_v11 = vld [vmem:[#allocation6_spill] sm:$0xff]  ;;  %v21424_v10 = vpop.permute.xlu0 %14450  ;;  %v22088_v5 = vld [vmem:[#allocation69_spill] sm:$0xff] }
 0x68d   : > { %v14900_v27 = vsel %vm14569_vm9, %v22078_v34, %v14895_v1  ;;  %v15117_v13 = vsel %vm14541_vm5, %v15116_v59, %v15112_v25  ;;  %v14830_v46 = vrot.slane %v22081_v54, %v21133_v22  ;;  %v15042_v20 = vrot.slane %v22082_v58, %v21088_v37  ;;  %v22087_v1 = vld [vmem:[#allocation32_spill] sm:$0xff]  ;;  %v22089_v17 = vld [vmem:[#allocation37_spill] sm:$0xff]  ;;  %v21440_v59 = vpop.permute.xlu1 %14501  ;;  %v22094_v34 = vld [vmem:[#allocation30_spill] sm:$0xff] }
 0x68e   : > { %v14747_v21 = vsel %vm14576_vm10, %v14746_v29, %v14742_v44  ;;  %v15122_v56 = vsel %vm14548_vm6, %v15121_v12, %v15117_v13  ;;  %v22084_v4 = vrot.slane %v22083_v14, %v21124_v19  ;;  %v14751_v50 = vrot.slane %v22085_v11, %v21133_v22  ;;  %v22090_v12 = vld [vmem:[#allocation27_spill] sm:$0xff] }
 0x68f   : > { %v15126_v6 = vrot.slane %v22086_v49, %v21099_v40  ;;  %v14831_v38 = vsel %vm14583_vm11, %v14830_v46, %v14826_v24  ;;  %v14840_v37 = vrot.slane %v22087_v1, %v21143_v16  ;;  %v14683_v28 = vsel %vm14597_vm13, %v14682_v32, %v14678_v63  ;;  %v22096_v24 = vld [vmem:[#allocation23_spill] sm:$0xff]  ;;  %v22097_v46 = vld [vmem:[#allocation12_spill] sm:$0xff] }
 0x690   : > { %v14905_v61 = vsel %vm14576_vm10, %v22084_v4, %v14900_v27  ;;  %v15047_v23 = vrot.slane %v22088_v5, %v21099_v40  ;;  %v15043_v57 = vsel %vm14548_vm6, %v15042_v20, %v15038_v52  ;;  %v14835_v25 = vrot.slane %v22089_v17, %v21148_v8  ;;  %v22093_v40 = vld [vmem:[#allocation60_spill] sm:$0xff]  ;;  %v22098_v20 = vld [vmem:[#allocation55_spill] sm:$0xff]  ;;  %v22101_v4 = vld [vmem:[#allocation10_spill] sm:$0xff] }
 0x691   : > { %v14752_v36 = vsel %vm14583_vm11, %v14751_v50, %v14747_v21  ;;  %v14761_v35 = vrot.slane %v22090_v12, %v21143_v16  ;;  %v15127_v62 = vsel %vm14555_vm7, %v15126_v6, %v15122_v56  ;;  %v22092_v44 = vrot.slane %v22091_v33, %v21133_v22  ;;  %v22102_v50 = vld [vmem:[#allocation78_spill] sm:$0xff] }
 0x692   : > { %v14998_v18 = vrot.slane %v22093_v40, %v21143_v16  ;;  %v14756_v27 = vrot.slane %v22094_v34, %v21148_v8  ;;  %v15131_v32 = vrot.slane %v22095_v9, %v21110_v43  ;;  %v14836_v30 = vsel %vm14590_vm12, %v14835_v25, %v14831_v38  ;;  %v22103_v38 = vld [vmem:[#allocation15_spill] sm:$0xff]  ;;  %v22105_v5 = vld [vmem:[#allocation14_spill] sm:$0xff]  ;;  %v22106_v25 = vld [vmem:[#allocation33_spill] sm:$0xff] }
 0x693   : > { %v14910_v15 = vsel %vm14583_vm11, %v22092_v44, %v14905_v61  ;;  %v14688_v60 = vsel %vm14604_vm14, %v14687_v42, %v14683_v28  ;;  %v15048_v29 = vsel %vm14555_vm7, %v15047_v23, %v15043_v57  ;;  %v15057_v63 = vrot.slane %v22096_v24, %v21107_v48  ;;  %v22100_v42 = vld [vmem:[#allocation64_spill] sm:$0xff]  ;;  %v14454_v6 = vpop.permute.xlu0 %14453 }
 0x694   : > { %v14841_v52 = vsel %vm14597_vm13, %v14840_v37, %v14836_v30  ;;  %v14757_v13 = vsel %vm14590_vm12, %v14756_v27, %v14752_v36  ;;  %v15132_v54 = vsel %vm14562_vm8, %v15131_v32, %v15127_v62  ;;  %v14845_v58 = vrot.slane %v22097_v46, %v21172_v39  ;;  %v22104_v37 = vld [vmem:[#allocation28_spill] sm:$0xff]  ;;  %v22110_v32 = vld [vmem:[#allocation67_spill] sm:$0xff] }
 0x695   : > { %v22099_v21 = vrot.slane %v22098_v20, %v21148_v8  ;;  %v15052_v14 = vrot.slane %v22100_v42, %v21110_v43  ;;  %v15062_v61 = vrot.slane %v22101_v4, %v21124_v19  ;;  %v14762_v11 = vsel %vm14597_vm13, %v14761_v35, %v14757_v13  ;;  %v22109_v27 = vld [vmem:[#allocation72_spill] sm:$0xff] }
 0x696   : > { %v15136_v49 = vrot.slane %v22102_v50, %v21107_v48  ;;  %v14692_v1 = vrot.slane %v22103_v38, %v21197_v55  ;;  %v14766_v28 = vrot.slane %v22104_v37, %v21172_v39  ;;  %v15141_v23 = vrot.slane %v22105_v5, %v21124_v19  ;;  %v14505_v48 = vpop.permute.xlu1 %14504  ;;  %v22114_v20 = vld [vmem:[#allocation52_spill] sm:$0xff]  ;;  %v22118_v38 = vld [vmem:[#allocation31_spill] sm:$0xff] }
 0x697   : > { %v14915_v56 = vsel %vm14590_vm12, %v22099_v21, %v14910_v15  ;;  %v14846_v43 = vsel %vm14604_vm14, %v14845_v58, %v14841_v52  ;;  %v15053_v57 = vsel %vm14562_vm8, %v15052_v14, %v15048_v29  ;;  %v14850_v36 = vrot.slane %v22106_v25, %v21197_v55  ;;  %v22108_v15 = vld [vmem:[#allocation17_spill] sm:$0xff] }
 0x698   : > { %v15137_v17 = vsel %vm14569_vm9, %v15136_v49, %v15132_v54  ;;  %v22107_v12 = vrot.slane %v22047_v0, %v21143_v16  ;;  %v14999_v62 = vsel %vm14597_vm13, %v14998_v18, %v21351_v47  ;;  %v14693_v19 = vsel %vm14611_vm15, %v14692_v1, %v14688_v60  ;;  %v22111_v18 = vld [vmem:[#allocation53_spill] sm:$0xff]  ;;  %v22113_v54 = vld [vmem:[#allocation34_spill] sm:$0xff] }
 0x699   : > { %v15058_v33 = vsel %vm14569_vm9, %v15057_v63, %v15053_v57  ;;  %v14767_v44 = vsel %vm14604_vm14, %v14766_v28, %v14762_v11  ;;  %v14697_v40 = vrot.slane %v22108_v15, %v21194_v45  ;;  %v14771_v9 = vrot.slane %v22109_v27, %v21197_v55  ;;  %v22119_v57 = vld [vmem:[#allocation39_spill] sm:$0xff] }
 0x69a   : > { %v14920_v35 = vsel %vm14597_vm13, %v22107_v12, %v14915_v56  ;;  %v15063_v34 = vsel %vm14576_vm10, %v15062_v61, %v15058_v33  ;;  %v14851_v0 = vsel %vm14611_vm15, %v14850_v36, %v14846_v43  ;;  %v15067_v30 = vrot.slane %v22110_v32, %v21133_v22  ;;  %v22116_v61 = vld [vmem:[#allocation46_spill] sm:$0xff]  ;;  %v22122_v33 = vld [vmem:[#allocation80_spill] sm:$0xff] }
 0x69b   : > { %v15142_v47 = vsel %vm14576_vm10, %v15141_v23, %v15137_v17  ;;  %v14855_v60 = vrot.slane %v22111_v18, %v21194_v45  ;;  %v22112_v29 = vrot.slane %v22045_v2, %v21172_v39  ;;  %v15004_v63 = vsel %vm14604_vm14, %v15003_v31, %v14999_v62  ;;  %v22115_v2 = vld [vmem:[#allocation68_spill] sm:$0xff] }
 0x69c   : > { %v14698_v52 = vsel %vm14618_vm0, %v14697_v40, %v14693_v19  ;;  %v14772_v13 = vsel %vm14611_vm15, %v14771_v9, %v14767_v44  ;;  %v15146_v46 = vrot.slane %v22113_v54, %v21133_v22  ;;  %v15072_v21 = vrot.slane %v22114_v20, %v21148_v8  ;;  %v14508_v22 = vpop.permute.xlu1 %14507 }
 0x69d   : > { %v14925_v24 = vsel %vm14604_vm14, %v22112_v29, %v14920_v35  ;;  %v14776_v56 = vrot.slane %v22115_v2, %v21194_v45  ;;  %v15068_v42 = vsel %vm14583_vm11, %v15067_v30, %v15063_v34  ;;  %v14856_v3 = vsel %vm14618_vm0, %v14855_v60, %v14851_v0 }
 0x69e   : > { %v14457_v58 = vpop.permute.xlu0 %14456  ;;  %v15147_v31 = vsel %vm14583_vm11, %v15146_v46, %v15142_v47  ;;  %v15156_v14 = vrot.slane %v21389_v7, %v21143_v16  ;;  %v15077_v4 = vrot.slane %v21424_v10, %v21143_v16  ;;  %v22117_v11 = vrot.slane %v22116_v61, %v21197_v55 }
 0x69f   : > { %v14777_v49 = vsel %vm14618_vm0, %v14776_v56, %v14772_v13  ;;  %v15151_v1 = vrot.slane %v22118_v38, %v21148_v8  ;;  %v15161_v37 = vrot.slane %v21440_v59, %v21172_v39  ;;  %v15082_v7 = vrot.slane %v14454_v6, %v21172_v39  ;;  %v22121_v6 = vld [vmem:[#allocation54_spill] sm:$0xff] }
 0x6a0   : > { %v14930_v50 = vsel %vm14611_vm15, %v22117_v11, %v14925_v24  ;;  %v15009_v16 = vsel %vm14611_vm15, %v15008_v51, %v15004_v63  ;;  %v15174_v10 = vcombine.low %v14777_v49, %v14856_v3  ;;  %v15166_v28 = vrot.slane %v14505_v48, %v21197_v55 }
 0x6a1   : > { %v15087_v5 = vrot.slane %v14457_v58, %v21197_v55  ;;  %v15152_v23 = vsel %vm14590_vm12, %v15151_v1, %v15147_v31  ;;  %v15073_v43 = vsel %vm14590_vm12, %v15072_v21, %v15068_v42  ;;  %v15171_v8 = vrot.slane %v14508_v22, %v21194_v45 }
 0x6a2   : > { %v22120_v59 = vrot.slane %v22119_v57, %v21194_v45  ;;  %v15173_v26 = vcombine.low %v22121_v6, %v14698_v52  ;;  %v15157_v51 = vsel %vm14597_vm13, %v15156_v14, %v15152_v23  ;;  %v15078_v17 = vsel %vm14597_vm13, %v15077_v4, %v15073_v43 }
 0x6a3   : > { %v14460_v25 = vpop.permute.xlu0 %14459  ;;  %v15014_v55 = vsel %vm14618_vm0, %v15013_v41, %v15009_v16  ;;  %v15162_v36 = vsel %vm14604_vm14, %v15161_v37, %v15157_v51  ;;  %v15083_v48 = vsel %vm14604_vm14, %v15082_v7, %v15078_v17  ;;  %v15190_v44 = vrot.slane %v15174_v10, %v22122_v33 }
 0x6a4   : > { %v14935_v39 = vsel %vm14618_vm0, %v22120_v59, %v14930_v50  ;;  %v15092_v12 = vrot.slane %v14460_v25, %v21194_v45  ;;  %v15167_v35 = vsel %vm14611_vm15, %v15166_v28, %v15162_v36  ;;  %v15088_v62 = vsel %vm14611_vm15, %v15087_v5, %v15083_v48 }
 0x6a5   : > { %v15175_v19 = vcombine.low %v14935_v39, %v15014_v55  ;;  %v15172_v15 = vsel %vm14618_vm0, %v15171_v8, %v15167_v35  ;;  %v15183_v40 = vrot.slane %v15173_v26, %v22122_v33 }
 0x6a6   : > { %v15093_v53 = vsel %vm14618_vm0, %v15092_v12, %v15088_v62 }
 0x6a7   : > { %v15176_v41 = vcombine.low %v15093_v53, %v15172_v15  ;;  %v15197_v45 = vrot.slane %v15175_v19, %v22122_v33  ;;  %v15205_v27 = vcombine.low %v15183_v40, %v15190_v44 }
 0x6a9   : > { %v15204_v34 = vrot.slane %v15176_v41, %v22122_v33  ;;  %v15213_v0 = vrot.slane %v15205_v27, %v22122_v33 }
 0x6ab   : > { %v15206_v9 = vcombine.low %v15197_v45, %v15204_v34 }
 0x6ad   : > { %v15220_v32 = vrot.slane %v15206_v9, %v22122_v33 }
 0x6af   : > { %v15221_v30 = vcombine.low %v15213_v0, %v15220_v32 }
 0x6b1   : > { %15223 = vst [vmem:[%s291_s30] sm:$0xff] %v15221_v30 }
 0x6b2   : > { %15848 = shalt.err (!%p15845_p5)
}
 0x6b3   : > { %s15849_s20 = scalar_lea.hbm %s21571_s15, 128  ;;  %s15853_s23 = scalar_lea.hbm %s21625_s7, 256 }
 0x6b4   : > { %p15850_p6 = scmp.ne.s32.totalorder %s21571_s15, %s15849_s20  ;;  %p15854_p10 = scmp.lt.u32.totalorder %s21571_s15, %s21625_s7 }
 0x6b5   : > { %p15855_p11 = scmp.lt.u32.totalorder %s15853_s23, %s15849_s20  ;;  %p15857_p13 = scmp.lt.u32.totalorder %s15849_s20, %s21571_s15 }
 0x6b6   : > { %p15851_p7 = pnand %p15850_p6, %p15998_p4 }
 0x6b7   : > { %p15856_p12 = por %p15855_p11, %p15854_p10 }
 0x6b8   : > { %p15852_p9 = pneg %p15851_p7 }
 0x6b9   : > { %p15858_p0 = por %p15857_p13, %p15856_p12 }
 0x6bb   : > { %p15859_p1 = pnand %p15858_p0, %p15852_p9 }
 0x6bd   : > { %15862 = shalt.err (!%p15859_p1)
}
 0x6be   : > { %15699 = dma.vmem_to_hbm [thread:$0]  (%p15998_p4), %s21573_s8, 128, %s21571_s15, %s15225_s16  }
 0x6bf PF: > { %p15705_p2 = scmp.ge.s32.totalorder %s15913_s29, 2  ;;  %s15251_s12 = sand.u32 1, %s15893_s24  }
 0x6c0   : > { %s15252_s27 = scalar_lea.sflag [#allocation4], %s15251_s12 }
 0x6c1   : > { %p15702_p3 = pnand %p15705_p2, %p16005_p8 }
 0x6c3   : > { %15888 = dma.done.wait (!%p15702_p3), %s15252_s27, 128  }
 0x6c4   : > { %15890 = vsyncadd (!%p15702_p3), %s15252_s27, 4294967168  ;;  %s20_s29 = sadd.s32 1, %s15913_s29   ;;  %s22123_s24 = smov %s15897_s25 }
 0x6c5   : > { %p17_p5 = scmp.ge.s32.totalorder %s20_s29, 4   ;;  %s22124_s25 = smov %s15901_s26 }
 0x6c6   : > { %s22125_s26 = smov %s16011_s14  ;;  %s22126_s27 = smov %s15909_s28 }
 0x6c7   : > { %s22127_s28 = smov %s22129_s9  ;;  %19 = sbr.rel (!%p17_p5) target bundleno = 4 (0x4), region = 91 }
 0x6ce   :  { %15257 = vsyncpa [#allocation4], 1 }
 0x6cf   :  { %15259 = vsyncpa [#allocation4 + $0x1], 1 }

</bundles_post_ra>
